<compile_context>
chip_gen: v7x
topology: tpu7x:2x2x1
jax: 0.10.0
libtpu: 0.0.40
codegen_flags: <defaults>
</compile_context>

<pallas_src>
import functools

import jax
import jax.numpy as jnp
from jax.experimental import pallas as pl
from jax.experimental.pallas import tpu as pltpu


# (inplanes, planes, stride, dilation) per stage for RTNet(dilated=True),
# layers=[1,1,1,1].  group_width = planes * 32 // 64 (bottleneck_width=32).
_CFGS = [(64, 64, 1, 1), (256, 128, 2, 1), (512, 256, 1, 1), (1024, 512, 1, 2)]


def _round_up(v, m):
    return (v + m - 1) // m * m


@functools.lru_cache(maxsize=1)
def _multicore():
    """True on chips with >1 TensorCore per chip (v7x); only used to decide
    whether single-block grids should be split so both cores get work."""
    try:
        kind = jax.devices()[0].device_kind.lower()
    except Exception:
        return False
    return ('v7' in kind) or ('7x' in kind)


# ------------------------------ Pallas kernels ------------------------------ #

def _mm_bias_kernel(x_ref, w_ref, b_ref, o_ref, *, relu):
    """o = (x @ w) + b (+ ReLU).  bf16 operands, f32 MXU accumulate, full-K tile."""
    acc = jnp.dot(x_ref[...], w_ref[...], preferred_element_type=jnp.float32)
    r = acc + b_ref[...]
    if relu:
        r = jnp.maximum(r, 0.0)
    o_ref[...] = r.astype(o_ref.dtype)


def _max9_kernel(x_ref, o_ref):
    # x_ref: (9, TR, 128) pooling-tap stack -> elementwise max over the 9 taps.
    o_ref[...] = jnp.max(x_ref[...], axis=0)


# ----------------------------- kernel wrappers ------------------------------ #

def _pick_tiles(M, Np):
    TM = min(128, _round_up(M, 16))          # 16: bf16 sublane packing
    Mp = _round_up(M, TM)
    TN = min(512, Np)
    if Np % TN:
        TN = 128                             # Np is always a multiple of 128
    if _multicore() and (Mp // TM) * (Np // TN) == 1:
        # Give the second TensorCore a block (v7x only; no-op on v5e/v6e).
        if TN >= 256 and (TN // 2) % 128 == 0:
            TN //= 2
        elif TM >= 32 and (TM // 2) % 16 == 0:
            TM //= 2
    return TM, Mp, TN


def matmul_bias(x, layer, *, relu, n=None):
    """out = (x @ w) + b, optional ReLU.  Weights pre-folded/padded/bf16.

    x: (M, K) activations; layer['w']: (Kp, Np) bf16, layer['b']: (1, Np) f32
    (both padded at fold time).  Returns bf16 (M, n), n = true out channels.
    """
    M, K = x.shape
    Kp, Np = layer['w'].shape
    TM, Mp, TN = _pick_tiles(M, Np)

    xp = x if (Mp, Kp) == (M, K) else jnp.pad(x, ((0, Mp - M), (0, Kp - K)))
    xp = xp.astype(jnp.bfloat16)

    out = pl.pallas_call(
        functools.partial(_mm_bias_kernel, relu=relu),
        out_shape=jax.ShapeDtypeStruct((Mp, Np), jnp.bfloat16),
        grid_spec=pltpu.PrefetchScalarGridSpec(
            num_scalar_prefetch=0,
            grid=(Mp // TM, Np // TN),
            in_specs=[
                pl.BlockSpec((TM, Kp), lambda i, j: (i, 0)),
                pl.BlockSpec((Kp, TN), lambda i, j: (0, j)),
                pl.BlockSpec((1, TN), lambda i, j: (0, j)),
            ],
            out_specs=pl.BlockSpec((TM, TN), lambda i, j: (i, j)),
        ),
        compiler_params=pltpu.CompilerParams(
            dimension_semantics=("parallel", "parallel")),
    )(xp, layer['w'], layer['b'])

    n = Np if n is None else n
    if (Mp, Np) != (M, n):
        out = out[:M, :n]
    return out


def batched_matmul_bias(x, layer, *, relu, n=None):
    """Two same-shaped GEMMs (conv_polar / conv_cart) in ONE pallas_call.

    x: (2, M, K); layer['w']: (2, Kp, Np) bf16; layer['b']: (2, 1, Np) f32.
    The leading grid axis of 2 is 'parallel' (one branch per TensorCore on v7x).
    """
    B, M, K = x.shape
    _, Kp, Np = layer['w'].shape
    TM = min(128, _round_up(M, 16))
    Mp = _round_up(M, TM)
    TN = min(512, Np)
    if Np % TN:
        TN = 128

    xp = x if (Mp, Kp) == (M, K) else jnp.pad(x, ((0, 0), (0, Mp - M), (0, Kp - K)))
    xp = xp.astype(jnp.bfloat16)

    out = pl.pallas_call(
        functools.partial(_mm_bias_kernel, relu=relu),
        out_shape=jax.ShapeDtypeStruct((B, Mp, Np), jnp.bfloat16),
        grid_spec=pltpu.PrefetchScalarGridSpec(
            num_scalar_prefetch=0,
            grid=(B, Mp // TM, Np // TN),
            in_specs=[
                pl.BlockSpec((None, TM, Kp), lambda g, i, j: (g, i, 0)),
                pl.BlockSpec((None, Kp, TN), lambda g, i, j: (g, 0, j)),
                pl.BlockSpec((None, 1, TN), lambda g, i, j: (g, 0, j)),
            ],
            out_specs=pl.BlockSpec((None, TM, TN), lambda g, i, j: (g, i, j)),
        ),
        compiler_params=pltpu.CompilerParams(
            dimension_semantics=("parallel", "parallel", "parallel")),
    )(xp, layer['w'], layer['b'])

    n = Np if n is None else n
    if (Mp, Np) != (M, n):
        out = out[:, :M, :n]
    return out


def maxpool3x3_s2_p1(x_nhwc):
    """3x3 max pool, stride 2, padding 1; tiled lane-dense Pallas reduce (bf16)."""
    N, H, W, C = x_nhwc.shape
    dt = x_nhwc.dtype
    neg = float(jnp.finfo(dt).min)
    xp = jnp.pad(x_nhwc, ((0, 0), (1, 1), (1, 1), (0, 0)), constant_values=neg)
    Ho = (H + 2 - 3) // 2 + 1
    Wo = (W + 2 - 3) // 2 + 1
    taps = [xp[:, ki:ki + 2 * (Ho - 1) + 1:2, kj:kj + 2 * (Wo - 1) + 1:2, :]
            for ki in range(3) for kj in range(3)]
    stk = jnp.stack(taps, axis=0).reshape(9, -1)                 # (9, N*Ho*Wo*C)
    total = stk.shape[1]
    rows_raw = (total + 127) // 128
    TR = min(256, _round_up(rows_raw, 8))
    rows = _round_up(rows_raw, TR)
    pad = rows * 128 - total
    if pad:
        stk = jnp.pad(stk, ((0, 0), (0, pad)), constant_values=neg)
    stk = stk.reshape(9, rows, 128)

    out = pl.pallas_call(
        _max9_kernel,
        out_shape=jax.ShapeDtypeStruct((rows, 128), dt),
        grid_spec=pltpu.PrefetchScalarGridSpec(
            num_scalar_prefetch=0,
            grid=(rows // TR,),
            in_specs=[pl.BlockSpec((9, TR, 128), lambda i: (0, i, 0))],
            out_specs=pl.BlockSpec((TR, 128), lambda i: (i, 0)),
        ),
        compiler_params=pltpu.CompilerParams(dimension_semantics=("parallel",)),
    )(stk)
    return out.reshape(-1)[:total].reshape(N, Ho, Wo, C)


# ------------------------------ im2col patches ------------------------------ #

def build_patches(x_nhwc, *, k, stride, dilation, padding, pad_mode):
    """Channels-last im2col patches.  pad_mode 'mix' reproduces MixPad2d:
    H padded circularly first, then W padded with edge replication (matches the
    F.pad call order in the PyTorch MixPad2d.forward)."""
    N, H, W, C = x_nhwc.shape
    if padding > 0 and pad_mode == 'mix':
        xp = jnp.pad(x_nhwc, ((0, 0), (padding, padding), (0, 0), (0, 0)),
                     mode='wrap')
        xp = jnp.pad(xp, ((0, 0), (0, 0), (padding, padding), (0, 0)),
                     mode='edge')
    elif padding > 0:
        xp = jnp.pad(x_nhwc, ((0, 0), (padding, padding),
                              (padding, padding), (0, 0)))
    else:
        xp = x_nhwc
    Hp, Wp = xp.shape[1], xp.shape[2]
    Ho = (Hp - dilation * (k - 1) - 1) // stride + 1
    Wo = (Wp - dilation * (k - 1) - 1) // stride + 1
    cols = [xp[:, ki * dilation:ki * dilation + (Ho - 1) * stride + 1:stride,
               kj * dilation:kj * dilation + (Wo - 1) * stride + 1:stride, :]
            for ki in range(k) for kj in range(k)]
    patches = jnp.concatenate(cols, axis=-1).reshape(N * Ho * Wo, k * k * C)
    return patches, Ho, Wo


# ------------------------------ RTNet forward ------------------------------- #

def hybrid_block(x, p, *, gw, stride, dilation):
    """HybridBlock forward (hybrid=False, avd=False, cardinality=1), fused:
       [conv1_a|conv1_b]+BN+ReLU -> {conv_polar, conv_cart}+BN+ReLU ->
       [conv3+bn3 ; downsample+bn] + residual add + ReLU."""
    N, H, W, C = x.shape
    # fused conv1_a + conv1_b (1x1) + BN + ReLU
    ab = matmul_bias(x.reshape(N * H * W, C), p['c1ab'], relu=True, n=2 * gw)
    a = ab[:, :gw].reshape(N, H, W, gw)
    b = ab[:, gw:].reshape(N, H, W, gw)
    # conv_polar (MixPad) / conv_cart (zero pad), 3x3 + BN + ReLU, one batched call
    pa, Ho, Wo = build_patches(a, k=3, stride=stride, dilation=dilation,
                               padding=dilation, pad_mode='mix')
    pb, _, _ = build_patches(b, k=3, stride=stride, dilation=dilation,
                             padding=dilation, pad_mode='zero')
    ab2 = batched_matmul_bias(jnp.stack([pa, pb], axis=0), p['cpcc'],
                              relu=True, n=gw)                     # (2, M, gw)
    # fused conv3 + bn3 + downsample(+bn) + residual add + ReLU:
    #   cat([a', b']) @ W3 + x_s @ Wd + (b3 + bd)  ==  out + downsample(x)
    xs = x[:, ::stride, ::stride, :] if stride > 1 else x
    lhs = jnp.concatenate([ab2[0], ab2[1], xs.reshape(N * Ho * Wo, C)], axis=-1)
    out = matmul_bias(lhs, p['c3d'], relu=True)
    return out.reshape(N, Ho, Wo, -1)


def rtnet_forward(x_nchw, rois, params):
    del rois  # only consumed by the hybrid roi warps; never built for layers=[1,1,1,1]
    x = jnp.transpose(x_nchw, (0, 2, 3, 1)).astype(jnp.bfloat16)   # NCHW -> NHWC
    N = x.shape[0]
    # stem: 7x7/s2 conv + BN + ReLU, then 3x3/s2 max pool
    patches, Ho, Wo = build_patches(x, k=7, stride=2, dilation=1, padding=3,
                                    pad_mode='zero')
    x = matmul_bias(patches, params['stem'], relu=True, n=64).reshape(N, Ho, Wo, 64)
    x = maxpool3x3_s2_p1(x)
    feats = []
    for i, (_, planes, stride, dil) in enumerate(_CFGS, start=1):
        x = hybrid_block(x, params[f'layer{i}'], gw=planes * 32 // 64,
                         stride=stride, dilation=dil)
        feats.append(x)
    to_nchw = lambda t: jnp.transpose(t, (0, 3, 1, 2)).astype(jnp.float32)
    return dict(c1=to_nchw(feats[0]), c2=to_nchw(feats[1]),
                c3=to_nchw(feats[2]), c4=to_nchw(feats[3]))


# ------------------------------ parameter init ------------------------------ #

def _conv_init(key, cout, cin, kh, kw):
    fan_out = kh * kw * cout
    std = (2.0 / fan_out) ** 0.5
    return jax.random.normal(key, (cout, cin, kh, kw), jnp.float32) * std


def _bn_init(c):
    # (gamma, beta, running_mean, running_var)
    return (jnp.ones((c,), jnp.float32), jnp.zeros((c,), jnp.float32),
            jnp.zeros((c,), jnp.float32), jnp.ones((c,), jnp.float32))


def make_raw_params(key):
    keys = iter(jax.random.split(key, 64))
    params = {'stem_w': _conv_init(next(keys), 64, 3, 7, 7), 'stem_bn': _bn_init(64)}
    for i, (inp, planes, _, _) in enumerate(_CFGS, start=1):
        gw = planes * 32 // 64   # group_width (bottleneck_width=32, cardinality=1)
        params[f'layer{i}'] = dict(
            w1a=_conv_init(next(keys), gw, inp, 1, 1), bn1a=_bn_init(gw),
            w1b=_conv_init(next(keys), gw, inp, 1, 1), bn1b=_bn_init(gw),
            wp=_conv_init(next(keys), gw, gw, 3, 3), bnp=_bn_init(gw),
            wc=_conv_init(next(keys), gw, gw, 3, 3), bnc=_bn_init(gw),
            w3=_conv_init(next(keys), planes * 4, gw * 2, 1, 1), bn3=_bn_init(planes * 4),
            wd=_conv_init(next(keys), planes * 4, inp, 1, 1), bnd=_bn_init(planes * 4),
        )
    return params


def fold_params(raw):
    """One-time prep (outside the jitted forward): fold eval-mode BN into conv
    weights, fuse [conv1_a|conv1_b] (N-concat), stack [conv_polar, conv_cart],
    fuse [conv3 ; downsample] (K-concat, biases summed), lay weights out as
    im2col GEMM matrices, pad K/N to multiples of 128 and cast to bf16."""

    def fold_mat(w_oihw, bn):
        gamma, beta, mean, var = bn
        cout, cin, kh, kw = w_oihw.shape
        scale = gamma / jnp.sqrt(var + 1e-5)
        w_mat = jnp.transpose(w_oihw, (2, 3, 1, 0)).reshape(kh * kw * cin, cout)
        return w_mat * scale[None, :], beta - mean * scale

    def pack(w_mat, bias):
        K, N = w_mat.shape
        Kp, Np = _round_up(K, 128), _round_up(N, 128)
        w = jnp.pad(w_mat, ((0, Kp - K), (0, Np - N)))
        b = jnp.pad(bias.reshape(1, -1), ((0, 0), (0, Np - N)))
        return dict(w=w.astype(jnp.bfloat16), b=b.astype(jnp.float32))

    def pack_stacked(pairs):
        packed = [pack(w, b) for w, b in pairs]
        return dict(w=jnp.stack([q['w'] for q in packed]),
                    b=jnp.stack([q['b'] for q in packed]))

    p = {'stem': pack(*fold_mat(raw['stem_w'], raw['stem_bn']))}
    for i in range(1, 5):
        l = raw[f'layer{i}']
        wa, ba = fold_mat(l['w1a'], l['bn1a'])
        wb, bb = fold_mat(l['w1b'], l['bn1b'])
        w3, b3 = fold_mat(l['w3'], l['bn3'])
        wd, bd = fold_mat(l['wd'], l['bnd'])
        p[f'layer{i}'] = dict(
            c1ab=pack(jnp.concatenate([wa, wb], axis=1), jnp.concatenate([ba, bb])),
            cpcc=pack_stacked([fold_mat(l['wp'], l['bnp']),
                               fold_mat(l['wc'], l['bnc'])]),
            c3d=pack(jnp.concatenate([w3, wd], axis=0), b3 + bd),
        )
    return p


# ---------------------------------- main ------------------------------------ #

if __name__ == "__main__":
    key = jax.random.PRNGKey(0)
    kx, kr, kp = jax.random.split(key, 3)
    x = jax.random.normal(kx, (2, 3, 32, 32), jnp.float32)       # NCHW like PyTorch
    rois = jax.random.uniform(kr, (2, 4), jnp.float32, 0.0, 32.0)
    params = fold_params(make_raw_params(kp))                    # one-time prep

    fwd = jax.jit(rtnet_forward)
    out = fwd(x, rois, params)
    jax.block_until_ready(out)

    assert out['c1'].shape == (2, 256, 8, 8)
    assert out['c2'].shape == (2, 512, 4, 4)
    assert out['c3'].shape == (2, 1024, 4, 4)
    assert out['c4'].shape == (2, 2048, 4, 4)
    assert out['c4'].dtype == jnp.float32
    print("KERNEL_OK")
</pallas_src>

<mosaic_0001>
module attributes {stable_mosaic.version = 11 : i64} {
  func.func @_mm_bias_kernel(%arg0: i32, %arg1: i32, %arg2: memref<128x256xbf16, #tpu.memory_space<vmem>>, %arg3: memref<256x128xbf16, #tpu.memory_space<vmem>>, %arg4: memref<1x128xf32, #tpu.memory_space<vmem>>, %arg5: memref<128x128xbf16, #tpu.memory_space<vmem>>) attributes {dimension_semantics = [#tpu.dimension_semantics<parallel>, #tpu.dimension_semantics<parallel>], iteration_bounds = array<i64: 4, 1>, scalar_prefetch = 0 : i64, scratch_operands = 0 : i64, tpu.core_type = #tpu.core_type<tc>, window_params = [{transform_indices = @transform_0, window_bounds = array<i64: 128, 256>}, {transform_indices = @transform_1, window_bounds = array<i64: 256, 128>}, {transform_indices = @transform_2, window_bounds = array<i64: 1, 128>}, {transform_indices = @transform_3, window_bounds = array<i64: 128, 128>}]} {
    %c0 = arith.constant 0 : index
    %c0_0 = arith.constant 0 : index
    %0 = vector.load %arg2[%c0, %c0_0] : memref<128x256xbf16, #tpu.memory_space<vmem>>, vector<128x256xbf16>
    %c0_1 = arith.constant 0 : index
    %c0_2 = arith.constant 0 : index
    %1 = vector.load %arg3[%c0_1, %c0_2] : memref<256x128xbf16, #tpu.memory_space<vmem>>, vector<256x128xbf16>
    %cst = arith.constant dense<0.000000e+00> : vector<128x128xf32>
    %2 = tpu.matmul %0, %1, %cst {dimension_numbers = #tpu.dot_dimension_numbers<[1], [0], [0], [1], [0, 0, 1, 1], [], []>} : vector<128x256xbf16>, vector<256x128xbf16>, vector<128x128xf32> -> vector<128x128xf32>
    %c0_3 = arith.constant 0 : index
    %c0_4 = arith.constant 0 : index
    %3 = vector.load %arg4[%c0_3, %c0_4] : memref<1x128xf32, #tpu.memory_space<vmem>>, vector<1x128xf32>
    %4 = vector.broadcast %3 : vector<1x128xf32> to vector<128x128xf32>
    %5 = arith.addf %2, %4 : vector<128x128xf32>
    %cst_5 = arith.constant 0.000000e+00 : f32
    %6 = vector.broadcast %cst_5 : f32 to vector<128x128xf32>
    %7 = arith.maximumf %5, %6 : vector<128x128xf32>
    %8 = arith.truncf %7 : vector<128x128xf32> to vector<128x128xbf16>
    %c0_6 = arith.constant 0 : index
    %c0_7 = arith.constant 0 : index
    %9 = vector.load %arg5[%c0_6, %c0_7] : memref<128x128xbf16, #tpu.memory_space<vmem>>, vector<128x128xbf16>
    tpu.vector_store %arg5[%c0_6, %c0_7], %8 {strides = array<i32>} : memref<128x128xbf16, #tpu.memory_space<vmem>>, vector<128x128xbf16>,
    return
  }
  func.func @transform_0(%arg0: i32, %arg1: i32) -> (i32, i32) {
    %c0_i32 = arith.constant 0 : i32
    %c0_i32_0 = arith.constant 0 : i32
    return %arg0, %c0_i32 : i32, i32
  }
  func.func @transform_1(%arg0: i32, %arg1: i32) -> (i32, i32) {
    %c0_i32 = arith.constant 0 : i32
    %c0_i32_0 = arith.constant 0 : i32
    return %c0_i32, %arg1 : i32, i32
  }
  func.func @transform_2(%arg0: i32, %arg1: i32) -> (i32, i32) {
    %c0_i32 = arith.constant 0 : i32
    %c0_i32_0 = arith.constant 0 : i32
    return %c0_i32, %arg1 : i32, i32
  }
  func.func @transform_3(%arg0: i32, %arg1: i32) -> (i32, i32) {
    %c0_i32 = arith.constant 0 : i32
    return %arg0, %arg1 : i32, i32
  }
}

module attributes {stable_mosaic.version = 11 : i64} {
  func.func @_max9_kernel(%arg0: i32, %arg1: memref<9x64x128xbf16, #tpu.memory_space<vmem>>, %arg2: memref<64x128xbf16, #tpu.memory_space<vmem>>) attributes {dimension_semantics = [#tpu.dimension_semantics<parallel>], iteration_bounds = array<i64: 1>, scalar_prefetch = 0 : i64, scratch_operands = 0 : i64, tpu.core_type = #tpu.core_type<tc>, window_params = [{transform_indices = @transform_0, window_bounds = array<i64: 9, 64, 128>}, {transform_indices = @transform_1, window_bounds = array<i64: 64, 128>}]} {
    %c0 = arith.constant 0 : index
    %c0_0 = arith.constant 0 : index
    %c0_1 = arith.constant 0 : index
    %0 = vector.load %arg1[%c0, %c0_0, %c0_1] : memref<9x64x128xbf16, #tpu.memory_space<vmem>>, vector<9x64x128xbf16>
    %cst = arith.constant dense<0xFF80> : vector<64x128xbf16>
    %1 = vector.multi_reduction <maximumf>, %0, %cst [0] : vector<9x64x128xbf16> to vector<64x128xbf16>
    %c0_2 = arith.constant 0 : index
    %c0_3 = arith.constant 0 : index
    %2 = vector.load %arg2[%c0_2, %c0_3] : memref<64x128xbf16, #tpu.memory_space<vmem>>, vector<64x128xbf16>
    tpu.vector_store %arg2[%c0_2, %c0_3], %1 {strides = array<i32>} : memref<64x128xbf16, #tpu.memory_space<vmem>>, vector<64x128xbf16>,
    return
  }
  func.func @transform_0(%arg0: i32) -> (i32, i32, i32) {
    %c0_i32 = arith.constant 0 : i32
    %c0_i32_0 = arith.constant 0 : i32
    %c0_i32_1 = arith.constant 0 : i32
    return %c0_i32, %arg0, %c0_i32_0 : i32, i32, i32
  }
  func.func @transform_1(%arg0: i32) -> (i32, i32) {
    %c0_i32 = arith.constant 0 : i32
    %c0_i32_0 = arith.constant 0 : i32
    return %arg0, %c0_i32 : i32, i32
  }
}

module attributes {stable_mosaic.version = 11 : i64} {
  func.func @_mm_bias_kernel(%arg0: i32, %arg1: i32, %arg2: memref<128x128xbf16, #tpu.memory_space<vmem>>, %arg3: memref<128x128xbf16, #tpu.memory_space<vmem>>, %arg4: memref<1x128xf32, #tpu.memory_space<vmem>>, %arg5: memref<128x128xbf16, #tpu.memory_space<vmem>>) attributes {dimension_semantics = [#tpu.dimension_semantics<parallel>, #tpu.dimension_semantics<parallel>], iteration_bounds = array<i64: 1, 1>, scalar_prefetch = 0 : i64, scratch_operands = 0 : i64, tpu.core_type = #tpu.core_type<tc>, window_params = [{transform_indices = @transform_0, window_bounds = array<i64: 128, 128>}, {transform_indices = @transform_1, window_bounds = array<i64: 128, 128>}, {transform_indices = @transform_2, window_bounds = array<i64: 1, 128>}, {transform_indices = @transform_3, window_bounds = array<i64: 128, 128>}]} {
    %c0 = arith.constant 0 : index
    %c0_0 = arith.constant 0 : index
    %0 = vector.load %arg2[%c0, %c0_0] : memref<128x128xbf16, #tpu.memory_space<vmem>>, vector<128x128xbf16>
    %c0_1 = arith.constant 0 : index
    %c0_2 = arith.constant 0 : index
    %1 = vector.load %arg3[%c0_1, %c0_2] : memref<128x128xbf16, #tpu.memory_space<vmem>>, vector<128x128xbf16>
    %cst = arith.constant dense<0.000000e+00> : vector<128x128xf32>
    %2 = tpu.matmul %0, %1, %cst {dimension_numbers = #tpu.dot_dimension_numbers<[1], [0], [0], [1], [0, 0, 1, 1], [], []>} : vector<128x128xbf16>, vector<128x128xbf16>, vector<128x128xf32> -> vector<128x128xf32>
    %c0_3 = arith.constant 0 : index
    %c0_4 = arith.constant 0 : index
    %3 = vector.load %arg4[%c0_3, %c0_4] : memref<1x128xf32, #tpu.memory_space<vmem>>, vector<1x128xf32>
    %4 = vector.broadcast %3 : vector<1x128xf32> to vector<128x128xf32>
    %5 = arith.addf %2, %4 : vector<128x128xf32>
    %cst_5 = arith.constant 0.000000e+00 : f32
    %6 = vector.broadcast %cst_5 : f32 to vector<128x128xf32>
    %7 = arith.maximumf %5, %6 : vector<128x128xf32>
    %8 = arith.truncf %7 : vector<128x128xf32> to vector<128x128xbf16>
    %c0_6 = arith.constant 0 : index
    %c0_7 = arith.constant 0 : index
    %9 = vector.load %arg5[%c0_6, %c0_7] : memref<128x128xbf16, #tpu.memory_space<vmem>>, vector<128x128xbf16>
    tpu.vector_store %arg5[%c0_6, %c0_7], %8 {strides = array<i32>} : memref<128x128xbf16, #tpu.memory_space<vmem>>, vector<128x128xbf16>,
    return
  }
  func.func @transform_0(%arg0: i32, %arg1: i32) -> (i32, i32) {
    %c0_i32 = arith.constant 0 : i32
    %c0_i32_0 = arith.constant 0 : i32
    return %arg0, %c0_i32 : i32, i32
  }
  func.func @transform_1(%arg0: i32, %arg1: i32) -> (i32, i32) {
    %c0_i32 = arith.constant 0 : i32
    %c0_i32_0 = arith.constant 0 : i32
    return %c0_i32, %arg1 : i32, i32
  }
  func.func @transform_2(%arg0: i32, %arg1: i32) -> (i32, i32) {
    %c0_i32 = arith.constant 0 : i32
    %c0_i32_0 = arith.constant 0 : i32
    return %c0_i32, %arg1 : i32, i32
  }
  func.func @transform_3(%arg0: i32, %arg1: i32) -> (i32, i32) {
    %c0_i32 = arith.constant 0 : i32
    return %arg0, %arg1 : i32, i32
  }
}

module attributes {stable_mosaic.version = 11 : i64} {
  func.func @_mm_bias_kernel(%arg0: i32, %arg1: i32, %arg2: i32, %arg3: memref<1x128x384xbf16, #tpu.memory_space<vmem>>, %arg4: memref<1x384x128xbf16, #tpu.memory_space<vmem>>, %arg5: memref<1x1x128xf32, #tpu.memory_space<vmem>>, %arg6: memref<1x128x128xbf16, #tpu.memory_space<vmem>>) attributes {dimension_semantics = [#tpu.dimension_semantics<parallel>, #tpu.dimension_semantics<parallel>, #tpu.dimension_semantics<parallel>], iteration_bounds = array<i64: 2, 1, 1>, scalar_prefetch = 0 : i64, scratch_operands = 0 : i64, tpu.core_type = #tpu.core_type<tc>, window_params = [{transform_indices = @transform_0, window_bounds = array<i64: 1, 128, 384>}, {transform_indices = @transform_1, window_bounds = array<i64: 1, 384, 128>}, {transform_indices = @transform_2, window_bounds = array<i64: 1, 1, 128>}, {transform_indices = @transform_3, window_bounds = array<i64: 1, 128, 128>}]} {
    %c0 = arith.constant 0 : index
    %c0_0 = arith.constant 0 : index
    %c0_1 = arith.constant 0 : index
    %0 = vector.load %arg3[%c0, %c0_0, %c0_1] : memref<1x128x384xbf16, #tpu.memory_space<vmem>>, vector<1x128x384xbf16>
    %1 = vector.shape_cast %0 : vector<1x128x384xbf16> to vector<128x384xbf16>
    %c0_2 = arith.constant 0 : index
    %c0_3 = arith.constant 0 : index
    %c0_4 = arith.constant 0 : index
    %2 = vector.load %arg4[%c0_2, %c0_3, %c0_4] : memref<1x384x128xbf16, #tpu.memory_space<vmem>>, vector<1x384x128xbf16>
    %3 = vector.shape_cast %2 : vector<1x384x128xbf16> to vector<384x128xbf16>
    %cst = arith.constant dense<0.000000e+00> : vector<128x128xf32>
    %4 = tpu.matmul %1, %3, %cst {dimension_numbers = #tpu.dot_dimension_numbers<[1], [0], [0], [1], [0, 0, 1, 1], [], []>} : vector<128x384xbf16>, vector<384x128xbf16>, vector<128x128xf32> -> vector<128x128xf32>
    %c0_5 = arith.constant 0 : index
    %c0_6 = arith.constant 0 : index
    %c0_7 = arith.constant 0 : index
    %5 = vector.load %arg5[%c0_5, %c0_6, %c0_7] : memref<1x1x128xf32, #tpu.memory_space<vmem>>, vector<1x1x128xf32>
    %6 = vector.shape_cast %5 : vector<1x1x128xf32> to vector<1x128xf32>
    %7 = vector.broadcast %6 : vector<1x128xf32> to vector<128x128xf32>
    %8 = arith.addf %4, %7 : vector<128x128xf32>
    %cst_8 = arith.constant 0.000000e+00 : f32
    %9 = vector.broadcast %cst_8 : f32 to vector<128x128xf32>
    %10 = arith.maximumf %8, %9 : vector<128x128xf32>
    %11 = arith.truncf %10 : vector<128x128xf32> to vector<128x128xbf16>
    %c0_9 = arith.constant 0 : index
    %c0_10 = arith.constant 0 : index
    %c0_11 = arith.constant 0 : index
    %12 = vector.load %arg6[%c0_9, %c0_10, %c0_11] : memref<1x128x128xbf16, #tpu.memory_space<vmem>>, vector<1x128x128xbf16>
    %13 = vector.shape_cast %12 : vector<1x128x128xbf16> to vector<128x128xbf16>
    %14 = vector.shape_cast %11 : vector<128x128xbf16> to vector<1x128x128xbf16>
    tpu.vector_store %arg6[%c0_9, %c0_10, %c0_11], %14 {strides = array<i32>} : memref<1x128x128xbf16, #tpu.memory_space<vmem>>, vector<1x128x128xbf16>,
    return
  }
  func.func @transform_0(%arg0: i32, %arg1: i32, %arg2: i32) -> (i32, i32, i32) {
    %c0_i32 = arith.constant 0 : i32
    %c0_i32_0 = arith.constant 0 : i32
    return %arg0, %arg1, %c0_i32 : i32, i32, i32
  }
  func.func @transform_1(%arg0: i32, %arg1: i32, %arg2: i32) -> (i32, i32, i32) {
    %c0_i32 = arith.constant 0 : i32
    %c0_i32_0 = arith.constant 0 : i32
    return %arg0, %c0_i32, %arg2 : i32, i32, i32
  }
  func.func @transform_2(%arg0: i32, %arg1: i32, %arg2: i32) -> (i32, i32, i32) {
    %c0_i32 = arith.constant 0 : i32
    %c0_i32_0 = arith.constant 0 : i32
    return %arg0, %c0_i32, %arg2 : i32, i32, i32
  }
  func.func @transform_3(%arg0: i32, %arg1: i32, %arg2: i32) -> (i32, i32, i32) {
    %c0_i32 = arith.constant 0 : i32
    return %arg0, %arg1, %arg2 : i32, i32, i32
  }
}

module attributes {stable_mosaic.version = 11 : i64} {
  func.func @_mm_bias_kernel(%arg0: i32, %arg1: i32, %arg2: memref<128x128xbf16, #tpu.memory_space<vmem>>, %arg3: memref<128x256xbf16, #tpu.memory_space<vmem>>, %arg4: memref<1x256xf32, #tpu.memory_space<vmem>>, %arg5: memref<128x256xbf16, #tpu.memory_space<vmem>>) attributes {dimension_semantics = [#tpu.dimension_semantics<parallel>, #tpu.dimension_semantics<parallel>], iteration_bounds = array<i64: 1, 1>, scalar_prefetch = 0 : i64, scratch_operands = 0 : i64, tpu.core_type = #tpu.core_type<tc>, window_params = [{transform_indices = @transform_0, window_bounds = array<i64: 128, 128>}, {transform_indices = @transform_1, window_bounds = array<i64: 128, 256>}, {transform_indices = @transform_2, window_bounds = array<i64: 1, 256>}, {transform_indices = @transform_3, window_bounds = array<i64: 128, 256>}]} {
    %c0 = arith.constant 0 : index
    %c0_0 = arith.constant 0 : index
    %0 = vector.load %arg2[%c0, %c0_0] : memref<128x128xbf16, #tpu.memory_space<vmem>>, vector<128x128xbf16>
    %c0_1 = arith.constant 0 : index
    %c0_2 = arith.constant 0 : index
    %1 = vector.load %arg3[%c0_1, %c0_2] : memref<128x256xbf16, #tpu.memory_space<vmem>>, vector<128x256xbf16>
    %cst = arith.constant dense<0.000000e+00> : vector<128x256xf32>
    %2 = tpu.matmul %0, %1, %cst {dimension_numbers = #tpu.dot_dimension_numbers<[1], [0], [0], [1], [0, 0, 1, 1], [], []>} : vector<128x128xbf16>, vector<128x256xbf16>, vector<128x256xf32> -> vector<128x256xf32>
    %c0_3 = arith.constant 0 : index
    %c0_4 = arith.constant 0 : index
    %3 = vector.load %arg4[%c0_3, %c0_4] : memref<1x256xf32, #tpu.memory_space<vmem>>, vector<1x256xf32>
    %4 = vector.broadcast %3 : vector<1x256xf32> to vector<128x256xf32>
    %5 = arith.addf %2, %4 : vector<128x256xf32>
    %cst_5 = arith.constant 0.000000e+00 : f32
    %6 = vector.broadcast %cst_5 : f32 to vector<128x256xf32>
    %7 = arith.maximumf %5, %6 : vector<128x256xf32>
    %8 = arith.truncf %7 : vector<128x256xf32> to vector<128x256xbf16>
    %c0_6 = arith.constant 0 : index
    %c0_7 = arith.constant 0 : index
    %9 = vector.load %arg5[%c0_6, %c0_7] : memref<128x256xbf16, #tpu.memory_space<vmem>>, vector<128x256xbf16>
    tpu.vector_store %arg5[%c0_6, %c0_7], %8 {strides = array<i32>} : memref<128x256xbf16, #tpu.memory_space<vmem>>, vector<128x256xbf16>,
    return
  }
  func.func @transform_0(%arg0: i32, %arg1: i32) -> (i32, i32) {
    %c0_i32 = arith.constant 0 : i32
    %c0_i32_0 = arith.constant 0 : i32
    return %arg0, %c0_i32 : i32, i32
  }
  func.func @transform_1(%arg0: i32, %arg1: i32) -> (i32, i32) {
    %c0_i32 = arith.constant 0 : i32
    %c0_i32_0 = arith.constant 0 : i32
    return %c0_i32, %arg1 : i32, i32
  }
  func.func @transform_2(%arg0: i32, %arg1: i32) -> (i32, i32) {
    %c0_i32 = arith.constant 0 : i32
    %c0_i32_0 = arith.constant 0 : i32
    return %c0_i32, %arg1 : i32, i32
  }
  func.func @transform_3(%arg0: i32, %arg1: i32) -> (i32, i32) {
    %c0_i32 = arith.constant 0 : i32
    return %arg0, %arg1 : i32, i32
  }
}

module attributes {stable_mosaic.version = 11 : i64} {
  func.func @_mm_bias_kernel(%arg0: i32, %arg1: i32, %arg2: memref<128x256xbf16, #tpu.memory_space<vmem>>, %arg3: memref<256x128xbf16, #tpu.memory_space<vmem>>, %arg4: memref<1x128xf32, #tpu.memory_space<vmem>>, %arg5: memref<128x128xbf16, #tpu.memory_space<vmem>>) attributes {dimension_semantics = [#tpu.dimension_semantics<parallel>, #tpu.dimension_semantics<parallel>], iteration_bounds = array<i64: 1, 1>, scalar_prefetch = 0 : i64, scratch_operands = 0 : i64, tpu.core_type = #tpu.core_type<tc>, window_params = [{transform_indices = @transform_0, window_bounds = array<i64: 128, 256>}, {transform_indices = @transform_1, window_bounds = array<i64: 256, 128>}, {transform_indices = @transform_2, window_bounds = array<i64: 1, 128>}, {transform_indices = @transform_3, window_bounds = array<i64: 128, 128>}]} {
    %c0 = arith.constant 0 : index
    %c0_0 = arith.constant 0 : index
    %0 = vector.load %arg2[%c0, %c0_0] : memref<128x256xbf16, #tpu.memory_space<vmem>>, vector<128x256xbf16>
    %c0_1 = arith.constant 0 : index
    %c0_2 = arith.constant 0 : index
    %1 = vector.load %arg3[%c0_1, %c0_2] : memref<256x128xbf16, #tpu.memory_space<vmem>>, vector<256x128xbf16>
    %cst = arith.constant dense<0.000000e+00> : vector<128x128xf32>
    %2 = tpu.matmul %0, %1, %cst {dimension_numbers = #tpu.dot_dimension_numbers<[1], [0], [0], [1], [0, 0, 1, 1], [], []>} : vector<128x256xbf16>, vector<256x128xbf16>, vector<128x128xf32> -> vector<128x128xf32>
    %c0_3 = arith.constant 0 : index
    %c0_4 = arith.constant 0 : index
    %3 = vector.load %arg4[%c0_3, %c0_4] : memref<1x128xf32, #tpu.memory_space<vmem>>, vector<1x128xf32>
    %4 = vector.broadcast %3 : vector<1x128xf32> to vector<128x128xf32>
    %5 = arith.addf %2, %4 : vector<128x128xf32>
    %cst_5 = arith.constant 0.000000e+00 : f32
    %6 = vector.broadcast %cst_5 : f32 to vector<128x128xf32>
    %7 = arith.maximumf %5, %6 : vector<128x128xf32>
    %8 = arith.truncf %7 : vector<128x128xf32> to vector<128x128xbf16>
    %c0_6 = arith.constant 0 : index
    %c0_7 = arith.constant 0 : index
    %9 = vector.load %arg5[%c0_6, %c0_7] : memref<128x128xbf16, #tpu.memory_space<vmem>>, vector<128x128xbf16>
    tpu.vector_store %arg5[%c0_6, %c0_7], %8 {strides = array<i32>} : memref<128x128xbf16, #tpu.memory_space<vmem>>, vector<128x128xbf16>,
    return
  }
  func.func @transform_0(%arg0: i32, %arg1: i32) -> (i32, i32) {
    %c0_i32 = arith.constant 0 : i32
    %c0_i32_0 = arith.constant 0 : i32
    return %arg0, %c0_i32 : i32, i32
  }
  func.func @transform_1(%arg0: i32, %arg1: i32) -> (i32, i32) {
    %c0_i32 = arith.constant 0 : i32
    %c0_i32_0 = arith.constant 0 : i32
    return %c0_i32, %arg1 : i32, i32
  }
  func.func @transform_2(%arg0: i32, %arg1: i32) -> (i32, i32) {
    %c0_i32 = arith.constant 0 : i32
    %c0_i32_0 = arith.constant 0 : i32
    return %c0_i32, %arg1 : i32, i32
  }
  func.func @transform_3(%arg0: i32, %arg1: i32) -> (i32, i32) {
    %c0_i32 = arith.constant 0 : i32
    return %arg0, %arg1 : i32, i32
  }
}

module attributes {stable_mosaic.version = 11 : i64} {
  func.func @_mm_bias_kernel(%arg0: i32, %arg1: i32, %arg2: i32, %arg3: memref<1x32x640xbf16, #tpu.memory_space<vmem>>, %arg4: memref<1x640x128xbf16, #tpu.memory_space<vmem>>, %arg5: memref<1x1x128xf32, #tpu.memory_space<vmem>>, %arg6: memref<1x32x128xbf16, #tpu.memory_space<vmem>>) attributes {dimension_semantics = [#tpu.dimension_semantics<parallel>, #tpu.dimension_semantics<parallel>, #tpu.dimension_semantics<parallel>], iteration_bounds = array<i64: 2, 1, 1>, scalar_prefetch = 0 : i64, scratch_operands = 0 : i64, tpu.core_type = #tpu.core_type<tc>, window_params = [{transform_indices = @transform_0, window_bounds = array<i64: 1, 32, 640>}, {transform_indices = @transform_1, window_bounds = array<i64: 1, 640, 128>}, {transform_indices = @transform_2, window_bounds = array<i64: 1, 1, 128>}, {transform_indices = @transform_3, window_bounds = array<i64: 1, 32, 128>}]} {
    %c0 = arith.constant 0 : index
    %c0_0 = arith.constant 0 : index
    %c0_1 = arith.constant 0 : index
    %0 = vector.load %arg3[%c0, %c0_0, %c0_1] : memref<1x32x640xbf16, #tpu.memory_space<vmem>>, vector<1x32x640xbf16>
    %1 = vector.shape_cast %0 : vector<1x32x640xbf16> to vector<32x640xbf16>
    %c0_2 = arith.constant 0 : index
    %c0_3 = arith.constant 0 : index
    %c0_4 = arith.constant 0 : index
    %2 = vector.load %arg4[%c0_2, %c0_3, %c0_4] : memref<1x640x128xbf16, #tpu.memory_space<vmem>>, vector<1x640x128xbf16>
    %3 = vector.shape_cast %2 : vector<1x640x128xbf16> to vector<640x128xbf16>
    %cst = arith.constant dense<0.000000e+00> : vector<32x128xf32>
    %4 = tpu.matmul %1, %3, %cst {dimension_numbers = #tpu.dot_dimension_numbers<[1], [0], [0], [1], [0, 0, 1, 1], [], []>} : vector<32x640xbf16>, vector<640x128xbf16>, vector<32x128xf32> -> vector<32x128xf32>
    %c0_5 = arith.constant 0 : index
    %c0_6 = arith.constant 0 : index
    %c0_7 = arith.constant 0 : index
    %5 = vector.load %arg5[%c0_5, %c0_6, %c0_7] : memref<1x1x128xf32, #tpu.memory_space<vmem>>, vector<1x1x128xf32>
    %6 = vector.shape_cast %5 : vector<1x1x128xf32> to vector<1x128xf32>
    %7 = vector.broadcast %6 : vector<1x128xf32> to vector<32x128xf32>
    %8 = arith.addf %4, %7 : vector<32x128xf32>
    %cst_8 = arith.constant 0.000000e+00 : f32
    %9 = vector.broadcast %cst_8 : f32 to vector<32x128xf32>
    %10 = arith.maximumf %8, %9 : vector<32x128xf32>
    %11 = arith.truncf %10 : vector<32x128xf32> to vector<32x128xbf16>
    %c0_9 = arith.constant 0 : index
    %c0_10 = arith.constant 0 : index
    %c0_11 = arith.constant 0 : index
    %12 = vector.load %arg6[%c0_9, %c0_10, %c0_11] : memref<1x32x128xbf16, #tpu.memory_space<vmem>>, vector<1x32x128xbf16>
    %13 = vector.shape_cast %12 : vector<1x32x128xbf16> to vector<32x128xbf16>
    %14 = vector.shape_cast %11 : vector<32x128xbf16> to vector<1x32x128xbf16>
    tpu.vector_store %arg6[%c0_9, %c0_10, %c0_11], %14 {strides = array<i32>} : memref<1x32x128xbf16, #tpu.memory_space<vmem>>, vector<1x32x128xbf16>,
    return
  }
  func.func @transform_0(%arg0: i32, %arg1: i32, %arg2: i32) -> (i32, i32, i32) {
    %c0_i32 = arith.constant 0 : i32
    %c0_i32_0 = arith.constant 0 : i32
    return %arg0, %arg1, %c0_i32 : i32, i32, i32
  }
  func.func @transform_1(%arg0: i32, %arg1: i32, %arg2: i32) -> (i32, i32, i32) {
    %c0_i32 = arith.constant 0 : i32
    %c0_i32_0 = arith.constant 0 : i32
    return %arg0, %c0_i32, %arg2 : i32, i32, i32
  }
  func.func @transform_2(%arg0: i32, %arg1: i32, %arg2: i32) -> (i32, i32, i32) {
    %c0_i32 = arith.constant 0 : i32
    %c0_i32_0 = arith.constant 0 : i32
    return %arg0, %c0_i32, %arg2 : i32, i32, i32
  }
  func.func @transform_3(%arg0: i32, %arg1: i32, %arg2: i32) -> (i32, i32, i32) {
    %c0_i32 = arith.constant 0 : i32
    return %arg0, %arg1, %arg2 : i32, i32, i32
  }
}

module attributes {stable_mosaic.version = 11 : i64} {
  func.func @_mm_bias_kernel(%arg0: i32, %arg1: i32, %arg2: memref<32x384xbf16, #tpu.memory_space<vmem>>, %arg3: memref<384x512xbf16, #tpu.memory_space<vmem>>, %arg4: memref<1x512xf32, #tpu.memory_space<vmem>>, %arg5: memref<32x512xbf16, #tpu.memory_space<vmem>>) attributes {dimension_semantics = [#tpu.dimension_semantics<parallel>, #tpu.dimension_semantics<parallel>], iteration_bounds = array<i64: 1, 1>, scalar_prefetch = 0 : i64, scratch_operands = 0 : i64, tpu.core_type = #tpu.core_type<tc>, window_params = [{transform_indices = @transform_0, window_bounds = array<i64: 32, 384>}, {transform_indices = @transform_1, window_bounds = array<i64: 384, 512>}, {transform_indices = @transform_2, window_bounds = array<i64: 1, 512>}, {transform_indices = @transform_3, window_bounds = array<i64: 32, 512>}]} {
    %c0 = arith.constant 0 : index
    %c0_0 = arith.constant 0 : index
    %0 = vector.load %arg2[%c0, %c0_0] : memref<32x384xbf16, #tpu.memory_space<vmem>>, vector<32x384xbf16>
    %c0_1 = arith.constant 0 : index
    %c0_2 = arith.constant 0 : index
    %1 = vector.load %arg3[%c0_1, %c0_2] : memref<384x512xbf16, #tpu.memory_space<vmem>>, vector<384x512xbf16>
    %cst = arith.constant dense<0.000000e+00> : vector<32x512xf32>
    %2 = tpu.matmul %0, %1, %cst {dimension_numbers = #tpu.dot_dimension_numbers<[1], [0], [0], [1], [0, 0, 1, 1], [], []>} : vector<32x384xbf16>, vector<384x512xbf16>, vector<32x512xf32> -> vector<32x512xf32>
    %c0_3 = arith.constant 0 : index
    %c0_4 = arith.constant 0 : index
    %3 = vector.load %arg4[%c0_3, %c0_4] : memref<1x512xf32, #tpu.memory_space<vmem>>, vector<1x512xf32>
    %4 = vector.broadcast %3 : vector<1x512xf32> to vector<32x512xf32>
    %5 = arith.addf %2, %4 : vector<32x512xf32>
    %cst_5 = arith.constant 0.000000e+00 : f32
    %6 = vector.broadcast %cst_5 : f32 to vector<32x512xf32>
    %7 = arith.maximumf %5, %6 : vector<32x512xf32>
    %8 = arith.truncf %7 : vector<32x512xf32> to vector<32x512xbf16>
    %c0_6 = arith.constant 0 : index
    %c0_7 = arith.constant 0 : index
    %9 = vector.load %arg5[%c0_6, %c0_7] : memref<32x512xbf16, #tpu.memory_space<vmem>>, vector<32x512xbf16>
    tpu.vector_store %arg5[%c0_6, %c0_7], %8 {strides = array<i32>} : memref<32x512xbf16, #tpu.memory_space<vmem>>, vector<32x512xbf16>,
    return
  }
  func.func @transform_0(%arg0: i32, %arg1: i32) -> (i32, i32) {
    %c0_i32 = arith.constant 0 : i32
    %c0_i32_0 = arith.constant 0 : i32
    return %arg0, %c0_i32 : i32, i32
  }
  func.func @transform_1(%arg0: i32, %arg1: i32) -> (i32, i32) {
    %c0_i32 = arith.constant 0 : i32
    %c0_i32_0 = arith.constant 0 : i32
    return %c0_i32, %arg1 : i32, i32
  }
  func.func @transform_2(%arg0: i32, %arg1: i32) -> (i32, i32) {
    %c0_i32 = arith.constant 0 : i32
    %c0_i32_0 = arith.constant 0 : i32
    return %c0_i32, %arg1 : i32, i32
  }
  func.func @transform_3(%arg0: i32, %arg1: i32) -> (i32, i32) {
    %c0_i32 = arith.constant 0 : i32
    return %arg0, %arg1 : i32, i32
  }
}

module attributes {stable_mosaic.version = 11 : i64} {
  func.func @_mm_bias_kernel(%arg0: i32, %arg1: i32, %arg2: memref<32x512xbf16, #tpu.memory_space<vmem>>, %arg3: memref<512x256xbf16, #tpu.memory_space<vmem>>, %arg4: memref<1x256xf32, #tpu.memory_space<vmem>>, %arg5: memref<32x256xbf16, #tpu.memory_space<vmem>>) attributes {dimension_semantics = [#tpu.dimension_semantics<parallel>, #tpu.dimension_semantics<parallel>], iteration_bounds = array<i64: 1, 1>, scalar_prefetch = 0 : i64, scratch_operands = 0 : i64, tpu.core_type = #tpu.core_type<tc>, window_params = [{transform_indices = @transform_0, window_bounds = array<i64: 32, 512>}, {transform_indices = @transform_1, window_bounds = array<i64: 512, 256>}, {transform_indices = @transform_2, window_bounds = array<i64: 1, 256>}, {transform_indices = @transform_3, window_bounds = array<i64: 32, 256>}]} {
    %c0 = arith.constant 0 : index
    %c0_0 = arith.constant 0 : index
    %0 = vector.load %arg2[%c0, %c0_0] : memref<32x512xbf16, #tpu.memory_space<vmem>>, vector<32x512xbf16>
    %c0_1 = arith.constant 0 : index
    %c0_2 = arith.constant 0 : index
    %1 = vector.load %arg3[%c0_1, %c0_2] : memref<512x256xbf16, #tpu.memory_space<vmem>>, vector<512x256xbf16>
    %cst = arith.constant dense<0.000000e+00> : vector<32x256xf32>
    %2 = tpu.matmul %0, %1, %cst {dimension_numbers = #tpu.dot_dimension_numbers<[1], [0], [0], [1], [0, 0, 1, 1], [], []>} : vector<32x512xbf16>, vector<512x256xbf16>, vector<32x256xf32> -> vector<32x256xf32>
    %c0_3 = arith.constant 0 : index
    %c0_4 = arith.constant 0 : index
    %3 = vector.load %arg4[%c0_3, %c0_4] : memref<1x256xf32, #tpu.memory_space<vmem>>, vector<1x256xf32>
    %4 = vector.broadcast %3 : vector<1x256xf32> to vector<32x256xf32>
    %5 = arith.addf %2, %4 : vector<32x256xf32>
    %cst_5 = arith.constant 0.000000e+00 : f32
    %6 = vector.broadcast %cst_5 : f32 to vector<32x256xf32>
    %7 = arith.maximumf %5, %6 : vector<32x256xf32>
    %8 = arith.truncf %7 : vector<32x256xf32> to vector<32x256xbf16>
    %c0_6 = arith.constant 0 : index
    %c0_7 = arith.constant 0 : index
    %9 = vector.load %arg5[%c0_6, %c0_7] : memref<32x256xbf16, #tpu.memory_space<vmem>>, vector<32x256xbf16>
    tpu.vector_store %arg5[%c0_6, %c0_7], %8 {strides = array<i32>} : memref<32x256xbf16, #tpu.memory_space<vmem>>, vector<32x256xbf16>,
    return
  }
  func.func @transform_0(%arg0: i32, %arg1: i32) -> (i32, i32) {
    %c0_i32 = arith.constant 0 : i32
    %c0_i32_0 = arith.constant 0 : i32
    return %arg0, %c0_i32 : i32, i32
  }
  func.func @transform_1(%arg0: i32, %arg1: i32) -> (i32, i32) {
    %c0_i32 = arith.constant 0 : i32
    %c0_i32_0 = arith.constant 0 : i32
    return %c0_i32, %arg1 : i32, i32
  }
  func.func @transform_2(%arg0: i32, %arg1: i32) -> (i32, i32) {
    %c0_i32 = arith.constant 0 : i32
    %c0_i32_0 = arith.constant 0 : i32
    return %c0_i32, %arg1 : i32, i32
  }
  func.func @transform_3(%arg0: i32, %arg1: i32) -> (i32, i32) {
    %c0_i32 = arith.constant 0 : i32
    return %arg0, %arg1 : i32, i32
  }
}

module attributes {stable_mosaic.version = 11 : i64} {
  func.func @_mm_bias_kernel(%arg0: i32, %arg1: i32, %arg2: i32, %arg3: memref<1x32x1152xbf16, #tpu.memory_space<vmem>>, %arg4: memref<1x1152x128xbf16, #tpu.memory_space<vmem>>, %arg5: memref<1x1x128xf32, #tpu.memory_space<vmem>>, %arg6: memref<1x32x128xbf16, #tpu.memory_space<vmem>>) attributes {dimension_semantics = [#tpu.dimension_semantics<parallel>, #tpu.dimension_semantics<parallel>, #tpu.dimension_semantics<parallel>], iteration_bounds = array<i64: 2, 1, 1>, scalar_prefetch = 0 : i64, scratch_operands = 0 : i64, tpu.core_type = #tpu.core_type<tc>, window_params = [{transform_indices = @transform_0, window_bounds = array<i64: 1, 32, 1152>}, {transform_indices = @transform_1, window_bounds = array<i64: 1, 1152, 128>}, {transform_indices = @transform_2, window_bounds = array<i64: 1, 1, 128>}, {transform_indices = @transform_3, window_bounds = array<i64: 1, 32, 128>}]} {
    %c0 = arith.constant 0 : index
    %c0_0 = arith.constant 0 : index
    %c0_1 = arith.constant 0 : index
    %0 = vector.load %arg3[%c0, %c0_0, %c0_1] : memref<1x32x1152xbf16, #tpu.memory_space<vmem>>, vector<1x32x1152xbf16>
    %1 = vector.shape_cast %0 : vector<1x32x1152xbf16> to vector<32x1152xbf16>
    %c0_2 = arith.constant 0 : index
    %c0_3 = arith.constant 0 : index
    %c0_4 = arith.constant 0 : index
    %2 = vector.load %arg4[%c0_2, %c0_3, %c0_4] : memref<1x1152x128xbf16, #tpu.memory_space<vmem>>, vector<1x1152x128xbf16>
    %3 = vector.shape_cast %2 : vector<1x1152x128xbf16> to vector<1152x128xbf16>
    %cst = arith.constant dense<0.000000e+00> : vector<32x128xf32>
    %4 = tpu.matmul %1, %3, %cst {dimension_numbers = #tpu.dot_dimension_numbers<[1], [0], [0], [1], [0, 0, 1, 1], [], []>} : vector<32x1152xbf16>, vector<1152x128xbf16>, vector<32x128xf32> -> vector<32x128xf32>
    %c0_5 = arith.constant 0 : index
    %c0_6 = arith.constant 0 : index
    %c0_7 = arith.constant 0 : index
    %5 = vector.load %arg5[%c0_5, %c0_6, %c0_7] : memref<1x1x128xf32, #tpu.memory_space<vmem>>, vector<1x1x128xf32>
    %6 = vector.shape_cast %5 : vector<1x1x128xf32> to vector<1x128xf32>
    %7 = vector.broadcast %6 : vector<1x128xf32> to vector<32x128xf32>
    %8 = arith.addf %4, %7 : vector<32x128xf32>
    %cst_8 = arith.constant 0.000000e+00 : f32
    %9 = vector.broadcast %cst_8 : f32 to vector<32x128xf32>
    %10 = arith.maximumf %8, %9 : vector<32x128xf32>
    %11 = arith.truncf %10 : vector<32x128xf32> to vector<32x128xbf16>
    %c0_9 = arith.constant 0 : index
    %c0_10 = arith.constant 0 : index
    %c0_11 = arith.constant 0 : index
    %12 = vector.load %arg6[%c0_9, %c0_10, %c0_11] : memref<1x32x128xbf16, #tpu.memory_space<vmem>>, vector<1x32x128xbf16>
    %13 = vector.shape_cast %12 : vector<1x32x128xbf16> to vector<32x128xbf16>
    %14 = vector.shape_cast %11 : vector<32x128xbf16> to vector<1x32x128xbf16>
    tpu.vector_store %arg6[%c0_9, %c0_10, %c0_11], %14 {strides = array<i32>} : memref<1x32x128xbf16, #tpu.memory_space<vmem>>, vector<1x32x128xbf16>,
    return
  }
  func.func @transform_0(%arg0: i32, %arg1: i32, %arg2: i32) -> (i32, i32, i32) {
    %c0_i32 = arith.constant 0 : i32
    %c0_i32_0 = arith.constant 0 : i32
    return %arg0, %arg1, %c0_i32 : i32, i32, i32
  }
  func.func @transform_1(%arg0: i32, %arg1: i32, %arg2: i32) -> (i32, i32, i32) {
    %c0_i32 = arith.constant 0 : i32
    %c0_i32_0 = arith.constant 0 : i32
    return %arg0, %c0_i32, %arg2 : i32, i32, i32
  }
  func.func @transform_2(%arg0: i32, %arg1: i32, %arg2: i32) -> (i32, i32, i32) {
    %c0_i32 = arith.constant 0 : i32
    %c0_i32_0 = arith.constant 0 : i32
    return %arg0, %c0_i32, %arg2 : i32, i32, i32
  }
  func.func @transform_3(%arg0: i32, %arg1: i32, %arg2: i32) -> (i32, i32, i32) {
    %c0_i32 = arith.constant 0 : i32
    return %arg0, %arg1, %arg2 : i32, i32, i32
  }
}

module attributes {stable_mosaic.version = 11 : i64} {
  func.func @_mm_bias_kernel(%arg0: i32, %arg1: i32, %arg2: memref<32x1024xbf16, #tpu.memory_space<vmem>>, %arg3: memref<1024x512xbf16, #tpu.memory_space<vmem>>, %arg4: memref<1x512xf32, #tpu.memory_space<vmem>>, %arg5: memref<32x512xbf16, #tpu.memory_space<vmem>>) attributes {dimension_semantics = [#tpu.dimension_semantics<parallel>, #tpu.dimension_semantics<parallel>], iteration_bounds = array<i64: 1, 1>, scalar_prefetch = 0 : i64, scratch_operands = 0 : i64, tpu.core_type = #tpu.core_type<tc>, window_params = [{transform_indices = @transform_0, window_bounds = array<i64: 32, 1024>}, {transform_indices = @transform_1, window_bounds = array<i64: 1024, 512>}, {transform_indices = @transform_2, window_bounds = array<i64: 1, 512>}, {transform_indices = @transform_3, window_bounds = array<i64: 32, 512>}]} {
    %c0 = arith.constant 0 : index
    %c0_0 = arith.constant 0 : index
    %0 = vector.load %arg2[%c0, %c0_0] : memref<32x1024xbf16, #tpu.memory_space<vmem>>, vector<32x1024xbf16>
    %c0_1 = arith.constant 0 : index
    %c0_2 = arith.constant 0 : index
    %1 = vector.load %arg3[%c0_1, %c0_2] : memref<1024x512xbf16, #tpu.memory_space<vmem>>, vector<1024x512xbf16>
    %cst = arith.constant dense<0.000000e+00> : vector<32x512xf32>
    %2 = tpu.matmul %0, %1, %cst {dimension_numbers = #tpu.dot_dimension_numbers<[1], [0], [0], [1], [0, 0, 1, 1], [], []>} : vector<32x1024xbf16>, vector<1024x512xbf16>, vector<32x512xf32> -> vector<32x512xf32>
    %c0_3 = arith.constant 0 : index
    %c0_4 = arith.constant 0 : index
    %3 = vector.load %arg4[%c0_3, %c0_4] : memref<1x512xf32, #tpu.memory_space<vmem>>, vector<1x512xf32>
    %4 = vector.broadcast %3 : vector<1x512xf32> to vector<32x512xf32>
    %5 = arith.addf %2, %4 : vector<32x512xf32>
    %cst_5 = arith.constant 0.000000e+00 : f32
    %6 = vector.broadcast %cst_5 : f32 to vector<32x512xf32>
    %7 = arith.maximumf %5, %6 : vector<32x512xf32>
    %8 = arith.truncf %7 : vector<32x512xf32> to vector<32x512xbf16>
    %c0_6 = arith.constant 0 : index
    %c0_7 = arith.constant 0 : index
    %9 = vector.load %arg5[%c0_6, %c0_7] : memref<32x512xbf16, #tpu.memory_space<vmem>>, vector<32x512xbf16>
    tpu.vector_store %arg5[%c0_6, %c0_7], %8 {strides = array<i32>} : memref<32x512xbf16, #tpu.memory_space<vmem>>, vector<32x512xbf16>,
    return
  }
  func.func @transform_0(%arg0: i32, %arg1: i32) -> (i32, i32) {
    %c0_i32 = arith.constant 0 : i32
    %c0_i32_0 = arith.constant 0 : i32
    return %arg0, %c0_i32 : i32, i32
  }
  func.func @transform_1(%arg0: i32, %arg1: i32) -> (i32, i32) {
    %c0_i32 = arith.constant 0 : i32
    %c0_i32_0 = arith.constant 0 : i32
    return %c0_i32, %arg1 : i32, i32
  }
  func.func @transform_2(%arg0: i32, %arg1: i32) -> (i32, i32) {
    %c0_i32 = arith.constant 0 : i32
    %c0_i32_0 = arith.constant 0 : i32
    return %c0_i32, %arg1 : i32, i32
  }
  func.func @transform_3(%arg0: i32, %arg1: i32) -> (i32, i32) {
    %c0_i32 = arith.constant 0 : i32
    return %arg0, %arg1 : i32, i32
  }
}

module attributes {stable_mosaic.version = 11 : i64} {
  func.func @_mm_bias_kernel(%arg0: i32, %arg1: i32, %arg2: memref<32x768xbf16, #tpu.memory_space<vmem>>, %arg3: memref<768x512xbf16, #tpu.memory_space<vmem>>, %arg4: memref<1x512xf32, #tpu.memory_space<vmem>>, %arg5: memref<32x512xbf16, #tpu.memory_space<vmem>>) attributes {dimension_semantics = [#tpu.dimension_semantics<parallel>, #tpu.dimension_semantics<parallel>], iteration_bounds = array<i64: 1, 2>, scalar_prefetch = 0 : i64, scratch_operands = 0 : i64, tpu.core_type = #tpu.core_type<tc>, window_params = [{transform_indices = @transform_0, window_bounds = array<i64: 32, 768>}, {transform_indices = @transform_1, window_bounds = array<i64: 768, 512>}, {transform_indices = @transform_2, window_bounds = array<i64: 1, 512>}, {transform_indices = @transform_3, window_bounds = array<i64: 32, 512>}]} {
    %c0 = arith.constant 0 : index
    %c0_0 = arith.constant 0 : index
    %0 = vector.load %arg2[%c0, %c0_0] : memref<32x768xbf16, #tpu.memory_space<vmem>>, vector<32x768xbf16>
    %c0_1 = arith.constant 0 : index
    %c0_2 = arith.constant 0 : index
    %1 = vector.load %arg3[%c0_1, %c0_2] : memref<768x512xbf16, #tpu.memory_space<vmem>>, vector<768x512xbf16>
    %cst = arith.constant dense<0.000000e+00> : vector<32x512xf32>
    %2 = tpu.matmul %0, %1, %cst {dimension_numbers = #tpu.dot_dimension_numbers<[1], [0], [0], [1], [0, 0, 1, 1], [], []>} : vector<32x768xbf16>, vector<768x512xbf16>, vector<32x512xf32> -> vector<32x512xf32>
    %c0_3 = arith.constant 0 : index
    %c0_4 = arith.constant 0 : index
    %3 = vector.load %arg4[%c0_3, %c0_4] : memref<1x512xf32, #tpu.memory_space<vmem>>, vector<1x512xf32>
    %4 = vector.broadcast %3 : vector<1x512xf32> to vector<32x512xf32>
    %5 = arith.addf %2, %4 : vector<32x512xf32>
    %cst_5 = arith.constant 0.000000e+00 : f32
    %6 = vector.broadcast %cst_5 : f32 to vector<32x512xf32>
    %7 = arith.maximumf %5, %6 : vector<32x512xf32>
    %8 = arith.truncf %7 : vector<32x512xf32> to vector<32x512xbf16>
    %c0_6 = arith.constant 0 : index
    %c0_7 = arith.constant 0 : index
    %9 = vector.load %arg5[%c0_6, %c0_7] : memref<32x512xbf16, #tpu.memory_space<vmem>>, vector<32x512xbf16>
    tpu.vector_store %arg5[%c0_6, %c0_7], %8 {strides = array<i32>} : memref<32x512xbf16, #tpu.memory_space<vmem>>, vector<32x512xbf16>,
    return
  }
  func.func @transform_0(%arg0: i32, %arg1: i32) -> (i32, i32) {
    %c0_i32 = arith.constant 0 : i32
    %c0_i32_0 = arith.constant 0 : i32
    return %arg0, %c0_i32 : i32, i32
  }
  func.func @transform_1(%arg0: i32, %arg1: i32) -> (i32, i32) {
    %c0_i32 = arith.constant 0 : i32
    %c0_i32_0 = arith.constant 0 : i32
    return %c0_i32, %arg1 : i32, i32
  }
  func.func @transform_2(%arg0: i32, %arg1: i32) -> (i32, i32) {
    %c0_i32 = arith.constant 0 : i32
    %c0_i32_0 = arith.constant 0 : i32
    return %c0_i32, %arg1 : i32, i32
  }
  func.func @transform_3(%arg0: i32, %arg1: i32) -> (i32, i32) {
    %c0_i32 = arith.constant 0 : i32
    return %arg0, %arg1 : i32, i32
  }
}

module attributes {stable_mosaic.version = 11 : i64} {
  func.func @_mm_bias_kernel(%arg0: i32, %arg1: i32, %arg2: i32, %arg3: memref<1x32x2304xbf16, #tpu.memory_space<vmem>>, %arg4: memref<1x2304x256xbf16, #tpu.memory_space<vmem>>, %arg5: memref<1x1x256xf32, #tpu.memory_space<vmem>>, %arg6: memref<1x32x256xbf16, #tpu.memory_space<vmem>>) attributes {dimension_semantics = [#tpu.dimension_semantics<parallel>, #tpu.dimension_semantics<parallel>, #tpu.dimension_semantics<parallel>], iteration_bounds = array<i64: 2, 1, 1>, scalar_prefetch = 0 : i64, scratch_operands = 0 : i64, tpu.core_type = #tpu.core_type<tc>, window_params = [{transform_indices = @transform_0, window_bounds = array<i64: 1, 32, 2304>}, {transform_indices = @transform_1, window_bounds = array<i64: 1, 2304, 256>}, {transform_indices = @transform_2, window_bounds = array<i64: 1, 1, 256>}, {transform_indices = @transform_3, window_bounds = array<i64: 1, 32, 256>}]} {
    %c0 = arith.constant 0 : index
    %c0_0 = arith.constant 0 : index
    %c0_1 = arith.constant 0 : index
    %0 = vector.load %arg3[%c0, %c0_0, %c0_1] : memref<1x32x2304xbf16, #tpu.memory_space<vmem>>, vector<1x32x2304xbf16>
    %1 = vector.shape_cast %0 : vector<1x32x2304xbf16> to vector<32x2304xbf16>
    %c0_2 = arith.constant 0 : index
    %c0_3 = arith.constant 0 : index
    %c0_4 = arith.constant 0 : index
    %2 = vector.load %arg4[%c0_2, %c0_3, %c0_4] : memref<1x2304x256xbf16, #tpu.memory_space<vmem>>, vector<1x2304x256xbf16>
    %3 = vector.shape_cast %2 : vector<1x2304x256xbf16> to vector<2304x256xbf16>
    %cst = arith.constant dense<0.000000e+00> : vector<32x256xf32>
    %4 = tpu.matmul %1, %3, %cst {dimension_numbers = #tpu.dot_dimension_numbers<[1], [0], [0], [1], [0, 0, 1, 1], [], []>} : vector<32x2304xbf16>, vector<2304x256xbf16>, vector<32x256xf32> -> vector<32x256xf32>
    %c0_5 = arith.constant 0 : index
    %c0_6 = arith.constant 0 : index
    %c0_7 = arith.constant 0 : index
    %5 = vector.load %arg5[%c0_5, %c0_6, %c0_7] : memref<1x1x256xf32, #tpu.memory_space<vmem>>, vector<1x1x256xf32>
    %6 = vector.shape_cast %5 : vector<1x1x256xf32> to vector<1x256xf32>
    %7 = vector.broadcast %6 : vector<1x256xf32> to vector<32x256xf32>
    %8 = arith.addf %4, %7 : vector<32x256xf32>
    %cst_8 = arith.constant 0.000000e+00 : f32
    %9 = vector.broadcast %cst_8 : f32 to vector<32x256xf32>
    %10 = arith.maximumf %8, %9 : vector<32x256xf32>
    %11 = arith.truncf %10 : vector<32x256xf32> to vector<32x256xbf16>
    %c0_9 = arith.constant 0 : index
    %c0_10 = arith.constant 0 : index
    %c0_11 = arith.constant 0 : index
    %12 = vector.load %arg6[%c0_9, %c0_10, %c0_11] : memref<1x32x256xbf16, #tpu.memory_space<vmem>>, vector<1x32x256xbf16>
    %13 = vector.shape_cast %12 : vector<1x32x256xbf16> to vector<32x256xbf16>
    %14 = vector.shape_cast %11 : vector<32x256xbf16> to vector<1x32x256xbf16>
    tpu.vector_store %arg6[%c0_9, %c0_10, %c0_11], %14 {strides = array<i32>} : memref<1x32x256xbf16, #tpu.memory_space<vmem>>, vector<1x32x256xbf16>,
    return
  }
  func.func @transform_0(%arg0: i32, %arg1: i32, %arg2: i32) -> (i32, i32, i32) {
    %c0_i32 = arith.constant 0 : i32
    %c0_i32_0 = arith.constant 0 : i32
    return %arg0, %arg1, %c0_i32 : i32, i32, i32
  }
  func.func @transform_1(%arg0: i32, %arg1: i32, %arg2: i32) -> (i32, i32, i32) {
    %c0_i32 = arith.constant 0 : i32
    %c0_i32_0 = arith.constant 0 : i32
    return %arg0, %c0_i32, %arg2 : i32, i32, i32
  }
  func.func @transform_2(%arg0: i32, %arg1: i32, %arg2: i32) -> (i32, i32, i32) {
    %c0_i32 = arith.constant 0 : i32
    %c0_i32_0 = arith.constant 0 : i32
    return %arg0, %c0_i32, %arg2 : i32, i32, i32
  }
  func.func @transform_3(%arg0: i32, %arg1: i32, %arg2: i32) -> (i32, i32, i32) {
    %c0_i32 = arith.constant 0 : i32
    return %arg0, %arg1, %arg2 : i32, i32, i32
  }
}

module attributes {stable_mosaic.version = 11 : i64} {
  func.func @_mm_bias_kernel(%arg0: i32, %arg1: i32, %arg2: memref<32x1536xbf16, #tpu.memory_space<vmem>>, %arg3: memref<1536x512xbf16, #tpu.memory_space<vmem>>, %arg4: memref<1x512xf32, #tpu.memory_space<vmem>>, %arg5: memref<32x512xbf16, #tpu.memory_space<vmem>>) attributes {dimension_semantics = [#tpu.dimension_semantics<parallel>, #tpu.dimension_semantics<parallel>], iteration_bounds = array<i64: 1, 4>, scalar_prefetch = 0 : i64, scratch_operands = 0 : i64, tpu.core_type = #tpu.core_type<tc>, window_params = [{transform_indices = @transform_0, window_bounds = array<i64: 32, 1536>}, {transform_indices = @transform_1, window_bounds = array<i64: 1536, 512>}, {transform_indices = @transform_2, window_bounds = array<i64: 1, 512>}, {transform_indices = @transform_3, window_bounds = array<i64: 32, 512>}]} {
    %c0 = arith.constant 0 : index
    %c0_0 = arith.constant 0 : index
    %0 = vector.load %arg2[%c0, %c0_0] : memref<32x1536xbf16, #tpu.memory_space<vmem>>, vector<32x1536xbf16>
    %c0_1 = arith.constant 0 : index
    %c0_2 = arith.constant 0 : index
    %1 = vector.load %arg3[%c0_1, %c0_2] : memref<1536x512xbf16, #tpu.memory_space<vmem>>, vector<1536x512xbf16>
    %cst = arith.constant dense<0.000000e+00> : vector<32x512xf32>
    %2 = tpu.matmul %0, %1, %cst {dimension_numbers = #tpu.dot_dimension_numbers<[1], [0], [0], [1], [0, 0, 1, 1], [], []>} : vector<32x1536xbf16>, vector<1536x512xbf16>, vector<32x512xf32> -> vector<32x512xf32>
    %c0_3 = arith.constant 0 : index
    %c0_4 = arith.constant 0 : index
    %3 = vector.load %arg4[%c0_3, %c0_4] : memref<1x512xf32, #tpu.memory_space<vmem>>, vector<1x512xf32>
    %4 = vector.broadcast %3 : vector<1x512xf32> to vector<32x512xf32>
    %5 = arith.addf %2, %4 : vector<32x512xf32>
    %cst_5 = arith.constant 0.000000e+00 : f32
    %6 = vector.broadcast %cst_5 : f32 to vector<32x512xf32>
    %7 = arith.maximumf %5, %6 : vector<32x512xf32>
    %8 = arith.truncf %7 : vector<32x512xf32> to vector<32x512xbf16>
    %c0_6 = arith.constant 0 : index
    %c0_7 = arith.constant 0 : index
    %9 = vector.load %arg5[%c0_6, %c0_7] : memref<32x512xbf16, #tpu.memory_space<vmem>>, vector<32x512xbf16>
    tpu.vector_store %arg5[%c0_6, %c0_7], %8 {strides = array<i32>} : memref<32x512xbf16, #tpu.memory_space<vmem>>, vector<32x512xbf16>,
    return
  }
  func.func @transform_0(%arg0: i32, %arg1: i32) -> (i32, i32) {
    %c0_i32 = arith.constant 0 : i32
    %c0_i32_0 = arith.constant 0 : i32
    return %arg0, %c0_i32 : i32, i32
  }
  func.func @transform_1(%arg0: i32, %arg1: i32) -> (i32, i32) {
    %c0_i32 = arith.constant 0 : i32
    %c0_i32_0 = arith.constant 0 : i32
    return %c0_i32, %arg1 : i32, i32
  }
  func.func @transform_2(%arg0: i32, %arg1: i32) -> (i32, i32) {
    %c0_i32 = arith.constant 0 : i32
    %c0_i32_0 = arith.constant 0 : i32
    return %c0_i32, %arg1 : i32, i32
  }
  func.func @transform_3(%arg0: i32, %arg1: i32) -> (i32, i32) {
    %c0_i32 = arith.constant 0 : i32
    return %arg0, %arg1 : i32, i32
  }
}

</mosaic_0001>

<bundles_post_ra>
// kernel: rtnet_forward.14
= control target key start
LH: loop header
LB: loop body
LE: loop exit
PB: predicated region body
PF: predicated region fallthrough
CT: control target
= control target key end

     0   :  { %s1070_s12 = smov 0   ;;  %s1072_s13 = smov 0   ;;  %s1204_s0 = inlined_call_operand.vmem [shape: bf16[512,256], index: 0, kind: input, shape index: {}]   ;;  %s1205_s1 = inlined_call_operand.vmem [shape: bf16[256,128], index: 1, kind: input, shape index: {}]   ;;  %s1206_s2 = inlined_call_operand.vmem [shape: f32[1,128], index: 2, kind: input, shape index: {}]   ;;  %s1207_s3 = inlined_call_operand.vmem [shape: bf16[512,128], index: 3, kind: output, shape index: {}]  }
   0x1   :  { %s1074_s14 = smov 0  }
   0x2 LB: > { %s25_s15 = sadd.s32 1, %s1044_s13  ;;  %p761_p0 = scmp.ge.s32.totalorder %s1048_s14, 1  ;;  %s1048_s14 = sphi %s1074_s14, %s13_s14   ;;  %s1044_s13 = sphi %s1072_s13, %s1209_s13   ;;  %s1040_s12 = sphi %s1070_s12, %s1208_s12  }
   0x3   : > { %p27_p1 = scmp.ge.s32.totalorder %s25_s15, 4  ;;  %p170_p2 = scmp.lt.s32.totalorder %s1048_s14, 5 }
   0x5   : > { %s1211_s15 = smov (%p27_p1, %s25_s15), 0  ;;  %p171_p3 = pnand %p761_p0, %p170_p2 }
   0x6   : > { %v986_v0 = vld [vmem:[%s1205_s1 + $0x40] sm:$0xff] (!%p171_p3)   ;;  %s762_s18 = sshll.u32 (!%p171_p3), %s1040_s12, 4  ;;  %v988_v2 = vld [vmem:[%s1205_s1 + $0x48] sm:$0xff] (!%p171_p3)   ;;  %v990_v4 = vld [vmem:[%s1205_s1 + $0x50] sm:$0xff] (!%p171_p3)  }
   0x7   : > { %174 = sbr.rel (%p171_p3) target bundleno = 288 (0x120), region = 32  ;;  %v987_v1 = vld [vmem:[%s1205_s1] sm:$0xff] (!%p171_p3)   ;;  %882 = vmatprep.subr.bf16.mxu0 (!%p171_p3), %v986_v0  ;;  %946 = vmatprep.subr.bf16.mxu1 (!%p171_p3), %v986_v0  ;;  %v989_v3 = vld [vmem:[%s1205_s1 + $0x8] sm:$0xff] (!%p171_p3)   ;;  %p206_p4 = scmp.lt.s32.totalorder (!%p171_p3), %s762_s18, 63  ;;  %v991_v5 = vld [vmem:[%s1205_s1 + $0x10] sm:$0xff] (!%p171_p3)  }
   0x8   : > { %883 = vmatpush3.bf16.msra.mxu0 (!%p171_p3), %v987_v1  ;;  %954 = vmatpush3.bf16.msra.mxu1 (!%p171_p3), %v987_v1  ;;  %v992_v6 = vld [vmem:[%s1205_s1 + $0x58] sm:$0xff] (!%p171_p3)   ;;  %v994_v8 = vld [vmem:[%s1205_s1 + $0x60] sm:$0xff] (!%p171_p3)   ;;  %v996_v10 = vld [vmem:[%s1205_s1 + $0x68] sm:$0xff] (!%p171_p3)  }
   0x9   : > { %884 = vmatprep.subr.bf16.mxu0 (!%p171_p3), %v988_v2  ;;  %947 = vmatprep.subr.bf16.mxu1 (!%p171_p3), %v988_v2  ;;  %v993_v7 = vld [vmem:[%s1205_s1 + $0x18] sm:$0xff] (!%p171_p3)   ;;  %v995_v9 = vld [vmem:[%s1205_s1 + $0x20] sm:$0xff] (!%p171_p3)   ;;  %v997_v13 = vld [vmem:[%s1205_s1 + $0x28] sm:$0xff] (!%p171_p3)  }
   0xa   : > { %v998_v14 = vld [vmem:[%s1205_s1 + $0x70] sm:$0xff] (!%p171_p3)   ;;  %v1000_v16 = vld [vmem:[%s1205_s1 + $0x78] sm:$0xff] (!%p171_p3)   ;;  %v1163_v34 = vld [vmem:[%s1206_s2] ss:$0 sm:$0xff] (!%p171_p3) }
   0xb   : > { %v999_v15 = vld [vmem:[%s1205_s1 + $0x30] sm:$0xff] (!%p171_p3)   ;;  %v1001_v17 = vld [vmem:[%s1205_s1 + $0x38] sm:$0xff] (!%p171_p3)  }
   0xc   : > { %885 = vmatpush3.bf16.msra.mxu0 (!%p171_p3), %v989_v3  ;;  %955 = vmatpush3.bf16.msra.mxu1 (!%p171_p3), %v989_v3 }
   0xd   : > { %886 = vmatprep.subr.bf16.mxu0 (!%p171_p3), %v990_v4  ;;  %948 = vmatprep.subr.bf16.mxu1 (!%p171_p3), %v990_v4 }
   0xe   : > { %s1213_s18 = smov (!%p206_p4, %s762_s18), 63 }
   0xf   : > { %s818_s6 = sshll.u32 %s1213_s18, 3  ;;  %s766_s5 = sshll.u32 %s1213_s18, 2 }
  0x10   : > { %887 = vmatpush3.bf16.msra.mxu0 %v991_v5  ;;  %956 = vmatpush3.bf16.msra.mxu1 %v991_v5  ;;  %s1121_s11 = scalar_lea.vmem %s1204_s0, %s818_s6  ;;  %s1173_s8 = scalar_lea.vmem %s1207_s3, %s766_s5 }
  0x11   : > { %888 = vmatprep.subr.bf16.mxu0 %v992_v6  ;;  %949 = vmatprep.subr.bf16.mxu1 %v992_v6  ;;  %v1004_v11 = vld [vmem:[%s1121_s11 + $0x4] ss:$8 sps:$4 sm:$0xff]   ;;  %v1002_v18 = vld [vmem:[%s1121_s11] ss:$8 sps:$4 sm:$0xff]   ;;  %v1008_v20 = vld [vmem:[%s1121_s11 + $0x14] ss:$8 sps:$4 sm:$0xff]  }
  0x12   : > { %v1007_v12 = vld [vmem:[%s1121_s11 + $0x44] ss:$8 sps:$4 sm:$0xff]   ;;  %492 = vmatprep.mubr.bf16.mxu0 %v1004_v11  ;;  %v1005_v19 = vld [vmem:[%s1121_s11 + $0x40] ss:$8 sps:$4 sm:$0xff]   ;;  %v1010_v21 = vld [vmem:[%s1121_s11 + $0x54] ss:$8 sps:$4 sm:$0xff]  }
  0x13   : > { %524 = vmatprep.mubr.bf16.mxu1 %v1007_v12  ;;  %v1012_v22 = vld [vmem:[%s1121_s11 + $0x10] ss:$8 sps:$4 sm:$0xff]   ;;  %v1014_v24 = vld [vmem:[%s1121_s11 + $0x24] ss:$8 sps:$4 sm:$0xff]   ;;  %v1018_v26 = vld [vmem:[%s1121_s11 + $0x20] ss:$8 sps:$4 sm:$0xff]  }
  0x14   : > { %889 = vmatpush3.bf16.msra.mxu0 %v993_v7  ;;  %957 = vmatpush3.bf16.msra.mxu1 %v993_v7  ;;  %v1013_v23 = vld [vmem:[%s1121_s11 + $0x50] ss:$8 sps:$4 sm:$0xff]   ;;  %v1016_v25 = vld [vmem:[%s1121_s11 + $0x64] ss:$8 sps:$4 sm:$0xff]   ;;  %v1019_v27 = vld [vmem:[%s1121_s11 + $0x60] ss:$8 sps:$4 sm:$0xff]  }
  0x15   : > { %890 = vmatprep.subr.bf16.mxu0 %v994_v8  ;;  %950 = vmatprep.subr.bf16.mxu1 %v994_v8  ;;  %v1020_v28 = vld [vmem:[%s1121_s11 + $0x34] ss:$8 sps:$4 sm:$0xff]   ;;  %v1024_v30 = vld [vmem:[%s1121_s11 + $0x30] ss:$8 sps:$4 sm:$0xff]  }
  0x16   : > { %v1022_v29 = vld [vmem:[%s1121_s11 + $0x74] ss:$8 sps:$4 sm:$0xff]   ;;  %v1025_v31 = vld [vmem:[%s1121_s11 + $0x70] ss:$8 sps:$4 sm:$0xff]  }
  0x18   : > { %891 = vmatpush3.bf16.msra.mxu0 %v995_v9  ;;  %958 = vmatpush3.bf16.msra.mxu1 %v995_v9 }
  0x19   : > { %892 = vmatprep.subr.bf16.mxu0 %v996_v10  ;;  %951 = vmatprep.subr.bf16.mxu1 %v996_v10 }
  0x1c   : > { %893 = vmatpush3.bf16.msra.mxu0 %v997_v13  ;;  %959 = vmatpush3.bf16.msra.mxu1 %v997_v13 }
  0x1d   : > { %894 = vmatprep.subr.bf16.mxu0 %v998_v14  ;;  %952 = vmatprep.subr.bf16.mxu1 %v998_v14 }
  0x20   : > { %895 = vmatpush3.bf16.msra.mxu0 %v999_v15  ;;  %960 = vmatpush3.bf16.msra.mxu1 %v999_v15 }
  0x21   : > { %896 = vmatprep.subr.bf16.mxu0 %v1000_v16  ;;  %953 = vmatprep.subr.bf16.mxu1 %v1000_v16 }
  0x24   : > { %897 = vmatpush3.bf16.msra.mxu0 %v1001_v17  ;;  %961 = vmatpush3.bf16.msra.mxu1 %v1001_v17 }
  0x27   : > { %493 = vmatmul.mubr.bf16.vlgmr.msra.gmra.mrb[0].mxu0 %v1002_v18  ;;  %525 = vmatmul.mubr.bf16.vlgmr.msra.gmra.mrb[0].mxu1 %v1005_v19 }
  0x28   : > { %500 = vmatprep.mubr.bf16.mxu0 %v1008_v20  ;;  %532 = vmatprep.mubr.bf16.mxu1 %v1010_v21 }
  0x2f   : > { %501 = vmatmul.mubr.bf16.gmra.mrb[4].mxu0 %v1012_v22  ;;  %533 = vmatmul.mubr.bf16.gmra.mrb[4].mxu1 %v1013_v23 }
  0x30   : > { %508 = vmatprep.mubr.bf16.mxu0 %v1014_v24  ;;  %540 = vmatprep.mubr.bf16.mxu1 %v1016_v25 }
  0x37   : > { %509 = vmatmul.mubr.bf16.gmra.mrb[8].mxu0 %v1018_v26  ;;  %541 = vmatmul.mubr.bf16.gmra.mrb[8].mxu1 %v1019_v27 }
  0x38   : > { %516 = vmatprep.mubr.bf16.mxu0 %v1020_v28  ;;  %548 = vmatprep.mubr.bf16.mxu1 %v1022_v29 }
  0x3f   : > { %517 = vmatmul.mubr.bf16.gmra.mrb[12].mxu0 %v1024_v30  ;;  %549 = vmatmul.mubr.bf16.gmra.mrb[12].mxu1 %v1025_v31 }
  0xfa   : > { %v898_v32 = vpop.f32.mrb[0].mxu0  ;;  %v922_v33 = vpop.f32.mrb[0].mxu1 }
  0xfb   : > { %v899_v35 = vpop.f32.mrb[1].mxu0  ;;  %v923_v36 = vpop.f32.mrb[1].mxu1 }
  0xfc   : > { %v900_v37 = vadd.f32 %v899_v35, %v898_v32  ;;  %v924_v38 = vadd.f32 %v923_v36, %v922_v33  ;;  %v901_v39 = vpop.f32.mrb[2].mxu0  ;;  %v925_v40 = vpop.f32.mrb[2].mxu1 }
  0xfd   : > { %v902_v41 = vpop.f32.mrb[3].mxu0  ;;  %v926_v42 = vpop.f32.mrb[3].mxu1 }
  0xfe   : > { %v495_v43 = vadd.f32 %v900_v37, %v1163_v34  ;;  %v527_v44 = vadd.f32 %v924_v38, %v1163_v34  ;;  %v903_v45 = vadd.f32 %v902_v41, %v901_v39  ;;  %v927_v46 = vadd.f32 %v926_v42, %v925_v40 }
 0x100   : > { %v498_v47 = vadd.f32 %v903_v45, %v1163_v34  ;;  %v530_v48 = vadd.f32 %v927_v46, %v1163_v34  ;;  %v557_v49 = vmax.f32 %v495_v43, 0.0  ;;  %v565_v50 = vmax.f32 %v527_v44, 0.0 }
 0x102   : > { %v558_v51 = vmax.f32 %v498_v47, 0.0  ;;  %v566_v52 = vmax.f32 %v530_v48, 0.0  ;;  %v904_v53 = vpop.f32.mrb[4].mxu0  ;;  %v928_v54 = vpop.f32.mrb[4].mxu1 }
 0x103   : > { %v905_v55 = vpop.f32.mrb[5].mxu0  ;;  %v929_v56 = vpop.f32.mrb[5].mxu1 }
 0x104   : > { %v838_v57 = vpack.c.bf16 %v558_v51, %v557_v49  ;;  %v858_v58 = vpack.c.bf16 %v566_v52, %v565_v50  ;;  %v906_v59 = vadd.f32 %v905_v55, %v904_v53  ;;  %v930_v60 = vadd.f32 %v929_v56, %v928_v54  ;;  %v907_v61 = vpop.f32.mrb[6].mxu0  ;;  %v931_v62 = vpop.f32.mrb[6].mxu1 }
 0x105   : > { %v908_v63 = vpop.f32.mrb[7].mxu0  ;;  %v932_v0 = vpop.f32.mrb[7].mxu1 }
 0x106   : > { %839 = vst [vmem:[%s1173_s8] sm:$0xff] %v838_v57   ;;  %878 = vst [vmem:[%s1173_s8 + $0x20] sm:$0xff] %v858_v58   ;;  %v503_v1 = vadd.f32 %v906_v59, %v1163_v34  ;;  %v535_v2 = vadd.f32 %v930_v60, %v1163_v34  ;;  %v909_v3 = vadd.f32 %v908_v63, %v907_v61 }
 0x107   : > { %v933_v4 = vadd.f32 %v932_v0, %v931_v62 }
 0x108   : > { %v506_v5 = vadd.f32 %v909_v3, %v1163_v34  ;;  %v559_v7 = vmax.f32 %v503_v1, 0.0  ;;  %v567_v8 = vmax.f32 %v535_v2, 0.0 }
 0x109   : > { %v538_v6 = vadd.f32 %v933_v4, %v1163_v34 }
 0x10a   : > { %v560_v9 = vmax.f32 %v506_v5, 0.0  ;;  %v910_v11 = vpop.f32.mrb[8].mxu0  ;;  %v934_v12 = vpop.f32.mrb[8].mxu1 }
 0x10b   : > { %v568_v10 = vmax.f32 %v538_v6, 0.0  ;;  %v911_v13 = vpop.f32.mrb[9].mxu0  ;;  %v935_v14 = vpop.f32.mrb[9].mxu1 }
 0x10c   : > { %v843_v15 = vpack.c.bf16 %v560_v9, %v559_v7  ;;  %v912_v17 = vadd.f32 %v911_v13, %v910_v11  ;;  %v936_v18 = vadd.f32 %v935_v14, %v934_v12  ;;  %v913_v19 = vpop.f32.mrb[10].mxu0  ;;  %v937_v20 = vpop.f32.mrb[10].mxu1 }
 0x10d   : > { %v863_v16 = vpack.c.bf16 %v568_v10, %v567_v8  ;;  %v914_v21 = vpop.f32.mrb[11].mxu0  ;;  %v938_v22 = vpop.f32.mrb[11].mxu1 }
 0x10e   : > { %875 = vst [vmem:[%s1173_s8 + $0x8] sm:$0xff] %v843_v15   ;;  %v511_v23 = vadd.f32 %v912_v17, %v1163_v34  ;;  %v543_v24 = vadd.f32 %v936_v18, %v1163_v34  ;;  %v915_v25 = vadd.f32 %v914_v21, %v913_v19  ;;  %v939_v26 = vadd.f32 %v938_v22, %v937_v20 }
 0x10f   : > { %879 = vst [vmem:[%s1173_s8 + $0x28] sm:$0xff] %v863_v16  }
 0x110   : > { %v514_v27 = vadd.f32 %v915_v25, %v1163_v34  ;;  %v546_v28 = vadd.f32 %v939_v26, %v1163_v34  ;;  %v561_v29 = vmax.f32 %v511_v23, 0.0  ;;  %v569_v30 = vmax.f32 %v543_v24, 0.0 }
 0x112   : > { %v562_v31 = vmax.f32 %v514_v27, 0.0  ;;  %v570_v32 = vmax.f32 %v546_v28, 0.0  ;;  %v916_v33 = vpop.f32.mrb[12].mxu0  ;;  %v940_v35 = vpop.f32.mrb[12].mxu1 }
 0x113   : > { %v917_v36 = vpop.f32.mrb[13].mxu0  ;;  %v941_v37 = vpop.f32.mrb[13].mxu1 }
 0x114   : > { %v848_v38 = vpack.c.bf16 %v562_v31, %v561_v29  ;;  %v868_v39 = vpack.c.bf16 %v570_v32, %v569_v30  ;;  %v918_v40 = vadd.f32 %v917_v36, %v916_v33  ;;  %v942_v41 = vadd.f32 %v941_v37, %v940_v35  ;;  %v919_v42 = vpop.f32.mrb[14].mxu0  ;;  %v943_v43 = vpop.f32.mrb[14].mxu1 }
 0x115   : > { %v920_v44 = vpop.f32.mrb[15].mxu0  ;;  %v944_v45 = vpop.f32.mrb[15].mxu1 }
 0x116   : > { %876 = vst [vmem:[%s1173_s8 + $0x10] sm:$0xff] %v848_v38   ;;  %880 = vst [vmem:[%s1173_s8 + $0x30] sm:$0xff] %v868_v39   ;;  %v519_v46 = vadd.f32 %v918_v40, %v1163_v34  ;;  %v551_v47 = vadd.f32 %v942_v41, %v1163_v34  ;;  %v921_v48 = vadd.f32 %v920_v44, %v919_v42 }
 0x117   : > { %v945_v49 = vadd.f32 %v944_v45, %v943_v43 }
 0x118   : > { %v522_v50 = vadd.f32 %v921_v48, %v1163_v34  ;;  %v563_v52 = vmax.f32 %v519_v46, 0.0  ;;  %v571_v53 = vmax.f32 %v551_v47, 0.0 }
 0x119   : > { %v554_v51 = vadd.f32 %v945_v49, %v1163_v34 }
 0x11a   : > { %v564_v54 = vmax.f32 %v522_v50, 0.0 }
 0x11b   : > { %v572_v55 = vmax.f32 %v554_v51, 0.0 }
 0x11c   : > { %v853_v56 = vpack.c.bf16 %v564_v54, %v563_v52 }
 0x11d   : > { %v873_v57 = vpack.c.bf16 %v572_v55, %v571_v53 }
 0x11e   : > { %877 = vst [vmem:[%s1173_s8 + $0x18] sm:$0xff] %v853_v56  }
 0x11f   : > { %881 = vst [vmem:[%s1173_s8 + $0x38] sm:$0xff] %v873_v57  }
 0x120 PF: > { %s13_s14 = sadd.s32 1, %s1048_s14   ;;  %s1208_s12 = smov %s1044_s13 }
 0x121   : > { %p10_p5 = scmp.ge.s32.totalorder %s13_s14, 6   ;;  %s1209_s13 = smov %s1211_s15 }
 0x123   :  { %12 = sbr.rel (!%p10_p5) target bundleno = 2 (0x2), region = 68 }

// kernel: rtnet_forward.15
= control target key start
LH: loop header
LB: loop body
LE: loop exit
PB: predicated region body
PF: predicated region fallthrough
CT: control target
= control target key end

     0   :  { %vm81_vm0 = vcmask 1043456   ;;  %s712_s0 = inlined_call_operand.vmem [shape: bf16[9,64,128], index: 0, kind: input, shape index: {}]   ;;  %s713_s1 = inlined_call_operand.vmem [shape: bf16[64,128], index: 1, kind: output, shape index: {}]  }
   0x1   :  { %v9_v0 = vld [vmem:[%s712_s0] sm:$0xf]  ;;  %v10_v3 = vld [vmem:[%s712_s0 + $0x4] sm:$0xf]  ;;  %v11_v39 = vld [vmem:[%s712_s0 + $0x8] sm:$0xf] }
   0x2   :  { %v17_v1 = vld [vmem:[%s712_s0 + $0x20] sm:$0xf]  ;;  %v18_v4 = vld [vmem:[%s712_s0 + $0x24] sm:$0xf]  ;;  %v84_v7 = vsel %vm81_vm0, %v9_v0, 4286644096 }
   0x3   :  { %v25_v2 = vld [vmem:[%s712_s0 + $0x40] sm:$0xf]  ;;  %v26_v5 = vld [vmem:[%s712_s0 + $0x44] sm:$0xf]  ;;  %v87_v8 = vsel %vm81_vm0, %v17_v1, 4286644096 }
   0x4   :  { %v33_v6 = vld [vmem:[%s712_s0 + $0x60] sm:$0xf]  ;;  %v91_v9 = vsel %vm81_vm0, %v25_v2, 4286644096  ;;  %v89_v11 = vmax.bf16 %v87_v8, %v84_v7  ;;  %v34_v12 = vld [vmem:[%s712_s0 + $0x64] sm:$0xf] }
   0x5   :  { %v41_v10 = vld [vmem:[%s712_s0 + $0x80] sm:$0xf]  ;;  %v95_v14 = vsel %vm81_vm0, %v33_v6, 4286644096  ;;  %v119_v16 = vsel %vm81_vm0, %v10_v3, 4286644096 }
   0x6   :  { %v49_v13 = vld [vmem:[%s712_s0 + $0xa0] sm:$0xf]  ;;  %v93_v15 = vmax.bf16 %v91_v9, %v89_v11  ;;  %v122_v17 = vsel %vm81_vm0, %v18_v4, 4286644096  ;;  %v126_v18 = vsel %vm81_vm0, %v26_v5, 4286644096 }
   0x7   :  { %v42_v19 = vld [vmem:[%s712_s0 + $0x84] sm:$0xf]  ;;  %v99_v20 = vsel %vm81_vm0, %v41_v10, 4286644096  ;;  %v124_v21 = vmax.bf16 %v122_v17, %v119_v16  ;;  %v57_v23 = vld [vmem:[%s712_s0 + $0xc0] sm:$0xf] }
   0x8   :  { %v50_v22 = vld [vmem:[%s712_s0 + $0xa4] sm:$0xf]  ;;  %v97_v24 = vmax.bf16 %v95_v14, %v93_v15  ;;  %v130_v25 = vsel %vm81_vm0, %v34_v12, 4286644096  ;;  %v103_v27 = vsel %vm81_vm0, %v49_v13, 4286644096 }
   0x9   :  { %v58_v26 = vld [vmem:[%s712_s0 + $0xc4] sm:$0xf]  ;;  %v128_v28 = vmax.bf16 %v126_v18, %v124_v21  ;;  %v65_v29 = vld [vmem:[%s712_s0 + $0xe0] sm:$0xf]  ;;  %v134_v32 = vsel %vm81_vm0, %v42_v19, 4286644096 }
   0xa   :  { %v73_v30 = vld [vmem:[%s712_s0 + $0x100] sm:$0xf]  ;;  %v101_v31 = vmax.bf16 %v99_v20, %v97_v24  ;;  %v66_v33 = vld [vmem:[%s712_s0 + $0xe4] sm:$0xf]  ;;  %v107_v34 = vsel %vm81_vm0, %v57_v23, 4286644096 }
   0xb   :  { %v132_v35 = vmax.bf16 %v130_v25, %v128_v28  ;;  %v138_v36 = vsel %vm81_vm0, %v50_v22, 4286644096  ;;  %v74_v37 = vld [vmem:[%s712_s0 + $0x104] sm:$0xf]  ;;  %v19_v40 = vld [vmem:[%s712_s0 + $0x28] sm:$0xf] }
   0xc   :  { %v105_v38 = vmax.bf16 %v103_v27, %v101_v31  ;;  %v27_v41 = vld [vmem:[%s712_s0 + $0x48] sm:$0xf]  ;;  %v111_v42 = vsel %vm81_vm0, %v65_v29, 4286644096  ;;  %v115_v43 = vsel %vm81_vm0, %v73_v30, 4286644096 }
   0xd   :  { %v136_v44 = vmax.bf16 %v134_v32, %v132_v35  ;;  %v142_v45 = vsel %vm81_vm0, %v58_v26, 4286644096  ;;  %v12_v47 = vld [vmem:[%s712_s0 + $0xc] sm:$0xf]  ;;  %v35_v48 = vld [vmem:[%s712_s0 + $0x68] sm:$0xf] }
   0xe   :  { %v109_v46 = vmax.bf16 %v107_v34, %v105_v38  ;;  %v43_v49 = vld [vmem:[%s712_s0 + $0x88] sm:$0xf]  ;;  %v154_v51 = vsel %vm81_vm0, %v11_v39, 4286644096  ;;  %v157_v52 = vsel %vm81_vm0, %v19_v40, 4286644096 }
   0xf   :  { %v140_v50 = vmax.bf16 %v138_v36, %v136_v44  ;;  %v161_v53 = vsel %vm81_vm0, %v27_v41, 4286644096  ;;  %v146_v55 = vsel %vm81_vm0, %v66_v33, 4286644096  ;;  %v20_v56 = vld [vmem:[%s712_s0 + $0x2c] sm:$0xf]  ;;  %v159_v58 = vmax.bf16 %v157_v52, %v154_v51 }
  0x10   :  { %v113_v54 = vmax.bf16 %v111_v42, %v109_v46  ;;  %v28_v57 = vld [vmem:[%s712_s0 + $0x4c] sm:$0xf]  ;;  %v150_v60 = vsel %vm81_vm0, %v74_v37, 4286644096  ;;  %v165_v62 = vsel %vm81_vm0, %v35_v48, 4286644096 }
  0x11   :  { %v144_v59 = vmax.bf16 %v142_v45, %v140_v50  ;;  %v36_v61 = vld [vmem:[%s712_s0 + $0x6c] sm:$0xf]  ;;  %v51_v63 = vld [vmem:[%s712_s0 + $0xa8] sm:$0xf]  ;;  %v163_v0 = vmax.bf16 %v161_v53, %v159_v58  ;;  %v169_v1 = vsel %vm81_vm0, %v43_v49, 4286644096 }
  0x12   :  { %v189_v2 = vsel %vm81_vm0, %v12_v47, 4286644096  ;;  %v117_v3 = vmax.bf16 %v115_v43, %v113_v54  ;;  %v192_v5 = vsel %vm81_vm0, %v20_v56, 4286644096  ;;  %v196_v6 = vsel %vm81_vm0, %v28_v57, 4286644096 }
  0x13   :  { %v148_v4 = vmax.bf16 %v146_v55, %v144_v59  ;;  %v44_v7 = vld [vmem:[%s712_s0 + $0x8c] sm:$0xf]  ;;  %v59_v8 = vld [vmem:[%s712_s0 + $0xc8] sm:$0xf]  ;;  %v167_v9 = vmax.bf16 %v165_v62, %v163_v0  ;;  %v194_v10 = vmax.bf16 %v192_v5, %v189_v2  ;;  %v173_v12 = vsel %vm81_vm0, %v51_v63, 4286644096 }
  0x14   :  { %v200_v13 = vsel %vm81_vm0, %v36_v61, 4286644096  ;;  %v52_v14 = vld [vmem:[%s712_s0 + $0xac] sm:$0xf]  ;;  %v67_v16 = vld [vmem:[%s712_s0 + $0xe8] sm:$0xf] }
  0x15   :  { %v152_v11 = vmax.bf16 %v150_v60, %v148_v4  ;;  %v60_v15 = vld [vmem:[%s712_s0 + $0xcc] sm:$0xf]  ;;  %v171_v17 = vmax.bf16 %v169_v1, %v167_v9  ;;  %v198_v18 = vmax.bf16 %v196_v6, %v194_v10  ;;  %v75_v20 = vld [vmem:[%s712_s0 + $0x108] sm:$0xf]  ;;  %v177_v21 = vsel %vm81_vm0, %v59_v8, 4286644096 }
  0x16   :  { %v204_v22 = vsel %vm81_vm0, %v44_v7, 4286644096  ;;  %v68_v23 = vld [vmem:[%s712_s0 + $0xec] sm:$0xf]  ;;  %v13_v26 = vld [vmem:[%s712_s0 + $0x10] sm:$0xf] }
  0x17   :  { %v395_v19 = vcombine.low %v117_v3, %v152_v11  ;;  %v175_v24 = vmax.bf16 %v173_v12, %v171_v17  ;;  %v202_v25 = vmax.bf16 %v200_v13, %v198_v18  ;;  %v21_v27 = vld [vmem:[%s712_s0 + $0x30] sm:$0xf]  ;;  %v76_v29 = vld [vmem:[%s712_s0 + $0x10c] sm:$0xf]  ;;  %v181_v30 = vsel %vm81_vm0, %v67_v16, 4286644096 }
  0x18   :  { %v29_v28 = vld [vmem:[%s712_s0 + $0x50] sm:$0xf]  ;;  %v208_v31 = vsel %vm81_vm0, %v52_v14, 4286644096  ;;  %v185_v33 = vsel %vm81_vm0, %v75_v20, 4286644096 }
  0x19   :  { %379 = vst [vmem:[%s713_s1] sm:$0xff] %v395_v19   ;;  %v179_v32 = vmax.bf16 %v177_v21, %v175_v24  ;;  %v206_v34 = vmax.bf16 %v204_v22, %v202_v25  ;;  %v212_v35 = vsel %vm81_vm0, %v60_v15, 4286644096  ;;  %v37_v36 = vld [vmem:[%s712_s0 + $0x70] sm:$0xf]  ;;  %v224_v37 = vsel %vm81_vm0, %v13_v26, 4286644096 }
  0x1a   :  { %v227_v38 = vsel %vm81_vm0, %v21_v27, 4286644096  ;;  %v231_v39 = vsel %vm81_vm0, %v29_v28, 4286644096  ;;  %v14_v42 = vld [vmem:[%s712_s0 + $0x14] sm:$0xf] }
  0x1b   :  { %v183_v40 = vmax.bf16 %v181_v30, %v179_v32  ;;  %v210_v41 = vmax.bf16 %v208_v31, %v206_v34  ;;  %v22_v43 = vld [vmem:[%s712_s0 + $0x34] sm:$0xf]  ;;  %v45_v44 = vld [vmem:[%s712_s0 + $0x90] sm:$0xf]  ;;  %v229_v45 = vmax.bf16 %v227_v38, %v224_v37  ;;  %v216_v46 = vsel %vm81_vm0, %v68_v23, 4286644096 }
  0x1c   :  { %v30_v47 = vld [vmem:[%s712_s0 + $0x54] sm:$0xf]  ;;  %v235_v48 = vsel %vm81_vm0, %v37_v36, 4286644096  ;;  %v220_v50 = vsel %vm81_vm0, %v76_v29, 4286644096 }
  0x1d   :  { %v214_v49 = vmax.bf16 %v212_v35, %v210_v41  ;;  %v38_v51 = vld [vmem:[%s712_s0 + $0x74] sm:$0xf]  ;;  %v53_v52 = vld [vmem:[%s712_s0 + $0xb0] sm:$0xf]  ;;  %v233_v53 = vmax.bf16 %v231_v39, %v229_v45  ;;  %v187_v54 = vmax.bf16 %v185_v33, %v183_v40  ;;  %v239_v55 = vsel %vm81_vm0, %v45_v44, 4286644096 }
  0x1e   :  { %v259_v56 = vsel %vm81_vm0, %v14_v42, 4286644096  ;;  %v262_v57 = vsel %vm81_vm0, %v22_v43, 4286644096  ;;  %v46_v59 = vld [vmem:[%s712_s0 + $0x94] sm:$0xf] }
  0x1f   :  { %v218_v58 = vmax.bf16 %v216_v46, %v214_v49  ;;  %v61_v60 = vld [vmem:[%s712_s0 + $0xd0] sm:$0xf]  ;;  %v237_v61 = vmax.bf16 %v235_v48, %v233_v53  ;;  %v264_v62 = vmax.bf16 %v262_v57, %v259_v56  ;;  %v266_v63 = vsel %vm81_vm0, %v30_v47, 4286644096  ;;  %v54_v3 = vld [vmem:[%s712_s0 + $0xb4] sm:$0xf] }
  0x20   :  { %v243_v0 = vsel %vm81_vm0, %v53_v52, 4286644096  ;;  %v270_v1 = vsel %vm81_vm0, %v38_v51, 4286644096  ;;  %v62_v4 = vld [vmem:[%s712_s0 + $0xd4] sm:$0xf] }
  0x21   :  { %v222_v2 = vmax.bf16 %v220_v50, %v218_v58  ;;  %v69_v5 = vld [vmem:[%s712_s0 + $0xf0] sm:$0xf]  ;;  %v241_v6 = vmax.bf16 %v239_v55, %v237_v61  ;;  %v268_v7 = vmax.bf16 %v266_v63, %v264_v62  ;;  %v247_v9 = vsel %vm81_vm0, %v61_v60, 4286644096  ;;  %v70_v12 = vld [vmem:[%s712_s0 + $0xf4] sm:$0xf] }
  0x22   :  { %v77_v8 = vld [vmem:[%s712_s0 + $0x110] sm:$0xf]  ;;  %v274_v10 = vsel %vm81_vm0, %v46_v59, 4286644096  ;;  %v15_v15 = vld [vmem:[%s712_s0 + $0x18] sm:$0xf] }
  0x23   :  { %v396_v11 = vcombine.low %v187_v54, %v222_v2  ;;  %v245_v13 = vmax.bf16 %v243_v0, %v241_v6  ;;  %v272_v14 = vmax.bf16 %v270_v1, %v268_v7  ;;  %v23_v16 = vld [vmem:[%s712_s0 + $0x38] sm:$0xf]  ;;  %v78_v18 = vld [vmem:[%s712_s0 + $0x114] sm:$0xf]  ;;  %v251_v19 = vsel %vm81_vm0, %v69_v5, 4286644096 }
  0x24   :  { %v31_v17 = vld [vmem:[%s712_s0 + $0x58] sm:$0xf]  ;;  %v278_v20 = vsel %vm81_vm0, %v54_v3, 4286644096  ;;  %v282_v23 = vsel %vm81_vm0, %v62_v4, 4286644096 }
  0x25   :  { %397 = vst [vmem:[%s713_s1 + $0x8] sm:$0xff] %v396_v11   ;;  %v249_v21 = vmax.bf16 %v247_v9, %v245_v13  ;;  %v276_v22 = vmax.bf16 %v274_v10, %v272_v14  ;;  %v16_v24 = vld [vmem:[%s712_s0 + $0x1c] sm:$0xf]  ;;  %v39_v25 = vld [vmem:[%s712_s0 + $0x78] sm:$0xf] }
  0x26   :  { %v294_v26 = vsel %vm81_vm0, %v15_v15, 4286644096  ;;  %v297_v27 = vsel %vm81_vm0, %v23_v16, 4286644096  ;;  %v301_v28 = vsel %vm81_vm0, %v31_v17, 4286644096 }
  0x27   :  { %v253_v29 = vmax.bf16 %v251_v19, %v249_v21  ;;  %v255_v30 = vsel %vm81_vm0, %v77_v8, 4286644096  ;;  %v280_v31 = vmax.bf16 %v278_v20, %v276_v22  ;;  %v24_v32 = vld [vmem:[%s712_s0 + $0x3c] sm:$0xf]  ;;  %v47_v33 = vld [vmem:[%s712_s0 + $0x98] sm:$0xf]  ;;  %v299_v34 = vmax.bf16 %v297_v27, %v294_v26 }
  0x28   :  { %v286_v35 = vsel %vm81_vm0, %v70_v12, 4286644096  ;;  %v32_v36 = vld [vmem:[%s712_s0 + $0x5c] sm:$0xf]  ;;  %v305_v37 = vsel %vm81_vm0, %v39_v25, 4286644096 }
  0x29   :  { %v284_v38 = vmax.bf16 %v282_v23, %v280_v31  ;;  %v290_v39 = vsel %vm81_vm0, %v78_v18, 4286644096  ;;  %v40_v40 = vld [vmem:[%s712_s0 + $0x7c] sm:$0xf]  ;;  %v55_v41 = vld [vmem:[%s712_s0 + $0xb8] sm:$0xf]  ;;  %v303_v42 = vmax.bf16 %v301_v28, %v299_v34  ;;  %v257_v43 = vmax.bf16 %v255_v30, %v253_v29 }
  0x2a   :  { %v309_v44 = vsel %vm81_vm0, %v47_v33, 4286644096  ;;  %v329_v45 = vsel %vm81_vm0, %v16_v24, 4286644096  ;;  %v332_v46 = vsel %vm81_vm0, %v24_v32, 4286644096 }
  0x2b   :  { %v288_v47 = vmax.bf16 %v286_v35, %v284_v38  ;;  %v48_v48 = vld [vmem:[%s712_s0 + $0x9c] sm:$0xf]  ;;  %v63_v49 = vld [vmem:[%s712_s0 + $0xd8] sm:$0xf]  ;;  %v307_v50 = vmax.bf16 %v305_v37, %v303_v42  ;;  %v334_v51 = vmax.bf16 %v332_v46, %v329_v45  ;;  %v336_v52 = vsel %vm81_vm0, %v32_v36, 4286644096 }
  0x2c   :  { %v313_v53 = vsel %vm81_vm0, %v55_v41, 4286644096  ;;  %v340_v54 = vsel %vm81_vm0, %v40_v40, 4286644096  ;;  %v56_v56 = vld [vmem:[%s712_s0 + $0xbc] sm:$0xf] }
  0x2d   :  { %v292_v55 = vmax.bf16 %v290_v39, %v288_v47  ;;  %v71_v57 = vld [vmem:[%s712_s0 + $0xf8] sm:$0xf]  ;;  %v311_v58 = vmax.bf16 %v309_v44, %v307_v50  ;;  %v338_v59 = vmax.bf16 %v336_v52, %v334_v51  ;;  %v317_v60 = vsel %vm81_vm0, %v63_v49, 4286644096  ;;  %v64_v63 = vld [vmem:[%s712_s0 + $0xdc] sm:$0xf] }
  0x2e   :  { %v344_v61 = vsel %vm81_vm0, %v48_v48, 4286644096  ;;  %v321_v2 = vsel %vm81_vm0, %v71_v57, 4286644096  ;;  %v348_v3 = vsel %vm81_vm0, %v56_v56, 4286644096 }
  0x2f   :  { %v398_v62 = vcombine.low %v257_v43, %v292_v55  ;;  %v315_v0 = vmax.bf16 %v313_v53, %v311_v58  ;;  %v342_v1 = vmax.bf16 %v340_v54, %v338_v59  ;;  %v72_v4 = vld [vmem:[%s712_s0 + $0xfc] sm:$0xf]  ;;  %v79_v5 = vld [vmem:[%s712_s0 + $0x118] sm:$0xf]  ;;  %v352_v8 = vsel %vm81_vm0, %v64_v63, 4286644096 }
  0x30   :  { %v80_v9 = vld [vmem:[%s712_s0 + $0x11c] sm:$0xf]  ;;  %v325_v12 = vsel %vm81_vm0, %v79_v5, 4286644096  ;;  %v356_v13 = vsel %vm81_vm0, %v72_v4, 4286644096 }
  0x31   :  { %399 = vst [vmem:[%s713_s1 + $0x10] sm:$0xff] %v398_v62   ;;  %v319_v6 = vmax.bf16 %v317_v60, %v315_v0  ;;  %v346_v7 = vmax.bf16 %v344_v61, %v342_v1  ;;  %v360_v15 = vsel %vm81_vm0, %v80_v9, 4286644096 }
  0x33   :  { %v323_v10 = vmax.bf16 %v321_v2, %v319_v6  ;;  %v350_v11 = vmax.bf16 %v348_v3, %v346_v7 }
  0x35   :  { %v354_v14 = vmax.bf16 %v352_v8, %v350_v11  ;;  %v327_v16 = vmax.bf16 %v325_v12, %v323_v10 }
  0x37   :  { %v358_v17 = vmax.bf16 %v356_v13, %v354_v14 }
  0x39   :  { %v362_v18 = vmax.bf16 %v360_v15, %v358_v17 }
  0x3b   :  { %v400_v19 = vcombine.low %v327_v16, %v362_v18 }
  0x3d   :  { %401 = vst [vmem:[%s713_s1 + $0x18] sm:$0xff] %v400_v19  }

// kernel: rtnet_forward.16
= control target key start
LH: loop header
LB: loop body
LE: loop exit
PB: predicated region body
PF: predicated region fallthrough
CT: control target
= control target key end

     0   :  { %s618_s1 = inlined_call_operand.vmem [shape: bf16[128,128], index: 1, kind: input, shape index: {}]   ;;  %s619_s0 = inlined_call_operand.vmem [shape: bf16[128,128], index: 0, kind: input, shape index: {}]   ;;  %s620_s2 = inlined_call_operand.vmem [shape: f32[1,128], index: 2, kind: input, shape index: {}]   ;;  %s621_s3 = inlined_call_operand.vmem [shape: bf16[128,128], index: 3, kind: output, shape index: {}]  }
   0x1   :  { %v507_v0 = vld [vmem:[%s618_s1] sm:$0xff]   ;;  %v508_v1 = vld [vmem:[%s618_s1 + $0x8] sm:$0xff]   ;;  %v509_v2 = vld [vmem:[%s618_s1 + $0x10] sm:$0xff]  }
   0x2   :  { %459 = vmatprep.subr.bf16.mxu0 %v507_v0  ;;  %491 = vmatprep.subr.bf16.mxu1 %v507_v0  ;;  %v510_v3 = vld [vmem:[%s618_s1 + $0x18] sm:$0xff]   ;;  %v515_v4 = vld [vmem:[%s619_s0] sm:$0xff]   ;;  %v512_v7 = vld [vmem:[%s618_s1 + $0x28] sm:$0xff]  }
   0x3   :  { %460 = vmatpush3.bf16.msra.mxu0 %v507_v0  ;;  %499 = vmatpush3.bf16.msra.mxu1 %v507_v0  ;;  %v516_v5 = vld [vmem:[%s619_s0 + $0x20] sm:$0xff]   ;;  %v513_v8 = vld [vmem:[%s618_s1 + $0x30] sm:$0xff]   ;;  %v514_v9 = vld [vmem:[%s618_s1 + $0x38] sm:$0xff]  }
   0x4   :  { %461 = vmatprep.subr.bf16.mxu0 %v508_v1  ;;  %492 = vmatprep.subr.bf16.mxu1 %v508_v1  ;;  %v511_v6 = vld [vmem:[%s618_s1 + $0x20] sm:$0xff]   ;;  %v517_v10 = vld [vmem:[%s619_s0 + $0x8] sm:$0xff]   ;;  %v519_v12 = vld [vmem:[%s619_s0 + $0x10] sm:$0xff]  }
   0x5   :  { %475 = vmatprep.mubr.bf16.mxu0 %v515_v4  ;;  %483 = vmatprep.mubr.bf16.mxu1 %v516_v5  ;;  %v518_v11 = vld [vmem:[%s619_s0 + $0x28] sm:$0xff]   ;;  %v520_v13 = vld [vmem:[%s619_s0 + $0x30] sm:$0xff]   ;;  %v521_v14 = vld [vmem:[%s619_s0 + $0x18] sm:$0xff]  }
   0x6   :  { %v522_v15 = vld [vmem:[%s619_s0 + $0x38] sm:$0xff]   ;;  %v347_v16 = vld [vmem:[%s620_s2] ss:$0 sm:$0xff] }
   0x7   :  { %462 = vmatpush3.bf16.msra.mxu0 %v508_v1  ;;  %500 = vmatpush3.bf16.msra.mxu1 %v508_v1 }
   0x8   :  { %463 = vmatprep.subr.bf16.mxu0 %v509_v2  ;;  %493 = vmatprep.subr.bf16.mxu1 %v509_v2 }
   0xb   :  { %464 = vmatpush3.bf16.msra.mxu0 %v509_v2  ;;  %501 = vmatpush3.bf16.msra.mxu1 %v509_v2 }
   0xc   :  { %465 = vmatprep.subr.bf16.mxu0 %v510_v3  ;;  %494 = vmatprep.subr.bf16.mxu1 %v510_v3 }
   0xf   :  { %466 = vmatpush3.bf16.msra.mxu0 %v510_v3  ;;  %502 = vmatpush3.bf16.msra.mxu1 %v510_v3 }
  0x10   :  { %467 = vmatprep.subr.bf16.mxu0 %v511_v6  ;;  %495 = vmatprep.subr.bf16.mxu1 %v511_v6 }
  0x13   :  { %468 = vmatpush3.bf16.msra.mxu0 %v511_v6  ;;  %503 = vmatpush3.bf16.msra.mxu1 %v511_v6 }
  0x14   :  { %469 = vmatprep.subr.bf16.mxu0 %v512_v7  ;;  %496 = vmatprep.subr.bf16.mxu1 %v512_v7 }
  0x17   :  { %470 = vmatpush3.bf16.msra.mxu0 %v512_v7  ;;  %504 = vmatpush3.bf16.msra.mxu1 %v512_v7 }
  0x18   :  { %471 = vmatprep.subr.bf16.mxu0 %v513_v8  ;;  %497 = vmatprep.subr.bf16.mxu1 %v513_v8 }
  0x1b   :  { %472 = vmatpush3.bf16.msra.mxu0 %v513_v8  ;;  %505 = vmatpush3.bf16.msra.mxu1 %v513_v8 }
  0x1c   :  { %473 = vmatprep.subr.bf16.mxu0 %v514_v9  ;;  %498 = vmatprep.subr.bf16.mxu1 %v514_v9 }
  0x1f   :  { %474 = vmatpush3.bf16.msra.mxu0 %v514_v9  ;;  %506 = vmatpush3.bf16.msra.mxu1 %v514_v9 }
  0x22   :  { %476 = vmatmul.mubr.bf16.vlgmr.msra.gmra.mrb[0].mxu0 %v517_v10  ;;  %484 = vmatmul.mubr.bf16.vlgmr.msra.gmra.mrb[0].mxu1 %v518_v11 }
  0x23   :  { %479 = vmatprep.mubr.bf16.mxu0 %v519_v12  ;;  %487 = vmatprep.mubr.bf16.mxu1 %v520_v13 }
  0x2a   :  { %480 = vmatmul.mubr.bf16.gmra.mrb[4].mxu0 %v521_v14  ;;  %488 = vmatmul.mubr.bf16.gmra.mrb[4].mxu1 %v522_v15 }
  0xf5   :  { %v477_v17 = vpop.f32.mrb[0].mxu0  ;;  %v485_v18 = vpop.f32.mrb[0].mxu1 }
  0xf6   :  { %v193_v19 = vadd.f32 %v477_v17, %v347_v16  ;;  %v225_v20 = vadd.f32 %v485_v18, %v347_v16  ;;  %v184_v21 = vpop.f32.mrb[1].mxu0  ;;  %v216_v22 = vpop.f32.mrb[1].mxu1 }
  0xf7   :  { %v185_v23 = vadd.f32 %v347_v16, %v184_v21  ;;  %v217_v24 = vadd.f32 %v347_v16, %v216_v22  ;;  %v478_v25 = vpop.f32.mrb[2].mxu0  ;;  %v486_v26 = vpop.f32.mrb[2].mxu1 }
  0xf8   :  { %v196_v27 = vadd.f32 %v478_v25, %v347_v16  ;;  %v228_v28 = vadd.f32 %v486_v26, %v347_v16  ;;  %v187_v29 = vpop.f32.mrb[3].mxu0  ;;  %v219_v30 = vpop.f32.mrb[3].mxu1  ;;  %v249_v33 = vmax.f32 %v193_v19, 0.0  ;;  %v257_v34 = vmax.f32 %v225_v20, 0.0 }
  0xf9   :  { %v188_v31 = vadd.f32 %v347_v16, %v187_v29  ;;  %v220_v32 = vadd.f32 %v347_v16, %v219_v30  ;;  %v247_v37 = vmax.f32 %v185_v23, 0.0  ;;  %v255_v38 = vmax.f32 %v217_v24, 0.0 }
  0xfa   :  { %v250_v35 = vmax.f32 %v196_v27, 0.0  ;;  %v258_v36 = vmax.f32 %v228_v28, 0.0 }
  0xfb   :  { %v248_v39 = vmax.f32 %v188_v31, 0.0  ;;  %v256_v40 = vmax.f32 %v220_v32, 0.0 }
  0xfc   :  { %v404_v41 = vpack.c.bf16 %v250_v35, %v249_v33  ;;  %v424_v42 = vpack.c.bf16 %v258_v36, %v257_v34 }
  0xfd   :  { %v399_v43 = vpack.c.bf16 %v248_v39, %v247_v37  ;;  %v419_v44 = vpack.c.bf16 %v256_v40, %v255_v38  ;;  %v481_v45 = vpop.f32.mrb[4].mxu0  ;;  %v489_v46 = vpop.f32.mrb[4].mxu1 }
  0xfe   :  { %436 = vst [vmem:[%s621_s3 + $0x8] sm:$0xff] %v404_v41   ;;  %440 = vst [vmem:[%s621_s3 + $0x28] sm:$0xff] %v424_v42   ;;  %v209_v47 = vadd.f32 %v481_v45, %v347_v16  ;;  %v241_v48 = vadd.f32 %v489_v46, %v347_v16  ;;  %v200_v49 = vpop.f32.mrb[5].mxu0  ;;  %v232_v50 = vpop.f32.mrb[5].mxu1 }
  0xff   :  { %400 = vst [vmem:[%s621_s3] sm:$0xff] %v399_v43   ;;  %439 = vst [vmem:[%s621_s3 + $0x20] sm:$0xff] %v419_v44   ;;  %v201_v51 = vadd.f32 %v347_v16, %v200_v49  ;;  %v233_v52 = vadd.f32 %v347_v16, %v232_v50  ;;  %v482_v53 = vpop.f32.mrb[6].mxu0  ;;  %v490_v54 = vpop.f32.mrb[6].mxu1 }
 0x100   :  { %v212_v55 = vadd.f32 %v482_v53, %v347_v16  ;;  %v244_v56 = vadd.f32 %v490_v54, %v347_v16  ;;  %v203_v57 = vpop.f32.mrb[7].mxu0  ;;  %v235_v58 = vpop.f32.mrb[7].mxu1  ;;  %v253_v61 = vmax.f32 %v209_v47, 0.0  ;;  %v261_v62 = vmax.f32 %v241_v48, 0.0 }
 0x101   :  { %v204_v59 = vadd.f32 %v347_v16, %v203_v57  ;;  %v236_v60 = vadd.f32 %v347_v16, %v235_v58  ;;  %v251_v1 = vmax.f32 %v201_v51, 0.0  ;;  %v259_v2 = vmax.f32 %v233_v52, 0.0 }
 0x102   :  { %v254_v63 = vmax.f32 %v212_v55, 0.0  ;;  %v262_v0 = vmax.f32 %v244_v56, 0.0 }
 0x103   :  { %v252_v3 = vmax.f32 %v204_v59, 0.0  ;;  %v260_v4 = vmax.f32 %v236_v60, 0.0 }
 0x104   :  { %v414_v5 = vpack.c.bf16 %v254_v63, %v253_v61  ;;  %v434_v6 = vpack.c.bf16 %v262_v0, %v261_v62 }
 0x105   :  { %v409_v7 = vpack.c.bf16 %v252_v3, %v251_v1  ;;  %v429_v8 = vpack.c.bf16 %v260_v4, %v259_v2 }
 0x106   :  { %438 = vst [vmem:[%s621_s3 + $0x18] sm:$0xff] %v414_v5   ;;  %442 = vst [vmem:[%s621_s3 + $0x38] sm:$0xff] %v434_v6  }
 0x107   :  { %437 = vst [vmem:[%s621_s3 + $0x10] sm:$0xff] %v409_v7   ;;  %441 = vst [vmem:[%s621_s3 + $0x30] sm:$0xff] %v429_v8  }

// kernel: rtnet_forward.17
= control target key start
LH: loop header
LB: loop body
LE: loop exit
PB: predicated region body
PF: predicated region fallthrough
CT: control target
= control target key end

     0   :  { %s1444_s12 = smov 0   ;;  %s1446_s13 = smov 0   ;;  %s1575_s0 = inlined_call_operand.vmem [shape: bf16[2,128,384], index: 0, kind: input, shape index: {}]   ;;  %s1576_s1 = inlined_call_operand.vmem [shape: bf16[2,384,128], index: 1, kind: input, shape index: {}]   ;;  %s1577_s2 = inlined_call_operand.vmem [shape: f32[2,1,128], index: 2, kind: input, shape index: {}]   ;;  %s1578_s3 = inlined_call_operand.vmem [shape: bf16[2,128,128], index: 3, kind: output, shape index: {}]  }
   0x1   :  { %s1448_s14 = smov 0  }
   0x2 LB: > { %s32_s15 = sadd.s32 1, %s1418_s13  ;;  %p1071_p0 = scmp.ge.s32.totalorder %s1422_s14, 1  ;;  %s1422_s14 = sphi %s1448_s14, %s13_s14   ;;  %s1418_s13 = sphi %s1446_s13, %s1580_s13   ;;  %s1414_s12 = sphi %s1444_s12, %s1579_s12  }
   0x3   : > { %p34_p1 = scmp.ge.s32.totalorder %s32_s15, 2  ;;  %p196_p2 = scmp.lt.s32.totalorder %s1422_s14, 3 }
   0x5   : > { %s1582_s15 = smov (%p34_p1, %s32_s15), 0  ;;  %p197_p3 = pnand %p1071_p0, %p196_p2 }
   0x6   : > { %p247_p4 = scmp.lt.s32.totalorder (!%p197_p3), %s1414_s12, 1 }
   0x7   : > { %200 = sbr.rel (%p197_p3) target bundleno = 333 (0x14d), region = 32 }
   0xe   : > { %s1584_s12 = smov (!%p247_p4, %s1414_s12), 1 }
   0xf   : > { %s1319_s16 = smul.u32 192, %s1584_s12  ;;  %s270_s25 = scalar_lea.vmem %s1577_s2, %s1584_s12 }
  0x10   : > { %v1531_v50 = vld [vmem:[%s270_s25] ss:$0 sm:$0xff]  ;;  %s1143_s26 = sshll.u32 %s1584_s12, 6 }
  0x11   : > { %s1470_s19 = scalar_lea.vmem %s1576_s1, %s1319_s16  ;;  %s1497_s22 = scalar_lea.vmem %s1575_s0, %s1319_s16 }
  0x12   : > { %v1344_v0 = vld [vmem:[%s1470_s19 + $0x40] sm:$0xff]   ;;  %v1346_v2 = vld [vmem:[%s1470_s19 + $0x48] sm:$0xff]   ;;  %v1349_v5 = vld [vmem:[%s1470_s19 + $0x50] sm:$0xff]   ;;  %s1539_s29 = scalar_lea.vmem %s1578_s3, %s1143_s26 }
  0x13   : > { %v1345_v1 = vld [vmem:[%s1470_s19] sm:$0xff]   ;;  %1207 = vmatprep.subr.bf16.mxu0 %v1344_v0  ;;  %v1348_v4 = vld [vmem:[%s1470_s19 + $0x8] sm:$0xff]   ;;  %v1351_v7 = vld [vmem:[%s1470_s19 + $0x10] sm:$0xff]  }
  0x14   : > { %1208 = vmatpush3.bf16.msra.mxu0 %v1345_v1  ;;  %v1347_v3 = vld [vmem:[%s1470_s19 + $0x80] sm:$0xff]   ;;  %v1350_v6 = vld [vmem:[%s1470_s19 + $0x88] sm:$0xff]   ;;  %v1352_v8 = vld [vmem:[%s1470_s19 + $0x58] sm:$0xff]  }
  0x15   : > { %1209 = vmatprep.subr.bf16.mxu0 %v1346_v2  ;;  %1287 = vmatprep.subr.bf16.mxu1 %v1347_v3  ;;  %v1353_v9 = vld [vmem:[%s1470_s19 + $0x90] sm:$0xff]   ;;  %v1354_v10 = vld [vmem:[%s1470_s19 + $0x18] sm:$0xff]   ;;  %v1355_v11 = vld [vmem:[%s1470_s19 + $0x60] sm:$0xff]  }
  0x16   : > { %1288 = vmatpush3.bf16.msra.mxu1 %v1347_v3  ;;  %v1356_v12 = vld [vmem:[%s1470_s19 + $0x98] sm:$0xff]   ;;  %v1357_v13 = vld [vmem:[%s1470_s19 + $0x20] sm:$0xff]   ;;  %v1358_v15 = vld [vmem:[%s1470_s19 + $0x68] sm:$0xff]  }
  0x17   : > { %1289 = vmatprep.subr.bf16.mxu1 %v1350_v6  ;;  %v1359_v14 = vld [vmem:[%s1470_s19 + $0xa0] sm:$0xff]   ;;  %v1360_v16 = vld [vmem:[%s1470_s19 + $0x28] sm:$0xff]   ;;  %v1361_v18 = vld [vmem:[%s1470_s19 + $0x70] sm:$0xff]  }
  0x18   : > { %1210 = vmatpush3.bf16.msra.mxu0 %v1348_v4  ;;  %v1362_v17 = vld [vmem:[%s1470_s19 + $0xa8] sm:$0xff]   ;;  %v1363_v19 = vld [vmem:[%s1470_s19 + $0x30] sm:$0xff]   ;;  %v1364_v20 = vld [vmem:[%s1470_s19 + $0x78] sm:$0xff]  }
  0x19   : > { %1211 = vmatprep.subr.bf16.mxu0 %v1349_v5  ;;  %v1365_v21 = vld [vmem:[%s1470_s19 + $0xb0] sm:$0xff]   ;;  %v1366_v23 = vld [vmem:[%s1470_s19 + $0x38] sm:$0xff]   ;;  %v1367_v26 = vld [vmem:[%s1497_s22] ss:$12 sps:$4 sm:$0xff]  }
  0x1a   : > { %1290 = vmatpush3.bf16.msra.mxu1 %v1350_v6  ;;  %v1369_v22 = vld [vmem:[%s1497_s22 + $0x4] ss:$12 sps:$4 sm:$0xff]   ;;  %v1371_v24 = vld [vmem:[%s1497_s22 + $0x8] ss:$12 sps:$4 sm:$0xff]   ;;  %v1370_v25 = vld [vmem:[%s1470_s19 + $0xb8] sm:$0xff]  }
  0x1b   : > { %1291 = vmatprep.subr.bf16.mxu1 %v1353_v9  ;;  %676 = vmatprep.mubr.bf16.mxu0 %v1369_v22  ;;  %v1373_v27 = vld [vmem:[%s1497_s22 + $0x1c] ss:$12 sps:$4 sm:$0xff]   ;;  %v1372_v28 = vld [vmem:[%s1497_s22 + $0x20] ss:$12 sps:$4 sm:$0xff]   ;;  %v1379_v29 = vld [vmem:[%s1497_s22 + $0x38] ss:$12 sps:$4 sm:$0xff]  }
  0x1c   : > { %1212 = vmatpush3.bf16.msra.mxu0 %v1351_v7  ;;  %1303 = vmatprep.mubr.bf16.mxu1 %v1371_v24  ;;  %v1375_v30 = vld [vmem:[%s1497_s22 + $0x18] ss:$12 sps:$4 sm:$0xff]   ;;  %v1376_v31 = vld [vmem:[%s1497_s22 + $0x34] ss:$12 sps:$4 sm:$0xff]   ;;  %v1380_v32 = vld [vmem:[%s1497_s22 + $0x50] ss:$12 sps:$4 sm:$0xff]  }
  0x1d   : > { %1213 = vmatprep.subr.bf16.mxu0 %v1352_v8  ;;  %v1387_v33 = vld [vmem:[%s1497_s22 + $0x68] ss:$12 sps:$4 sm:$0xff]   ;;  %v1378_v34 = vld [vmem:[%s1497_s22 + $0x30] ss:$12 sps:$4 sm:$0xff]   ;;  %v1381_v35 = vld [vmem:[%s1497_s22 + $0x4c] ss:$12 sps:$4 sm:$0xff]  }
  0x1e   : > { %1292 = vmatpush3.bf16.msra.mxu1 %v1353_v9  ;;  %v1388_v36 = vld [vmem:[%s1497_s22 + $0x80] ss:$12 sps:$4 sm:$0xff]   ;;  %v1395_v37 = vld [vmem:[%s1497_s22 + $0x98] ss:$12 sps:$4 sm:$0xff]   ;;  %v1383_v38 = vld [vmem:[%s1497_s22 + $0x48] ss:$12 sps:$4 sm:$0xff]  }
  0x1f   : > { %1293 = vmatprep.subr.bf16.mxu1 %v1356_v12  ;;  %v1384_v39 = vld [vmem:[%s1497_s22 + $0x64] ss:$12 sps:$4 sm:$0xff]   ;;  %v1386_v41 = vld [vmem:[%s1497_s22 + $0x60] ss:$12 sps:$4 sm:$0xff]   ;;  %v1389_v42 = vld [vmem:[%s1497_s22 + $0x7c] ss:$12 sps:$4 sm:$0xff]  }
  0x20   : > { %1214 = vmatpush3.bf16.msra.mxu0 %v1354_v10  ;;  %v1396_v40 = vld [vmem:[%s1497_s22 + $0xb0] ss:$12 sps:$4 sm:$0xff]   ;;  %v1391_v43 = vld [vmem:[%s1497_s22 + $0x78] ss:$12 sps:$4 sm:$0xff]   ;;  %v1392_v44 = vld [vmem:[%s1497_s22 + $0x94] ss:$12 sps:$4 sm:$0xff]  }
  0x21   : > { %1215 = vmatprep.subr.bf16.mxu0 %v1355_v11  ;;  %v1394_v45 = vld [vmem:[%s1497_s22 + $0x90] ss:$12 sps:$4 sm:$0xff]   ;;  %v1397_v46 = vld [vmem:[%s1497_s22 + $0xac] ss:$12 sps:$4 sm:$0xff]   ;;  %v1399_v47 = vld [vmem:[%s1497_s22 + $0xa8] ss:$12 sps:$4 sm:$0xff]  }
  0x22   : > { %1294 = vmatpush3.bf16.msra.mxu1 %v1356_v12 }
  0x23   : > { %1295 = vmatprep.subr.bf16.mxu1 %v1359_v14 }
  0x24   : > { %1216 = vmatpush3.bf16.msra.mxu0 %v1357_v13 }
  0x25   : > { %1217 = vmatprep.subr.bf16.mxu0 %v1358_v15 }
  0x26   : > { %1296 = vmatpush3.bf16.msra.mxu1 %v1359_v14 }
  0x27   : > { %1297 = vmatprep.subr.bf16.mxu1 %v1362_v17 }
  0x28   : > { %1218 = vmatpush3.bf16.msra.mxu0 %v1360_v16 }
  0x29   : > { %1219 = vmatprep.subr.bf16.mxu0 %v1361_v18 }
  0x2a   : > { %1298 = vmatpush3.bf16.msra.mxu1 %v1362_v17 }
  0x2b   : > { %1299 = vmatprep.subr.bf16.mxu1 %v1365_v21 }
  0x2c   : > { %1220 = vmatpush3.bf16.msra.mxu0 %v1363_v19 }
  0x2d   : > { %1221 = vmatprep.subr.bf16.mxu0 %v1364_v20 }
  0x2e   : > { %1300 = vmatpush3.bf16.msra.mxu1 %v1365_v21 }
  0x2f   : > { %1301 = vmatprep.subr.bf16.mxu1 %v1370_v25 }
  0x30   : > { %1222 = vmatpush3.bf16.msra.mxu0 %v1366_v23 }
  0x32   : > { %1302 = vmatpush3.bf16.msra.mxu1 %v1370_v25 }
  0x33   : > { %677 = vmatmul.mubr.bf16.vlgmr.msra.gmra.mrb[0].mxu0 %v1367_v26 }
  0x34   : > { %684 = vmatprep.mubr.bf16.mxu0 %v1373_v27 }
  0x35   : > { %1304 = vmatmul.mubr.bf16.vlgmr.msra.gmra.mrb[0].mxu1 %v1372_v28 }
  0x36   : > { %1307 = vmatprep.mubr.bf16.mxu1 %v1379_v29 }
  0x3b   : > { %685 = vmatmul.mubr.bf16.gmra.mrb[4].mxu0 %v1375_v30 }
  0x3c   : > { %692 = vmatprep.mubr.bf16.mxu0 %v1376_v31 }
  0x3d   : > { %1308 = vmatmul.mubr.bf16.gmra.mrb[4].mxu1 %v1380_v32 }
  0x3e   : > { %1311 = vmatprep.mubr.bf16.mxu1 %v1387_v33 }
  0x43   : > { %693 = vmatmul.mubr.bf16.gmra.mrb[8].mxu0 %v1378_v34 }
  0x44   : > { %700 = vmatprep.mubr.bf16.mxu0 %v1381_v35 }
  0x45   : > { %1312 = vmatmul.mubr.bf16.gmra.mrb[8].mxu1 %v1388_v36 }
  0x46   : > { %1315 = vmatprep.mubr.bf16.mxu1 %v1395_v37 }
  0x4b   : > { %701 = vmatmul.mubr.bf16.gmra.mrb[12].mxu0 %v1383_v38 }
  0x4c   : > { %708 = vmatprep.mubr.bf16.mxu0 %v1384_v39 }
  0x4d   : > { %1316 = vmatmul.mubr.bf16.gmra.mrb[12].mxu1 %v1396_v40 }
  0x53   : > { %709 = vmatmul.mubr.bf16.gmra.mrb[16].mxu0 %v1386_v41 }
  0x54   : > { %716 = vmatprep.mubr.bf16.mxu0 %v1389_v42 }
  0x5b   : > { %717 = vmatmul.mubr.bf16.gmra.mrb[20].mxu0 %v1391_v43 }
  0x5c   : > { %724 = vmatprep.mubr.bf16.mxu0 %v1392_v44 }
  0x63   : > { %725 = vmatmul.mubr.bf16.gmra.mrb[24].mxu0 %v1394_v45 }
  0x64   : > { %732 = vmatprep.mubr.bf16.mxu0 %v1397_v46 }
  0x6b   : > { %733 = vmatmul.mubr.bf16.gmra.mrb[28].mxu0 %v1399_v47 }
 0x106   : > { %v1223_v48 = vpop.f32.mrb[0].mxu0 }
 0x107   : > { %v1224_v49 = vpop.f32.mrb[1].mxu0 }
 0x108   : > { %v1225_v51 = vadd.f32 %v1224_v49, %v1223_v48  ;;  %v1226_v52 = vpop.f32.mrb[2].mxu0  ;;  %v1305_v54 = vpop.f32.mrb[0].mxu1 }
 0x109   : > { %v1227_v53 = vpop.f32.mrb[3].mxu0  ;;  %v775_v57 = vpop.f32.mrb[1].mxu1 }
 0x10a   : > { %v1228_v55 = vadd.f32 %v1227_v53, %v1226_v52  ;;  %v679_v56 = vadd.f32 %v1225_v51, %v1531_v50  ;;  %v1306_v58 = vpop.f32.mrb[2].mxu1 }
 0x10b   : > { %v778_v61 = vpop.f32.mrb[3].mxu1 }
 0x10c   : > { %v776_v59 = vadd.f32 %v775_v57, %v679_v56  ;;  %v682_v60 = vadd.f32 %v1228_v55, %v1531_v50 }
 0x10e   : > { %v779_v62 = vadd.f32 %v778_v61, %v682_v60  ;;  %v1229_v63 = vpop.f32.mrb[4].mxu0  ;;  %v838_v1 = vmax.f32 %v776_v59, 0.0 }
 0x10f   : > { %v1230_v0 = vpop.f32.mrb[5].mxu0 }
 0x110   : > { %v839_v2 = vmax.f32 %v779_v62, 0.0  ;;  %v1231_v3 = vadd.f32 %v1230_v0, %v1229_v63  ;;  %v1232_v4 = vpop.f32.mrb[6].mxu0  ;;  %v1309_v6 = vpop.f32.mrb[4].mxu1 }
 0x111   : > { %v1233_v5 = vpop.f32.mrb[7].mxu0  ;;  %v791_v10 = vpop.f32.mrb[5].mxu1 }
 0x112   : > { %v1163_v7 = vpack.c.bf16 %v839_v2, %v838_v1  ;;  %v687_v8 = vadd.f32 %v1231_v3, %v1531_v50  ;;  %v1234_v9 = vadd.f32 %v1233_v5, %v1232_v4  ;;  %v1310_v11 = vpop.f32.mrb[6].mxu1 }
 0x113   : > { %v794_v14 = vpop.f32.mrb[7].mxu1 }
 0x114   : > { %1164 = vst [vmem:[%s1539_s29] sm:$0xff] %v1163_v7   ;;  %v784_v12 = vadd.f32 %v1305_v54, %v687_v8  ;;  %v690_v13 = vadd.f32 %v1234_v9, %v1531_v50 }
 0x116   : > { %v787_v15 = vadd.f32 %v1306_v58, %v690_v13  ;;  %v1235_v16 = vpop.f32.mrb[8].mxu0  ;;  %v840_v18 = vmax.f32 %v784_v12, 0.0 }
 0x117   : > { %v1236_v17 = vpop.f32.mrb[9].mxu0 }
 0x118   : > { %v841_v19 = vmax.f32 %v787_v15, 0.0  ;;  %v1237_v20 = vadd.f32 %v1236_v17, %v1235_v16  ;;  %v1238_v21 = vpop.f32.mrb[10].mxu0  ;;  %v1313_v23 = vpop.f32.mrb[8].mxu1 }
 0x119   : > { %v1239_v22 = vpop.f32.mrb[11].mxu0  ;;  %v807_v27 = vpop.f32.mrb[9].mxu1 }
 0x11a   : > { %v1168_v24 = vpack.c.bf16 %v841_v19, %v840_v18  ;;  %v1240_v25 = vadd.f32 %v1239_v22, %v1238_v21  ;;  %v695_v26 = vadd.f32 %v1237_v20, %v1531_v50  ;;  %v1314_v28 = vpop.f32.mrb[10].mxu1 }
 0x11b   : > { %v810_v31 = vpop.f32.mrb[11].mxu1 }
 0x11c   : > { %1200 = vst [vmem:[%s1539_s29 + $0x8] sm:$0xff] %v1168_v24   ;;  %v792_v29 = vadd.f32 %v791_v10, %v695_v26  ;;  %v698_v30 = vadd.f32 %v1240_v25, %v1531_v50 }
 0x11e   : > { %v795_v32 = vadd.f32 %v794_v14, %v698_v30  ;;  %v1241_v33 = vpop.f32.mrb[12].mxu0  ;;  %v842_v35 = vmax.f32 %v792_v29, 0.0 }
 0x11f   : > { %v1242_v34 = vpop.f32.mrb[13].mxu0 }
 0x120   : > { %v843_v36 = vmax.f32 %v795_v32, 0.0  ;;  %v1243_v37 = vadd.f32 %v1242_v34, %v1241_v33  ;;  %v1244_v38 = vpop.f32.mrb[14].mxu0  ;;  %v1547_v40 = vpop.f32.mrb[12].mxu1 }
 0x121   : > { %v1245_v39 = vpop.f32.mrb[15].mxu0  ;;  %v823_v44 = vpop.f32.mrb[13].mxu1 }
 0x122   : > { %v1173_v41 = vpack.c.bf16 %v843_v36, %v842_v35  ;;  %v703_v42 = vadd.f32 %v1243_v37, %v1531_v50  ;;  %v1246_v43 = vadd.f32 %v1245_v39, %v1244_v38  ;;  %v1318_v45 = vpop.f32.mrb[14].mxu1 }
 0x123   : > { %v826_v48 = vpop.f32.mrb[15].mxu1 }
 0x124   : > { %1201 = vst [vmem:[%s1539_s29 + $0x10] sm:$0xff] %v1173_v41   ;;  %v800_v46 = vadd.f32 %v1309_v6, %v703_v42  ;;  %v706_v47 = vadd.f32 %v1246_v43, %v1531_v50 }
 0x126   : > { %v803_v49 = vadd.f32 %v1310_v11, %v706_v47  ;;  %v1247_v51 = vpop.f32.mrb[16].mxu0  ;;  %v844_v53 = vmax.f32 %v800_v46, 0.0 }
 0x127   : > { %v1248_v52 = vpop.f32.mrb[17].mxu0 }
 0x128   : > { %v845_v54 = vmax.f32 %v803_v49, 0.0  ;;  %v1249_v55 = vadd.f32 %v1248_v52, %v1247_v51  ;;  %v1250_v56 = vpop.f32.mrb[18].mxu0 }
 0x129   : > { %v1251_v57 = vpop.f32.mrb[19].mxu0 }
 0x12a   : > { %v1178_v58 = vpack.c.bf16 %v845_v54, %v844_v53  ;;  %v1252_v59 = vadd.f32 %v1251_v57, %v1250_v56  ;;  %v711_v60 = vadd.f32 %v1249_v55, %v1531_v50 }
 0x12c   : > { %1202 = vst [vmem:[%s1539_s29 + $0x18] sm:$0xff] %v1178_v58   ;;  %v808_v61 = vadd.f32 %v807_v27, %v711_v60  ;;  %v714_v62 = vadd.f32 %v1252_v59, %v1531_v50 }
 0x12e   : > { %v811_v63 = vadd.f32 %v810_v31, %v714_v62  ;;  %v1253_v0 = vpop.f32.mrb[20].mxu0  ;;  %v846_v2 = vmax.f32 %v808_v61, 0.0 }
 0x12f   : > { %v1254_v1 = vpop.f32.mrb[21].mxu0 }
 0x130   : > { %v847_v3 = vmax.f32 %v811_v63, 0.0  ;;  %v1255_v4 = vadd.f32 %v1254_v1, %v1253_v0  ;;  %v1256_v5 = vpop.f32.mrb[22].mxu0 }
 0x131   : > { %v1257_v6 = vpop.f32.mrb[23].mxu0 }
 0x132   : > { %v1183_v7 = vpack.c.bf16 %v847_v3, %v846_v2  ;;  %v719_v8 = vadd.f32 %v1255_v4, %v1531_v50  ;;  %v1258_v9 = vadd.f32 %v1257_v6, %v1256_v5 }
 0x134   : > { %1203 = vst [vmem:[%s1539_s29 + $0x20] sm:$0xff] %v1183_v7   ;;  %v816_v10 = vadd.f32 %v1313_v23, %v719_v8  ;;  %v722_v11 = vadd.f32 %v1258_v9, %v1531_v50 }
 0x136   : > { %v819_v12 = vadd.f32 %v1314_v28, %v722_v11  ;;  %v1259_v13 = vpop.f32.mrb[24].mxu0  ;;  %v848_v15 = vmax.f32 %v816_v10, 0.0 }
 0x137   : > { %v1260_v14 = vpop.f32.mrb[25].mxu0 }
 0x138   : > { %v849_v16 = vmax.f32 %v819_v12, 0.0  ;;  %v1261_v17 = vadd.f32 %v1260_v14, %v1259_v13  ;;  %v1262_v18 = vpop.f32.mrb[26].mxu0 }
 0x139   : > { %v1263_v19 = vpop.f32.mrb[27].mxu0 }
 0x13a   : > { %v1188_v20 = vpack.c.bf16 %v849_v16, %v848_v15  ;;  %v1264_v21 = vadd.f32 %v1263_v19, %v1262_v18  ;;  %v727_v22 = vadd.f32 %v1261_v17, %v1531_v50 }
 0x13c   : > { %1204 = vst [vmem:[%s1539_s29 + $0x28] sm:$0xff] %v1188_v20   ;;  %v824_v24 = vadd.f32 %v823_v44, %v727_v22  ;;  %v730_v25 = vadd.f32 %v1264_v21, %v1531_v50 }
 0x13e   : > { %v827_v23 = vadd.f32 %v826_v48, %v730_v25  ;;  %v1265_v26 = vpop.f32.mrb[28].mxu0  ;;  %v850_v28 = vmax.f32 %v824_v24, 0.0 }
 0x13f   : > { %v1266_v27 = vpop.f32.mrb[29].mxu0 }
 0x140   : > { %v851_v29 = vmax.f32 %v827_v23, 0.0  ;;  %v1267_v30 = vadd.f32 %v1266_v27, %v1265_v26  ;;  %v1268_v31 = vpop.f32.mrb[30].mxu0 }
 0x141   : > { %v1269_v32 = vpop.f32.mrb[31].mxu0 }
 0x142   : > { %v1193_v33 = vpack.c.bf16 %v851_v29, %v850_v28  ;;  %v735_v34 = vadd.f32 %v1267_v30, %v1531_v50  ;;  %v1270_v35 = vadd.f32 %v1269_v32, %v1268_v31 }
 0x144   : > { %1205 = vst [vmem:[%s1539_s29 + $0x30] sm:$0xff] %v1193_v33   ;;  %v832_v36 = vadd.f32 %v1547_v40, %v735_v34  ;;  %v738_v37 = vadd.f32 %v1270_v35, %v1531_v50 }
 0x146   : > { %v835_v38 = vadd.f32 %v1318_v45, %v738_v37  ;;  %v852_v39 = vmax.f32 %v832_v36, 0.0 }
 0x148   : > { %v853_v41 = vmax.f32 %v835_v38, 0.0 }
 0x14a   : > { %v1198_v42 = vpack.c.bf16 %v853_v41, %v852_v39 }
 0x14c   : > { %1206 = vst [vmem:[%s1539_s29 + $0x38] sm:$0xff] %v1198_v42  }
 0x14d PF: > { %s13_s14 = sadd.s32 1, %s1422_s14   ;;  %s1579_s12 = smov %s1418_s13 }
 0x14e   : > { %p10_p5 = scmp.ge.s32.totalorder %s13_s14, 4   ;;  %s1580_s13 = smov %s1582_s15 }
 0x150   :  { %12 = sbr.rel (!%p10_p5) target bundleno = 2 (0x2), region = 68 }

// kernel: rtnet_forward.18
= control target key start
LH: loop header
LB: loop body
LE: loop exit
PB: predicated region body
PF: predicated region fallthrough
CT: control target
= control target key end

     0   :  { %v553_v1 = vmov 0   ;;  %v49_v25 = vlaneseq  ;;  %s741_s1 = inlined_call_operand.vmem [shape: bf16[128,256], index: 1, kind: input, shape index: {}]   ;;  %s742_s0 = inlined_call_operand.vmem [shape: bf16[128,128], index: 0, kind: input, shape index: {}]   ;;  %s743_s2 = inlined_call_operand.vmem [shape: f32[1,256], index: 2, kind: input, shape index: {}]   ;;  %s744_s3 = inlined_call_operand.vmem [shape: bf16[128,256], index: 3, kind: output, shape index: {}]  }
   0x1   :  { %v521_v0 = vld [vmem:[%s741_s1 + $0x4] ss:$8 sps:$4 sm:$0xff]   ;;  %219 = vmatprep.mubr.bf16.mxu0 %v553_v1  ;;  %259 = vmatprep.mubr.bf16.mxu1 %v553_v1  ;;  %v523_v2 = vld [vmem:[%s741_s1] ss:$8 sps:$4 sm:$0xff]   ;;  %v524_v3 = vld [vmem:[%s741_s1 + $0x14] ss:$8 sps:$4 sm:$0xff]  }
   0x2   :  { %187 = vmatprep.subr.bf16.mxu0 %v521_v0  ;;  %504 = vmatprep.subr.bf16.mxu1 %v521_v0  ;;  %v526_v4 = vld [vmem:[%s741_s1 + $0x10] ss:$8 sps:$4 sm:$0xff]   ;;  %v527_v5 = vld [vmem:[%s741_s1 + $0x24] ss:$8 sps:$4 sm:$0xff]   ;;  %v529_v6 = vld [vmem:[%s741_s1 + $0x20] ss:$8 sps:$4 sm:$0xff]  }
   0x3   :  { %188 = vmatpush1.bf16.msra.mxu0 %v523_v2  ;;  %512 = vmatpush1.bf16.msra.mxu1 %v523_v2  ;;  %v530_v7 = vld [vmem:[%s741_s1 + $0x34] ss:$8 sps:$4 sm:$0xff]   ;;  %v532_v8 = vld [vmem:[%s741_s1 + $0x30] ss:$8 sps:$4 sm:$0xff]   ;;  %v533_v9 = vld [vmem:[%s741_s1 + $0x44] ss:$8 sps:$4 sm:$0xff]  }
   0x4   :  { %189 = vmatprep.subr.bf16.mxu0 %v524_v3  ;;  %505 = vmatprep.subr.bf16.mxu1 %v524_v3  ;;  %v535_v10 = vld [vmem:[%s741_s1 + $0x40] ss:$8 sps:$4 sm:$0xff]   ;;  %v536_v11 = vld [vmem:[%s741_s1 + $0x54] ss:$8 sps:$4 sm:$0xff]   ;;  %v538_v12 = vld [vmem:[%s741_s1 + $0x50] ss:$8 sps:$4 sm:$0xff]  }
   0x5   :  { %v539_v13 = vld [vmem:[%s741_s1 + $0x64] ss:$8 sps:$4 sm:$0xff]   ;;  %v541_v14 = vld [vmem:[%s741_s1 + $0x60] ss:$8 sps:$4 sm:$0xff]   ;;  %v542_v15 = vld [vmem:[%s741_s1 + $0x74] ss:$8 sps:$4 sm:$0xff]  }
   0x6   :  { %v544_v16 = vld [vmem:[%s741_s1 + $0x70] ss:$8 sps:$4 sm:$0xff]   ;;  %v545_v17 = vld [vmem:[%s742_s0] sm:$0xff]   ;;  %v547_v19 = vld [vmem:[%s742_s0 + $0x8] sm:$0xff]   ;;  %v50_v26 = vshrl.u32 %v49_v25, 7 }
   0x7   :  { %190 = vmatpush1.bf16.msra.mxu0 %v526_v4  ;;  %513 = vmatpush1.bf16.msra.mxu1 %v526_v4  ;;  %v546_v18 = vld [vmem:[%s742_s0 + $0x20] sm:$0xff]   ;;  %v548_v20 = vld [vmem:[%s742_s0 + $0x28] sm:$0xff]   ;;  %v549_v21 = vld [vmem:[%s742_s0 + $0x10] sm:$0xff]  }
   0x8   :  { %191 = vmatprep.subr.bf16.mxu0 %v527_v5  ;;  %506 = vmatprep.subr.bf16.mxu1 %v527_v5  ;;  %v550_v22 = vld [vmem:[%s742_s0 + $0x30] sm:$0xff]   ;;  %v551_v23 = vld [vmem:[%s742_s0 + $0x18] sm:$0xff]   ;;  %v51_v27 = vsub.s32 0, %v50_v26  ;;  %v47_v28 = vld [vmem:[%s743_s2] sm:$0x3]  ;;  %v55_v29 = vsub.s32 1, %v50_v26 }
   0x9   :  { %v552_v24 = vld [vmem:[%s742_s0 + $0x38] sm:$0xff]  }
   0xa   :  { %v657_v30 = vrot.slane %v47_v28, %v51_v27  ;;  %v659_v31 = vrot.slane %v47_v28, %v55_v29 }
   0xb   :  { %192 = vmatpush1.bf16.msra.mxu0 %v529_v6  ;;  %514 = vmatpush1.bf16.msra.mxu1 %v529_v6 }
   0xc   :  { %193 = vmatprep.subr.bf16.mxu0 %v530_v7  ;;  %507 = vmatprep.subr.bf16.mxu1 %v530_v7 }
   0xf   :  { %194 = vmatpush1.bf16.msra.mxu0 %v532_v8  ;;  %515 = vmatpush1.bf16.msra.mxu1 %v532_v8 }
  0x10   :  { %195 = vmatprep.subr.bf16.mxu0 %v533_v9  ;;  %508 = vmatprep.subr.bf16.mxu1 %v533_v9 }
  0x13   :  { %196 = vmatpush1.bf16.msra.mxu0 %v535_v10  ;;  %516 = vmatpush1.bf16.msra.mxu1 %v535_v10 }
  0x14   :  { %197 = vmatprep.subr.bf16.mxu0 %v536_v11  ;;  %509 = vmatprep.subr.bf16.mxu1 %v536_v11 }
  0x17   :  { %198 = vmatpush1.bf16.msra.mxu0 %v538_v12  ;;  %517 = vmatpush1.bf16.msra.mxu1 %v538_v12 }
  0x18   :  { %199 = vmatprep.subr.bf16.mxu0 %v539_v13  ;;  %510 = vmatprep.subr.bf16.mxu1 %v539_v13 }
  0x1b   :  { %200 = vmatpush1.bf16.msra.mxu0 %v541_v14  ;;  %518 = vmatpush1.bf16.msra.mxu1 %v541_v14 }
  0x1c   :  { %201 = vmatprep.subr.bf16.mxu0 %v542_v15  ;;  %511 = vmatprep.subr.bf16.mxu1 %v542_v15 }
  0x1f   :  { %202 = vmatpush1.bf16.msra.mxu0 %v544_v16  ;;  %519 = vmatpush1.bf16.msra.mxu1 %v544_v16 }
  0x22   :  { %220 = vmatmul.mubr.bf16.vlgmr.msra.gmra.mrb[0].mxu0 %v545_v17  ;;  %260 = vmatmul.mubr.bf16.vlgmr.msra.gmra.mrb[0].mxu1 %v546_v18 }
  0x23   :  { %229 = vmatprep.mubr.bf16.mxu0 %v553_v1  ;;  %269 = vmatprep.mubr.bf16.mxu1 %v553_v1 }
  0x2a   :  { %230 = vmatmul.mubr.bf16.gmra.mrb[4].mxu0 %v547_v19  ;;  %270 = vmatmul.mubr.bf16.gmra.mrb[4].mxu1 %v548_v20 }
  0x2b   :  { %239 = vmatprep.mubr.bf16.mxu0 %v553_v1  ;;  %279 = vmatprep.mubr.bf16.mxu1 %v553_v1 }
  0x32   :  { %240 = vmatmul.mubr.bf16.gmra.mrb[8].mxu0 %v549_v21  ;;  %280 = vmatmul.mubr.bf16.gmra.mrb[8].mxu1 %v550_v22 }
  0x33   :  { %249 = vmatprep.mubr.bf16.mxu0 %v553_v1  ;;  %289 = vmatprep.mubr.bf16.mxu1 %v553_v1 }
  0x3a   :  { %250 = vmatmul.mubr.bf16.gmra.mrb[12].mxu0 %v551_v23  ;;  %290 = vmatmul.mubr.bf16.gmra.mrb[12].mxu1 %v552_v24 }
  0xf5   :  { %v221_v32 = vpop.f32.mrb[0].mxu0  ;;  %v261_v33 = vpop.f32.mrb[0].mxu1 }
  0xf6   :  { %v222_v34 = vadd.f32 %v221_v32, %v657_v30  ;;  %v262_v35 = vadd.f32 %v261_v33, %v657_v30  ;;  %v223_v36 = vpop.f32.mrb[1].mxu0  ;;  %v263_v37 = vpop.f32.mrb[1].mxu1 }
  0xf7   :  { %v224_v38 = vadd.f32 %v223_v36, %v659_v31  ;;  %v264_v39 = vadd.f32 %v263_v37, %v659_v31  ;;  %v225_v40 = vpop.f32.mrb[2].mxu0  ;;  %v265_v41 = vpop.f32.mrb[2].mxu1 }
  0xf8   :  { %v300_v42 = vmax.f32 %v222_v34, 0.0  ;;  %v316_v43 = vmax.f32 %v262_v35, 0.0  ;;  %v226_v44 = vadd.f32 %v225_v40, %v657_v30  ;;  %v266_v45 = vadd.f32 %v265_v41, %v657_v30  ;;  %v227_v46 = vpop.f32.mrb[3].mxu0  ;;  %v267_v47 = vpop.f32.mrb[3].mxu1 }
  0xf9   :  { %v301_v48 = vmax.f32 %v224_v38, 0.0  ;;  %v317_v49 = vmax.f32 %v264_v39, 0.0  ;;  %v228_v50 = vadd.f32 %v227_v46, %v659_v31  ;;  %v268_v51 = vadd.f32 %v267_v47, %v659_v31 }
  0xfa   :  { %v302_v52 = vmax.f32 %v226_v44, 0.0  ;;  %v318_v53 = vmax.f32 %v266_v45, 0.0 }
  0xfb   :  { %v488_v54 = vpack.c.bf16 %v301_v48, %v300_v42  ;;  %v496_v55 = vpack.c.bf16 %v317_v49, %v316_v43  ;;  %v303_v56 = vmax.f32 %v228_v50, 0.0  ;;  %v319_v57 = vmax.f32 %v268_v51, 0.0 }
  0xfd   :  { %428 = vst [vmem:[%s744_s3] sm:$0xff] %v488_v54  ;;  %436 = vst [vmem:[%s744_s3 + $0x40] sm:$0xff] %v496_v55  ;;  %v489_v58 = vpack.c.bf16 %v303_v56, %v302_v52  ;;  %v497_v59 = vpack.c.bf16 %v319_v57, %v318_v53  ;;  %v231_v60 = vpop.f32.mrb[4].mxu0  ;;  %v271_v61 = vpop.f32.mrb[4].mxu1 }
  0xfe   :  { %v232_v62 = vadd.f32 %v231_v60, %v657_v30  ;;  %v272_v63 = vadd.f32 %v271_v61, %v657_v30  ;;  %v233_v0 = vpop.f32.mrb[5].mxu0  ;;  %v273_v1 = vpop.f32.mrb[5].mxu1 }
  0xff   :  { %429 = vst [vmem:[%s744_s3 + $0x8] sm:$0xff] %v489_v58  ;;  %437 = vst [vmem:[%s744_s3 + $0x48] sm:$0xff] %v497_v59  ;;  %v234_v2 = vadd.f32 %v233_v0, %v659_v31  ;;  %v274_v3 = vadd.f32 %v273_v1, %v659_v31  ;;  %v235_v4 = vpop.f32.mrb[6].mxu0  ;;  %v275_v5 = vpop.f32.mrb[6].mxu1 }
 0x100   :  { %v304_v6 = vmax.f32 %v232_v62, 0.0  ;;  %v320_v7 = vmax.f32 %v272_v63, 0.0  ;;  %v236_v8 = vadd.f32 %v235_v4, %v657_v30  ;;  %v276_v9 = vadd.f32 %v275_v5, %v657_v30  ;;  %v237_v10 = vpop.f32.mrb[7].mxu0  ;;  %v277_v11 = vpop.f32.mrb[7].mxu1 }
 0x101   :  { %v305_v12 = vmax.f32 %v234_v2, 0.0  ;;  %v321_v13 = vmax.f32 %v274_v3, 0.0  ;;  %v238_v14 = vadd.f32 %v237_v10, %v659_v31  ;;  %v278_v15 = vadd.f32 %v277_v11, %v659_v31 }
 0x102   :  { %v306_v16 = vmax.f32 %v236_v8, 0.0  ;;  %v322_v17 = vmax.f32 %v276_v9, 0.0 }
 0x103   :  { %v490_v18 = vpack.c.bf16 %v305_v12, %v304_v6  ;;  %v498_v19 = vpack.c.bf16 %v321_v13, %v320_v7  ;;  %v307_v20 = vmax.f32 %v238_v14, 0.0  ;;  %v323_v21 = vmax.f32 %v278_v15, 0.0 }
 0x105   :  { %430 = vst [vmem:[%s744_s3 + $0x10] sm:$0xff] %v490_v18  ;;  %438 = vst [vmem:[%s744_s3 + $0x50] sm:$0xff] %v498_v19  ;;  %v491_v22 = vpack.c.bf16 %v307_v20, %v306_v16  ;;  %v499_v23 = vpack.c.bf16 %v323_v21, %v322_v17  ;;  %v241_v24 = vpop.f32.mrb[8].mxu0  ;;  %v281_v25 = vpop.f32.mrb[8].mxu1 }
 0x106   :  { %v242_v26 = vadd.f32 %v241_v24, %v657_v30  ;;  %v282_v27 = vadd.f32 %v281_v25, %v657_v30  ;;  %v243_v28 = vpop.f32.mrb[9].mxu0  ;;  %v283_v29 = vpop.f32.mrb[9].mxu1 }
 0x107   :  { %431 = vst [vmem:[%s744_s3 + $0x18] sm:$0xff] %v491_v22  ;;  %439 = vst [vmem:[%s744_s3 + $0x58] sm:$0xff] %v499_v23  ;;  %v244_v32 = vadd.f32 %v243_v28, %v659_v31  ;;  %v284_v33 = vadd.f32 %v283_v29, %v659_v31  ;;  %v245_v34 = vpop.f32.mrb[10].mxu0  ;;  %v285_v35 = vpop.f32.mrb[10].mxu1 }
 0x108   :  { %v308_v36 = vmax.f32 %v242_v26, 0.0  ;;  %v324_v37 = vmax.f32 %v282_v27, 0.0  ;;  %v246_v38 = vadd.f32 %v245_v34, %v657_v30  ;;  %v286_v39 = vadd.f32 %v285_v35, %v657_v30  ;;  %v247_v40 = vpop.f32.mrb[11].mxu0  ;;  %v287_v41 = vpop.f32.mrb[11].mxu1 }
 0x109   :  { %v309_v42 = vmax.f32 %v244_v32, 0.0  ;;  %v325_v43 = vmax.f32 %v284_v33, 0.0  ;;  %v248_v44 = vadd.f32 %v247_v40, %v659_v31  ;;  %v288_v45 = vadd.f32 %v287_v41, %v659_v31 }
 0x10a   :  { %v310_v46 = vmax.f32 %v246_v38, 0.0  ;;  %v326_v47 = vmax.f32 %v286_v39, 0.0 }
 0x10b   :  { %v492_v48 = vpack.c.bf16 %v309_v42, %v308_v36  ;;  %v500_v49 = vpack.c.bf16 %v325_v43, %v324_v37  ;;  %v311_v50 = vmax.f32 %v248_v44, 0.0  ;;  %v327_v51 = vmax.f32 %v288_v45, 0.0 }
 0x10d   :  { %432 = vst [vmem:[%s744_s3 + $0x20] sm:$0xff] %v492_v48  ;;  %440 = vst [vmem:[%s744_s3 + $0x60] sm:$0xff] %v500_v49  ;;  %v493_v52 = vpack.c.bf16 %v311_v50, %v310_v46  ;;  %v501_v53 = vpack.c.bf16 %v327_v51, %v326_v47  ;;  %v251_v54 = vpop.f32.mrb[12].mxu0  ;;  %v291_v55 = vpop.f32.mrb[12].mxu1 }
 0x10e   :  { %v252_v56 = vadd.f32 %v251_v54, %v657_v30  ;;  %v292_v57 = vadd.f32 %v291_v55, %v657_v30  ;;  %v253_v58 = vpop.f32.mrb[13].mxu0  ;;  %v293_v59 = vpop.f32.mrb[13].mxu1 }
 0x10f   :  { %433 = vst [vmem:[%s744_s3 + $0x28] sm:$0xff] %v493_v52  ;;  %441 = vst [vmem:[%s744_s3 + $0x68] sm:$0xff] %v501_v53  ;;  %v254_v60 = vadd.f32 %v253_v58, %v659_v31  ;;  %v294_v61 = vadd.f32 %v293_v59, %v659_v31  ;;  %v255_v62 = vpop.f32.mrb[14].mxu0  ;;  %v295_v63 = vpop.f32.mrb[14].mxu1 }
 0x110   :  { %v312_v0 = vmax.f32 %v252_v56, 0.0  ;;  %v328_v1 = vmax.f32 %v292_v57, 0.0  ;;  %v256_v2 = vadd.f32 %v255_v62, %v657_v30  ;;  %v296_v3 = vadd.f32 %v295_v63, %v657_v30  ;;  %v257_v4 = vpop.f32.mrb[15].mxu0  ;;  %v297_v5 = vpop.f32.mrb[15].mxu1 }
 0x111   :  { %v313_v6 = vmax.f32 %v254_v60, 0.0  ;;  %v329_v7 = vmax.f32 %v294_v61, 0.0  ;;  %v258_v8 = vadd.f32 %v257_v4, %v659_v31  ;;  %v298_v9 = vadd.f32 %v297_v5, %v659_v31 }
 0x112   :  { %v314_v10 = vmax.f32 %v256_v2, 0.0  ;;  %v330_v11 = vmax.f32 %v296_v3, 0.0 }
 0x113   :  { %v494_v12 = vpack.c.bf16 %v313_v6, %v312_v0  ;;  %v502_v13 = vpack.c.bf16 %v329_v7, %v328_v1  ;;  %v315_v14 = vmax.f32 %v258_v8, 0.0  ;;  %v331_v15 = vmax.f32 %v298_v9, 0.0 }
 0x115   :  { %434 = vst [vmem:[%s744_s3 + $0x30] sm:$0xff] %v494_v12  ;;  %442 = vst [vmem:[%s744_s3 + $0x70] sm:$0xff] %v502_v13  ;;  %v495_v30 = vpack.c.bf16 %v315_v14, %v314_v10  ;;  %v503_v16 = vpack.c.bf16 %v331_v15, %v330_v11 }
 0x117   :  { %435 = vst [vmem:[%s744_s3 + $0x38] sm:$0xff] %v495_v30  ;;  %443 = vst [vmem:[%s744_s3 + $0x78] sm:$0xff] %v503_v16 }

// kernel: rtnet_forward.19
= control target key start
LH: loop header
LB: loop body
LE: loop exit
PB: predicated region body
PF: predicated region fallthrough
CT: control target
= control target key end

     0   :  { %s836_s1 = inlined_call_operand.vmem [shape: bf16[256,128], index: 1, kind: input, shape index: {}]   ;;  %s837_s0 = inlined_call_operand.vmem [shape: bf16[128,256], index: 0, kind: input, shape index: {}]   ;;  %s838_s2 = inlined_call_operand.vmem [shape: f32[1,128], index: 2, kind: input, shape index: {}]   ;;  %s839_s3 = inlined_call_operand.vmem [shape: bf16[128,128], index: 3, kind: output, shape index: {}]  }
   0x1   :  { %v635_v0 = vld [vmem:[%s836_s1 + $0x40] sm:$0xff]   ;;  %v637_v2 = vld [vmem:[%s836_s1 + $0x48] sm:$0xff]   ;;  %v639_v4 = vld [vmem:[%s836_s1 + $0x50] sm:$0xff]  }
   0x2   :  { %v636_v1 = vld [vmem:[%s836_s1] sm:$0xff]   ;;  %555 = vmatprep.subr.bf16.mxu0 %v635_v0  ;;  %619 = vmatprep.subr.bf16.mxu1 %v635_v0  ;;  %v638_v3 = vld [vmem:[%s836_s1 + $0x8] sm:$0xff]   ;;  %v640_v5 = vld [vmem:[%s836_s1 + $0x10] sm:$0xff]  }
   0x3   :  { %556 = vmatpush3.bf16.msra.mxu0 %v636_v1  ;;  %627 = vmatpush3.bf16.msra.mxu1 %v636_v1  ;;  %v641_v6 = vld [vmem:[%s836_s1 + $0x58] sm:$0xff]   ;;  %v643_v8 = vld [vmem:[%s836_s1 + $0x60] sm:$0xff]   ;;  %v645_v10 = vld [vmem:[%s836_s1 + $0x68] sm:$0xff]  }
   0x4   :  { %557 = vmatprep.subr.bf16.mxu0 %v637_v2  ;;  %620 = vmatprep.subr.bf16.mxu1 %v637_v2  ;;  %v642_v7 = vld [vmem:[%s836_s1 + $0x18] sm:$0xff]   ;;  %v644_v9 = vld [vmem:[%s836_s1 + $0x20] sm:$0xff]   ;;  %v646_v13 = vld [vmem:[%s836_s1 + $0x28] sm:$0xff]  }
   0x5   :  { %v653_v11 = vld [vmem:[%s837_s0 + $0x4] ss:$8 sps:$4 sm:$0xff]   ;;  %v647_v14 = vld [vmem:[%s836_s1 + $0x70] sm:$0xff]   ;;  %v649_v16 = vld [vmem:[%s836_s1 + $0x78] sm:$0xff]  }
   0x6   :  { %v656_v12 = vld [vmem:[%s837_s0 + $0x44] ss:$8 sps:$4 sm:$0xff]   ;;  %278 = vmatprep.mubr.bf16.mxu0 %v653_v11  ;;  %v648_v15 = vld [vmem:[%s836_s1 + $0x30] sm:$0xff]   ;;  %v650_v17 = vld [vmem:[%s836_s1 + $0x38] sm:$0xff]  }
   0x7   :  { %558 = vmatpush3.bf16.msra.mxu0 %v638_v3  ;;  %628 = vmatpush3.bf16.msra.mxu1 %v638_v3  ;;  %v651_v18 = vld [vmem:[%s837_s0] ss:$8 sps:$4 sm:$0xff]   ;;  %v657_v20 = vld [vmem:[%s837_s0 + $0x14] ss:$8 sps:$4 sm:$0xff]   ;;  %v661_v22 = vld [vmem:[%s837_s0 + $0x10] ss:$8 sps:$4 sm:$0xff]  }
   0x8   :  { %559 = vmatprep.subr.bf16.mxu0 %v639_v4  ;;  %621 = vmatprep.subr.bf16.mxu1 %v639_v4  ;;  %v654_v19 = vld [vmem:[%s837_s0 + $0x40] ss:$8 sps:$4 sm:$0xff]   ;;  %v659_v21 = vld [vmem:[%s837_s0 + $0x54] ss:$8 sps:$4 sm:$0xff]   ;;  %v662_v23 = vld [vmem:[%s837_s0 + $0x50] ss:$8 sps:$4 sm:$0xff]  }
   0x9   :  { %310 = vmatprep.mubr.bf16.mxu1 %v656_v12  ;;  %v663_v24 = vld [vmem:[%s837_s0 + $0x24] ss:$8 sps:$4 sm:$0xff]   ;;  %v667_v26 = vld [vmem:[%s837_s0 + $0x20] ss:$8 sps:$4 sm:$0xff]   ;;  %v669_v28 = vld [vmem:[%s837_s0 + $0x34] ss:$8 sps:$4 sm:$0xff]  }
   0xa   :  { %v665_v25 = vld [vmem:[%s837_s0 + $0x64] ss:$8 sps:$4 sm:$0xff]   ;;  %v668_v27 = vld [vmem:[%s837_s0 + $0x60] ss:$8 sps:$4 sm:$0xff]   ;;  %v671_v29 = vld [vmem:[%s837_s0 + $0x74] ss:$8 sps:$4 sm:$0xff]  }
   0xb   :  { %560 = vmatpush3.bf16.msra.mxu0 %v640_v5  ;;  %629 = vmatpush3.bf16.msra.mxu1 %v640_v5  ;;  %v673_v30 = vld [vmem:[%s837_s0 + $0x30] ss:$8 sps:$4 sm:$0xff]   ;;  %v794_v34 = vld [vmem:[%s838_s2] ss:$0 sm:$0xff] }
   0xc   :  { %561 = vmatprep.subr.bf16.mxu0 %v641_v6  ;;  %622 = vmatprep.subr.bf16.mxu1 %v641_v6  ;;  %v674_v31 = vld [vmem:[%s837_s0 + $0x70] ss:$8 sps:$4 sm:$0xff]  }
   0xf   :  { %562 = vmatpush3.bf16.msra.mxu0 %v642_v7  ;;  %630 = vmatpush3.bf16.msra.mxu1 %v642_v7 }
  0x10   :  { %563 = vmatprep.subr.bf16.mxu0 %v643_v8  ;;  %623 = vmatprep.subr.bf16.mxu1 %v643_v8 }
  0x13   :  { %564 = vmatpush3.bf16.msra.mxu0 %v644_v9  ;;  %631 = vmatpush3.bf16.msra.mxu1 %v644_v9 }
  0x14   :  { %565 = vmatprep.subr.bf16.mxu0 %v645_v10  ;;  %624 = vmatprep.subr.bf16.mxu1 %v645_v10 }
  0x17   :  { %566 = vmatpush3.bf16.msra.mxu0 %v646_v13  ;;  %632 = vmatpush3.bf16.msra.mxu1 %v646_v13 }
  0x18   :  { %567 = vmatprep.subr.bf16.mxu0 %v647_v14  ;;  %625 = vmatprep.subr.bf16.mxu1 %v647_v14 }
  0x1b   :  { %568 = vmatpush3.bf16.msra.mxu0 %v648_v15  ;;  %633 = vmatpush3.bf16.msra.mxu1 %v648_v15 }
  0x1c   :  { %569 = vmatprep.subr.bf16.mxu0 %v649_v16  ;;  %626 = vmatprep.subr.bf16.mxu1 %v649_v16 }
  0x1f   :  { %570 = vmatpush3.bf16.msra.mxu0 %v650_v17  ;;  %634 = vmatpush3.bf16.msra.mxu1 %v650_v17 }
  0x22   :  { %279 = vmatmul.mubr.bf16.vlgmr.msra.gmra.mrb[0].mxu0 %v651_v18  ;;  %311 = vmatmul.mubr.bf16.vlgmr.msra.gmra.mrb[0].mxu1 %v654_v19 }
  0x23   :  { %286 = vmatprep.mubr.bf16.mxu0 %v657_v20  ;;  %318 = vmatprep.mubr.bf16.mxu1 %v659_v21 }
  0x2a   :  { %287 = vmatmul.mubr.bf16.gmra.mrb[4].mxu0 %v661_v22  ;;  %319 = vmatmul.mubr.bf16.gmra.mrb[4].mxu1 %v662_v23 }
  0x2b   :  { %294 = vmatprep.mubr.bf16.mxu0 %v663_v24  ;;  %326 = vmatprep.mubr.bf16.mxu1 %v665_v25 }
  0x32   :  { %295 = vmatmul.mubr.bf16.gmra.mrb[8].mxu0 %v667_v26  ;;  %327 = vmatmul.mubr.bf16.gmra.mrb[8].mxu1 %v668_v27 }
  0x33   :  { %302 = vmatprep.mubr.bf16.mxu0 %v669_v28  ;;  %334 = vmatprep.mubr.bf16.mxu1 %v671_v29 }
  0x3a   :  { %303 = vmatmul.mubr.bf16.gmra.mrb[12].mxu0 %v673_v30  ;;  %335 = vmatmul.mubr.bf16.gmra.mrb[12].mxu1 %v674_v31 }
  0xf5   :  { %v571_v32 = vpop.f32.mrb[0].mxu0  ;;  %v595_v33 = vpop.f32.mrb[0].mxu1 }
  0xf6   :  { %v572_v35 = vpop.f32.mrb[1].mxu0  ;;  %v596_v36 = vpop.f32.mrb[1].mxu1 }
  0xf7   :  { %v573_v37 = vadd.f32 %v572_v35, %v571_v32  ;;  %v597_v38 = vadd.f32 %v596_v36, %v595_v33  ;;  %v574_v39 = vpop.f32.mrb[2].mxu0  ;;  %v598_v40 = vpop.f32.mrb[2].mxu1 }
  0xf8   :  { %v575_v41 = vpop.f32.mrb[3].mxu0  ;;  %v599_v42 = vpop.f32.mrb[3].mxu1 }
  0xf9   :  { %v281_v43 = vadd.f32 %v573_v37, %v794_v34  ;;  %v313_v44 = vadd.f32 %v597_v38, %v794_v34  ;;  %v576_v45 = vadd.f32 %v575_v41, %v574_v39  ;;  %v600_v46 = vadd.f32 %v599_v42, %v598_v40 }
  0xfb   :  { %v284_v47 = vadd.f32 %v576_v45, %v794_v34  ;;  %v316_v48 = vadd.f32 %v600_v46, %v794_v34  ;;  %v343_v49 = vmax.f32 %v281_v43, 0.0  ;;  %v351_v50 = vmax.f32 %v313_v44, 0.0 }
  0xfd   :  { %v344_v51 = vmax.f32 %v284_v47, 0.0  ;;  %v352_v52 = vmax.f32 %v316_v48, 0.0  ;;  %v577_v53 = vpop.f32.mrb[4].mxu0  ;;  %v601_v54 = vpop.f32.mrb[4].mxu1 }
  0xfe   :  { %v578_v55 = vpop.f32.mrb[5].mxu0  ;;  %v602_v56 = vpop.f32.mrb[5].mxu1 }
  0xff   :  { %v511_v57 = vpack.c.bf16 %v344_v51, %v343_v49  ;;  %v531_v58 = vpack.c.bf16 %v352_v52, %v351_v50  ;;  %v579_v59 = vadd.f32 %v578_v55, %v577_v53  ;;  %v603_v60 = vadd.f32 %v602_v56, %v601_v54  ;;  %v580_v61 = vpop.f32.mrb[6].mxu0  ;;  %v604_v62 = vpop.f32.mrb[6].mxu1 }
 0x100   :  { %v581_v63 = vpop.f32.mrb[7].mxu0  ;;  %v605_v0 = vpop.f32.mrb[7].mxu1 }
 0x101   :  { %512 = vst [vmem:[%s839_s3] sm:$0xff] %v511_v57   ;;  %551 = vst [vmem:[%s839_s3 + $0x20] sm:$0xff] %v531_v58   ;;  %v289_v1 = vadd.f32 %v579_v59, %v794_v34  ;;  %v321_v2 = vadd.f32 %v603_v60, %v794_v34  ;;  %v582_v3 = vadd.f32 %v581_v63, %v580_v61 }
 0x102   :  { %v606_v4 = vadd.f32 %v605_v0, %v604_v62 }
 0x103   :  { %v292_v5 = vadd.f32 %v582_v3, %v794_v34  ;;  %v345_v7 = vmax.f32 %v289_v1, 0.0  ;;  %v353_v8 = vmax.f32 %v321_v2, 0.0 }
 0x104   :  { %v324_v6 = vadd.f32 %v606_v4, %v794_v34 }
 0x105   :  { %v346_v9 = vmax.f32 %v292_v5, 0.0  ;;  %v583_v11 = vpop.f32.mrb[8].mxu0  ;;  %v607_v12 = vpop.f32.mrb[8].mxu1 }
 0x106   :  { %v354_v10 = vmax.f32 %v324_v6, 0.0  ;;  %v584_v13 = vpop.f32.mrb[9].mxu0  ;;  %v608_v14 = vpop.f32.mrb[9].mxu1 }
 0x107   :  { %v516_v15 = vpack.c.bf16 %v346_v9, %v345_v7  ;;  %v585_v17 = vadd.f32 %v584_v13, %v583_v11  ;;  %v609_v18 = vadd.f32 %v608_v14, %v607_v12  ;;  %v586_v19 = vpop.f32.mrb[10].mxu0  ;;  %v610_v20 = vpop.f32.mrb[10].mxu1 }
 0x108   :  { %v536_v16 = vpack.c.bf16 %v354_v10, %v353_v8  ;;  %v587_v21 = vpop.f32.mrb[11].mxu0  ;;  %v611_v22 = vpop.f32.mrb[11].mxu1 }
 0x109   :  { %548 = vst [vmem:[%s839_s3 + $0x8] sm:$0xff] %v516_v15   ;;  %v297_v23 = vadd.f32 %v585_v17, %v794_v34  ;;  %v329_v24 = vadd.f32 %v609_v18, %v794_v34  ;;  %v588_v25 = vadd.f32 %v587_v21, %v586_v19  ;;  %v612_v26 = vadd.f32 %v611_v22, %v610_v20 }
 0x10a   :  { %552 = vst [vmem:[%s839_s3 + $0x28] sm:$0xff] %v536_v16  }
 0x10b   :  { %v300_v27 = vadd.f32 %v588_v25, %v794_v34  ;;  %v332_v28 = vadd.f32 %v612_v26, %v794_v34  ;;  %v347_v29 = vmax.f32 %v297_v23, 0.0  ;;  %v355_v30 = vmax.f32 %v329_v24, 0.0 }
 0x10d   :  { %v348_v31 = vmax.f32 %v300_v27, 0.0  ;;  %v356_v32 = vmax.f32 %v332_v28, 0.0  ;;  %v589_v33 = vpop.f32.mrb[12].mxu0  ;;  %v613_v35 = vpop.f32.mrb[12].mxu1 }
 0x10e   :  { %v590_v36 = vpop.f32.mrb[13].mxu0  ;;  %v614_v37 = vpop.f32.mrb[13].mxu1 }
 0x10f   :  { %v521_v38 = vpack.c.bf16 %v348_v31, %v347_v29  ;;  %v541_v39 = vpack.c.bf16 %v356_v32, %v355_v30  ;;  %v591_v40 = vadd.f32 %v590_v36, %v589_v33  ;;  %v615_v41 = vadd.f32 %v614_v37, %v613_v35  ;;  %v592_v42 = vpop.f32.mrb[14].mxu0  ;;  %v616_v43 = vpop.f32.mrb[14].mxu1 }
 0x110   :  { %v593_v44 = vpop.f32.mrb[15].mxu0  ;;  %v617_v45 = vpop.f32.mrb[15].mxu1 }
 0x111   :  { %549 = vst [vmem:[%s839_s3 + $0x10] sm:$0xff] %v521_v38   ;;  %553 = vst [vmem:[%s839_s3 + $0x30] sm:$0xff] %v541_v39   ;;  %v305_v46 = vadd.f32 %v591_v40, %v794_v34  ;;  %v337_v47 = vadd.f32 %v615_v41, %v794_v34  ;;  %v594_v48 = vadd.f32 %v593_v44, %v592_v42 }
 0x112   :  { %v618_v49 = vadd.f32 %v617_v45, %v616_v43 }
 0x113   :  { %v308_v50 = vadd.f32 %v594_v48, %v794_v34  ;;  %v349_v52 = vmax.f32 %v305_v46, 0.0  ;;  %v357_v53 = vmax.f32 %v337_v47, 0.0 }
 0x114   :  { %v340_v51 = vadd.f32 %v618_v49, %v794_v34 }
 0x115   :  { %v350_v54 = vmax.f32 %v308_v50, 0.0 }
 0x116   :  { %v358_v55 = vmax.f32 %v340_v51, 0.0 }
 0x117   :  { %v526_v56 = vpack.c.bf16 %v350_v54, %v349_v52 }
 0x118   :  { %v546_v57 = vpack.c.bf16 %v358_v55, %v357_v53 }
 0x119   :  { %550 = vst [vmem:[%s839_s3 + $0x18] sm:$0xff] %v526_v56  }
 0x11a   :  { %554 = vst [vmem:[%s839_s3 + $0x38] sm:$0xff] %v546_v57  }

// kernel: rtnet_forward.20
= control target key start
LH: loop header
LB: loop body
LE: loop exit
PB: predicated region body
PF: predicated region fallthrough
CT: control target
= control target key end

     0   :  { %s1272_s12 = smov 0   ;;  %s1274_s13 = smov 0   ;;  %s1371_s0 = inlined_call_operand.vmem [shape: bf16[2,32,640], index: 0, kind: input, shape index: {}]   ;;  %s1372_s1 = inlined_call_operand.vmem [shape: bf16[2,640,128], index: 1, kind: input, shape index: {}]   ;;  %s1373_s2 = inlined_call_operand.vmem [shape: f32[2,1,128], index: 2, kind: input, shape index: {}]   ;;  %s1374_s3 = inlined_call_operand.vmem [shape: bf16[2,32,128], index: 3, kind: output, shape index: {}]  }
   0x1   :  { %s1276_s14 = smov 0  }
   0x2 LB: > { %s32_s15 = sadd.s32 1, %s1246_s13  ;;  %p984_p0 = scmp.ge.s32.totalorder %s1250_s14, 1  ;;  %s1250_s14 = sphi %s1276_s14, %s13_s14   ;;  %s1246_s13 = sphi %s1274_s13, %s1376_s13   ;;  %s1242_s12 = sphi %s1272_s12, %s1375_s12  }
   0x3   : > { %p34_p1 = scmp.ge.s32.totalorder %s32_s15, 2  ;;  %p196_p2 = scmp.lt.s32.totalorder %s1250_s14, 3 }
   0x5   : > { %s1378_s15 = smov (%p34_p1, %s32_s15), 0  ;;  %p197_p3 = pnand %p984_p0, %p196_p2 }
   0x6   : > { %p247_p4 = scmp.lt.s32.totalorder (!%p197_p3), %s1242_s12, 1 }
   0x7   : > { %200 = sbr.rel (%p197_p3) target bundleno = 305 (0x131), region = 32 }
   0xe   : > { %s1380_s12 = smov (!%p247_p4, %s1242_s12), 1 }
   0xf   : > { %s1149_s16 = smul.u32 320, %s1380_s12  ;;  %s270_s26 = scalar_lea.vmem %s1373_s2, %s1380_s12 }
  0x10   : > { %s1148_s20 = smul.u32 80, %s1380_s12  ;;  %v989_v51 = vld [vmem:[%s270_s26] ss:$0 sm:$0xff]  ;;  %s1046_s27 = sshll.u32 %s1380_s12, 4 }
  0x11   : > { %s1296_s19 = scalar_lea.vmem %s1372_s1, %s1149_s16  ;;  %s282_s30 = scalar_lea.vmem %s1374_s3, %s1046_s27 }
  0x12   : > { %v1174_v0 = vld [vmem:[%s1296_s19 + $0x40] sm:$0xff]   ;;  %v1178_v4 = vld [vmem:[%s1296_s19 + $0x48] sm:$0xff]   ;;  %v1182_v8 = vld [vmem:[%s1296_s19 + $0x50] sm:$0xff]   ;;  %s1331_s23 = scalar_lea.vmem %s1371_s0, %s1148_s20 }
  0x13   : > { %v1175_v1 = vld [vmem:[%s1296_s19] sm:$0xff]   ;;  %1062 = vmatprep.subr.bf16.mxu0 %v1174_v0  ;;  %v1179_v5 = vld [vmem:[%s1296_s19 + $0x8] sm:$0xff]   ;;  %v1183_v9 = vld [vmem:[%s1296_s19 + $0x10] sm:$0xff]  }
  0x14   : > { %v1176_v2 = vld [vmem:[%s1296_s19 + $0xc0] sm:$0xff]   ;;  %1063 = vmatpush3.bf16.msra.mxu0 %v1175_v1  ;;  %v1180_v6 = vld [vmem:[%s1296_s19 + $0xc8] sm:$0xff]   ;;  %v1184_v10 = vld [vmem:[%s1296_s19 + $0xd0] sm:$0xff]  }
  0x15   : > { %v1177_v3 = vld [vmem:[%s1296_s19 + $0x80] sm:$0xff]   ;;  %1090 = vmatprep.subr.bf16.mxu1 %v1176_v2  ;;  %1064 = vmatprep.subr.bf16.mxu0 %v1178_v4  ;;  %v1181_v7 = vld [vmem:[%s1296_s19 + $0x88] sm:$0xff]   ;;  %v1185_v11 = vld [vmem:[%s1296_s19 + $0x90] sm:$0xff]  }
  0x16   : > { %1091 = vmatpush3.bf16.msra.mxu1 %v1177_v3  ;;  %v1186_v12 = vld [vmem:[%s1296_s19 + $0x58] sm:$0xff]   ;;  %v1190_v16 = vld [vmem:[%s1296_s19 + $0x60] sm:$0xff]   ;;  %v1194_v20 = vld [vmem:[%s1296_s19 + $0x68] sm:$0xff]  }
  0x17   : > { %1092 = vmatprep.subr.bf16.mxu1 %v1180_v6  ;;  %v1187_v13 = vld [vmem:[%s1296_s19 + $0x18] sm:$0xff]   ;;  %v1191_v17 = vld [vmem:[%s1296_s19 + $0x20] sm:$0xff]   ;;  %v1195_v21 = vld [vmem:[%s1296_s19 + $0x28] sm:$0xff]  }
  0x18   : > { %1065 = vmatpush3.bf16.msra.mxu0 %v1179_v5  ;;  %v1188_v14 = vld [vmem:[%s1296_s19 + $0xd8] sm:$0xff]   ;;  %v1192_v18 = vld [vmem:[%s1296_s19 + $0xe0] sm:$0xff]   ;;  %v1196_v22 = vld [vmem:[%s1296_s19 + $0xe8] sm:$0xff]  }
  0x19   : > { %1066 = vmatprep.subr.bf16.mxu0 %v1182_v8  ;;  %v1189_v15 = vld [vmem:[%s1296_s19 + $0x98] sm:$0xff]   ;;  %v1193_v19 = vld [vmem:[%s1296_s19 + $0xa0] sm:$0xff]   ;;  %v1197_v23 = vld [vmem:[%s1296_s19 + $0xa8] sm:$0xff]  }
  0x1a   : > { %1093 = vmatpush3.bf16.msra.mxu1 %v1181_v7  ;;  %v1198_v24 = vld [vmem:[%s1296_s19 + $0x70] sm:$0xff]   ;;  %v1202_v28 = vld [vmem:[%s1296_s19 + $0x78] sm:$0xff]   ;;  %v1209_v34 = vld [vmem:[%s1296_s19 + $0x100] sm:$0xff]  }
  0x1b   : > { %1094 = vmatprep.subr.bf16.mxu1 %v1184_v10  ;;  %v1199_v25 = vld [vmem:[%s1296_s19 + $0x30] sm:$0xff]   ;;  %v1203_v29 = vld [vmem:[%s1296_s19 + $0x38] sm:$0xff]   ;;  %v1212_v36 = vld [vmem:[%s1331_s23 + $0xc] ss:$20 sps:$4 sm:$0xff]  }
  0x1c   : > { %1067 = vmatpush3.bf16.msra.mxu0 %v1183_v9  ;;  %v1200_v26 = vld [vmem:[%s1296_s19 + $0xf0] sm:$0xff]   ;;  %v1204_v30 = vld [vmem:[%s1296_s19 + $0xf8] sm:$0xff]   ;;  %v1213_v37 = vld [vmem:[%s1296_s19 + $0x108] sm:$0xff]   ;;  %757 = vmatprep.mubr.bf16.mxu1 %v1212_v36 }
  0x1d   : > { %1068 = vmatprep.subr.bf16.mxu0 %v1186_v12  ;;  %v1201_v27 = vld [vmem:[%s1296_s19 + $0xb0] sm:$0xff]   ;;  %v1207_v32 = vld [vmem:[%s1331_s23 + $0x4] ss:$20 sps:$4 sm:$0xff]   ;;  %v1210_v35 = vld [vmem:[%s1331_s23 + $0x8] ss:$20 sps:$4 sm:$0xff]  }
  0x1e   : > { %1095 = vmatpush3.bf16.msra.mxu1 %v1185_v11  ;;  %v1205_v31 = vld [vmem:[%s1331_s23] ss:$20 sps:$4 sm:$0xff]   ;;  %v1208_v33 = vld [vmem:[%s1296_s19 + $0xb8] sm:$0xff]   ;;  %708 = vmatprep.mubr.bf16.mxu0 %v1207_v32  ;;  %v1223_v43 = vld [vmem:[%s1331_s23 + $0x30] ss:$20 sps:$4 sm:$0xff]  }
  0x1f   : > { %1096 = vmatprep.subr.bf16.mxu1 %v1188_v14  ;;  %v1214_v38 = vld [vmem:[%s1296_s19 + $0x110] sm:$0xff]   ;;  %v1217_v39 = vld [vmem:[%s1331_s23 + $0x2c] ss:$20 sps:$4 sm:$0xff]   ;;  %v1215_v40 = vld [vmem:[%s1296_s19 + $0x118] sm:$0xff]  }
  0x20   : > { %1069 = vmatpush3.bf16.msra.mxu0 %v1187_v13  ;;  %v1220_v41 = vld [vmem:[%s1331_s23 + $0x28] ss:$20 sps:$4 sm:$0xff]   ;;  %v1216_v44 = vld [vmem:[%s1296_s19 + $0x120] sm:$0xff]   ;;  %v1224_v47 = vld [vmem:[%s1296_s19 + $0x130] sm:$0xff]  }
  0x21   : > { %1070 = vmatprep.subr.bf16.mxu0 %v1190_v16  ;;  %v1221_v42 = vld [vmem:[%s1331_s23 + $0x34] ss:$20 sps:$4 sm:$0xff]   ;;  %v1226_v45 = vld [vmem:[%s1331_s23 + $0x10] ss:$20 sps:$4 sm:$0xff]   ;;  %v1225_v48 = vld [vmem:[%s1296_s19 + $0x138] sm:$0xff]  }
  0x22   : > { %1097 = vmatpush3.bf16.msra.mxu1 %v1189_v15  ;;  %v1219_v46 = vld [vmem:[%s1296_s19 + $0x128] sm:$0xff]  }
  0x23   : > { %1098 = vmatprep.subr.bf16.mxu1 %v1192_v18  ;;  %v1227_v49 = vld [vmem:[%s1331_s23 + $0x38] ss:$20 sps:$4 sm:$0xff]  }
  0x24   : > { %1071 = vmatpush3.bf16.msra.mxu0 %v1191_v17 }
  0x25   : > { %1072 = vmatprep.subr.bf16.mxu0 %v1194_v20 }
  0x26   : > { %1099 = vmatpush3.bf16.msra.mxu1 %v1193_v19 }
  0x27   : > { %1100 = vmatprep.subr.bf16.mxu1 %v1196_v22 }
  0x28   : > { %1073 = vmatpush3.bf16.msra.mxu0 %v1195_v21 }
  0x29   : > { %1074 = vmatprep.subr.bf16.mxu0 %v1198_v24 }
  0x2a   : > { %1101 = vmatpush3.bf16.msra.mxu1 %v1197_v23 }
  0x2b   : > { %1102 = vmatprep.subr.bf16.mxu1 %v1200_v26 }
  0x2c   : > { %1075 = vmatpush3.bf16.msra.mxu0 %v1199_v25 }
  0x2d   : > { %1076 = vmatprep.subr.bf16.mxu0 %v1202_v28 }
  0x2e   : > { %1103 = vmatpush3.bf16.msra.mxu1 %v1201_v27 }
  0x2f   : > { %1104 = vmatprep.subr.bf16.mxu1 %v1204_v30 }
  0x30   : > { %1077 = vmatpush3.bf16.msra.mxu0 %v1203_v29 }
  0x31   : > { %1128 = vmatprep.subr.bf16.mxu0 %v1209_v34 }
  0x32   : > { %1105 = vmatpush3.bf16.msra.mxu1 %v1208_v33 }
  0x33   : > { %709 = vmatmul.mubr.bf16.vlgmr.msra.gmra.mrb[0].mxu0 %v1205_v31 }
  0x34   : > { %1129 = vmatpush3.bf16.msra.mxu0 %v1209_v34  ;;  %716 = vmatprep.mubr.bf16.mxu0 %v1217_v39 }
  0x35   : > { %758 = vmatmul.mubr.bf16.vlgmr.msra.gmra.mrb[0].mxu1 %v1210_v35  ;;  %1130 = vmatprep.subr.bf16.mxu0 %v1213_v37 }
  0x36   : > { %765 = vmatprep.mubr.bf16.mxu1 %v1221_v42 }
  0x38   : > { %1131 = vmatpush3.bf16.msra.mxu0 %v1213_v37 }
  0x39   : > { %1132 = vmatprep.subr.bf16.mxu0 %v1214_v38 }
  0x3b   : > { %717 = vmatmul.mubr.bf16.gmra.mrb[4].mxu0 %v1220_v41 }
  0x3c   : > { %1133 = vmatpush3.bf16.msra.mxu0 %v1214_v38  ;;  %1144 = vmatprep.mubr.bf16.mxu0 %v1226_v45 }
  0x3d   : > { %1134 = vmatprep.subr.bf16.mxu0 %v1215_v40  ;;  %766 = vmatmul.mubr.bf16.gmra.mrb[4].mxu1 %v1223_v43 }
  0x40   : > { %1135 = vmatpush3.bf16.msra.mxu0 %v1215_v40 }
  0x41   : > { %1136 = vmatprep.subr.bf16.mxu0 %v1216_v44 }
  0x44   : > { %1137 = vmatpush3.bf16.msra.mxu0 %v1216_v44 }
  0x45   : > { %1138 = vmatprep.subr.bf16.mxu0 %v1219_v46 }
  0x48   : > { %1139 = vmatpush3.bf16.msra.mxu0 %v1219_v46 }
  0x49   : > { %1140 = vmatprep.subr.bf16.mxu0 %v1224_v47 }
  0x4c   : > { %1141 = vmatpush3.bf16.msra.mxu0 %v1224_v47 }
  0x4d   : > { %1142 = vmatprep.subr.bf16.mxu0 %v1225_v48 }
  0x50   : > { %1143 = vmatpush3.bf16.msra.mxu0 %v1225_v48 }
  0x53   : > { %1145 = vmatmul.mubr.bf16.vlgmr.msra.gmra.mrb[8].mxu0 %v1227_v49 }
 0x106   : > { %v1078_v50 = vpop.f32.mrb[0].mxu0 }
 0x107   : > { %v1079_v52 = vpop.f32.mrb[1].mxu0 }
 0x108   : > { %v1080_v53 = vadd.f32 %v1079_v52, %v1078_v50  ;;  %v1081_v54 = vpop.f32.mrb[2].mxu0  ;;  %v1106_v55 = vpop.f32.mrb[0].mxu1 }
 0x109   : > { %v1082_v56 = vpop.f32.mrb[3].mxu0  ;;  %v1107_v59 = vpop.f32.mrb[1].mxu1 }
 0x10a   : > { %v711_v57 = vadd.f32 %v1080_v53, %v989_v51  ;;  %v1083_v58 = vadd.f32 %v1082_v56, %v1081_v54  ;;  %v1108_v60 = vadd.f32 %v1107_v59, %v1106_v55  ;;  %v1109_v61 = vpop.f32.mrb[2].mxu1 }
 0x10b   : > { %v1110_v63 = vpop.f32.mrb[3].mxu1 }
 0x10c   : > { %v714_v62 = vadd.f32 %v1083_v58, %v989_v51  ;;  %v1111_v0 = vadd.f32 %v1110_v63, %v1109_v61  ;;  %v760_v1 = vadd.f32 %v1108_v60, %v711_v57 }
 0x10e   : > { %v1084_v2 = vpop.f32.mrb[4].mxu0  ;;  %v763_v4 = vadd.f32 %v1111_v0, %v714_v62 }
 0x10f   : > { %v1085_v3 = vpop.f32.mrb[5].mxu0 }
 0x110   : > { %v1086_v5 = vadd.f32 %v1085_v3, %v1084_v2  ;;  %v1087_v6 = vpop.f32.mrb[6].mxu0  ;;  %v1112_v7 = vpop.f32.mrb[4].mxu1 }
 0x111   : > { %v1088_v8 = vpop.f32.mrb[7].mxu0  ;;  %v1113_v11 = vpop.f32.mrb[5].mxu1 }
 0x112   : > { %v719_v9 = vadd.f32 %v1086_v5, %v989_v51  ;;  %v1089_v10 = vadd.f32 %v1088_v8, %v1087_v6  ;;  %v1114_v12 = vadd.f32 %v1113_v11, %v1112_v7  ;;  %v1115_v13 = vpop.f32.mrb[6].mxu1 }
 0x113   : > { %v1116_v15 = vpop.f32.mrb[7].mxu1 }
 0x114   : > { %v722_v14 = vadd.f32 %v1089_v10, %v989_v51  ;;  %v1117_v16 = vadd.f32 %v1116_v15, %v1115_v13  ;;  %v768_v17 = vadd.f32 %v1114_v12, %v719_v9 }
 0x116   : > { %v771_v18 = vadd.f32 %v1117_v16, %v722_v14 }
 0x126   : > { %v1146_v19 = vpop.f32.mrb[8].mxu0 }
 0x127   : > { %v817_v20 = vadd.f32 %v1146_v19, %v768_v17  ;;  %v808_v21 = vpop.f32.mrb[9].mxu0 }
 0x128   : > { %v809_v22 = vadd.f32 %v808_v21, %v760_v1  ;;  %v1147_v23 = vpop.f32.mrb[10].mxu0 }
 0x129   : > { %v820_v24 = vadd.f32 %v1147_v23, %v771_v18  ;;  %v811_v25 = vpop.f32.mrb[11].mxu0  ;;  %v825_v27 = vmax.f32 %v817_v20, 0.0 }
 0x12a   : > { %v812_v26 = vadd.f32 %v811_v25, %v763_v4  ;;  %v823_v29 = vmax.f32 %v809_v22, 0.0 }
 0x12b   : > { %v826_v28 = vmax.f32 %v820_v24, 0.0 }
 0x12c   : > { %v824_v30 = vmax.f32 %v812_v26, 0.0 }
 0x12d   : > { %v1059_v31 = vpack.c.bf16 %v826_v28, %v825_v27 }
 0x12e   : > { %v1054_v32 = vpack.c.bf16 %v824_v30, %v823_v29 }
 0x12f   : > { %1061 = vst [vmem:[%s282_s30 + $0x8] sm:$0xff] %v1059_v31  }
 0x130   : > { %1055 = vst [vmem:[%s282_s30] sm:$0xff] %v1054_v32  }
 0x131 PF: > { %s13_s14 = sadd.s32 1, %s1250_s14   ;;  %s1375_s12 = smov %s1246_s13 }
 0x132   : > { %p10_p5 = scmp.ge.s32.totalorder %s13_s14, 4   ;;  %s1376_s13 = smov %s1378_s15 }
 0x134   :  { %12 = sbr.rel (!%p10_p5) target bundleno = 2 (0x2), region = 68 }

// kernel: rtnet_forward.22
= control target key start
LH: loop header
LB: loop body
LE: loop exit
PB: predicated region body
PF: predicated region fallthrough
CT: control target
= control target key end

     0   :  { %s1059_s1 = inlined_call_operand.vmem [shape: bf16[512,256], index: 1, kind: input, shape index: {}]   ;;  %s1060_s0 = inlined_call_operand.vmem [shape: bf16[32,512], index: 0, kind: input, shape index: {}]   ;;  %s1061_s2 = inlined_call_operand.vmem [shape: f32[1,256], index: 2, kind: input, shape index: {}]   ;;  %s1062_s3 = inlined_call_operand.vmem [shape: bf16[32,256], index: 3, kind: output, shape index: {}]  }
   0x1   :  { %v700_v0 = vld [vmem:[%s1059_s1 + $0x4] ss:$8 sps:$4 sm:$0xff]   ;;  %v704_v2 = vld [vmem:[%s1059_s1] ss:$8 sps:$4 sm:$0xff]   ;;  %v706_v4 = vld [vmem:[%s1059_s1 + $0x14] ss:$8 sps:$4 sm:$0xff]  }
   0x2   :  { %v702_v1 = vld [vmem:[%s1059_s1 + $0x104] ss:$8 sps:$4 sm:$0xff]   ;;  %458 = vmatprep.subr.bf16.mxu1 %v700_v0  ;;  %v705_v3 = vld [vmem:[%s1059_s1 + $0x100] ss:$8 sps:$4 sm:$0xff]   ;;  %v708_v5 = vld [vmem:[%s1059_s1 + $0x114] ss:$8 sps:$4 sm:$0xff]  }
   0x3   :  { %511 = vmatprep.subr.bf16.mxu0 %v702_v1  ;;  %459 = vmatpush1.bf16.msra.mxu1 %v704_v2  ;;  %v710_v6 = vld [vmem:[%s1059_s1 + $0x10] ss:$8 sps:$4 sm:$0xff]   ;;  %v712_v8 = vld [vmem:[%s1059_s1 + $0x24] ss:$8 sps:$4 sm:$0xff]   ;;  %v716_v10 = vld [vmem:[%s1059_s1 + $0x20] ss:$8 sps:$4 sm:$0xff]  }
   0x4   :  { %512 = vmatpush1.bf16.msra.mxu0 %v705_v3  ;;  %460 = vmatprep.subr.bf16.mxu1 %v706_v4  ;;  %v711_v7 = vld [vmem:[%s1059_s1 + $0x110] ss:$8 sps:$4 sm:$0xff]   ;;  %v714_v9 = vld [vmem:[%s1059_s1 + $0x124] ss:$8 sps:$4 sm:$0xff]   ;;  %v717_v11 = vld [vmem:[%s1059_s1 + $0x120] ss:$8 sps:$4 sm:$0xff]  }
   0x5   :  { %513 = vmatprep.subr.bf16.mxu0 %v708_v5  ;;  %v718_v12 = vld [vmem:[%s1059_s1 + $0x34] ss:$8 sps:$4 sm:$0xff]   ;;  %v722_v14 = vld [vmem:[%s1059_s1 + $0x30] ss:$8 sps:$4 sm:$0xff]   ;;  %v724_v16 = vld [vmem:[%s1059_s1 + $0x44] ss:$8 sps:$4 sm:$0xff]  }
   0x6   :  { %v720_v13 = vld [vmem:[%s1059_s1 + $0x134] ss:$8 sps:$4 sm:$0xff]   ;;  %v723_v15 = vld [vmem:[%s1059_s1 + $0x130] ss:$8 sps:$4 sm:$0xff]   ;;  %v726_v17 = vld [vmem:[%s1059_s1 + $0x144] ss:$8 sps:$4 sm:$0xff]  }
   0x7   :  { %461 = vmatpush1.bf16.msra.mxu1 %v710_v6  ;;  %v728_v18 = vld [vmem:[%s1059_s1 + $0x40] ss:$8 sps:$4 sm:$0xff]   ;;  %v730_v20 = vld [vmem:[%s1059_s1 + $0x54] ss:$8 sps:$4 sm:$0xff]   ;;  %v734_v22 = vld [vmem:[%s1059_s1 + $0x50] ss:$8 sps:$4 sm:$0xff]  }
   0x8   :  { %514 = vmatpush1.bf16.msra.mxu0 %v711_v7  ;;  %462 = vmatprep.subr.bf16.mxu1 %v712_v8  ;;  %v729_v19 = vld [vmem:[%s1059_s1 + $0x140] ss:$8 sps:$4 sm:$0xff]   ;;  %v732_v21 = vld [vmem:[%s1059_s1 + $0x154] ss:$8 sps:$4 sm:$0xff]   ;;  %v735_v23 = vld [vmem:[%s1059_s1 + $0x150] ss:$8 sps:$4 sm:$0xff]   ;;  %v88_v8 = vlaneseq }
   0x9   :  { %515 = vmatprep.subr.bf16.mxu0 %v714_v9  ;;  %v736_v24 = vld [vmem:[%s1059_s1 + $0x64] ss:$8 sps:$4 sm:$0xff]   ;;  %v740_v26 = vld [vmem:[%s1059_s1 + $0x60] ss:$8 sps:$4 sm:$0xff]   ;;  %v742_v28 = vld [vmem:[%s1059_s1 + $0x74] ss:$8 sps:$4 sm:$0xff]  }
   0xa   :  { %v738_v25 = vld [vmem:[%s1059_s1 + $0x164] ss:$8 sps:$4 sm:$0xff]   ;;  %v741_v27 = vld [vmem:[%s1059_s1 + $0x160] ss:$8 sps:$4 sm:$0xff]   ;;  %v744_v29 = vld [vmem:[%s1059_s1 + $0x174] ss:$8 sps:$4 sm:$0xff]  }
   0xb   :  { %463 = vmatpush1.bf16.msra.mxu1 %v716_v10  ;;  %v746_v30 = vld [vmem:[%s1059_s1 + $0x70] ss:$8 sps:$4 sm:$0xff]   ;;  %v748_v32 = vld [vmem:[%s1059_s1 + $0x84] ss:$8 sps:$4 sm:$0xff]   ;;  %v752_v34 = vld [vmem:[%s1059_s1 + $0x80] ss:$8 sps:$4 sm:$0xff]  }
   0xc   :  { %516 = vmatpush1.bf16.msra.mxu0 %v717_v11  ;;  %464 = vmatprep.subr.bf16.mxu1 %v718_v12  ;;  %v747_v31 = vld [vmem:[%s1059_s1 + $0x170] ss:$8 sps:$4 sm:$0xff]   ;;  %v750_v33 = vld [vmem:[%s1059_s1 + $0x184] ss:$8 sps:$4 sm:$0xff]   ;;  %v753_v35 = vld [vmem:[%s1059_s1 + $0x180] ss:$8 sps:$4 sm:$0xff]  }
   0xd   :  { %517 = vmatprep.subr.bf16.mxu0 %v720_v13  ;;  %v754_v36 = vld [vmem:[%s1059_s1 + $0x94] ss:$8 sps:$4 sm:$0xff]   ;;  %v758_v38 = vld [vmem:[%s1059_s1 + $0x90] ss:$8 sps:$4 sm:$0xff]   ;;  %v760_v40 = vld [vmem:[%s1059_s1 + $0xa4] ss:$8 sps:$4 sm:$0xff]  }
   0xe   :  { %v756_v37 = vld [vmem:[%s1059_s1 + $0x194] ss:$8 sps:$4 sm:$0xff]   ;;  %v759_v39 = vld [vmem:[%s1059_s1 + $0x190] ss:$8 sps:$4 sm:$0xff]   ;;  %v762_v41 = vld [vmem:[%s1059_s1 + $0x1a4] ss:$8 sps:$4 sm:$0xff]  }
   0xf   :  { %465 = vmatpush1.bf16.msra.mxu1 %v722_v14  ;;  %v764_v42 = vld [vmem:[%s1059_s1 + $0xa0] ss:$8 sps:$4 sm:$0xff]   ;;  %v766_v44 = vld [vmem:[%s1059_s1 + $0xb4] ss:$8 sps:$4 sm:$0xff]   ;;  %v770_v46 = vld [vmem:[%s1059_s1 + $0xb0] ss:$8 sps:$4 sm:$0xff]  }
  0x10   :  { %518 = vmatpush1.bf16.msra.mxu0 %v723_v15  ;;  %466 = vmatprep.subr.bf16.mxu1 %v724_v16  ;;  %v765_v43 = vld [vmem:[%s1059_s1 + $0x1a0] ss:$8 sps:$4 sm:$0xff]   ;;  %v768_v45 = vld [vmem:[%s1059_s1 + $0x1b4] ss:$8 sps:$4 sm:$0xff]   ;;  %v771_v47 = vld [vmem:[%s1059_s1 + $0x1b0] ss:$8 sps:$4 sm:$0xff]  }
  0x11   :  { %519 = vmatprep.subr.bf16.mxu0 %v726_v17  ;;  %v772_v48 = vld [vmem:[%s1059_s1 + $0xc4] ss:$8 sps:$4 sm:$0xff]   ;;  %v776_v52 = vld [vmem:[%s1059_s1 + $0xc0] ss:$8 sps:$4 sm:$0xff]   ;;  %v778_v54 = vld [vmem:[%s1059_s1 + $0xd4] ss:$8 sps:$4 sm:$0xff]  }
  0x12   :  { %v798_v49 = vld [vmem:[%s1060_s0 + $0x4] ss:$16 sps:$4 sm:$0xff]   ;;  %v801_v51 = vld [vmem:[%s1060_s0 + $0xc] ss:$16 sps:$4 sm:$0xff]   ;;  %v777_v53 = vld [vmem:[%s1059_s1 + $0x1c0] ss:$8 sps:$4 sm:$0xff]  }
  0x13   :  { %467 = vmatpush1.bf16.msra.mxu1 %v728_v18  ;;  %v774_v50 = vld [vmem:[%s1059_s1 + $0x1c4] ss:$8 sps:$4 sm:$0xff]   ;;  %490 = vmatprep.mubr.bf16.mxu1 %v798_v49  ;;  %v780_v55 = vld [vmem:[%s1059_s1 + $0x1d4] ss:$8 sps:$4 sm:$0xff]   ;;  %v782_v56 = vld [vmem:[%s1059_s1 + $0xd0] ss:$8 sps:$4 sm:$0xff]  }
  0x14   :  { %520 = vmatpush1.bf16.msra.mxu0 %v729_v19  ;;  %468 = vmatprep.subr.bf16.mxu1 %v730_v20  ;;  %v783_v57 = vld [vmem:[%s1059_s1 + $0x1d0] ss:$8 sps:$4 sm:$0xff]   ;;  %v784_v58 = vld [vmem:[%s1059_s1 + $0xe4] ss:$8 sps:$4 sm:$0xff]   ;;  %v788_v60 = vld [vmem:[%s1059_s1 + $0xe0] ss:$8 sps:$4 sm:$0xff]  }
  0x15   :  { %521 = vmatprep.subr.bf16.mxu0 %v732_v21  ;;  %543 = vmatprep.mubr.bf16.mxu0 %v801_v51  ;;  %v786_v59 = vld [vmem:[%s1059_s1 + $0x1e4] ss:$8 sps:$4 sm:$0xff]   ;;  %v789_v61 = vld [vmem:[%s1059_s1 + $0x1e0] ss:$8 sps:$4 sm:$0xff]   ;;  %v790_v62 = vld [vmem:[%s1059_s1 + $0xf4] ss:$8 sps:$4 sm:$0xff]  }
  0x16   :  { %v792_v63 = vld [vmem:[%s1059_s1 + $0x1f4] ss:$8 sps:$4 sm:$0xff]   ;;  %v794_v0 = vld [vmem:[%s1059_s1 + $0xf0] ss:$8 sps:$4 sm:$0xff]   ;;  %v89_v9 = vshrl.u32 %v88_v8, 7 }
  0x17   :  { %469 = vmatpush1.bf16.msra.mxu1 %v734_v22  ;;  %v795_v1 = vld [vmem:[%s1059_s1 + $0x1f0] ss:$8 sps:$4 sm:$0xff]   ;;  %v802_v4 = vld [vmem:[%s1060_s0 + $0x24] ss:$16 sps:$4 sm:$0xff]   ;;  %v804_v5 = vld [vmem:[%s1060_s0 + $0x2c] ss:$16 sps:$4 sm:$0xff]  }
  0x18   :  { %522 = vmatpush1.bf16.msra.mxu0 %v735_v23  ;;  %470 = vmatprep.subr.bf16.mxu1 %v736_v24  ;;  %v796_v2 = vld [vmem:[%s1060_s0] ss:$16 sps:$4 sm:$0xff]   ;;  %v799_v3 = vld [vmem:[%s1060_s0 + $0x8] ss:$16 sps:$4 sm:$0xff]   ;;  %v90_v10 = vsub.s32 0, %v89_v9  ;;  %v94_v12 = vsub.s32 1, %v89_v9 }
  0x19   :  { %523 = vmatprep.subr.bf16.mxu0 %v738_v25  ;;  %v806_v6 = vld [vmem:[%s1060_s0 + $0x20] ss:$16 sps:$4 sm:$0xff]   ;;  %v807_v7 = vld [vmem:[%s1060_s0 + $0x28] ss:$16 sps:$4 sm:$0xff]  }
  0x1a   :  { %v86_v11 = vld [vmem:[%s1061_s2] sm:$0x3] }
  0x1b   :  { %471 = vmatpush1.bf16.msra.mxu1 %v740_v26  ;;  %v91_v13 = vrot.slane %v86_v11, %v90_v10  ;;  %v95_v14 = vrot.slane %v86_v11, %v94_v12 }
  0x1c   :  { %524 = vmatpush1.bf16.msra.mxu0 %v741_v27  ;;  %472 = vmatprep.subr.bf16.mxu1 %v742_v28 }
  0x1d   :  { %525 = vmatprep.subr.bf16.mxu0 %v744_v29 }
  0x1f   :  { %473 = vmatpush1.bf16.msra.mxu1 %v746_v30 }
  0x20   :  { %526 = vmatpush1.bf16.msra.mxu0 %v747_v31  ;;  %474 = vmatprep.subr.bf16.mxu1 %v748_v32 }
  0x21   :  { %527 = vmatprep.subr.bf16.mxu0 %v750_v33 }
  0x23   :  { %475 = vmatpush1.bf16.msra.mxu1 %v752_v34 }
  0x24   :  { %528 = vmatpush1.bf16.msra.mxu0 %v753_v35  ;;  %476 = vmatprep.subr.bf16.mxu1 %v754_v36 }
  0x25   :  { %529 = vmatprep.subr.bf16.mxu0 %v756_v37 }
  0x27   :  { %477 = vmatpush1.bf16.msra.mxu1 %v758_v38 }
  0x28   :  { %530 = vmatpush1.bf16.msra.mxu0 %v759_v39  ;;  %478 = vmatprep.subr.bf16.mxu1 %v760_v40 }
  0x29   :  { %531 = vmatprep.subr.bf16.mxu0 %v762_v41 }
  0x2b   :  { %479 = vmatpush1.bf16.msra.mxu1 %v764_v42 }
  0x2c   :  { %532 = vmatpush1.bf16.msra.mxu0 %v765_v43  ;;  %480 = vmatprep.subr.bf16.mxu1 %v766_v44 }
  0x2d   :  { %533 = vmatprep.subr.bf16.mxu0 %v768_v45 }
  0x2f   :  { %481 = vmatpush1.bf16.msra.mxu1 %v770_v46 }
  0x30   :  { %534 = vmatpush1.bf16.msra.mxu0 %v771_v47  ;;  %482 = vmatprep.subr.bf16.mxu1 %v772_v48 }
  0x31   :  { %535 = vmatprep.subr.bf16.mxu0 %v774_v50 }
  0x33   :  { %483 = vmatpush1.bf16.msra.mxu1 %v776_v52 }
  0x34   :  { %536 = vmatpush1.bf16.msra.mxu0 %v777_v53  ;;  %484 = vmatprep.subr.bf16.mxu1 %v778_v54 }
  0x35   :  { %537 = vmatprep.subr.bf16.mxu0 %v780_v55 }
  0x37   :  { %485 = vmatpush1.bf16.msra.mxu1 %v782_v56 }
  0x38   :  { %538 = vmatpush1.bf16.msra.mxu0 %v783_v57  ;;  %486 = vmatprep.subr.bf16.mxu1 %v784_v58 }
  0x39   :  { %539 = vmatprep.subr.bf16.mxu0 %v786_v59 }
  0x3b   :  { %487 = vmatpush1.bf16.msra.mxu1 %v788_v60 }
  0x3c   :  { %540 = vmatpush1.bf16.msra.mxu0 %v789_v61  ;;  %488 = vmatprep.subr.bf16.mxu1 %v790_v62 }
  0x3d   :  { %541 = vmatprep.subr.bf16.mxu0 %v792_v63 }
  0x3f   :  { %489 = vmatpush1.bf16.msra.mxu1 %v794_v0 }
  0x40   :  { %542 = vmatpush1.bf16.msra.mxu0 %v795_v1 }
  0x42   :  { %491 = vmatmul.mubr.bf16.vlgmr.msra.gmra.mrb[0].mxu1 %v796_v2 }
  0x43   :  { %544 = vmatmul.mubr.bf16.vlgmr.msra.gmra.mrb[0].mxu0 %v799_v3  ;;  %500 = vmatprep.mubr.bf16.mxu1 %v802_v4 }
  0x44   :  { %553 = vmatprep.mubr.bf16.mxu0 %v804_v5 }
  0x4a   :  { %501 = vmatmul.mubr.bf16.gmra.mrb[4].mxu1 %v806_v6 }
  0x4b   :  { %554 = vmatmul.mubr.bf16.gmra.mrb[4].mxu0 %v807_v7 }
 0x115   :  { %v492_v15 = vpop.f32.mrb[0].mxu1 }
 0x116   :  { %v545_v16 = vpop.f32.mrb[0].mxu0  ;;  %v493_v17 = vadd.f32 %v492_v15, %v91_v13  ;;  %v494_v18 = vpop.f32.mrb[1].mxu1 }
 0x117   :  { %v547_v19 = vpop.f32.mrb[1].mxu0  ;;  %v495_v20 = vadd.f32 %v494_v18, %v95_v14  ;;  %v496_v21 = vpop.f32.mrb[2].mxu1 }
 0x118   :  { %v549_v22 = vpop.f32.mrb[2].mxu0  ;;  %v546_v23 = vadd.f32 %v545_v16, %v493_v17  ;;  %v497_v24 = vadd.f32 %v496_v21, %v91_v13  ;;  %v498_v25 = vpop.f32.mrb[3].mxu1 }
 0x119   :  { %v551_v26 = vpop.f32.mrb[3].mxu0  ;;  %v548_v27 = vadd.f32 %v547_v19, %v495_v20  ;;  %v499_v28 = vadd.f32 %v498_v25, %v95_v14 }
 0x11a   :  { %v564_v29 = vmax.f32 %v546_v23, 0.0  ;;  %v550_v30 = vadd.f32 %v549_v22, %v497_v24 }
 0x11b   :  { %v565_v31 = vmax.f32 %v548_v27, 0.0  ;;  %v552_v32 = vadd.f32 %v551_v26, %v499_v28 }
 0x11c   :  { %v566_v33 = vmax.f32 %v550_v30, 0.0 }
 0x11d   :  { %v680_v34 = vpack.c.bf16 %v565_v31, %v564_v29  ;;  %v567_v35 = vmax.f32 %v552_v32, 0.0  ;;  %v502_v36 = vpop.f32.mrb[4].mxu1 }
 0x11e   :  { %v555_v37 = vpop.f32.mrb[4].mxu0  ;;  %v503_v38 = vadd.f32 %v502_v36, %v91_v13  ;;  %v504_v39 = vpop.f32.mrb[5].mxu1 }
 0x11f   :  { %v557_v40 = vpop.f32.mrb[5].mxu0  ;;  %596 = vst [vmem:[%s1062_s3] sm:$0xff] %v680_v34  ;;  %v681_v41 = vpack.c.bf16 %v567_v35, %v566_v33  ;;  %v505_v42 = vadd.f32 %v504_v39, %v95_v14  ;;  %v506_v43 = vpop.f32.mrb[6].mxu1 }
 0x120   :  { %v559_v44 = vpop.f32.mrb[6].mxu0  ;;  %v556_v45 = vadd.f32 %v555_v37, %v503_v38  ;;  %v507_v46 = vadd.f32 %v506_v43, %v91_v13  ;;  %v508_v47 = vpop.f32.mrb[7].mxu1 }
 0x121   :  { %v561_v48 = vpop.f32.mrb[7].mxu0  ;;  %597 = vst [vmem:[%s1062_s3 + $0x8] sm:$0xff] %v681_v41  ;;  %v558_v49 = vadd.f32 %v557_v40, %v505_v42  ;;  %v509_v50 = vadd.f32 %v508_v47, %v95_v14 }
 0x122   :  { %v568_v51 = vmax.f32 %v556_v45, 0.0  ;;  %v560_v52 = vadd.f32 %v559_v44, %v507_v46 }
 0x123   :  { %v569_v53 = vmax.f32 %v558_v49, 0.0  ;;  %v562_v54 = vadd.f32 %v561_v48, %v509_v50 }
 0x124   :  { %v570_v55 = vmax.f32 %v560_v52, 0.0 }
 0x125   :  { %v682_v56 = vpack.c.bf16 %v569_v53, %v568_v51  ;;  %v571_v57 = vmax.f32 %v562_v54, 0.0 }
 0x127   :  { %598 = vst [vmem:[%s1062_s3 + $0x10] sm:$0xff] %v682_v56  ;;  %v683_v58 = vpack.c.bf16 %v571_v57, %v570_v55 }
 0x129   :  { %599 = vst [vmem:[%s1062_s3 + $0x18] sm:$0xff] %v683_v58 }

// kernel: rtnet_forward.21
= control target key start
LH: loop header
LB: loop body
LE: loop exit
PB: predicated region body
PF: predicated region fallthrough
CT: control target
= control target key end

     0   :  { %s1598_s1 = inlined_call_operand.vmem [shape: bf16[384,512], index: 1, kind: input, shape index: {}]   ;;  %s1599_s0 = inlined_call_operand.vmem [shape: bf16[32,384], index: 0, kind: input, shape index: {}]   ;;  %s1600_s2 = inlined_call_operand.vmem [shape: f32[1,512], index: 2, kind: input, shape index: {}]   ;;  %s1601_s3 = inlined_call_operand.vmem [shape: bf16[32,512], index: 3, kind: output, shape index: {}]  }
   0x1   :  { %v1092_v0 = vld [vmem:[%s1598_s1 + $0x4] ss:$16 sps:$4 sm:$0xff]   ;;  %v1094_v1 = vld [vmem:[%s1598_s1 + $0xc] ss:$16 sps:$4 sm:$0xff]   ;;  %v1096_v2 = vld [vmem:[%s1598_s1] ss:$16 sps:$4 sm:$0xff]  }
   0x2   :  { %653 = vmatprep.subr.bf16.mxu0 %v1092_v0  ;;  %v1097_v3 = vld [vmem:[%s1598_s1 + $0x8] ss:$16 sps:$4 sm:$0xff]   ;;  %759 = vmatprep.subr.bf16.mxu1 %v1094_v1  ;;  %v1098_v4 = vld [vmem:[%s1598_s1 + $0x24] ss:$16 sps:$4 sm:$0xff]   ;;  %v1100_v5 = vld [vmem:[%s1598_s1 + $0x2c] ss:$16 sps:$4 sm:$0xff]  }
   0x3   :  { %654 = vmatpush1.bf16.msra.mxu0 %v1096_v2  ;;  %760 = vmatpush1.bf16.msra.mxu1 %v1097_v3  ;;  %v1102_v6 = vld [vmem:[%s1598_s1 + $0x20] ss:$16 sps:$4 sm:$0xff]   ;;  %v1103_v7 = vld [vmem:[%s1598_s1 + $0x28] ss:$16 sps:$4 sm:$0xff]   ;;  %v1104_v8 = vld [vmem:[%s1598_s1 + $0x44] ss:$16 sps:$4 sm:$0xff]  }
   0x4   :  { %655 = vmatprep.subr.bf16.mxu0 %v1098_v4  ;;  %761 = vmatprep.subr.bf16.mxu1 %v1100_v5  ;;  %v1106_v9 = vld [vmem:[%s1598_s1 + $0x4c] ss:$16 sps:$4 sm:$0xff]   ;;  %v1108_v10 = vld [vmem:[%s1598_s1 + $0x40] ss:$16 sps:$4 sm:$0xff]   ;;  %v1109_v11 = vld [vmem:[%s1598_s1 + $0x48] ss:$16 sps:$4 sm:$0xff]  }
   0x5   :  { %v1110_v12 = vld [vmem:[%s1598_s1 + $0x64] ss:$16 sps:$4 sm:$0xff]   ;;  %v1112_v13 = vld [vmem:[%s1598_s1 + $0x6c] ss:$16 sps:$4 sm:$0xff]   ;;  %v1114_v14 = vld [vmem:[%s1598_s1 + $0x60] ss:$16 sps:$4 sm:$0xff]  }
   0x6   :  { %v1115_v15 = vld [vmem:[%s1598_s1 + $0x68] ss:$16 sps:$4 sm:$0xff]   ;;  %v1116_v16 = vld [vmem:[%s1598_s1 + $0x84] ss:$16 sps:$4 sm:$0xff]   ;;  %v1118_v17 = vld [vmem:[%s1598_s1 + $0x8c] ss:$16 sps:$4 sm:$0xff]  }
   0x7   :  { %656 = vmatpush1.bf16.msra.mxu0 %v1102_v6  ;;  %762 = vmatpush1.bf16.msra.mxu1 %v1103_v7  ;;  %v1120_v18 = vld [vmem:[%s1598_s1 + $0x80] ss:$16 sps:$4 sm:$0xff]   ;;  %v1121_v19 = vld [vmem:[%s1598_s1 + $0x88] ss:$16 sps:$4 sm:$0xff]   ;;  %v1122_v20 = vld [vmem:[%s1598_s1 + $0xa4] ss:$16 sps:$4 sm:$0xff]  }
   0x8   :  { %657 = vmatprep.subr.bf16.mxu0 %v1104_v8  ;;  %763 = vmatprep.subr.bf16.mxu1 %v1106_v9  ;;  %v1124_v21 = vld [vmem:[%s1598_s1 + $0xac] ss:$16 sps:$4 sm:$0xff]   ;;  %v1126_v22 = vld [vmem:[%s1598_s1 + $0xa0] ss:$16 sps:$4 sm:$0xff]   ;;  %v1127_v23 = vld [vmem:[%s1598_s1 + $0xa8] ss:$16 sps:$4 sm:$0xff]  }
   0x9   :  { %v1128_v24 = vld [vmem:[%s1598_s1 + $0xc4] ss:$16 sps:$4 sm:$0xff]   ;;  %v1130_v25 = vld [vmem:[%s1598_s1 + $0xcc] ss:$16 sps:$4 sm:$0xff]   ;;  %v1132_v26 = vld [vmem:[%s1598_s1 + $0xc0] ss:$16 sps:$4 sm:$0xff]  }
   0xa   :  { %v1133_v27 = vld [vmem:[%s1598_s1 + $0xc8] ss:$16 sps:$4 sm:$0xff]   ;;  %v1134_v28 = vld [vmem:[%s1598_s1 + $0xe4] ss:$16 sps:$4 sm:$0xff]   ;;  %v1136_v29 = vld [vmem:[%s1598_s1 + $0xec] ss:$16 sps:$4 sm:$0xff]  }
   0xb   :  { %658 = vmatpush1.bf16.msra.mxu0 %v1108_v10  ;;  %764 = vmatpush1.bf16.msra.mxu1 %v1109_v11  ;;  %v1138_v30 = vld [vmem:[%s1598_s1 + $0xe0] ss:$16 sps:$4 sm:$0xff]   ;;  %v1139_v31 = vld [vmem:[%s1598_s1 + $0xe8] ss:$16 sps:$4 sm:$0xff]   ;;  %v1140_v32 = vld [vmem:[%s1598_s1 + $0x104] ss:$16 sps:$4 sm:$0xff]  }
   0xc   :  { %659 = vmatprep.subr.bf16.mxu0 %v1110_v12  ;;  %765 = vmatprep.subr.bf16.mxu1 %v1112_v13  ;;  %v1142_v33 = vld [vmem:[%s1598_s1 + $0x10c] ss:$16 sps:$4 sm:$0xff]   ;;  %v1144_v34 = vld [vmem:[%s1598_s1 + $0x100] ss:$16 sps:$4 sm:$0xff]   ;;  %v1145_v35 = vld [vmem:[%s1598_s1 + $0x108] ss:$16 sps:$4 sm:$0xff]  }
   0xd   :  { %v1146_v36 = vld [vmem:[%s1598_s1 + $0x124] ss:$16 sps:$4 sm:$0xff]   ;;  %v1148_v37 = vld [vmem:[%s1598_s1 + $0x12c] ss:$16 sps:$4 sm:$0xff]   ;;  %v1150_v38 = vld [vmem:[%s1598_s1 + $0x120] ss:$16 sps:$4 sm:$0xff]  }
   0xe   :  { %v1151_v39 = vld [vmem:[%s1598_s1 + $0x128] ss:$16 sps:$4 sm:$0xff]   ;;  %v1152_v40 = vld [vmem:[%s1598_s1 + $0x144] ss:$16 sps:$4 sm:$0xff]   ;;  %v1154_v41 = vld [vmem:[%s1598_s1 + $0x14c] ss:$16 sps:$4 sm:$0xff]  }
   0xf   :  { %660 = vmatpush1.bf16.msra.mxu0 %v1114_v14  ;;  %766 = vmatpush1.bf16.msra.mxu1 %v1115_v15  ;;  %v1156_v42 = vld [vmem:[%s1598_s1 + $0x140] ss:$16 sps:$4 sm:$0xff]   ;;  %v1157_v43 = vld [vmem:[%s1598_s1 + $0x148] ss:$16 sps:$4 sm:$0xff]   ;;  %v1158_v44 = vld [vmem:[%s1598_s1 + $0x164] ss:$16 sps:$4 sm:$0xff]  }
  0x10   :  { %661 = vmatprep.subr.bf16.mxu0 %v1116_v16  ;;  %767 = vmatprep.subr.bf16.mxu1 %v1118_v17  ;;  %v1160_v45 = vld [vmem:[%s1598_s1 + $0x16c] ss:$16 sps:$4 sm:$0xff]   ;;  %v1162_v46 = vld [vmem:[%s1598_s1 + $0x160] ss:$16 sps:$4 sm:$0xff]   ;;  %v1163_v47 = vld [vmem:[%s1598_s1 + $0x168] ss:$16 sps:$4 sm:$0xff]  }
  0x11   :  { %v1190_v48 = vld [vmem:[%s1599_s0 + $0x4] ss:$12 sps:$4 sm:$0xff]   ;;  %v1166_v50 = vld [vmem:[%s1598_s1 + $0x18c] ss:$16 sps:$4 sm:$0xff]   ;;  %v1169_v52 = vld [vmem:[%s1598_s1 + $0x188] ss:$16 sps:$4 sm:$0xff]  }
  0x12   :  { %v1164_v49 = vld [vmem:[%s1598_s1 + $0x184] ss:$16 sps:$4 sm:$0xff]   ;;  %685 = vmatprep.mubr.bf16.mxu0 %v1190_v48  ;;  %791 = vmatprep.mubr.bf16.mxu1 %v1190_v48  ;;  %v1168_v51 = vld [vmem:[%s1598_s1 + $0x180] ss:$16 sps:$4 sm:$0xff]   ;;  %v1172_v54 = vld [vmem:[%s1598_s1 + $0x1ac] ss:$16 sps:$4 sm:$0xff]  }
  0x13   :  { %662 = vmatpush1.bf16.msra.mxu0 %v1120_v18  ;;  %768 = vmatpush1.bf16.msra.mxu1 %v1121_v19  ;;  %v1170_v53 = vld [vmem:[%s1598_s1 + $0x1a4] ss:$16 sps:$4 sm:$0xff]   ;;  %v1174_v55 = vld [vmem:[%s1598_s1 + $0x1a0] ss:$16 sps:$4 sm:$0xff]   ;;  %v1175_v56 = vld [vmem:[%s1598_s1 + $0x1a8] ss:$16 sps:$4 sm:$0xff]  }
  0x14   :  { %663 = vmatprep.subr.bf16.mxu0 %v1122_v20  ;;  %769 = vmatprep.subr.bf16.mxu1 %v1124_v21  ;;  %v1176_v57 = vld [vmem:[%s1598_s1 + $0x1c4] ss:$16 sps:$4 sm:$0xff]   ;;  %v1178_v58 = vld [vmem:[%s1598_s1 + $0x1cc] ss:$16 sps:$4 sm:$0xff]   ;;  %v1180_v59 = vld [vmem:[%s1598_s1 + $0x1c0] ss:$16 sps:$4 sm:$0xff]  }
  0x15   :  { %v1181_v60 = vld [vmem:[%s1598_s1 + $0x1c8] ss:$16 sps:$4 sm:$0xff]   ;;  %v1182_v61 = vld [vmem:[%s1598_s1 + $0x1e4] ss:$16 sps:$4 sm:$0xff]   ;;  %v1184_v62 = vld [vmem:[%s1598_s1 + $0x1ec] ss:$16 sps:$4 sm:$0xff]  }
  0x16   :  { %v1186_v63 = vld [vmem:[%s1598_s1 + $0x1e0] ss:$16 sps:$4 sm:$0xff]   ;;  %v1187_v0 = vld [vmem:[%s1598_s1 + $0x1e8] ss:$16 sps:$4 sm:$0xff]   ;;  %v1193_v1 = vld [vmem:[%s1598_s1 + $0x204] ss:$16 sps:$4 sm:$0xff]  }
  0x17   :  { %664 = vmatpush1.bf16.msra.mxu0 %v1126_v22  ;;  %770 = vmatpush1.bf16.msra.mxu1 %v1127_v23  ;;  %v1196_v2 = vld [vmem:[%s1598_s1 + $0x20c] ss:$16 sps:$4 sm:$0xff]   ;;  %v1191_v4 = vld [vmem:[%s1598_s1 + $0x200] ss:$16 sps:$4 sm:$0xff]   ;;  %v1194_v5 = vld [vmem:[%s1598_s1 + $0x208] ss:$16 sps:$4 sm:$0xff]  }
  0x18   :  { %665 = vmatprep.subr.bf16.mxu0 %v1128_v24  ;;  %771 = vmatprep.subr.bf16.mxu1 %v1130_v25  ;;  %v1188_v3 = vld [vmem:[%s1599_s0] ss:$12 sps:$4 sm:$0xff]   ;;  %v1199_v6 = vld [vmem:[%s1598_s1 + $0x224] ss:$16 sps:$4 sm:$0xff]   ;;  %v1227_v8 = vld [vmem:[%s1599_s0 + $0x1c] ss:$12 sps:$4 sm:$0xff]  }
  0x19   :  { %v1202_v7 = vld [vmem:[%s1598_s1 + $0x22c] ss:$16 sps:$4 sm:$0xff]   ;;  %v1197_v9 = vld [vmem:[%s1598_s1 + $0x220] ss:$16 sps:$4 sm:$0xff]   ;;  %v1200_v10 = vld [vmem:[%s1598_s1 + $0x228] ss:$16 sps:$4 sm:$0xff]  }
  0x1a   :  { %v1205_v11 = vld [vmem:[%s1598_s1 + $0x244] ss:$16 sps:$4 sm:$0xff]   ;;  %v1208_v12 = vld [vmem:[%s1598_s1 + $0x24c] ss:$16 sps:$4 sm:$0xff]   ;;  %v1203_v14 = vld [vmem:[%s1598_s1 + $0x240] ss:$16 sps:$4 sm:$0xff]  }
  0x1b   :  { %666 = vmatpush1.bf16.msra.mxu0 %v1132_v26  ;;  %772 = vmatpush1.bf16.msra.mxu1 %v1133_v27  ;;  %v1229_v13 = vld [vmem:[%s1599_s0 + $0x18] ss:$12 sps:$4 sm:$0xff]   ;;  %v1214_v17 = vld [vmem:[%s1598_s1 + $0x26c] ss:$16 sps:$4 sm:$0xff]   ;;  %v1209_v18 = vld [vmem:[%s1598_s1 + $0x260] ss:$16 sps:$4 sm:$0xff]  }
  0x1c   :  { %667 = vmatprep.subr.bf16.mxu0 %v1134_v28  ;;  %773 = vmatprep.subr.bf16.mxu1 %v1136_v29  ;;  %v1206_v15 = vld [vmem:[%s1598_s1 + $0x248] ss:$16 sps:$4 sm:$0xff]   ;;  %v1211_v16 = vld [vmem:[%s1598_s1 + $0x264] ss:$16 sps:$4 sm:$0xff]   ;;  %v1220_v21 = vld [vmem:[%s1598_s1 + $0x28c] ss:$16 sps:$4 sm:$0xff]  }
  0x1d   :  { %v1212_v19 = vld [vmem:[%s1598_s1 + $0x268] ss:$16 sps:$4 sm:$0xff]   ;;  %v1217_v20 = vld [vmem:[%s1598_s1 + $0x284] ss:$16 sps:$4 sm:$0xff]   ;;  %v1244_v22 = vmov 0  }
  0x1e   :  { %v1215_v23 = vld [vmem:[%s1598_s1 + $0x280] ss:$16 sps:$4 sm:$0xff]   ;;  %v1218_v24 = vld [vmem:[%s1598_s1 + $0x288] ss:$16 sps:$4 sm:$0xff]   ;;  %v1223_v25 = vld [vmem:[%s1598_s1 + $0x2a4] ss:$16 sps:$4 sm:$0xff]  }
  0x1f   :  { %668 = vmatpush1.bf16.msra.mxu0 %v1138_v30  ;;  %774 = vmatpush1.bf16.msra.mxu1 %v1139_v31  ;;  %v1226_v26 = vld [vmem:[%s1598_s1 + $0x2ac] ss:$16 sps:$4 sm:$0xff]   ;;  %v1221_v27 = vld [vmem:[%s1598_s1 + $0x2a0] ss:$16 sps:$4 sm:$0xff]   ;;  %v1224_v28 = vld [vmem:[%s1598_s1 + $0x2a8] ss:$16 sps:$4 sm:$0xff]  }
  0x20   :  { %669 = vmatprep.subr.bf16.mxu0 %v1140_v32  ;;  %775 = vmatprep.subr.bf16.mxu1 %v1142_v33  ;;  %v1232_v29 = vld [vmem:[%s1598_s1 + $0x2c4] ss:$16 sps:$4 sm:$0xff]   ;;  %v1235_v30 = vld [vmem:[%s1598_s1 + $0x2cc] ss:$16 sps:$4 sm:$0xff]   ;;  %v1230_v31 = vld [vmem:[%s1598_s1 + $0x2c0] ss:$16 sps:$4 sm:$0xff]  }
  0x21   :  { %v1233_v32 = vld [vmem:[%s1598_s1 + $0x2c8] ss:$16 sps:$4 sm:$0xff]   ;;  %v1238_v33 = vld [vmem:[%s1598_s1 + $0x2e4] ss:$16 sps:$4 sm:$0xff]  }
  0x23   :  { %670 = vmatpush1.bf16.msra.mxu0 %v1144_v34  ;;  %776 = vmatpush1.bf16.msra.mxu1 %v1145_v35  ;;  %v1241_v34 = vld [vmem:[%s1598_s1 + $0x2ec] ss:$16 sps:$4 sm:$0xff]   ;;  %v1236_v35 = vld [vmem:[%s1598_s1 + $0x2e0] ss:$16 sps:$4 sm:$0xff]  }
  0x24   :  { %671 = vmatprep.subr.bf16.mxu0 %v1146_v36  ;;  %777 = vmatprep.subr.bf16.mxu1 %v1148_v37  ;;  %v1239_v36 = vld [vmem:[%s1598_s1 + $0x2e8] ss:$16 sps:$4 sm:$0xff]  }
  0x25   :  { %v1242_v37 = vld [vmem:[%s1599_s0 + $0x8] ss:$12 sps:$4 sm:$0xff]  }
  0x27   :  { %672 = vmatpush1.bf16.msra.mxu0 %v1150_v38  ;;  %778 = vmatpush1.bf16.msra.mxu1 %v1151_v39  ;;  %v1243_v38 = vld [vmem:[%s1599_s0 + $0x20] ss:$12 sps:$4 sm:$0xff]   ;;  %v121_v39 = vlaneseq }
  0x28   :  { %673 = vmatprep.subr.bf16.mxu0 %v1152_v40  ;;  %779 = vmatprep.subr.bf16.mxu1 %v1154_v41 }
  0x29   :  { %v122_v40 = vshrl.u32 %v121_v39, 7 }
  0x2b   :  { %674 = vmatpush1.bf16.msra.mxu0 %v1156_v42  ;;  %780 = vmatpush1.bf16.msra.mxu1 %v1157_v43  ;;  %v123_v41 = vsub.s32 0, %v122_v40  ;;  %v131_v42 = vsub.s32 2, %v122_v40  ;;  %v119_v43 = vld [vmem:[%s1600_s2] sm:$0xf] }
  0x2c   :  { %675 = vmatprep.subr.bf16.mxu0 %v1158_v44  ;;  %781 = vmatprep.subr.bf16.mxu1 %v1160_v45  ;;  %v127_v44 = vsub.s32 1, %v122_v40  ;;  %v135_v45 = vsub.s32 3, %v122_v40 }
  0x2e   :  { %v128_v48 = vrot.slane %v119_v43, %v127_v44 }
  0x2f   :  { %676 = vmatpush1.bf16.msra.mxu0 %v1162_v46  ;;  %782 = vmatpush1.bf16.msra.mxu1 %v1163_v47  ;;  %v124_v46 = vrot.slane %v119_v43, %v123_v41  ;;  %v132_v47 = vrot.slane %v119_v43, %v131_v42 }
  0x30   :  { %677 = vmatprep.subr.bf16.mxu0 %v1164_v49  ;;  %783 = vmatprep.subr.bf16.mxu1 %v1166_v50  ;;  %v136_v49 = vrot.slane %v119_v43, %v135_v45 }
  0x33   :  { %678 = vmatpush1.bf16.msra.mxu0 %v1168_v51  ;;  %784 = vmatpush1.bf16.msra.mxu1 %v1169_v52 }
  0x34   :  { %679 = vmatprep.subr.bf16.mxu0 %v1170_v53  ;;  %785 = vmatprep.subr.bf16.mxu1 %v1172_v54 }
  0x37   :  { %680 = vmatpush1.bf16.msra.mxu0 %v1174_v55  ;;  %786 = vmatpush1.bf16.msra.mxu1 %v1175_v56 }
  0x38   :  { %681 = vmatprep.subr.bf16.mxu0 %v1176_v57  ;;  %787 = vmatprep.subr.bf16.mxu1 %v1178_v58 }
  0x3b   :  { %682 = vmatpush1.bf16.msra.mxu0 %v1180_v59  ;;  %788 = vmatpush1.bf16.msra.mxu1 %v1181_v60 }
  0x3c   :  { %683 = vmatprep.subr.bf16.mxu0 %v1182_v61  ;;  %789 = vmatprep.subr.bf16.mxu1 %v1184_v62 }
  0x3f   :  { %684 = vmatpush1.bf16.msra.mxu0 %v1186_v63  ;;  %790 = vmatpush1.bf16.msra.mxu1 %v1187_v0 }
  0x40   :  { %706 = vmatprep.subr.bf16.mxu0 %v1193_v1  ;;  %812 = vmatprep.subr.bf16.mxu1 %v1196_v2 }
  0x42   :  { %686 = vmatmul.mubr.bf16.vlgmr.msra.gmra.mrb[0].mxu0 %v1188_v3  ;;  %792 = vmatmul.mubr.bf16.vlgmr.msra.gmra.mrb[0].mxu1 %v1188_v3 }
  0x43   :  { %707 = vmatpush1.bf16.msra.mxu0 %v1191_v4  ;;  %813 = vmatpush1.bf16.msra.mxu1 %v1194_v5 }
  0x44   :  { %708 = vmatprep.subr.bf16.mxu0 %v1199_v6  ;;  %814 = vmatprep.subr.bf16.mxu1 %v1202_v7 }
  0x45   :  { %695 = vmatprep.mubr.bf16.mxu0 %v1227_v8  ;;  %801 = vmatprep.mubr.bf16.mxu1 %v1227_v8 }
  0x47   :  { %709 = vmatpush1.bf16.msra.mxu0 %v1197_v9  ;;  %815 = vmatpush1.bf16.msra.mxu1 %v1200_v10 }
  0x48   :  { %710 = vmatprep.subr.bf16.mxu0 %v1205_v11  ;;  %816 = vmatprep.subr.bf16.mxu1 %v1208_v12 }
  0x4a   :  { %696 = vmatmul.mubr.bf16.gmra.mrb[4].mxu0 %v1229_v13  ;;  %802 = vmatmul.mubr.bf16.gmra.mrb[4].mxu1 %v1229_v13 }
  0x4b   :  { %711 = vmatpush1.bf16.msra.mxu0 %v1203_v14  ;;  %817 = vmatpush1.bf16.msra.mxu1 %v1206_v15 }
  0x4c   :  { %712 = vmatprep.subr.bf16.mxu0 %v1211_v16  ;;  %818 = vmatprep.subr.bf16.mxu1 %v1214_v17 }
  0x4d   :  { %738 = vmatprep.mubr.bf16.mxu0 %v1244_v22  ;;  %844 = vmatprep.mubr.bf16.mxu1 %v1244_v22 }
  0x4f   :  { %713 = vmatpush1.bf16.msra.mxu0 %v1209_v18  ;;  %819 = vmatpush1.bf16.msra.mxu1 %v1212_v19 }
  0x50   :  { %714 = vmatprep.subr.bf16.mxu0 %v1217_v20  ;;  %820 = vmatprep.subr.bf16.mxu1 %v1220_v21 }
  0x53   :  { %715 = vmatpush1.bf16.msra.mxu0 %v1215_v23  ;;  %821 = vmatpush1.bf16.msra.mxu1 %v1218_v24 }
  0x54   :  { %716 = vmatprep.subr.bf16.mxu0 %v1223_v25  ;;  %822 = vmatprep.subr.bf16.mxu1 %v1226_v26 }
  0x57   :  { %717 = vmatpush1.bf16.msra.mxu0 %v1221_v27  ;;  %823 = vmatpush1.bf16.msra.mxu1 %v1224_v28 }
  0x58   :  { %718 = vmatprep.subr.bf16.mxu0 %v1232_v29  ;;  %824 = vmatprep.subr.bf16.mxu1 %v1235_v30 }
  0x5b   :  { %719 = vmatpush1.bf16.msra.mxu0 %v1230_v31  ;;  %825 = vmatpush1.bf16.msra.mxu1 %v1233_v32 }
  0x5c   :  { %720 = vmatprep.subr.bf16.mxu0 %v1238_v33  ;;  %826 = vmatprep.subr.bf16.mxu1 %v1241_v34 }
  0x5f   :  { %721 = vmatpush1.bf16.msra.mxu0 %v1236_v35  ;;  %827 = vmatpush1.bf16.msra.mxu1 %v1239_v36 }
  0x62   :  { %739 = vmatmul.mubr.bf16.vlgmr.msra.gmra.mrb[0].mxu0 %v1242_v37  ;;  %845 = vmatmul.mubr.bf16.vlgmr.msra.gmra.mrb[0].mxu1 %v1242_v37 }
  0x63   :  { %748 = vmatprep.mubr.bf16.mxu0 %v1244_v22  ;;  %854 = vmatprep.mubr.bf16.mxu1 %v1244_v22 }
  0x6a   :  { %749 = vmatmul.mubr.bf16.gmra.mrb[4].mxu0 %v1243_v38  ;;  %855 = vmatmul.mubr.bf16.gmra.mrb[4].mxu1 %v1243_v38 }
 0x135   :  { %v740_v50 = vpop.f32.mrb[0].mxu0  ;;  %v846_v51 = vpop.f32.mrb[0].mxu1 }
 0x136   :  { %v1059_v52 = vadd.f32 %v740_v50, %v124_v46  ;;  %v1067_v53 = vadd.f32 %v846_v51, %v132_v47  ;;  %v742_v54 = vpop.f32.mrb[1].mxu0  ;;  %v848_v55 = vpop.f32.mrb[1].mxu1 }
 0x137   :  { %v1060_v56 = vadd.f32 %v742_v54, %v128_v48  ;;  %v1068_v57 = vadd.f32 %v848_v55, %v136_v49  ;;  %v744_v58 = vpop.f32.mrb[2].mxu0  ;;  %v850_v59 = vpop.f32.mrb[2].mxu1 }
 0x138   :  { %v865_v60 = vmax.f32 %v1059_v52, 0.0  ;;  %v867_v61 = vmax.f32 %v1067_v53, 0.0  ;;  %v1061_v62 = vadd.f32 %v744_v58, %v124_v46  ;;  %v1069_v63 = vadd.f32 %v850_v59, %v132_v47  ;;  %v746_v0 = vpop.f32.mrb[3].mxu0  ;;  %v852_v1 = vpop.f32.mrb[3].mxu1 }
 0x139   :  { %v866_v2 = vmax.f32 %v1060_v56, 0.0  ;;  %v868_v3 = vmax.f32 %v1068_v57, 0.0  ;;  %v1062_v4 = vadd.f32 %v746_v0, %v128_v48  ;;  %v1070_v5 = vadd.f32 %v852_v1, %v136_v49 }
 0x13a   :  { %v869_v6 = vmax.f32 %v1061_v62, 0.0  ;;  %v871_v7 = vmax.f32 %v1069_v63, 0.0 }
 0x13b   :  { %v1051_v8 = vpack.c.bf16 %v866_v2, %v865_v60  ;;  %v1052_v9 = vpack.c.bf16 %v868_v3, %v867_v61  ;;  %v870_v10 = vmax.f32 %v1062_v4, 0.0  ;;  %v872_v11 = vmax.f32 %v1070_v5, 0.0 }
 0x13d   :  { %929 = vst [vmem:[%s1601_s3] sm:$0xff] %v1051_v8  ;;  %930 = vst [vmem:[%s1601_s3 + $0x8] sm:$0xff] %v1052_v9  ;;  %v1053_v12 = vpack.c.bf16 %v870_v10, %v869_v6  ;;  %v1054_v13 = vpack.c.bf16 %v872_v11, %v871_v7  ;;  %v750_v14 = vpop.f32.mrb[4].mxu0  ;;  %v856_v15 = vpop.f32.mrb[4].mxu1 }
 0x13e   :  { %v1063_v16 = vadd.f32 %v750_v14, %v124_v46  ;;  %v1071_v17 = vadd.f32 %v856_v15, %v132_v47  ;;  %v752_v18 = vpop.f32.mrb[5].mxu0  ;;  %v858_v19 = vpop.f32.mrb[5].mxu1 }
 0x13f   :  { %931 = vst [vmem:[%s1601_s3 + $0x10] sm:$0xff] %v1053_v12  ;;  %932 = vst [vmem:[%s1601_s3 + $0x18] sm:$0xff] %v1054_v13  ;;  %v1064_v20 = vadd.f32 %v752_v18, %v128_v48  ;;  %v1072_v21 = vadd.f32 %v858_v19, %v136_v49  ;;  %v754_v22 = vpop.f32.mrb[6].mxu0  ;;  %v860_v23 = vpop.f32.mrb[6].mxu1 }
 0x140   :  { %v873_v24 = vmax.f32 %v1063_v16, 0.0  ;;  %v875_v25 = vmax.f32 %v1071_v17, 0.0  ;;  %v1065_v26 = vadd.f32 %v754_v22, %v124_v46  ;;  %v1073_v27 = vadd.f32 %v860_v23, %v132_v47  ;;  %v756_v28 = vpop.f32.mrb[7].mxu0  ;;  %v862_v29 = vpop.f32.mrb[7].mxu1 }
 0x141   :  { %v874_v30 = vmax.f32 %v1064_v20, 0.0  ;;  %v876_v31 = vmax.f32 %v1072_v21, 0.0  ;;  %v1066_v32 = vadd.f32 %v756_v28, %v128_v48  ;;  %v1074_v33 = vadd.f32 %v862_v29, %v136_v49 }
 0x142   :  { %v877_v34 = vmax.f32 %v1065_v26, 0.0  ;;  %v879_v35 = vmax.f32 %v1073_v27, 0.0 }
 0x143   :  { %v1055_v36 = vpack.c.bf16 %v874_v30, %v873_v24  ;;  %v1056_v37 = vpack.c.bf16 %v876_v31, %v875_v25  ;;  %v878_v38 = vmax.f32 %v1066_v32, 0.0  ;;  %v880_v39 = vmax.f32 %v1074_v33, 0.0 }
 0x145   :  { %933 = vst [vmem:[%s1601_s3 + $0x20] sm:$0xff] %v1055_v36  ;;  %934 = vst [vmem:[%s1601_s3 + $0x28] sm:$0xff] %v1056_v37  ;;  %v1057_v40 = vpack.c.bf16 %v878_v38, %v877_v34  ;;  %v1058_v41 = vpack.c.bf16 %v880_v39, %v879_v35 }
 0x147   :  { %935 = vst [vmem:[%s1601_s3 + $0x30] sm:$0xff] %v1057_v40  ;;  %936 = vst [vmem:[%s1601_s3 + $0x38] sm:$0xff] %v1058_v41 }

// kernel: rtnet_forward.23
= control target key start
LH: loop header
LB: loop body
LE: loop exit
PB: predicated region body
PF: predicated region fallthrough
CT: control target
= control target key end

     0   :  { %s1814_s12 = smov 0   ;;  %s1816_s13 = smov 0   ;;  %s1953_s0 = inlined_call_operand.vmem [shape: bf16[2,32,1152], index: 0, kind: input, shape index: {}]   ;;  %s1954_s1 = inlined_call_operand.vmem [shape: bf16[2,1152,128], index: 1, kind: input, shape index: {}]   ;;  %s1955_s2 = inlined_call_operand.vmem [shape: f32[2,1,128], index: 2, kind: input, shape index: {}]   ;;  %s1956_s3 = inlined_call_operand.vmem [shape: bf16[2,32,128], index: 3, kind: output, shape index: {}]  }
   0x1   :  { %s1818_s14 = smov 0  }
   0x2 LB: > { %s32_s15 = sadd.s32 1, %s1788_s13  ;;  %p1386_p0 = scmp.ge.s32.totalorder %s1792_s14, 1  ;;  %s1792_s14 = sphi %s1818_s14, %s13_s14   ;;  %s1788_s13 = sphi %s1816_s13, %s1958_s13   ;;  %s1784_s12 = sphi %s1814_s12, %s1957_s12  }
   0x3   : > { %p34_p1 = scmp.ge.s32.totalorder %s32_s15, 2  ;;  %p196_p2 = scmp.lt.s32.totalorder %s1792_s14, 3 }
   0x5   : > { %s1960_s15 = smov (%p34_p1, %s32_s15), 0  ;;  %p197_p3 = pnand %p1386_p0, %p196_p2 }
   0x6   : > { %p247_p4 = scmp.lt.s32.totalorder (!%p197_p3), %s1784_s12, 1 }
   0x7   : > { %200 = sbr.rel (%p197_p3) target bundleno = 337 (0x151), region = 32 }
   0xe   : > { %s1962_s12 = smov (!%p247_p4, %s1784_s12), 1 }
   0xf   : > { %s1647_s16 = smul.u32 576, %s1962_s12  ;;  %s270_s26 = scalar_lea.vmem %s1955_s2, %s1962_s12 }
  0x10   : > { %s1646_s20 = smul.u32 144, %s1962_s12  ;;  %s1488_s27 = sshll.u32 %s1962_s12, 4 }
  0x11   : > { %s1838_s19 = scalar_lea.vmem %s1954_s1, %s1647_s16  ;;  %s282_s30 = scalar_lea.vmem %s1956_s3, %s1488_s27 }
  0x12   : > { %v1672_v0 = vld [vmem:[%s1838_s19 + $0x40] sm:$0xff]   ;;  %v1676_v4 = vld [vmem:[%s1838_s19 + $0x48] sm:$0xff]   ;;  %v1680_v8 = vld [vmem:[%s1838_s19 + $0x50] sm:$0xff]   ;;  %s1873_s23 = scalar_lea.vmem %s1953_s0, %s1646_s20 }
  0x13   : > { %v1673_v1 = vld [vmem:[%s1838_s19] sm:$0xff]   ;;  %1504 = vmatprep.subr.bf16.mxu0 %v1672_v0  ;;  %v1677_v5 = vld [vmem:[%s1838_s19 + $0x8] sm:$0xff]   ;;  %v1681_v9 = vld [vmem:[%s1838_s19 + $0x10] sm:$0xff]  }
  0x14   : > { %v1674_v2 = vld [vmem:[%s1838_s19 + $0xc0] sm:$0xff]   ;;  %1505 = vmatpush3.bf16.msra.mxu0 %v1673_v1  ;;  %v1678_v6 = vld [vmem:[%s1838_s19 + $0xc8] sm:$0xff]   ;;  %v1682_v10 = vld [vmem:[%s1838_s19 + $0xd0] sm:$0xff]  }
  0x15   : > { %v1675_v3 = vld [vmem:[%s1838_s19 + $0x80] sm:$0xff]   ;;  %1532 = vmatprep.subr.bf16.mxu1 %v1674_v2  ;;  %1506 = vmatprep.subr.bf16.mxu0 %v1676_v4  ;;  %v1679_v7 = vld [vmem:[%s1838_s19 + $0x88] sm:$0xff]   ;;  %v1683_v11 = vld [vmem:[%s1838_s19 + $0x90] sm:$0xff]  }
  0x16   : > { %1533 = vmatpush3.bf16.msra.mxu1 %v1675_v3  ;;  %v1684_v12 = vld [vmem:[%s1838_s19 + $0x58] sm:$0xff]   ;;  %v1688_v16 = vld [vmem:[%s1838_s19 + $0x60] sm:$0xff]   ;;  %v1692_v20 = vld [vmem:[%s1838_s19 + $0x68] sm:$0xff]  }
  0x17   : > { %1534 = vmatprep.subr.bf16.mxu1 %v1678_v6  ;;  %v1685_v13 = vld [vmem:[%s1838_s19 + $0x18] sm:$0xff]   ;;  %v1689_v17 = vld [vmem:[%s1838_s19 + $0x20] sm:$0xff]   ;;  %v1693_v21 = vld [vmem:[%s1838_s19 + $0x28] sm:$0xff]  }
  0x18   : > { %1507 = vmatpush3.bf16.msra.mxu0 %v1677_v5  ;;  %v1686_v14 = vld [vmem:[%s1838_s19 + $0xd8] sm:$0xff]   ;;  %v1690_v18 = vld [vmem:[%s1838_s19 + $0xe0] sm:$0xff]   ;;  %v1694_v22 = vld [vmem:[%s1838_s19 + $0xe8] sm:$0xff]  }
  0x19   : > { %1508 = vmatprep.subr.bf16.mxu0 %v1680_v8  ;;  %v1687_v15 = vld [vmem:[%s1838_s19 + $0x98] sm:$0xff]   ;;  %v1691_v19 = vld [vmem:[%s1838_s19 + $0xa0] sm:$0xff]   ;;  %v1695_v23 = vld [vmem:[%s1838_s19 + $0xa8] sm:$0xff]  }
  0x1a   : > { %1535 = vmatpush3.bf16.msra.mxu1 %v1679_v7  ;;  %v1696_v24 = vld [vmem:[%s1838_s19 + $0x70] sm:$0xff]   ;;  %v1700_v28 = vld [vmem:[%s1838_s19 + $0x78] sm:$0xff]   ;;  %v1703_v31 = vld [vmem:[%s1873_s23] ss:$36 sps:$4 sm:$0xff]  }
  0x1b   : > { %1536 = vmatprep.subr.bf16.mxu1 %v1682_v10  ;;  %v1697_v25 = vld [vmem:[%s1838_s19 + $0x30] sm:$0xff]   ;;  %v1701_v29 = vld [vmem:[%s1838_s19 + $0x38] sm:$0xff]   ;;  %v1705_v32 = vld [vmem:[%s1873_s23 + $0x4] ss:$36 sps:$4 sm:$0xff]  }
  0x1c   : > { %1509 = vmatpush3.bf16.msra.mxu0 %v1681_v9  ;;  %v1698_v26 = vld [vmem:[%s1838_s19 + $0xf0] sm:$0xff]   ;;  %v1702_v30 = vld [vmem:[%s1838_s19 + $0xf8] sm:$0xff]   ;;  %1012 = vmatprep.mubr.bf16.mxu0 %v1705_v32  ;;  %v1707_v34 = vld [vmem:[%s1838_s19 + $0x140] sm:$0xff]  }
  0x1d   : > { %1510 = vmatprep.subr.bf16.mxu0 %v1684_v12  ;;  %v1699_v27 = vld [vmem:[%s1838_s19 + $0xb0] sm:$0xff]   ;;  %v1706_v33 = vld [vmem:[%s1838_s19 + $0xb8] sm:$0xff]   ;;  %v1708_v35 = vld [vmem:[%s1873_s23 + $0x8] ss:$36 sps:$4 sm:$0xff]  }
  0x1e   : > { %1537 = vmatpush3.bf16.msra.mxu1 %v1683_v11  ;;  %v1710_v36 = vld [vmem:[%s1873_s23 + $0xc] ss:$36 sps:$4 sm:$0xff]   ;;  %v1711_v37 = vld [vmem:[%s1838_s19 + $0x100] sm:$0xff]   ;;  %v1722_v48 = vld [vmem:[%s1838_s19 + $0x158] sm:$0xff]  }
  0x1f   : > { %1538 = vmatprep.subr.bf16.mxu1 %v1686_v14  ;;  %1061 = vmatprep.mubr.bf16.mxu1 %v1710_v36  ;;  %v1712_v38 = vld [vmem:[%s1838_s19 + $0x1c0] sm:$0xff]   ;;  %v1714_v40 = vld [vmem:[%s1838_s19 + $0x148] sm:$0xff]   ;;  %v1718_v44 = vld [vmem:[%s1838_s19 + $0x150] sm:$0xff]  }
  0x20   : > { %1511 = vmatpush3.bf16.msra.mxu0 %v1685_v13  ;;  %v1713_v39 = vld [vmem:[%s1838_s19 + $0x180] sm:$0xff]   ;;  %v1715_v41 = vld [vmem:[%s1838_s19 + $0x108] sm:$0xff]   ;;  %v1719_v45 = vld [vmem:[%s1838_s19 + $0x110] sm:$0xff]  }
  0x21   : > { %1512 = vmatprep.subr.bf16.mxu0 %v1688_v16  ;;  %v1716_v42 = vld [vmem:[%s1838_s19 + $0x1c8] sm:$0xff]   ;;  %v1720_v46 = vld [vmem:[%s1838_s19 + $0x1d0] sm:$0xff]   ;;  %v1723_v49 = vld [vmem:[%s1838_s19 + $0x118] sm:$0xff]  }
  0x22   : > { %1539 = vmatpush3.bf16.msra.mxu1 %v1687_v15  ;;  %v1717_v43 = vld [vmem:[%s1838_s19 + $0x188] sm:$0xff]   ;;  %v1721_v47 = vld [vmem:[%s1838_s19 + $0x190] sm:$0xff]   ;;  %v1724_v50 = vld [vmem:[%s1838_s19 + $0x1d8] sm:$0xff]  }
  0x23   : > { %1540 = vmatprep.subr.bf16.mxu1 %v1690_v18  ;;  %v1725_v51 = vld [vmem:[%s1838_s19 + $0x198] sm:$0xff]   ;;  %v1726_v52 = vld [vmem:[%s1838_s19 + $0x160] sm:$0xff]   ;;  %v1730_v56 = vld [vmem:[%s1838_s19 + $0x168] sm:$0xff]  }
  0x24   : > { %1513 = vmatpush3.bf16.msra.mxu0 %v1689_v17  ;;  %v1727_v53 = vld [vmem:[%s1838_s19 + $0x120] sm:$0xff]   ;;  %v1731_v57 = vld [vmem:[%s1873_s23 + $0x4c] ss:$36 sps:$4 sm:$0xff]   ;;  %v1736_v61 = vld [vmem:[%s1873_s23 + $0x54] ss:$36 sps:$4 sm:$0xff]  }
  0x25   : > { %1514 = vmatprep.subr.bf16.mxu0 %v1692_v20  ;;  %v1728_v54 = vld [vmem:[%s1838_s19 + $0x1e0] sm:$0xff]   ;;  %v1733_v58 = vld [vmem:[%s1838_s19 + $0x128] sm:$0xff]   ;;  %v1739_v63 = vld [vmem:[%s1873_s23 + $0x50] ss:$36 sps:$4 sm:$0xff]  }
  0x26   : > { %1541 = vmatpush3.bf16.msra.mxu1 %v1691_v19  ;;  %v1729_v55 = vld [vmem:[%s1838_s19 + $0x1a0] sm:$0xff]   ;;  %v1734_v59 = vld [vmem:[%s1873_s23 + $0x48] ss:$36 sps:$4 sm:$0xff]   ;;  %v1740_v0 = vld [vmem:[%s1838_s19 + $0x170] sm:$0xff]  }
  0x27   : > { %1542 = vmatprep.subr.bf16.mxu1 %v1694_v22  ;;  %v1735_v60 = vld [vmem:[%s1838_s19 + $0x1e8] sm:$0xff]   ;;  %v1741_v1 = vld [vmem:[%s1838_s19 + $0x130] sm:$0xff]   ;;  %v1744_v4 = vld [vmem:[%s1838_s19 + $0x178] sm:$0xff]  }
  0x28   : > { %1515 = vmatpush3.bf16.msra.mxu0 %v1693_v21  ;;  %v1738_v62 = vld [vmem:[%s1838_s19 + $0x1a8] sm:$0xff]   ;;  %v1742_v2 = vld [vmem:[%s1838_s19 + $0x1f0] sm:$0xff]   ;;  %v1745_v5 = vld [vmem:[%s1838_s19 + $0x138] sm:$0xff]  }
  0x29   : > { %1516 = vmatprep.subr.bf16.mxu0 %v1696_v24  ;;  %v1743_v3 = vld [vmem:[%s1838_s19 + $0x1b0] sm:$0xff]   ;;  %v1746_v6 = vld [vmem:[%s1838_s19 + $0x1f8] sm:$0xff]   ;;  %v1751_v10 = vld [vmem:[%s1838_s19 + $0x200] sm:$0xff]  }
  0x2a   : > { %1543 = vmatpush3.bf16.msra.mxu1 %v1695_v23  ;;  %v1747_v7 = vld [vmem:[%s1873_s23 + $0x10] ss:$36 sps:$4 sm:$0xff]   ;;  %v1750_v9 = vld [vmem:[%s1838_s19 + $0x1b8] sm:$0xff]   ;;  %v1755_v13 = vld [vmem:[%s1838_s19 + $0x208] sm:$0xff]  }
  0x2b   : > { %1544 = vmatprep.subr.bf16.mxu1 %v1698_v26  ;;  %v1749_v8 = vld [vmem:[%s1873_s23 + $0x14] ss:$36 sps:$4 sm:$0xff]   ;;  %v1754_v12 = vld [vmem:[%s1873_s23 + $0x1c] ss:$36 sps:$4 sm:$0xff]   ;;  %v1760_v17 = vld [vmem:[%s1873_s23 + $0x64] ss:$36 sps:$4 sm:$0xff]  }
  0x2c   : > { %1517 = vmatpush3.bf16.msra.mxu0 %v1697_v25  ;;  %v1752_v11 = vld [vmem:[%s1873_s23 + $0x18] ss:$36 sps:$4 sm:$0xff]   ;;  %v1759_v16 = vld [vmem:[%s1838_s19 + $0x210] sm:$0xff]   ;;  %v1762_v18 = vld [vmem:[%s1873_s23 + $0x60] ss:$36 sps:$4 sm:$0xff]  }
  0x2d   : > { %1518 = vmatprep.subr.bf16.mxu0 %v1700_v28  ;;  %v1756_v14 = vld [vmem:[%s1873_s23 + $0x5c] ss:$36 sps:$4 sm:$0xff]   ;;  %v1765_v22 = vld [vmem:[%s1838_s19 + $0x228] sm:$0xff]   ;;  %v1766_v23 = vld [vmem:[%s1838_s19 + $0x230] sm:$0xff]  }
  0x2e   : > { %1545 = vmatpush3.bf16.msra.mxu1 %v1699_v27  ;;  %v1758_v15 = vld [vmem:[%s1873_s23 + $0x58] ss:$36 sps:$4 sm:$0xff]   ;;  %v1764_v20 = vld [vmem:[%s1838_s19 + $0x220] sm:$0xff]   ;;  %v1769_v25 = vld [vmem:[%s1873_s23 + $0x68] ss:$36 sps:$4 sm:$0xff]  }
  0x2f   : > { %1546 = vmatprep.subr.bf16.mxu1 %v1702_v30  ;;  %v1763_v19 = vld [vmem:[%s1838_s19 + $0x218] sm:$0xff]   ;;  %v1768_v21 = vld [vmem:[%s1873_s23 + $0x20] ss:$36 sps:$4 sm:$0xff]  }
  0x30   : > { %1519 = vmatpush3.bf16.msra.mxu0 %v1701_v29  ;;  %v1767_v24 = vld [vmem:[%s1838_s19 + $0x238] sm:$0xff]   ;;  %v1391_v27 = vld [vmem:[%s270_s26] ss:$0 sm:$0xff] }
  0x31   : > { %1560 = vmatprep.subr.bf16.mxu0 %v1707_v34 }
  0x32   : > { %1547 = vmatpush3.bf16.msra.mxu1 %v1706_v33 }
  0x33   : > { %1013 = vmatmul.mubr.bf16.vlgmr.msra.gmra.mrb[0].mxu0 %v1703_v31  ;;  %1588 = vmatprep.subr.bf16.mxu1 %v1712_v38 }
  0x34   : > { %1561 = vmatpush3.bf16.msra.mxu0 %v1711_v37  ;;  %1020 = vmatprep.mubr.bf16.mxu0 %v1731_v57 }
  0x35   : > { %1062 = vmatmul.mubr.bf16.vlgmr.msra.gmra.mrb[0].mxu1 %v1708_v35  ;;  %1562 = vmatprep.subr.bf16.mxu0 %v1714_v40 }
  0x36   : > { %1589 = vmatpush3.bf16.msra.mxu1 %v1713_v39  ;;  %1069 = vmatprep.mubr.bf16.mxu1 %v1736_v61 }
  0x37   : > { %1590 = vmatprep.subr.bf16.mxu1 %v1716_v42 }
  0x38   : > { %1563 = vmatpush3.bf16.msra.mxu0 %v1715_v41 }
  0x39   : > { %1564 = vmatprep.subr.bf16.mxu0 %v1718_v44 }
  0x3a   : > { %1591 = vmatpush3.bf16.msra.mxu1 %v1717_v43 }
  0x3b   : > { %1592 = vmatprep.subr.bf16.mxu1 %v1720_v46  ;;  %1021 = vmatmul.mubr.bf16.gmra.mrb[4].mxu0 %v1734_v59 }
  0x3c   : > { %1565 = vmatpush3.bf16.msra.mxu0 %v1719_v45  ;;  %1110 = vmatprep.mubr.bf16.mxu0 %v1749_v8 }
  0x3d   : > { %1566 = vmatprep.subr.bf16.mxu0 %v1722_v48  ;;  %1070 = vmatmul.mubr.bf16.gmra.mrb[4].mxu1 %v1739_v63 }
  0x3e   : > { %1593 = vmatpush3.bf16.msra.mxu1 %v1721_v47  ;;  %1159 = vmatprep.mubr.bf16.mxu1 %v1754_v12 }
  0x3f   : > { %1594 = vmatprep.subr.bf16.mxu1 %v1724_v50 }
  0x40   : > { %1567 = vmatpush3.bf16.msra.mxu0 %v1723_v49 }
  0x41   : > { %1568 = vmatprep.subr.bf16.mxu0 %v1726_v52 }
  0x42   : > { %1595 = vmatpush3.bf16.msra.mxu1 %v1725_v51 }
  0x43   : > { %1596 = vmatprep.subr.bf16.mxu1 %v1728_v54 }
  0x44   : > { %1569 = vmatpush3.bf16.msra.mxu0 %v1727_v53 }
  0x45   : > { %1570 = vmatprep.subr.bf16.mxu0 %v1730_v56 }
  0x46   : > { %1597 = vmatpush3.bf16.msra.mxu1 %v1729_v55 }
  0x47   : > { %1598 = vmatprep.subr.bf16.mxu1 %v1735_v60 }
  0x48   : > { %1571 = vmatpush3.bf16.msra.mxu0 %v1733_v58 }
  0x49   : > { %1572 = vmatprep.subr.bf16.mxu0 %v1740_v0 }
  0x4a   : > { %1599 = vmatpush3.bf16.msra.mxu1 %v1738_v62 }
  0x4b   : > { %1600 = vmatprep.subr.bf16.mxu1 %v1742_v2 }
  0x4c   : > { %1573 = vmatpush3.bf16.msra.mxu0 %v1741_v1 }
  0x4d   : > { %1574 = vmatprep.subr.bf16.mxu0 %v1744_v4 }
  0x4e   : > { %1601 = vmatpush3.bf16.msra.mxu1 %v1743_v3 }
  0x4f   : > { %1602 = vmatprep.subr.bf16.mxu1 %v1746_v6 }
  0x50   : > { %1575 = vmatpush3.bf16.msra.mxu0 %v1745_v5 }
  0x51   : > { %1626 = vmatprep.subr.bf16.mxu0 %v1751_v10 }
  0x52   : > { %1603 = vmatpush3.bf16.msra.mxu1 %v1750_v9 }
  0x53   : > { %1111 = vmatmul.mubr.bf16.vlgmr.msra.gmra.mrb[8].mxu0 %v1747_v7 }
  0x54   : > { %1627 = vmatpush3.bf16.msra.mxu0 %v1751_v10  ;;  %1118 = vmatprep.mubr.bf16.mxu0 %v1756_v14 }
  0x55   : > { %1160 = vmatmul.mubr.bf16.vlgmr.msra.gmra.mrb[8].mxu1 %v1752_v11  ;;  %1628 = vmatprep.subr.bf16.mxu0 %v1755_v13 }
  0x56   : > { %1167 = vmatprep.mubr.bf16.mxu1 %v1760_v17 }
  0x58   : > { %1629 = vmatpush3.bf16.msra.mxu0 %v1755_v13 }
  0x59   : > { %1630 = vmatprep.subr.bf16.mxu0 %v1759_v16 }
  0x5b   : > { %1119 = vmatmul.mubr.bf16.gmra.mrb[12].mxu0 %v1758_v15 }
  0x5c   : > { %1631 = vmatpush3.bf16.msra.mxu0 %v1759_v16  ;;  %1642 = vmatprep.mubr.bf16.mxu0 %v1768_v21 }
  0x5d   : > { %1168 = vmatmul.mubr.bf16.gmra.mrb[12].mxu1 %v1762_v18  ;;  %1632 = vmatprep.subr.bf16.mxu0 %v1763_v19 }
  0x60   : > { %1633 = vmatpush3.bf16.msra.mxu0 %v1763_v19 }
  0x61   : > { %1634 = vmatprep.subr.bf16.mxu0 %v1764_v20 }
  0x64   : > { %1635 = vmatpush3.bf16.msra.mxu0 %v1764_v20 }
  0x65   : > { %1636 = vmatprep.subr.bf16.mxu0 %v1765_v22 }
  0x68   : > { %1637 = vmatpush3.bf16.msra.mxu0 %v1765_v22 }
  0x69   : > { %1638 = vmatprep.subr.bf16.mxu0 %v1766_v23 }
  0x6c   : > { %1639 = vmatpush3.bf16.msra.mxu0 %v1766_v23 }
  0x6d   : > { %1640 = vmatprep.subr.bf16.mxu0 %v1767_v24 }
  0x70   : > { %1641 = vmatpush3.bf16.msra.mxu0 %v1767_v24 }
  0x73   : > { %1643 = vmatmul.mubr.bf16.vlgmr.msra.gmra.mrb[16].mxu0 %v1769_v25 }
 0x106   : > { %v1520_v26 = vpop.f32.mrb[0].mxu0 }
 0x107   : > { %v1521_v28 = vpop.f32.mrb[1].mxu0 }
 0x108   : > { %v1522_v29 = vadd.f32 %v1521_v28, %v1520_v26  ;;  %v1523_v30 = vpop.f32.mrb[2].mxu0  ;;  %v1548_v31 = vpop.f32.mrb[0].mxu1 }
 0x109   : > { %v1524_v32 = vpop.f32.mrb[3].mxu0  ;;  %v1549_v35 = vpop.f32.mrb[1].mxu1 }
 0x10a   : > { %v1015_v33 = vadd.f32 %v1522_v29, %v1391_v27  ;;  %v1525_v34 = vadd.f32 %v1524_v32, %v1523_v30  ;;  %v1550_v36 = vadd.f32 %v1549_v35, %v1548_v31  ;;  %v1551_v37 = vpop.f32.mrb[2].mxu1 }
 0x10b   : > { %v1552_v39 = vpop.f32.mrb[3].mxu1 }
 0x10c   : > { %v1018_v38 = vadd.f32 %v1525_v34, %v1391_v27  ;;  %v1064_v40 = vadd.f32 %v1550_v36, %v1015_v33  ;;  %v1553_v41 = vadd.f32 %v1552_v39, %v1551_v37 }
 0x10e   : > { %v1067_v42 = vadd.f32 %v1553_v41, %v1018_v38  ;;  %v1526_v43 = vpop.f32.mrb[4].mxu0 }
 0x10f   : > { %v1527_v44 = vpop.f32.mrb[5].mxu0 }
 0x110   : > { %v1528_v45 = vadd.f32 %v1527_v44, %v1526_v43  ;;  %v1529_v46 = vpop.f32.mrb[6].mxu0  ;;  %v1554_v47 = vpop.f32.mrb[4].mxu1 }
 0x111   : > { %v1530_v48 = vpop.f32.mrb[7].mxu0  ;;  %v1555_v51 = vpop.f32.mrb[5].mxu1 }
 0x112   : > { %v1023_v49 = vadd.f32 %v1528_v45, %v1391_v27  ;;  %v1531_v50 = vadd.f32 %v1530_v48, %v1529_v46  ;;  %v1556_v52 = vadd.f32 %v1555_v51, %v1554_v47  ;;  %v1557_v53 = vpop.f32.mrb[6].mxu1 }
 0x113   : > { %v1558_v55 = vpop.f32.mrb[7].mxu1 }
 0x114   : > { %v1026_v54 = vadd.f32 %v1531_v50, %v1391_v27  ;;  %v1072_v56 = vadd.f32 %v1556_v52, %v1023_v49  ;;  %v1559_v57 = vadd.f32 %v1558_v55, %v1557_v53 }
 0x116   : > { %v1075_v58 = vadd.f32 %v1559_v57, %v1026_v54 }
 0x126   : > { %v1576_v59 = vpop.f32.mrb[8].mxu0 }
 0x127   : > { %v1577_v60 = vpop.f32.mrb[9].mxu0 }
 0x128   : > { %v1578_v61 = vadd.f32 %v1577_v60, %v1576_v59  ;;  %v1579_v62 = vpop.f32.mrb[10].mxu0  ;;  %v1604_v63 = vpop.f32.mrb[8].mxu1 }
 0x129   : > { %v1580_v0 = vpop.f32.mrb[11].mxu0  ;;  %v1605_v3 = vpop.f32.mrb[9].mxu1 }
 0x12a   : > { %v1113_v1 = vadd.f32 %v1578_v61, %v1064_v40  ;;  %v1581_v2 = vadd.f32 %v1580_v0, %v1579_v62  ;;  %v1606_v4 = vadd.f32 %v1605_v3, %v1604_v63  ;;  %v1607_v5 = vpop.f32.mrb[10].mxu1 }
 0x12b   : > { %v1608_v7 = vpop.f32.mrb[11].mxu1 }
 0x12c   : > { %v1116_v6 = vadd.f32 %v1581_v2, %v1067_v42  ;;  %v1609_v8 = vadd.f32 %v1608_v7, %v1607_v5  ;;  %v1162_v9 = vadd.f32 %v1606_v4, %v1113_v1 }
 0x12e   : > { %v1582_v10 = vpop.f32.mrb[12].mxu0  ;;  %v1165_v12 = vadd.f32 %v1609_v8, %v1116_v6 }
 0x12f   : > { %v1583_v11 = vpop.f32.mrb[13].mxu0 }
 0x130   : > { %v1584_v13 = vadd.f32 %v1583_v11, %v1582_v10  ;;  %v1585_v14 = vpop.f32.mrb[14].mxu0  ;;  %v1610_v15 = vpop.f32.mrb[12].mxu1 }
 0x131   : > { %v1586_v16 = vpop.f32.mrb[15].mxu0  ;;  %v1611_v19 = vpop.f32.mrb[13].mxu1 }
 0x132   : > { %v1121_v17 = vadd.f32 %v1584_v13, %v1072_v56  ;;  %v1587_v18 = vadd.f32 %v1586_v16, %v1585_v14  ;;  %v1612_v20 = vadd.f32 %v1611_v19, %v1610_v15  ;;  %v1613_v21 = vpop.f32.mrb[14].mxu1 }
 0x133   : > { %v1614_v23 = vpop.f32.mrb[15].mxu1 }
 0x134   : > { %v1124_v22 = vadd.f32 %v1587_v18, %v1075_v58  ;;  %v1615_v24 = vadd.f32 %v1614_v23, %v1613_v21  ;;  %v1170_v25 = vadd.f32 %v1612_v20, %v1121_v17 }
 0x136   : > { %v1173_v26 = vadd.f32 %v1615_v24, %v1124_v22 }
 0x146   : > { %v1644_v27 = vpop.f32.mrb[16].mxu0 }
 0x147   : > { %v1219_v28 = vadd.f32 %v1644_v27, %v1170_v25  ;;  %v1210_v29 = vpop.f32.mrb[17].mxu0 }
 0x148   : > { %v1211_v30 = vadd.f32 %v1210_v29, %v1162_v9  ;;  %v1645_v31 = vpop.f32.mrb[18].mxu0 }
 0x149   : > { %v1222_v32 = vadd.f32 %v1645_v31, %v1173_v26  ;;  %v1213_v33 = vpop.f32.mrb[19].mxu0  ;;  %v1227_v35 = vmax.f32 %v1219_v28, 0.0 }
 0x14a   : > { %v1214_v34 = vadd.f32 %v1213_v33, %v1165_v12  ;;  %v1225_v37 = vmax.f32 %v1211_v30, 0.0 }
 0x14b   : > { %v1228_v36 = vmax.f32 %v1222_v32, 0.0 }
 0x14c   : > { %v1226_v38 = vmax.f32 %v1214_v34, 0.0 }
 0x14d   : > { %v1501_v39 = vpack.c.bf16 %v1228_v36, %v1227_v35 }
 0x14e   : > { %v1496_v40 = vpack.c.bf16 %v1226_v38, %v1225_v37 }
 0x14f   : > { %1503 = vst [vmem:[%s282_s30 + $0x8] sm:$0xff] %v1501_v39  }
 0x150   : > { %1497 = vst [vmem:[%s282_s30] sm:$0xff] %v1496_v40  }
 0x151 PF: > { %s13_s14 = sadd.s32 1, %s1792_s14   ;;  %s1957_s12 = smov %s1788_s13 }
 0x152   : > { %p10_p5 = scmp.ge.s32.totalorder %s13_s14, 4   ;;  %s1958_s13 = smov %s1960_s15 }
 0x154   :  { %12 = sbr.rel (!%p10_p5) target bundleno = 2 (0x2), region = 68 }

// kernel: rtnet_forward.24
= control target key start
LH: loop header
LB: loop body
LE: loop exit
PB: predicated region body
PF: predicated region fallthrough
CT: control target
= control target key end

     0   :  { %s3093_s12 = smov 0   ;;  %s3095_s13 = smov 0   ;;  %s3809_s0 = inlined_call_operand.vmem [shape: bf16[32,768], index: 0, kind: input, shape index: {}]   ;;  %s3810_s1 = inlined_call_operand.vmem [shape: bf16[768,1024], index: 1, kind: input, shape index: {}]   ;;  %s3811_s2 = inlined_call_operand.vmem [shape: f32[1,1024], index: 2, kind: input, shape index: {}]   ;;  %s3812_s3 = inlined_call_operand.vmem [shape: bf16[32,1024], index: 3, kind: output, shape index: {}]  }
   0x1   :  { %s3097_s14 = smov 0   ;;  %s3099_s15 = smov 0  }
   0x2   :  { %s3101_s16 = smov 0  }
   0x3 LB: > { %s22_s17 = sadd.s32 1, %s3067_s15  ;;  %s2400_s18 = sadd.s32 4294967295, %s3071_s16   ;;  %s3071_s16 = sphi %s3101_s16, %s13_s16   ;;  %s3067_s15 = sphi %s3099_s15, %s3817_s15   ;;  %s3063_s14 = sphi %s3097_s14, %s3816_s14   ;;  %s3059_s13 = sphi %s3095_s13, %s3815_s13   ;;  %s3055_s12 = sphi %s3093_s12, %s3814_s12  }
   0x4   : > { %p23_p0 = scmp.ge.s32.totalorder %s22_s17, 2  ;;  %p65_p1 = scmp.ne.s32.totalorder %s3059_s13, %s3055_s12 }
   0x5   : > { %p66_p2 = scmp.eq.s32.totalorder %s3071_s16, 0  ;;  %p123_p4 = scmp.eq.s32.totalorder %s2400_s18, 1 }
   0x6   : > { %s3819_s17 = smov (%p23_p0, %s22_s17), 0  ;;  %s58_s20 = sadd.s32 1, %s3059_s13 }
   0x7   : > { %p67_p3 = por %p66_p2, %p65_p1  ;;  %s55_s19 = ssub.s32 %s3067_s15, %s3819_s17 }
   0x8   : > { %p56_p5 = scmp.eq.s32.totalorder %s55_s19, 0  ;;  %p3128_p6 = por %p123_p4, %p65_p1 }
   0x9   : > { %p2404_p7 = scmp.ge.s32.totalorder %s3071_s16, 2 }
   0xa   : > { %s3133_s22 = scalar_select %p56_p5, %s3059_s13, %s58_s20  }
   0xb   : > { %155 = sbr.rel (%p2404_p7) target bundleno = 118 (0x76), region = 20 }
  0x12   : > { %158 = sbr.rel (!%p67_p3) target bundleno = 118 (0x76), region = 24  ;;  %s160_s23 = sand.u32 (%p67_p3), 1, %s3059_s13  }
  0x13   : > { %s2627_s24 = sshll.u32 (%p67_p3), %s3067_s15, 4  ;;  %s2685_s25 = smul.u32 (%p67_p3), 1536, %s160_s23 }
  0x14   : > { %s3141_s28 = scalar_lea.vmem (%p67_p3), %s3810_s1, %s2627_s24 }
  0x15   : > { %v178_v0 = vld [vmem:[%s3141_s28] sm:$0xff] (%p67_p3)  ;;  %v180_v1 = vld [vmem:[%s3141_s28 + $0x8] sm:$0xff] (%p67_p3)  ;;  %s3149_s29 = scalar_lea.vmem (%p67_p3), [#allocation2], %s2685_s25 }
  0x16   : > { %v182_v2 = vld [vmem:[%s3141_s28 + $0x20] sm:$0xff] (%p67_p3)  ;;  %v184_v3 = vld [vmem:[%s3141_s28 + $0x28] sm:$0xff] (%p67_p3)  ;;  %179 = vst [vmem:[%s3149_s29] sm:$0xff] (%p67_p3), %v178_v0  ;;  %181 = vst [vmem:[%s3149_s29 + $0x8] sm:$0xff] (%p67_p3), %v180_v1 }
  0x17   : > { %v186_v4 = vld [vmem:[%s3141_s28 + $0x40] sm:$0xff] (%p67_p3)  ;;  %v188_v5 = vld [vmem:[%s3141_s28 + $0x48] sm:$0xff] (%p67_p3)  ;;  %183 = vst [vmem:[%s3149_s29 + $0x10] sm:$0xff] (%p67_p3), %v182_v2  ;;  %185 = vst [vmem:[%s3149_s29 + $0x18] sm:$0xff] (%p67_p3), %v184_v3 }
  0x18   : > { %187 = vst [vmem:[%s3149_s29 + $0x20] sm:$0xff] (%p67_p3), %v186_v4  ;;  %189 = vst [vmem:[%s3149_s29 + $0x28] sm:$0xff] (%p67_p3), %v188_v5  ;;  %v190_v6 = vld [vmem:[%s3141_s28 + $0x60] sm:$0xff] (%p67_p3)  ;;  %v192_v7 = vld [vmem:[%s3141_s28 + $0x68] sm:$0xff] (%p67_p3) }
  0x19   : > { %v194_v8 = vld [vmem:[%s3141_s28 + $0x80] sm:$0xff]  ;;  %191 = vst [vmem:[%s3149_s29 + $0x30] sm:$0xff] %v190_v6  ;;  %193 = vst [vmem:[%s3149_s29 + $0x38] sm:$0xff] %v192_v7  ;;  %v196_v9 = vld [vmem:[%s3141_s28 + $0x88] sm:$0xff] }
  0x1a   : > { %195 = vst [vmem:[%s3149_s29 + $0x40] sm:$0xff] %v194_v8  ;;  %v198_v10 = vld [vmem:[%s3141_s28 + $0xa0] sm:$0xff]  ;;  %v200_v11 = vld [vmem:[%s3141_s28 + $0xa8] sm:$0xff]  ;;  %197 = vst [vmem:[%s3149_s29 + $0x48] sm:$0xff] %v196_v9 }
  0x1b   : > { %199 = vst [vmem:[%s3149_s29 + $0x50] sm:$0xff] %v198_v10  ;;  %201 = vst [vmem:[%s3149_s29 + $0x58] sm:$0xff] %v200_v11  ;;  %v202_v12 = vld [vmem:[%s3141_s28 + $0xc0] sm:$0xff]  ;;  %v204_v13 = vld [vmem:[%s3141_s28 + $0xc8] sm:$0xff] }
  0x1c   : > { %v206_v14 = vld [vmem:[%s3141_s28 + $0xe0] sm:$0xff]  ;;  %203 = vst [vmem:[%s3149_s29 + $0x60] sm:$0xff] %v202_v12  ;;  %205 = vst [vmem:[%s3149_s29 + $0x68] sm:$0xff] %v204_v13  ;;  %v208_v15 = vld [vmem:[%s3141_s28 + $0xe8] sm:$0xff] }
  0x1d   : > { %207 = vst [vmem:[%s3149_s29 + $0x70] sm:$0xff] %v206_v14  ;;  %v210_v16 = vld [vmem:[%s3141_s28 + $0x100] sm:$0xff]  ;;  %v212_v17 = vld [vmem:[%s3141_s28 + $0x108] sm:$0xff]  ;;  %209 = vst [vmem:[%s3149_s29 + $0x78] sm:$0xff] %v208_v15 }
  0x1e   : > { %211 = vst [vmem:[%s3149_s29 + $0x80] sm:$0xff] %v210_v16  ;;  %213 = vst [vmem:[%s3149_s29 + $0x88] sm:$0xff] %v212_v17  ;;  %v214_v18 = vld [vmem:[%s3141_s28 + $0x120] sm:$0xff]  ;;  %v216_v19 = vld [vmem:[%s3141_s28 + $0x128] sm:$0xff] }
  0x1f   : > { %v218_v20 = vld [vmem:[%s3141_s28 + $0x140] sm:$0xff]  ;;  %215 = vst [vmem:[%s3149_s29 + $0x90] sm:$0xff] %v214_v18  ;;  %217 = vst [vmem:[%s3149_s29 + $0x98] sm:$0xff] %v216_v19  ;;  %v220_v21 = vld [vmem:[%s3141_s28 + $0x148] sm:$0xff] }
  0x20   : > { %219 = vst [vmem:[%s3149_s29 + $0xa0] sm:$0xff] %v218_v20  ;;  %v222_v22 = vld [vmem:[%s3141_s28 + $0x160] sm:$0xff]  ;;  %v224_v23 = vld [vmem:[%s3141_s28 + $0x168] sm:$0xff]  ;;  %221 = vst [vmem:[%s3149_s29 + $0xa8] sm:$0xff] %v220_v21 }
  0x21   : > { %223 = vst [vmem:[%s3149_s29 + $0xb0] sm:$0xff] %v222_v22  ;;  %225 = vst [vmem:[%s3149_s29 + $0xb8] sm:$0xff] %v224_v23  ;;  %v226_v24 = vld [vmem:[%s3141_s28 + $0x180] sm:$0xff]  ;;  %v228_v25 = vld [vmem:[%s3141_s28 + $0x188] sm:$0xff] }
  0x22   : > { %v230_v26 = vld [vmem:[%s3141_s28 + $0x1a0] sm:$0xff]  ;;  %227 = vst [vmem:[%s3149_s29 + $0xc0] sm:$0xff] %v226_v24  ;;  %229 = vst [vmem:[%s3149_s29 + $0xc8] sm:$0xff] %v228_v25  ;;  %v232_v27 = vld [vmem:[%s3141_s28 + $0x1a8] sm:$0xff] }
  0x23   : > { %231 = vst [vmem:[%s3149_s29 + $0xd0] sm:$0xff] %v230_v26  ;;  %v234_v28 = vld [vmem:[%s3141_s28 + $0x1c0] sm:$0xff]  ;;  %v236_v29 = vld [vmem:[%s3141_s28 + $0x1c8] sm:$0xff]  ;;  %233 = vst [vmem:[%s3149_s29 + $0xd8] sm:$0xff] %v232_v27 }
  0x24   : > { %235 = vst [vmem:[%s3149_s29 + $0xe0] sm:$0xff] %v234_v28  ;;  %237 = vst [vmem:[%s3149_s29 + $0xe8] sm:$0xff] %v236_v29  ;;  %v238_v30 = vld [vmem:[%s3141_s28 + $0x1e0] sm:$0xff]  ;;  %v240_v31 = vld [vmem:[%s3141_s28 + $0x1e8] sm:$0xff] }
  0x25   : > { %v242_v32 = vld [vmem:[%s3141_s28 + $0x200] sm:$0xff]  ;;  %239 = vst [vmem:[%s3149_s29 + $0xf0] sm:$0xff] %v238_v30  ;;  %241 = vst [vmem:[%s3149_s29 + $0xf8] sm:$0xff] %v240_v31  ;;  %v244_v33 = vld [vmem:[%s3141_s28 + $0x208] sm:$0xff] }
  0x26   : > { %243 = vst [vmem:[%s3149_s29 + $0x100] sm:$0xff] %v242_v32  ;;  %v246_v34 = vld [vmem:[%s3141_s28 + $0x220] sm:$0xff]  ;;  %v248_v35 = vld [vmem:[%s3141_s28 + $0x228] sm:$0xff]  ;;  %245 = vst [vmem:[%s3149_s29 + $0x108] sm:$0xff] %v244_v33 }
  0x27   : > { %247 = vst [vmem:[%s3149_s29 + $0x110] sm:$0xff] %v246_v34  ;;  %249 = vst [vmem:[%s3149_s29 + $0x118] sm:$0xff] %v248_v35  ;;  %v250_v36 = vld [vmem:[%s3141_s28 + $0x240] sm:$0xff]  ;;  %v252_v37 = vld [vmem:[%s3141_s28 + $0x248] sm:$0xff] }
  0x28   : > { %v254_v38 = vld [vmem:[%s3141_s28 + $0x260] sm:$0xff]  ;;  %251 = vst [vmem:[%s3149_s29 + $0x120] sm:$0xff] %v250_v36  ;;  %253 = vst [vmem:[%s3149_s29 + $0x128] sm:$0xff] %v252_v37  ;;  %v256_v39 = vld [vmem:[%s3141_s28 + $0x268] sm:$0xff] }
  0x29   : > { %255 = vst [vmem:[%s3149_s29 + $0x130] sm:$0xff] %v254_v38  ;;  %v258_v40 = vld [vmem:[%s3141_s28 + $0x280] sm:$0xff]  ;;  %v260_v41 = vld [vmem:[%s3141_s28 + $0x288] sm:$0xff]  ;;  %257 = vst [vmem:[%s3149_s29 + $0x138] sm:$0xff] %v256_v39 }
  0x2a   : > { %259 = vst [vmem:[%s3149_s29 + $0x140] sm:$0xff] %v258_v40  ;;  %261 = vst [vmem:[%s3149_s29 + $0x148] sm:$0xff] %v260_v41  ;;  %v262_v42 = vld [vmem:[%s3141_s28 + $0x2a0] sm:$0xff]  ;;  %v264_v43 = vld [vmem:[%s3141_s28 + $0x2a8] sm:$0xff] }
  0x2b   : > { %v266_v44 = vld [vmem:[%s3141_s28 + $0x2c0] sm:$0xff]  ;;  %263 = vst [vmem:[%s3149_s29 + $0x150] sm:$0xff] %v262_v42  ;;  %265 = vst [vmem:[%s3149_s29 + $0x158] sm:$0xff] %v264_v43  ;;  %v268_v45 = vld [vmem:[%s3141_s28 + $0x2c8] sm:$0xff] }
  0x2c   : > { %267 = vst [vmem:[%s3149_s29 + $0x160] sm:$0xff] %v266_v44  ;;  %v270_v46 = vld [vmem:[%s3141_s28 + $0x2e0] sm:$0xff]  ;;  %v272_v47 = vld [vmem:[%s3141_s28 + $0x2e8] sm:$0xff]  ;;  %269 = vst [vmem:[%s3149_s29 + $0x168] sm:$0xff] %v268_v45 }
  0x2d   : > { %271 = vst [vmem:[%s3149_s29 + $0x170] sm:$0xff] %v270_v46  ;;  %273 = vst [vmem:[%s3149_s29 + $0x178] sm:$0xff] %v272_v47  ;;  %v274_v48 = vld [vmem:[%s3141_s28 + $0x300] sm:$0xff]  ;;  %v276_v49 = vld [vmem:[%s3141_s28 + $0x308] sm:$0xff] }
  0x2e   : > { %v278_v50 = vld [vmem:[%s3141_s28 + $0x320] sm:$0xff]  ;;  %275 = vst [vmem:[%s3149_s29 + $0x180] sm:$0xff] %v274_v48  ;;  %277 = vst [vmem:[%s3149_s29 + $0x188] sm:$0xff] %v276_v49  ;;  %v280_v51 = vld [vmem:[%s3141_s28 + $0x328] sm:$0xff] }
  0x2f   : > { %279 = vst [vmem:[%s3149_s29 + $0x190] sm:$0xff] %v278_v50  ;;  %v282_v52 = vld [vmem:[%s3141_s28 + $0x340] sm:$0xff]  ;;  %v284_v53 = vld [vmem:[%s3141_s28 + $0x348] sm:$0xff]  ;;  %281 = vst [vmem:[%s3149_s29 + $0x198] sm:$0xff] %v280_v51 }
  0x30   : > { %283 = vst [vmem:[%s3149_s29 + $0x1a0] sm:$0xff] %v282_v52  ;;  %285 = vst [vmem:[%s3149_s29 + $0x1a8] sm:$0xff] %v284_v53  ;;  %v286_v54 = vld [vmem:[%s3141_s28 + $0x360] sm:$0xff]  ;;  %v288_v55 = vld [vmem:[%s3141_s28 + $0x368] sm:$0xff] }
  0x31   : > { %v290_v56 = vld [vmem:[%s3141_s28 + $0x380] sm:$0xff]  ;;  %287 = vst [vmem:[%s3149_s29 + $0x1b0] sm:$0xff] %v286_v54  ;;  %289 = vst [vmem:[%s3149_s29 + $0x1b8] sm:$0xff] %v288_v55  ;;  %v292_v57 = vld [vmem:[%s3141_s28 + $0x388] sm:$0xff] }
  0x32   : > { %291 = vst [vmem:[%s3149_s29 + $0x1c0] sm:$0xff] %v290_v56  ;;  %v294_v58 = vld [vmem:[%s3141_s28 + $0x3a0] sm:$0xff]  ;;  %v296_v59 = vld [vmem:[%s3141_s28 + $0x3a8] sm:$0xff]  ;;  %293 = vst [vmem:[%s3149_s29 + $0x1c8] sm:$0xff] %v292_v57 }
  0x33   : > { %295 = vst [vmem:[%s3149_s29 + $0x1d0] sm:$0xff] %v294_v58  ;;  %297 = vst [vmem:[%s3149_s29 + $0x1d8] sm:$0xff] %v296_v59  ;;  %v298_v60 = vld [vmem:[%s3141_s28 + $0x3c0] sm:$0xff]  ;;  %v300_v61 = vld [vmem:[%s3141_s28 + $0x3c8] sm:$0xff] }
  0x34   : > { %v302_v62 = vld [vmem:[%s3141_s28 + $0x3e0] sm:$0xff]  ;;  %299 = vst [vmem:[%s3149_s29 + $0x1e0] sm:$0xff] %v298_v60  ;;  %301 = vst [vmem:[%s3149_s29 + $0x1e8] sm:$0xff] %v300_v61  ;;  %v304_v63 = vld [vmem:[%s3141_s28 + $0x3e8] sm:$0xff] }
  0x35   : > { %303 = vst [vmem:[%s3149_s29 + $0x1f0] sm:$0xff] %v302_v62  ;;  %v306_v0 = vld [vmem:[%s3141_s28 + $0x400] sm:$0xff]  ;;  %v308_v1 = vld [vmem:[%s3141_s28 + $0x408] sm:$0xff]  ;;  %305 = vst [vmem:[%s3149_s29 + $0x1f8] sm:$0xff] %v304_v63 }
  0x36   : > { %307 = vst [vmem:[%s3149_s29 + $0x200] sm:$0xff] %v306_v0  ;;  %309 = vst [vmem:[%s3149_s29 + $0x208] sm:$0xff] %v308_v1  ;;  %v310_v2 = vld [vmem:[%s3141_s28 + $0x420] sm:$0xff]  ;;  %v312_v3 = vld [vmem:[%s3141_s28 + $0x428] sm:$0xff] }
  0x37   : > { %v314_v4 = vld [vmem:[%s3141_s28 + $0x440] sm:$0xff]  ;;  %311 = vst [vmem:[%s3149_s29 + $0x210] sm:$0xff] %v310_v2  ;;  %313 = vst [vmem:[%s3149_s29 + $0x218] sm:$0xff] %v312_v3  ;;  %v316_v5 = vld [vmem:[%s3141_s28 + $0x448] sm:$0xff] }
  0x38   : > { %315 = vst [vmem:[%s3149_s29 + $0x220] sm:$0xff] %v314_v4  ;;  %v318_v6 = vld [vmem:[%s3141_s28 + $0x460] sm:$0xff]  ;;  %v320_v7 = vld [vmem:[%s3141_s28 + $0x468] sm:$0xff]  ;;  %317 = vst [vmem:[%s3149_s29 + $0x228] sm:$0xff] %v316_v5 }
  0x39   : > { %319 = vst [vmem:[%s3149_s29 + $0x230] sm:$0xff] %v318_v6  ;;  %321 = vst [vmem:[%s3149_s29 + $0x238] sm:$0xff] %v320_v7  ;;  %v322_v8 = vld [vmem:[%s3141_s28 + $0x480] sm:$0xff]  ;;  %v324_v9 = vld [vmem:[%s3141_s28 + $0x488] sm:$0xff] }
  0x3a   : > { %v326_v10 = vld [vmem:[%s3141_s28 + $0x4a0] sm:$0xff]  ;;  %323 = vst [vmem:[%s3149_s29 + $0x240] sm:$0xff] %v322_v8  ;;  %325 = vst [vmem:[%s3149_s29 + $0x248] sm:$0xff] %v324_v9  ;;  %v328_v11 = vld [vmem:[%s3141_s28 + $0x4a8] sm:$0xff] }
  0x3b   : > { %327 = vst [vmem:[%s3149_s29 + $0x250] sm:$0xff] %v326_v10  ;;  %v330_v12 = vld [vmem:[%s3141_s28 + $0x4c0] sm:$0xff]  ;;  %v332_v13 = vld [vmem:[%s3141_s28 + $0x4c8] sm:$0xff]  ;;  %329 = vst [vmem:[%s3149_s29 + $0x258] sm:$0xff] %v328_v11 }
  0x3c   : > { %331 = vst [vmem:[%s3149_s29 + $0x260] sm:$0xff] %v330_v12  ;;  %333 = vst [vmem:[%s3149_s29 + $0x268] sm:$0xff] %v332_v13  ;;  %v334_v14 = vld [vmem:[%s3141_s28 + $0x4e0] sm:$0xff]  ;;  %v336_v15 = vld [vmem:[%s3141_s28 + $0x4e8] sm:$0xff] }
  0x3d   : > { %v338_v16 = vld [vmem:[%s3141_s28 + $0x500] sm:$0xff]  ;;  %335 = vst [vmem:[%s3149_s29 + $0x270] sm:$0xff] %v334_v14  ;;  %337 = vst [vmem:[%s3149_s29 + $0x278] sm:$0xff] %v336_v15  ;;  %v340_v17 = vld [vmem:[%s3141_s28 + $0x508] sm:$0xff] }
  0x3e   : > { %339 = vst [vmem:[%s3149_s29 + $0x280] sm:$0xff] %v338_v16  ;;  %v342_v18 = vld [vmem:[%s3141_s28 + $0x520] sm:$0xff]  ;;  %v344_v19 = vld [vmem:[%s3141_s28 + $0x528] sm:$0xff]  ;;  %341 = vst [vmem:[%s3149_s29 + $0x288] sm:$0xff] %v340_v17 }
  0x3f   : > { %343 = vst [vmem:[%s3149_s29 + $0x290] sm:$0xff] %v342_v18  ;;  %345 = vst [vmem:[%s3149_s29 + $0x298] sm:$0xff] %v344_v19  ;;  %v346_v20 = vld [vmem:[%s3141_s28 + $0x540] sm:$0xff]  ;;  %v348_v21 = vld [vmem:[%s3141_s28 + $0x548] sm:$0xff] }
  0x40   : > { %v350_v22 = vld [vmem:[%s3141_s28 + $0x560] sm:$0xff]  ;;  %347 = vst [vmem:[%s3149_s29 + $0x2a0] sm:$0xff] %v346_v20  ;;  %349 = vst [vmem:[%s3149_s29 + $0x2a8] sm:$0xff] %v348_v21  ;;  %v352_v23 = vld [vmem:[%s3141_s28 + $0x568] sm:$0xff] }
  0x41   : > { %351 = vst [vmem:[%s3149_s29 + $0x2b0] sm:$0xff] %v350_v22  ;;  %v354_v24 = vld [vmem:[%s3141_s28 + $0x580] sm:$0xff]  ;;  %v356_v25 = vld [vmem:[%s3141_s28 + $0x588] sm:$0xff]  ;;  %353 = vst [vmem:[%s3149_s29 + $0x2b8] sm:$0xff] %v352_v23 }
  0x42   : > { %355 = vst [vmem:[%s3149_s29 + $0x2c0] sm:$0xff] %v354_v24  ;;  %357 = vst [vmem:[%s3149_s29 + $0x2c8] sm:$0xff] %v356_v25  ;;  %v358_v26 = vld [vmem:[%s3141_s28 + $0x5a0] sm:$0xff]  ;;  %v360_v27 = vld [vmem:[%s3141_s28 + $0x5a8] sm:$0xff] }
  0x43   : > { %v362_v28 = vld [vmem:[%s3141_s28 + $0x5c0] sm:$0xff]  ;;  %359 = vst [vmem:[%s3149_s29 + $0x2d0] sm:$0xff] %v358_v26  ;;  %361 = vst [vmem:[%s3149_s29 + $0x2d8] sm:$0xff] %v360_v27  ;;  %v364_v29 = vld [vmem:[%s3141_s28 + $0x5c8] sm:$0xff] }
  0x44   : > { %363 = vst [vmem:[%s3149_s29 + $0x2e0] sm:$0xff] %v362_v28  ;;  %v366_v30 = vld [vmem:[%s3141_s28 + $0x5e0] sm:$0xff]  ;;  %v368_v31 = vld [vmem:[%s3141_s28 + $0x5e8] sm:$0xff]  ;;  %365 = vst [vmem:[%s3149_s29 + $0x2e8] sm:$0xff] %v364_v29 }
  0x45   : > { %367 = vst [vmem:[%s3149_s29 + $0x2f0] sm:$0xff] %v366_v30  ;;  %369 = vst [vmem:[%s3149_s29 + $0x2f8] sm:$0xff] %v368_v31  ;;  %v370_v32 = vld [vmem:[%s3141_s28 + $0x600] sm:$0xff]  ;;  %v372_v33 = vld [vmem:[%s3141_s28 + $0x608] sm:$0xff] }
  0x46   : > { %v374_v34 = vld [vmem:[%s3141_s28 + $0x620] sm:$0xff]  ;;  %371 = vst [vmem:[%s3149_s29 + $0x300] sm:$0xff] %v370_v32  ;;  %373 = vst [vmem:[%s3149_s29 + $0x308] sm:$0xff] %v372_v33  ;;  %v376_v35 = vld [vmem:[%s3141_s28 + $0x628] sm:$0xff] }
  0x47   : > { %375 = vst [vmem:[%s3149_s29 + $0x310] sm:$0xff] %v374_v34  ;;  %v378_v36 = vld [vmem:[%s3141_s28 + $0x640] sm:$0xff]  ;;  %v380_v37 = vld [vmem:[%s3141_s28 + $0x648] sm:$0xff]  ;;  %377 = vst [vmem:[%s3149_s29 + $0x318] sm:$0xff] %v376_v35 }
  0x48   : > { %379 = vst [vmem:[%s3149_s29 + $0x320] sm:$0xff] %v378_v36  ;;  %381 = vst [vmem:[%s3149_s29 + $0x328] sm:$0xff] %v380_v37  ;;  %v382_v38 = vld [vmem:[%s3141_s28 + $0x660] sm:$0xff]  ;;  %v384_v39 = vld [vmem:[%s3141_s28 + $0x668] sm:$0xff] }
  0x49   : > { %v386_v40 = vld [vmem:[%s3141_s28 + $0x680] sm:$0xff]  ;;  %383 = vst [vmem:[%s3149_s29 + $0x330] sm:$0xff] %v382_v38  ;;  %385 = vst [vmem:[%s3149_s29 + $0x338] sm:$0xff] %v384_v39  ;;  %v388_v41 = vld [vmem:[%s3141_s28 + $0x688] sm:$0xff] }
  0x4a   : > { %387 = vst [vmem:[%s3149_s29 + $0x340] sm:$0xff] %v386_v40  ;;  %v390_v42 = vld [vmem:[%s3141_s28 + $0x6a0] sm:$0xff]  ;;  %v392_v43 = vld [vmem:[%s3141_s28 + $0x6a8] sm:$0xff]  ;;  %389 = vst [vmem:[%s3149_s29 + $0x348] sm:$0xff] %v388_v41 }
  0x4b   : > { %391 = vst [vmem:[%s3149_s29 + $0x350] sm:$0xff] %v390_v42  ;;  %393 = vst [vmem:[%s3149_s29 + $0x358] sm:$0xff] %v392_v43  ;;  %v394_v44 = vld [vmem:[%s3141_s28 + $0x6c0] sm:$0xff]  ;;  %v396_v45 = vld [vmem:[%s3141_s28 + $0x6c8] sm:$0xff] }
  0x4c   : > { %v398_v46 = vld [vmem:[%s3141_s28 + $0x6e0] sm:$0xff]  ;;  %395 = vst [vmem:[%s3149_s29 + $0x360] sm:$0xff] %v394_v44  ;;  %397 = vst [vmem:[%s3149_s29 + $0x368] sm:$0xff] %v396_v45  ;;  %v400_v47 = vld [vmem:[%s3141_s28 + $0x6e8] sm:$0xff] }
  0x4d   : > { %399 = vst [vmem:[%s3149_s29 + $0x370] sm:$0xff] %v398_v46  ;;  %v402_v48 = vld [vmem:[%s3141_s28 + $0x700] sm:$0xff]  ;;  %v404_v49 = vld [vmem:[%s3141_s28 + $0x708] sm:$0xff]  ;;  %401 = vst [vmem:[%s3149_s29 + $0x378] sm:$0xff] %v400_v47 }
  0x4e   : > { %403 = vst [vmem:[%s3149_s29 + $0x380] sm:$0xff] %v402_v48  ;;  %405 = vst [vmem:[%s3149_s29 + $0x388] sm:$0xff] %v404_v49  ;;  %v406_v50 = vld [vmem:[%s3141_s28 + $0x720] sm:$0xff]  ;;  %v408_v51 = vld [vmem:[%s3141_s28 + $0x728] sm:$0xff] }
  0x4f   : > { %v410_v52 = vld [vmem:[%s3141_s28 + $0x740] sm:$0xff]  ;;  %407 = vst [vmem:[%s3149_s29 + $0x390] sm:$0xff] %v406_v50  ;;  %409 = vst [vmem:[%s3149_s29 + $0x398] sm:$0xff] %v408_v51  ;;  %v412_v53 = vld [vmem:[%s3141_s28 + $0x748] sm:$0xff] }
  0x50   : > { %411 = vst [vmem:[%s3149_s29 + $0x3a0] sm:$0xff] %v410_v52  ;;  %v414_v54 = vld [vmem:[%s3141_s28 + $0x760] sm:$0xff]  ;;  %v416_v55 = vld [vmem:[%s3141_s28 + $0x768] sm:$0xff]  ;;  %413 = vst [vmem:[%s3149_s29 + $0x3a8] sm:$0xff] %v412_v53 }
  0x51   : > { %415 = vst [vmem:[%s3149_s29 + $0x3b0] sm:$0xff] %v414_v54  ;;  %417 = vst [vmem:[%s3149_s29 + $0x3b8] sm:$0xff] %v416_v55  ;;  %v418_v56 = vld [vmem:[%s3141_s28 + $0x780] sm:$0xff]  ;;  %v420_v57 = vld [vmem:[%s3141_s28 + $0x788] sm:$0xff] }
  0x52   : > { %v422_v58 = vld [vmem:[%s3141_s28 + $0x7a0] sm:$0xff]  ;;  %419 = vst [vmem:[%s3149_s29 + $0x3c0] sm:$0xff] %v418_v56  ;;  %421 = vst [vmem:[%s3149_s29 + $0x3c8] sm:$0xff] %v420_v57  ;;  %v424_v59 = vld [vmem:[%s3141_s28 + $0x7a8] sm:$0xff] }
  0x53   : > { %423 = vst [vmem:[%s3149_s29 + $0x3d0] sm:$0xff] %v422_v58  ;;  %v426_v60 = vld [vmem:[%s3141_s28 + $0x7c0] sm:$0xff]  ;;  %v428_v61 = vld [vmem:[%s3141_s28 + $0x7c8] sm:$0xff]  ;;  %425 = vst [vmem:[%s3149_s29 + $0x3d8] sm:$0xff] %v424_v59 }
  0x54   : > { %427 = vst [vmem:[%s3149_s29 + $0x3e0] sm:$0xff] %v426_v60  ;;  %429 = vst [vmem:[%s3149_s29 + $0x3e8] sm:$0xff] %v428_v61  ;;  %v430_v62 = vld [vmem:[%s3141_s28 + $0x7e0] sm:$0xff]  ;;  %v432_v63 = vld [vmem:[%s3141_s28 + $0x7e8] sm:$0xff] }
  0x55   : > { %v434_v0 = vld [vmem:[%s3141_s28 + $0x800] sm:$0xff]  ;;  %431 = vst [vmem:[%s3149_s29 + $0x3f0] sm:$0xff] %v430_v62  ;;  %433 = vst [vmem:[%s3149_s29 + $0x3f8] sm:$0xff] %v432_v63  ;;  %v436_v1 = vld [vmem:[%s3141_s28 + $0x808] sm:$0xff] }
  0x56   : > { %435 = vst [vmem:[%s3149_s29 + $0x400] sm:$0xff] %v434_v0  ;;  %v438_v2 = vld [vmem:[%s3141_s28 + $0x820] sm:$0xff]  ;;  %v440_v3 = vld [vmem:[%s3141_s28 + $0x828] sm:$0xff]  ;;  %437 = vst [vmem:[%s3149_s29 + $0x408] sm:$0xff] %v436_v1 }
  0x57   : > { %439 = vst [vmem:[%s3149_s29 + $0x410] sm:$0xff] %v438_v2  ;;  %441 = vst [vmem:[%s3149_s29 + $0x418] sm:$0xff] %v440_v3  ;;  %v442_v4 = vld [vmem:[%s3141_s28 + $0x840] sm:$0xff]  ;;  %v444_v5 = vld [vmem:[%s3141_s28 + $0x848] sm:$0xff] }
  0x58   : > { %v446_v6 = vld [vmem:[%s3141_s28 + $0x860] sm:$0xff]  ;;  %443 = vst [vmem:[%s3149_s29 + $0x420] sm:$0xff] %v442_v4  ;;  %445 = vst [vmem:[%s3149_s29 + $0x428] sm:$0xff] %v444_v5  ;;  %v448_v7 = vld [vmem:[%s3141_s28 + $0x868] sm:$0xff] }
  0x59   : > { %447 = vst [vmem:[%s3149_s29 + $0x430] sm:$0xff] %v446_v6  ;;  %v450_v8 = vld [vmem:[%s3141_s28 + $0x880] sm:$0xff]  ;;  %v452_v9 = vld [vmem:[%s3141_s28 + $0x888] sm:$0xff]  ;;  %449 = vst [vmem:[%s3149_s29 + $0x438] sm:$0xff] %v448_v7 }
  0x5a   : > { %451 = vst [vmem:[%s3149_s29 + $0x440] sm:$0xff] %v450_v8  ;;  %453 = vst [vmem:[%s3149_s29 + $0x448] sm:$0xff] %v452_v9  ;;  %v454_v10 = vld [vmem:[%s3141_s28 + $0x8a0] sm:$0xff]  ;;  %v456_v11 = vld [vmem:[%s3141_s28 + $0x8a8] sm:$0xff] }
  0x5b   : > { %v458_v12 = vld [vmem:[%s3141_s28 + $0x8c0] sm:$0xff]  ;;  %455 = vst [vmem:[%s3149_s29 + $0x450] sm:$0xff] %v454_v10  ;;  %457 = vst [vmem:[%s3149_s29 + $0x458] sm:$0xff] %v456_v11  ;;  %v460_v13 = vld [vmem:[%s3141_s28 + $0x8c8] sm:$0xff] }
  0x5c   : > { %459 = vst [vmem:[%s3149_s29 + $0x460] sm:$0xff] %v458_v12  ;;  %v462_v14 = vld [vmem:[%s3141_s28 + $0x8e0] sm:$0xff]  ;;  %v464_v15 = vld [vmem:[%s3141_s28 + $0x8e8] sm:$0xff]  ;;  %461 = vst [vmem:[%s3149_s29 + $0x468] sm:$0xff] %v460_v13 }
  0x5d   : > { %463 = vst [vmem:[%s3149_s29 + $0x470] sm:$0xff] %v462_v14  ;;  %465 = vst [vmem:[%s3149_s29 + $0x478] sm:$0xff] %v464_v15  ;;  %v466_v16 = vld [vmem:[%s3141_s28 + $0x900] sm:$0xff]  ;;  %v468_v17 = vld [vmem:[%s3141_s28 + $0x908] sm:$0xff] }
  0x5e   : > { %v470_v18 = vld [vmem:[%s3141_s28 + $0x920] sm:$0xff]  ;;  %467 = vst [vmem:[%s3149_s29 + $0x480] sm:$0xff] %v466_v16  ;;  %469 = vst [vmem:[%s3149_s29 + $0x488] sm:$0xff] %v468_v17  ;;  %v472_v19 = vld [vmem:[%s3141_s28 + $0x928] sm:$0xff] }
  0x5f   : > { %471 = vst [vmem:[%s3149_s29 + $0x490] sm:$0xff] %v470_v18  ;;  %v474_v20 = vld [vmem:[%s3141_s28 + $0x940] sm:$0xff]  ;;  %v476_v21 = vld [vmem:[%s3141_s28 + $0x948] sm:$0xff]  ;;  %473 = vst [vmem:[%s3149_s29 + $0x498] sm:$0xff] %v472_v19 }
  0x60   : > { %475 = vst [vmem:[%s3149_s29 + $0x4a0] sm:$0xff] %v474_v20  ;;  %477 = vst [vmem:[%s3149_s29 + $0x4a8] sm:$0xff] %v476_v21  ;;  %v478_v22 = vld [vmem:[%s3141_s28 + $0x960] sm:$0xff]  ;;  %v480_v23 = vld [vmem:[%s3141_s28 + $0x968] sm:$0xff] }
  0x61   : > { %v482_v24 = vld [vmem:[%s3141_s28 + $0x980] sm:$0xff]  ;;  %479 = vst [vmem:[%s3149_s29 + $0x4b0] sm:$0xff] %v478_v22  ;;  %481 = vst [vmem:[%s3149_s29 + $0x4b8] sm:$0xff] %v480_v23  ;;  %v484_v25 = vld [vmem:[%s3141_s28 + $0x988] sm:$0xff] }
  0x62   : > { %483 = vst [vmem:[%s3149_s29 + $0x4c0] sm:$0xff] %v482_v24  ;;  %v486_v26 = vld [vmem:[%s3141_s28 + $0x9a0] sm:$0xff]  ;;  %v488_v27 = vld [vmem:[%s3141_s28 + $0x9a8] sm:$0xff]  ;;  %485 = vst [vmem:[%s3149_s29 + $0x4c8] sm:$0xff] %v484_v25 }
  0x63   : > { %487 = vst [vmem:[%s3149_s29 + $0x4d0] sm:$0xff] %v486_v26  ;;  %489 = vst [vmem:[%s3149_s29 + $0x4d8] sm:$0xff] %v488_v27  ;;  %v490_v28 = vld [vmem:[%s3141_s28 + $0x9c0] sm:$0xff]  ;;  %v492_v29 = vld [vmem:[%s3141_s28 + $0x9c8] sm:$0xff] }
  0x64   : > { %v494_v30 = vld [vmem:[%s3141_s28 + $0x9e0] sm:$0xff]  ;;  %491 = vst [vmem:[%s3149_s29 + $0x4e0] sm:$0xff] %v490_v28  ;;  %493 = vst [vmem:[%s3149_s29 + $0x4e8] sm:$0xff] %v492_v29  ;;  %v496_v31 = vld [vmem:[%s3141_s28 + $0x9e8] sm:$0xff] }
  0x65   : > { %495 = vst [vmem:[%s3149_s29 + $0x4f0] sm:$0xff] %v494_v30  ;;  %v498_v32 = vld [vmem:[%s3141_s28 + $0xa00] sm:$0xff]  ;;  %v500_v33 = vld [vmem:[%s3141_s28 + $0xa08] sm:$0xff]  ;;  %497 = vst [vmem:[%s3149_s29 + $0x4f8] sm:$0xff] %v496_v31 }
  0x66   : > { %499 = vst [vmem:[%s3149_s29 + $0x500] sm:$0xff] %v498_v32  ;;  %501 = vst [vmem:[%s3149_s29 + $0x508] sm:$0xff] %v500_v33  ;;  %v502_v34 = vld [vmem:[%s3141_s28 + $0xa20] sm:$0xff]  ;;  %v504_v35 = vld [vmem:[%s3141_s28 + $0xa28] sm:$0xff] }
  0x67   : > { %v506_v36 = vld [vmem:[%s3141_s28 + $0xa40] sm:$0xff]  ;;  %503 = vst [vmem:[%s3149_s29 + $0x510] sm:$0xff] %v502_v34  ;;  %505 = vst [vmem:[%s3149_s29 + $0x518] sm:$0xff] %v504_v35  ;;  %v508_v37 = vld [vmem:[%s3141_s28 + $0xa48] sm:$0xff] }
  0x68   : > { %507 = vst [vmem:[%s3149_s29 + $0x520] sm:$0xff] %v506_v36  ;;  %v510_v38 = vld [vmem:[%s3141_s28 + $0xa60] sm:$0xff]  ;;  %v512_v39 = vld [vmem:[%s3141_s28 + $0xa68] sm:$0xff]  ;;  %509 = vst [vmem:[%s3149_s29 + $0x528] sm:$0xff] %v508_v37 }
  0x69   : > { %511 = vst [vmem:[%s3149_s29 + $0x530] sm:$0xff] %v510_v38  ;;  %513 = vst [vmem:[%s3149_s29 + $0x538] sm:$0xff] %v512_v39  ;;  %v514_v40 = vld [vmem:[%s3141_s28 + $0xa80] sm:$0xff]  ;;  %v516_v41 = vld [vmem:[%s3141_s28 + $0xa88] sm:$0xff] }
  0x6a   : > { %v518_v42 = vld [vmem:[%s3141_s28 + $0xaa0] sm:$0xff]  ;;  %515 = vst [vmem:[%s3149_s29 + $0x540] sm:$0xff] %v514_v40  ;;  %517 = vst [vmem:[%s3149_s29 + $0x548] sm:$0xff] %v516_v41  ;;  %v520_v43 = vld [vmem:[%s3141_s28 + $0xaa8] sm:$0xff] }
  0x6b   : > { %519 = vst [vmem:[%s3149_s29 + $0x550] sm:$0xff] %v518_v42  ;;  %v522_v44 = vld [vmem:[%s3141_s28 + $0xac0] sm:$0xff]  ;;  %v524_v45 = vld [vmem:[%s3141_s28 + $0xac8] sm:$0xff]  ;;  %521 = vst [vmem:[%s3149_s29 + $0x558] sm:$0xff] %v520_v43 }
  0x6c   : > { %523 = vst [vmem:[%s3149_s29 + $0x560] sm:$0xff] %v522_v44  ;;  %525 = vst [vmem:[%s3149_s29 + $0x568] sm:$0xff] %v524_v45  ;;  %v526_v46 = vld [vmem:[%s3141_s28 + $0xae0] sm:$0xff]  ;;  %v528_v47 = vld [vmem:[%s3141_s28 + $0xae8] sm:$0xff] }
  0x6d   : > { %v530_v48 = vld [vmem:[%s3141_s28 + $0xb00] sm:$0xff]  ;;  %527 = vst [vmem:[%s3149_s29 + $0x570] sm:$0xff] %v526_v46  ;;  %529 = vst [vmem:[%s3149_s29 + $0x578] sm:$0xff] %v528_v47  ;;  %v532_v49 = vld [vmem:[%s3141_s28 + $0xb08] sm:$0xff] }
  0x6e   : > { %531 = vst [vmem:[%s3149_s29 + $0x580] sm:$0xff] %v530_v48  ;;  %v534_v50 = vld [vmem:[%s3141_s28 + $0xb20] sm:$0xff]  ;;  %v536_v51 = vld [vmem:[%s3141_s28 + $0xb28] sm:$0xff]  ;;  %533 = vst [vmem:[%s3149_s29 + $0x588] sm:$0xff] %v532_v49 }
  0x6f   : > { %535 = vst [vmem:[%s3149_s29 + $0x590] sm:$0xff] %v534_v50  ;;  %537 = vst [vmem:[%s3149_s29 + $0x598] sm:$0xff] %v536_v51  ;;  %v538_v52 = vld [vmem:[%s3141_s28 + $0xb40] sm:$0xff]  ;;  %v540_v53 = vld [vmem:[%s3141_s28 + $0xb48] sm:$0xff] }
  0x70   : > { %v542_v54 = vld [vmem:[%s3141_s28 + $0xb60] sm:$0xff]  ;;  %539 = vst [vmem:[%s3149_s29 + $0x5a0] sm:$0xff] %v538_v52  ;;  %541 = vst [vmem:[%s3149_s29 + $0x5a8] sm:$0xff] %v540_v53  ;;  %v544_v55 = vld [vmem:[%s3141_s28 + $0xb68] sm:$0xff] }
  0x71   : > { %543 = vst [vmem:[%s3149_s29 + $0x5b0] sm:$0xff] %v542_v54  ;;  %v546_v56 = vld [vmem:[%s3141_s28 + $0xb80] sm:$0xff]  ;;  %v548_v57 = vld [vmem:[%s3141_s28 + $0xb88] sm:$0xff]  ;;  %545 = vst [vmem:[%s3149_s29 + $0x5b8] sm:$0xff] %v544_v55 }
  0x72   : > { %547 = vst [vmem:[%s3149_s29 + $0x5c0] sm:$0xff] %v546_v56  ;;  %549 = vst [vmem:[%s3149_s29 + $0x5c8] sm:$0xff] %v548_v57  ;;  %v550_v58 = vld [vmem:[%s3141_s28 + $0xba0] sm:$0xff]  ;;  %v552_v59 = vld [vmem:[%s3141_s28 + $0xba8] sm:$0xff] }
  0x73   : > { %v554_v60 = vld [vmem:[%s3141_s28 + $0xbc0] sm:$0xff]  ;;  %551 = vst [vmem:[%s3149_s29 + $0x5d0] sm:$0xff] %v550_v58  ;;  %553 = vst [vmem:[%s3149_s29 + $0x5d8] sm:$0xff] %v552_v59  ;;  %v556_v61 = vld [vmem:[%s3141_s28 + $0xbc8] sm:$0xff] }
  0x74   : > { %555 = vst [vmem:[%s3149_s29 + $0x5e0] sm:$0xff] %v554_v60  ;;  %v558_v62 = vld [vmem:[%s3141_s28 + $0xbe0] sm:$0xff]  ;;  %v560_v63 = vld [vmem:[%s3141_s28 + $0xbe8] sm:$0xff]  ;;  %557 = vst [vmem:[%s3149_s29 + $0x5e8] sm:$0xff] %v556_v61 }
  0x75   : > { %559 = vst [vmem:[%s3149_s29 + $0x5f0] sm:$0xff] %v558_v62  ;;  %561 = vst [vmem:[%s3149_s29 + $0x5f8] sm:$0xff] %v560_v63 }
  0x76 PF: > { %p2407_p8 = scmp.ge.s32.totalorder %s3071_s16, 1  ;;  %p574_p9 = scmp.lt.s32.totalorder %s3071_s16, 3 }
  0x78   : > { %p575_p10 = pnand %p2407_p8, %p574_p9 }
  0x79   : > { %s581_s30 = sand.u32 (!%p575_p10), 1, %s3055_s12   ;;  %v2825_v0 = vld [vmem:[%s3809_s0 + $0x4] ss:$24 sps:$4 sm:$0xff] (!%p575_p10)  }
  0x7a   : > { %578 = sbr.rel (%p575_p10) target bundleno = 557 (0x22d), region = 51  ;;  %1906 = vmatprep.mubr.bf16.mxu0 (!%p575_p10), %v2825_v0  ;;  %2065 = vmatprep.mubr.bf16.mxu1 (!%p575_p10), %v2825_v0  ;;  %s2408_s24 = sshll.u32 (!%p575_p10), %s581_s30, 6 }
  0x7b   : > { %s2686_s4 = smul.u32 (!%p575_p10), 1536, %s581_s30  ;;  %s3770_s12 = scalar_lea.vmem (!%p575_p10), [#allocation3], %s2408_s24 }
  0x7d   : > { %s3537_s7 = scalar_lea.vmem (!%p575_p10), [#allocation2], %s2686_s4 }
  0x7e   : > { %v2727_v1 = vld [vmem:[%s3537_s7 + $0x4] ss:$16 sps:$4 sm:$0xff] (!%p575_p10)   ;;  %v2729_v2 = vld [vmem:[%s3537_s7 + $0xc] ss:$16 sps:$4 sm:$0xff] (!%p575_p10)   ;;  %v2731_v3 = vld [vmem:[%s3537_s7] ss:$16 sps:$4 sm:$0xff] (!%p575_p10)  }
  0x7f   : > { %1874 = vmatprep.subr.bf16.mxu0 (!%p575_p10), %v2727_v1  ;;  %v2732_v4 = vld [vmem:[%s3537_s7 + $0x8] ss:$16 sps:$4 sm:$0xff] (!%p575_p10)   ;;  %2033 = vmatprep.subr.bf16.mxu1 (!%p575_p10), %v2729_v2  ;;  %v2733_v5 = vld [vmem:[%s3537_s7 + $0x24] ss:$16 sps:$4 sm:$0xff] (!%p575_p10)   ;;  %v2735_v6 = vld [vmem:[%s3537_s7 + $0x2c] ss:$16 sps:$4 sm:$0xff] (!%p575_p10)  }
  0x80   : > { %1875 = vmatpush1.bf16.msra.mxu0 (!%p575_p10), %v2731_v3  ;;  %2034 = vmatpush1.bf16.msra.mxu1 (!%p575_p10), %v2732_v4  ;;  %v2737_v7 = vld [vmem:[%s3537_s7 + $0x20] ss:$16 sps:$4 sm:$0xff] (!%p575_p10)   ;;  %v2738_v8 = vld [vmem:[%s3537_s7 + $0x28] ss:$16 sps:$4 sm:$0xff] (!%p575_p10)   ;;  %v2739_v9 = vld [vmem:[%s3537_s7 + $0x44] ss:$16 sps:$4 sm:$0xff] (!%p575_p10)  }
  0x81   : > { %1876 = vmatprep.subr.bf16.mxu0 %v2733_v5  ;;  %2035 = vmatprep.subr.bf16.mxu1 %v2735_v6  ;;  %v2741_v10 = vld [vmem:[%s3537_s7 + $0x4c] ss:$16 sps:$4 sm:$0xff]   ;;  %v2743_v11 = vld [vmem:[%s3537_s7 + $0x40] ss:$16 sps:$4 sm:$0xff]   ;;  %v2744_v12 = vld [vmem:[%s3537_s7 + $0x48] ss:$16 sps:$4 sm:$0xff]  }
  0x82   : > { %v2745_v13 = vld [vmem:[%s3537_s7 + $0x64] ss:$16 sps:$4 sm:$0xff]   ;;  %v2747_v14 = vld [vmem:[%s3537_s7 + $0x6c] ss:$16 sps:$4 sm:$0xff]   ;;  %v2749_v15 = vld [vmem:[%s3537_s7 + $0x60] ss:$16 sps:$4 sm:$0xff]  }
  0x83   : > { %v2750_v16 = vld [vmem:[%s3537_s7 + $0x68] ss:$16 sps:$4 sm:$0xff]   ;;  %v2751_v17 = vld [vmem:[%s3537_s7 + $0x84] ss:$16 sps:$4 sm:$0xff]   ;;  %v2753_v18 = vld [vmem:[%s3537_s7 + $0x8c] ss:$16 sps:$4 sm:$0xff]  }
  0x84   : > { %1877 = vmatpush1.bf16.msra.mxu0 %v2737_v7  ;;  %2036 = vmatpush1.bf16.msra.mxu1 %v2738_v8  ;;  %v2755_v19 = vld [vmem:[%s3537_s7 + $0x80] ss:$16 sps:$4 sm:$0xff]   ;;  %v2756_v20 = vld [vmem:[%s3537_s7 + $0x88] ss:$16 sps:$4 sm:$0xff]   ;;  %v2757_v21 = vld [vmem:[%s3537_s7 + $0xa4] ss:$16 sps:$4 sm:$0xff]  }
  0x85   : > { %1878 = vmatprep.subr.bf16.mxu0 %v2739_v9  ;;  %2037 = vmatprep.subr.bf16.mxu1 %v2741_v10  ;;  %v2759_v22 = vld [vmem:[%s3537_s7 + $0xac] ss:$16 sps:$4 sm:$0xff]   ;;  %v2761_v23 = vld [vmem:[%s3537_s7 + $0xa0] ss:$16 sps:$4 sm:$0xff]   ;;  %v2762_v24 = vld [vmem:[%s3537_s7 + $0xa8] ss:$16 sps:$4 sm:$0xff]  }
  0x86   : > { %v2763_v25 = vld [vmem:[%s3537_s7 + $0xc4] ss:$16 sps:$4 sm:$0xff]   ;;  %v2765_v26 = vld [vmem:[%s3537_s7 + $0xcc] ss:$16 sps:$4 sm:$0xff]   ;;  %v2767_v27 = vld [vmem:[%s3537_s7 + $0xc0] ss:$16 sps:$4 sm:$0xff]  }
  0x87   : > { %v2768_v28 = vld [vmem:[%s3537_s7 + $0xc8] ss:$16 sps:$4 sm:$0xff]   ;;  %v2769_v29 = vld [vmem:[%s3537_s7 + $0xe4] ss:$16 sps:$4 sm:$0xff]   ;;  %v2771_v30 = vld [vmem:[%s3537_s7 + $0xec] ss:$16 sps:$4 sm:$0xff]  }
  0x88   : > { %1879 = vmatpush1.bf16.msra.mxu0 %v2743_v11  ;;  %2038 = vmatpush1.bf16.msra.mxu1 %v2744_v12  ;;  %v2773_v31 = vld [vmem:[%s3537_s7 + $0xe0] ss:$16 sps:$4 sm:$0xff]   ;;  %v2774_v32 = vld [vmem:[%s3537_s7 + $0xe8] ss:$16 sps:$4 sm:$0xff]   ;;  %v2775_v33 = vld [vmem:[%s3537_s7 + $0x104] ss:$16 sps:$4 sm:$0xff]  }
  0x89   : > { %1880 = vmatprep.subr.bf16.mxu0 %v2745_v13  ;;  %2039 = vmatprep.subr.bf16.mxu1 %v2747_v14  ;;  %v2777_v34 = vld [vmem:[%s3537_s7 + $0x10c] ss:$16 sps:$4 sm:$0xff]   ;;  %v2779_v35 = vld [vmem:[%s3537_s7 + $0x100] ss:$16 sps:$4 sm:$0xff]   ;;  %v2780_v36 = vld [vmem:[%s3537_s7 + $0x108] ss:$16 sps:$4 sm:$0xff]  }
  0x8a   : > { %v2781_v37 = vld [vmem:[%s3537_s7 + $0x124] ss:$16 sps:$4 sm:$0xff]   ;;  %v2783_v38 = vld [vmem:[%s3537_s7 + $0x12c] ss:$16 sps:$4 sm:$0xff]   ;;  %v2785_v39 = vld [vmem:[%s3537_s7 + $0x120] ss:$16 sps:$4 sm:$0xff]  }
  0x8b   : > { %v2786_v40 = vld [vmem:[%s3537_s7 + $0x128] ss:$16 sps:$4 sm:$0xff]   ;;  %v2787_v41 = vld [vmem:[%s3537_s7 + $0x144] ss:$16 sps:$4 sm:$0xff]   ;;  %v2789_v42 = vld [vmem:[%s3537_s7 + $0x14c] ss:$16 sps:$4 sm:$0xff]  }
  0x8c   : > { %1881 = vmatpush1.bf16.msra.mxu0 %v2749_v15  ;;  %2040 = vmatpush1.bf16.msra.mxu1 %v2750_v16  ;;  %v2791_v43 = vld [vmem:[%s3537_s7 + $0x140] ss:$16 sps:$4 sm:$0xff]   ;;  %v2792_v44 = vld [vmem:[%s3537_s7 + $0x148] ss:$16 sps:$4 sm:$0xff]   ;;  %v2793_v45 = vld [vmem:[%s3537_s7 + $0x164] ss:$16 sps:$4 sm:$0xff]  }
  0x8d   : > { %1882 = vmatprep.subr.bf16.mxu0 %v2751_v17  ;;  %2041 = vmatprep.subr.bf16.mxu1 %v2753_v18  ;;  %v2795_v46 = vld [vmem:[%s3537_s7 + $0x16c] ss:$16 sps:$4 sm:$0xff]   ;;  %v2797_v47 = vld [vmem:[%s3537_s7 + $0x160] ss:$16 sps:$4 sm:$0xff]   ;;  %v2798_v48 = vld [vmem:[%s3537_s7 + $0x168] ss:$16 sps:$4 sm:$0xff]  }
  0x8e   : > { %v2799_v49 = vld [vmem:[%s3537_s7 + $0x184] ss:$16 sps:$4 sm:$0xff]   ;;  %v2801_v50 = vld [vmem:[%s3537_s7 + $0x18c] ss:$16 sps:$4 sm:$0xff]   ;;  %v2803_v51 = vld [vmem:[%s3537_s7 + $0x180] ss:$16 sps:$4 sm:$0xff]  }
  0x8f   : > { %v2804_v52 = vld [vmem:[%s3537_s7 + $0x188] ss:$16 sps:$4 sm:$0xff]   ;;  %v2805_v53 = vld [vmem:[%s3537_s7 + $0x1a4] ss:$16 sps:$4 sm:$0xff]   ;;  %v2807_v54 = vld [vmem:[%s3537_s7 + $0x1ac] ss:$16 sps:$4 sm:$0xff]  }
  0x90   : > { %1883 = vmatpush1.bf16.msra.mxu0 %v2755_v19  ;;  %2042 = vmatpush1.bf16.msra.mxu1 %v2756_v20  ;;  %v2809_v55 = vld [vmem:[%s3537_s7 + $0x1a0] ss:$16 sps:$4 sm:$0xff]   ;;  %v2810_v56 = vld [vmem:[%s3537_s7 + $0x1a8] ss:$16 sps:$4 sm:$0xff]   ;;  %v2811_v57 = vld [vmem:[%s3537_s7 + $0x1c4] ss:$16 sps:$4 sm:$0xff]  }
  0x91   : > { %1884 = vmatprep.subr.bf16.mxu0 %v2757_v21  ;;  %2043 = vmatprep.subr.bf16.mxu1 %v2759_v22  ;;  %v2813_v58 = vld [vmem:[%s3537_s7 + $0x1cc] ss:$16 sps:$4 sm:$0xff]   ;;  %v2815_v59 = vld [vmem:[%s3537_s7 + $0x1c0] ss:$16 sps:$4 sm:$0xff]   ;;  %v2816_v60 = vld [vmem:[%s3537_s7 + $0x1c8] ss:$16 sps:$4 sm:$0xff]  }
  0x92   : > { %v2817_v61 = vld [vmem:[%s3537_s7 + $0x1e4] ss:$16 sps:$4 sm:$0xff]   ;;  %v2819_v62 = vld [vmem:[%s3537_s7 + $0x1ec] ss:$16 sps:$4 sm:$0xff]   ;;  %v2821_v63 = vld [vmem:[%s3537_s7 + $0x1e0] ss:$16 sps:$4 sm:$0xff]  }
  0x93   : > { %v2822_v0 = vld [vmem:[%s3537_s7 + $0x1e8] ss:$16 sps:$4 sm:$0xff]   ;;  %v2828_v1 = vld [vmem:[%s3537_s7 + $0x204] ss:$16 sps:$4 sm:$0xff]   ;;  %v2831_v2 = vld [vmem:[%s3537_s7 + $0x20c] ss:$16 sps:$4 sm:$0xff]  }
  0x94   : > { %1885 = vmatpush1.bf16.msra.mxu0 %v2761_v23  ;;  %2044 = vmatpush1.bf16.msra.mxu1 %v2762_v24  ;;  %v2823_v3 = vld [vmem:[%s3809_s0] ss:$24 sps:$4 sm:$0xff]   ;;  %v2834_v6 = vld [vmem:[%s3537_s7 + $0x224] ss:$16 sps:$4 sm:$0xff]   ;;  %v2837_v7 = vld [vmem:[%s3537_s7 + $0x22c] ss:$16 sps:$4 sm:$0xff]  }
  0x95   : > { %1886 = vmatprep.subr.bf16.mxu0 %v2763_v25  ;;  %2045 = vmatprep.subr.bf16.mxu1 %v2765_v26  ;;  %v2826_v4 = vld [vmem:[%s3537_s7 + $0x200] ss:$16 sps:$4 sm:$0xff]   ;;  %v2829_v5 = vld [vmem:[%s3537_s7 + $0x208] ss:$16 sps:$4 sm:$0xff]   ;;  %v2910_v8 = vld [vmem:[%s3809_s0 + $0x34] ss:$24 sps:$4 sm:$0xff]  }
  0x96   : > { %v2832_v9 = vld [vmem:[%s3537_s7 + $0x220] ss:$16 sps:$4 sm:$0xff]   ;;  %v2835_v10 = vld [vmem:[%s3537_s7 + $0x228] ss:$16 sps:$4 sm:$0xff]   ;;  %v2840_v11 = vld [vmem:[%s3537_s7 + $0x244] ss:$16 sps:$4 sm:$0xff]  }
  0x97   : > { %v2843_v12 = vld [vmem:[%s3537_s7 + $0x24c] ss:$16 sps:$4 sm:$0xff]   ;;  %v2918_v13 = vld [vmem:[%s3809_s0 + $0x30] ss:$24 sps:$4 sm:$0xff]   ;;  %v2846_v16 = vld [vmem:[%s3537_s7 + $0x264] ss:$16 sps:$4 sm:$0xff]  }
  0x98   : > { %1887 = vmatpush1.bf16.msra.mxu0 %v2767_v27  ;;  %2046 = vmatpush1.bf16.msra.mxu1 %v2768_v28  ;;  %v2838_v14 = vld [vmem:[%s3537_s7 + $0x240] ss:$16 sps:$4 sm:$0xff]   ;;  %v2841_v15 = vld [vmem:[%s3537_s7 + $0x248] ss:$16 sps:$4 sm:$0xff]   ;;  %v2849_v17 = vld [vmem:[%s3537_s7 + $0x26c] ss:$16 sps:$4 sm:$0xff]  }
  0x99   : > { %1888 = vmatprep.subr.bf16.mxu0 %v2769_v29  ;;  %2047 = vmatprep.subr.bf16.mxu1 %v2771_v30  ;;  %v2844_v18 = vld [vmem:[%s3537_s7 + $0x260] ss:$16 sps:$4 sm:$0xff]   ;;  %v2847_v19 = vld [vmem:[%s3537_s7 + $0x268] ss:$16 sps:$4 sm:$0xff]   ;;  %v2852_v20 = vld [vmem:[%s3537_s7 + $0x284] ss:$16 sps:$4 sm:$0xff]  }
  0x9a   : > { %v2855_v21 = vld [vmem:[%s3537_s7 + $0x28c] ss:$16 sps:$4 sm:$0xff]   ;;  %v2850_v22 = vld [vmem:[%s3537_s7 + $0x280] ss:$16 sps:$4 sm:$0xff]   ;;  %v2853_v23 = vld [vmem:[%s3537_s7 + $0x288] ss:$16 sps:$4 sm:$0xff]  }
  0x9b   : > { %v2858_v24 = vld [vmem:[%s3537_s7 + $0x2a4] ss:$16 sps:$4 sm:$0xff]   ;;  %v2861_v25 = vld [vmem:[%s3537_s7 + $0x2ac] ss:$16 sps:$4 sm:$0xff]   ;;  %v2856_v26 = vld [vmem:[%s3537_s7 + $0x2a0] ss:$16 sps:$4 sm:$0xff]  }
  0x9c   : > { %1889 = vmatpush1.bf16.msra.mxu0 %v2773_v31  ;;  %2048 = vmatpush1.bf16.msra.mxu1 %v2774_v32  ;;  %v2859_v27 = vld [vmem:[%s3537_s7 + $0x2a8] ss:$16 sps:$4 sm:$0xff]   ;;  %v2864_v28 = vld [vmem:[%s3537_s7 + $0x2c4] ss:$16 sps:$4 sm:$0xff]   ;;  %v2867_v29 = vld [vmem:[%s3537_s7 + $0x2cc] ss:$16 sps:$4 sm:$0xff]  }
  0x9d   : > { %1890 = vmatprep.subr.bf16.mxu0 %v2775_v33  ;;  %2049 = vmatprep.subr.bf16.mxu1 %v2777_v34  ;;  %v2927_v30 = vld [vmem:[%s3809_s0 + $0xc] ss:$24 sps:$4 sm:$0xff]   ;;  %v2862_v31 = vld [vmem:[%s3537_s7 + $0x2c0] ss:$16 sps:$4 sm:$0xff]   ;;  %v2865_v32 = vld [vmem:[%s3537_s7 + $0x2c8] ss:$16 sps:$4 sm:$0xff]  }
  0x9e   : > { %v2870_v33 = vld [vmem:[%s3537_s7 + $0x2e4] ss:$16 sps:$4 sm:$0xff]   ;;  %v2873_v34 = vld [vmem:[%s3537_s7 + $0x2ec] ss:$16 sps:$4 sm:$0xff]   ;;  %s2636_s30 = sshll.u32 (%p3128_p6), %s3063_s14, 4 }
  0x9f   : > { %s2276_s27 = scalar_lea.vmem (%p3128_p6), %s3812_s3, %s2636_s30 }
  0xa0   : > { %1891 = vmatpush1.bf16.msra.mxu0 %v2779_v35  ;;  %2050 = vmatpush1.bf16.msra.mxu1 %v2780_v36  ;;  %v2868_v35 = vld [vmem:[%s3537_s7 + $0x2e0] ss:$16 sps:$4 sm:$0xff]   ;;  %v2871_v36 = vld [vmem:[%s3537_s7 + $0x2e8] ss:$16 sps:$4 sm:$0xff]  }
  0xa1   : > { %1892 = vmatprep.subr.bf16.mxu0 %v2781_v37  ;;  %2051 = vmatprep.subr.bf16.mxu1 %v2783_v38  ;;  %v2876_v37 = vld [vmem:[%s3537_s7 + $0x304] ss:$16 sps:$4 sm:$0xff]   ;;  %v2879_v38 = vld [vmem:[%s3537_s7 + $0x30c] ss:$16 sps:$4 sm:$0xff]  }
  0xa4   : > { %1893 = vmatpush1.bf16.msra.mxu0 %v2785_v39  ;;  %2052 = vmatpush1.bf16.msra.mxu1 %v2786_v40  ;;  %v2874_v39 = vld [vmem:[%s3537_s7 + $0x300] ss:$16 sps:$4 sm:$0xff]   ;;  %v2877_v40 = vld [vmem:[%s3537_s7 + $0x308] ss:$16 sps:$4 sm:$0xff]  }
  0xa5   : > { %1894 = vmatprep.subr.bf16.mxu0 %v2787_v41  ;;  %2053 = vmatprep.subr.bf16.mxu1 %v2789_v42  ;;  %v2882_v41 = vld [vmem:[%s3537_s7 + $0x324] ss:$16 sps:$4 sm:$0xff]   ;;  %v2885_v42 = vld [vmem:[%s3537_s7 + $0x32c] ss:$16 sps:$4 sm:$0xff]  }
  0xa8   : > { %1895 = vmatpush1.bf16.msra.mxu0 %v2791_v43  ;;  %2054 = vmatpush1.bf16.msra.mxu1 %v2792_v44  ;;  %v2880_v43 = vld [vmem:[%s3537_s7 + $0x320] ss:$16 sps:$4 sm:$0xff]   ;;  %v2883_v44 = vld [vmem:[%s3537_s7 + $0x328] ss:$16 sps:$4 sm:$0xff]  }
  0xa9   : > { %1896 = vmatprep.subr.bf16.mxu0 %v2793_v45  ;;  %2055 = vmatprep.subr.bf16.mxu1 %v2795_v46  ;;  %v2888_v45 = vld [vmem:[%s3537_s7 + $0x344] ss:$16 sps:$4 sm:$0xff]   ;;  %v2891_v46 = vld [vmem:[%s3537_s7 + $0x34c] ss:$16 sps:$4 sm:$0xff]  }
  0xac   : > { %1897 = vmatpush1.bf16.msra.mxu0 %v2797_v47  ;;  %2056 = vmatpush1.bf16.msra.mxu1 %v2798_v48  ;;  %v2886_v47 = vld [vmem:[%s3537_s7 + $0x340] ss:$16 sps:$4 sm:$0xff]   ;;  %v2889_v48 = vld [vmem:[%s3537_s7 + $0x348] ss:$16 sps:$4 sm:$0xff]  }
  0xad   : > { %1898 = vmatprep.subr.bf16.mxu0 %v2799_v49  ;;  %2057 = vmatprep.subr.bf16.mxu1 %v2801_v50  ;;  %v2894_v49 = vld [vmem:[%s3537_s7 + $0x364] ss:$16 sps:$4 sm:$0xff]   ;;  %v2897_v50 = vld [vmem:[%s3537_s7 + $0x36c] ss:$16 sps:$4 sm:$0xff]  }
  0xb0   : > { %1899 = vmatpush1.bf16.msra.mxu0 %v2803_v51  ;;  %2058 = vmatpush1.bf16.msra.mxu1 %v2804_v52  ;;  %v2892_v51 = vld [vmem:[%s3537_s7 + $0x360] ss:$16 sps:$4 sm:$0xff]   ;;  %v2895_v52 = vld [vmem:[%s3537_s7 + $0x368] ss:$16 sps:$4 sm:$0xff]  }
  0xb1   : > { %1900 = vmatprep.subr.bf16.mxu0 %v2805_v53  ;;  %2059 = vmatprep.subr.bf16.mxu1 %v2807_v54  ;;  %v2900_v53 = vld [vmem:[%s3537_s7 + $0x384] ss:$16 sps:$4 sm:$0xff]   ;;  %v2903_v54 = vld [vmem:[%s3537_s7 + $0x38c] ss:$16 sps:$4 sm:$0xff]  }
  0xb4   : > { %1901 = vmatpush1.bf16.msra.mxu0 %v2809_v55  ;;  %2060 = vmatpush1.bf16.msra.mxu1 %v2810_v56  ;;  %v2898_v55 = vld [vmem:[%s3537_s7 + $0x380] ss:$16 sps:$4 sm:$0xff]   ;;  %v2901_v56 = vld [vmem:[%s3537_s7 + $0x388] ss:$16 sps:$4 sm:$0xff]  }
  0xb5   : > { %1902 = vmatprep.subr.bf16.mxu0 %v2811_v57  ;;  %2061 = vmatprep.subr.bf16.mxu1 %v2813_v58  ;;  %v2906_v57 = vld [vmem:[%s3537_s7 + $0x3a4] ss:$16 sps:$4 sm:$0xff]   ;;  %v2909_v58 = vld [vmem:[%s3537_s7 + $0x3ac] ss:$16 sps:$4 sm:$0xff]  }
  0xb8   : > { %1903 = vmatpush1.bf16.msra.mxu0 %v2815_v59  ;;  %2062 = vmatpush1.bf16.msra.mxu1 %v2816_v60  ;;  %v2904_v59 = vld [vmem:[%s3537_s7 + $0x3a0] ss:$16 sps:$4 sm:$0xff]   ;;  %v2907_v60 = vld [vmem:[%s3537_s7 + $0x3a8] ss:$16 sps:$4 sm:$0xff]  }
  0xb9   : > { %1904 = vmatprep.subr.bf16.mxu0 %v2817_v61  ;;  %2063 = vmatprep.subr.bf16.mxu1 %v2819_v62  ;;  %v2914_v61 = vld [vmem:[%s3537_s7 + $0x3c4] ss:$16 sps:$4 sm:$0xff]   ;;  %v2917_v62 = vld [vmem:[%s3537_s7 + $0x3cc] ss:$16 sps:$4 sm:$0xff]  }
  0xbc   : > { %1905 = vmatpush1.bf16.msra.mxu0 %v2821_v63  ;;  %2064 = vmatpush1.bf16.msra.mxu1 %v2822_v0  ;;  %v2912_v63 = vld [vmem:[%s3537_s7 + $0x3c0] ss:$16 sps:$4 sm:$0xff]   ;;  %v2915_v0 = vld [vmem:[%s3537_s7 + $0x3c8] ss:$16 sps:$4 sm:$0xff]  }
  0xbd   : > { %1927 = vmatprep.subr.bf16.mxu0 %v2828_v1  ;;  %2086 = vmatprep.subr.bf16.mxu1 %v2831_v2  ;;  %v2921_v1 = vld [vmem:[%s3537_s7 + $0x3e4] ss:$16 sps:$4 sm:$0xff]   ;;  %v2924_v2 = vld [vmem:[%s3537_s7 + $0x3ec] ss:$16 sps:$4 sm:$0xff]  }
  0xbf   : > { %1907 = vmatmul.mubr.bf16.vlgmr.msra.gmra.mrb[0].mxu0 %v2823_v3  ;;  %2066 = vmatmul.mubr.bf16.vlgmr.msra.gmra.mrb[0].mxu1 %v2823_v3  ;;  %v2919_v3 = vld [vmem:[%s3537_s7 + $0x3e0] ss:$16 sps:$4 sm:$0xff]  }
  0xc0   : > { %1928 = vmatpush1.bf16.msra.mxu0 %v2826_v4  ;;  %2087 = vmatpush1.bf16.msra.mxu1 %v2829_v5  ;;  %v2922_v4 = vld [vmem:[%s3537_s7 + $0x3e8] ss:$16 sps:$4 sm:$0xff]   ;;  %v2930_v5 = vld [vmem:[%s3537_s7 + $0x404] ss:$16 sps:$4 sm:$0xff]  }
  0xc1   : > { %1929 = vmatprep.subr.bf16.mxu0 %v2834_v6  ;;  %2088 = vmatprep.subr.bf16.mxu1 %v2837_v7  ;;  %v2933_v6 = vld [vmem:[%s3537_s7 + $0x40c] ss:$16 sps:$4 sm:$0xff]   ;;  %v2925_v7 = vld [vmem:[%s3809_s0 + $0x8] ss:$24 sps:$4 sm:$0xff]  }
  0xc2   : > { %1916 = vmatprep.mubr.bf16.mxu0 %v2910_v8  ;;  %2075 = vmatprep.mubr.bf16.mxu1 %v2910_v8  ;;  %v2928_v8 = vld [vmem:[%s3537_s7 + $0x400] ss:$16 sps:$4 sm:$0xff]  }
  0xc4   : > { %1930 = vmatpush1.bf16.msra.mxu0 %v2832_v9  ;;  %2089 = vmatpush1.bf16.msra.mxu1 %v2835_v10  ;;  %v2931_v9 = vld [vmem:[%s3537_s7 + $0x408] ss:$16 sps:$4 sm:$0xff]   ;;  %v2936_v10 = vld [vmem:[%s3537_s7 + $0x424] ss:$16 sps:$4 sm:$0xff]  }
  0xc5   : > { %1931 = vmatprep.subr.bf16.mxu0 %v2840_v11  ;;  %2090 = vmatprep.subr.bf16.mxu1 %v2843_v12  ;;  %v2939_v11 = vld [vmem:[%s3537_s7 + $0x42c] ss:$16 sps:$4 sm:$0xff]  }
  0xc6   : > { %v3012_v12 = vld [vmem:[%s3809_s0 + $0x3c] ss:$24 sps:$4 sm:$0xff]  }
  0xc7   : > { %1917 = vmatmul.mubr.bf16.gmra.mrb[4].mxu0 %v2918_v13  ;;  %2076 = vmatmul.mubr.bf16.gmra.mrb[4].mxu1 %v2918_v13  ;;  %v2934_v13 = vld [vmem:[%s3537_s7 + $0x420] ss:$16 sps:$4 sm:$0xff]  }
  0xc8   : > { %1932 = vmatpush1.bf16.msra.mxu0 %v2838_v14  ;;  %2091 = vmatpush1.bf16.msra.mxu1 %v2841_v15  ;;  %v2937_v14 = vld [vmem:[%s3537_s7 + $0x428] ss:$16 sps:$4 sm:$0xff]   ;;  %v2942_v15 = vld [vmem:[%s3537_s7 + $0x444] ss:$16 sps:$4 sm:$0xff]  }
  0xc9   : > { %1933 = vmatprep.subr.bf16.mxu0 %v2846_v16  ;;  %2092 = vmatprep.subr.bf16.mxu1 %v2849_v17  ;;  %v2945_v16 = vld [vmem:[%s3537_s7 + $0x44c] ss:$16 sps:$4 sm:$0xff]   ;;  %v3014_v17 = vld [vmem:[%s3809_s0 + $0x38] ss:$24 sps:$4 sm:$0xff]  }
  0xca   : > { %1959 = vmatprep.mubr.bf16.mxu0 %v2927_v30  ;;  %2118 = vmatprep.mubr.bf16.mxu1 %v2927_v30  ;;  %v2963_v30 = vld [vmem:[%s3537_s7 + $0x4ac] ss:$16 sps:$4 sm:$0xff]  }
  0xcc   : > { %1934 = vmatpush1.bf16.msra.mxu0 %v2844_v18  ;;  %2093 = vmatpush1.bf16.msra.mxu1 %v2847_v19  ;;  %v2940_v18 = vld [vmem:[%s3537_s7 + $0x440] ss:$16 sps:$4 sm:$0xff]   ;;  %v2943_v19 = vld [vmem:[%s3537_s7 + $0x448] ss:$16 sps:$4 sm:$0xff]  }
  0xcd   : > { %1935 = vmatprep.subr.bf16.mxu0 %v2852_v20  ;;  %2094 = vmatprep.subr.bf16.mxu1 %v2855_v21  ;;  %v2948_v20 = vld [vmem:[%s3537_s7 + $0x464] ss:$16 sps:$4 sm:$0xff]   ;;  %v2951_v21 = vld [vmem:[%s3537_s7 + $0x46c] ss:$16 sps:$4 sm:$0xff]  }
  0xd0   : > { %1936 = vmatpush1.bf16.msra.mxu0 %v2850_v22  ;;  %2095 = vmatpush1.bf16.msra.mxu1 %v2853_v23  ;;  %v3029_v22 = vld [vmem:[%s3809_s0 + $0x14] ss:$24 sps:$4 sm:$0xff]   ;;  %v2946_v23 = vld [vmem:[%s3537_s7 + $0x460] ss:$16 sps:$4 sm:$0xff]  }
  0xd1   : > { %1937 = vmatprep.subr.bf16.mxu0 %v2858_v24  ;;  %2096 = vmatprep.subr.bf16.mxu1 %v2861_v25  ;;  %v2949_v24 = vld [vmem:[%s3537_s7 + $0x468] ss:$16 sps:$4 sm:$0xff]   ;;  %v2954_v25 = vld [vmem:[%s3537_s7 + $0x484] ss:$16 sps:$4 sm:$0xff]  }
  0xd4   : > { %1938 = vmatpush1.bf16.msra.mxu0 %v2856_v26  ;;  %2097 = vmatpush1.bf16.msra.mxu1 %v2859_v27  ;;  %v2957_v26 = vld [vmem:[%s3537_s7 + $0x48c] ss:$16 sps:$4 sm:$0xff]   ;;  %v2952_v27 = vld [vmem:[%s3537_s7 + $0x480] ss:$16 sps:$4 sm:$0xff]  }
  0xd5   : > { %1939 = vmatprep.subr.bf16.mxu0 %v2864_v28  ;;  %2098 = vmatprep.subr.bf16.mxu1 %v2867_v29  ;;  %v2955_v28 = vld [vmem:[%s3537_s7 + $0x488] ss:$16 sps:$4 sm:$0xff]   ;;  %v2960_v29 = vld [vmem:[%s3537_s7 + $0x4a4] ss:$16 sps:$4 sm:$0xff]  }
  0xd8   : > { %1940 = vmatpush1.bf16.msra.mxu0 %v2862_v31  ;;  %2099 = vmatpush1.bf16.msra.mxu1 %v2865_v32  ;;  %v2958_v31 = vld [vmem:[%s3537_s7 + $0x4a0] ss:$16 sps:$4 sm:$0xff]   ;;  %v2961_v32 = vld [vmem:[%s3537_s7 + $0x4a8] ss:$16 sps:$4 sm:$0xff]  }
  0xd9   : > { %1941 = vmatprep.subr.bf16.mxu0 %v2870_v33  ;;  %2100 = vmatprep.subr.bf16.mxu1 %v2873_v34  ;;  %v2966_v33 = vld [vmem:[%s3537_s7 + $0x4c4] ss:$16 sps:$4 sm:$0xff]   ;;  %v2969_v34 = vld [vmem:[%s3537_s7 + $0x4cc] ss:$16 sps:$4 sm:$0xff]  }
  0xdc   : > { %1942 = vmatpush1.bf16.msra.mxu0 %v2868_v35  ;;  %2101 = vmatpush1.bf16.msra.mxu1 %v2871_v36  ;;  %v2964_v35 = vld [vmem:[%s3537_s7 + $0x4c0] ss:$16 sps:$4 sm:$0xff]   ;;  %v2967_v36 = vld [vmem:[%s3537_s7 + $0x4c8] ss:$16 sps:$4 sm:$0xff]  }
  0xdd   : > { %1943 = vmatprep.subr.bf16.mxu0 %v2876_v37  ;;  %2102 = vmatprep.subr.bf16.mxu1 %v2879_v38  ;;  %v2972_v37 = vld [vmem:[%s3537_s7 + $0x4e4] ss:$16 sps:$4 sm:$0xff]   ;;  %v2975_v38 = vld [vmem:[%s3537_s7 + $0x4ec] ss:$16 sps:$4 sm:$0xff]  }
  0xe0   : > { %1944 = vmatpush1.bf16.msra.mxu0 %v2874_v39  ;;  %2103 = vmatpush1.bf16.msra.mxu1 %v2877_v40  ;;  %v2970_v39 = vld [vmem:[%s3537_s7 + $0x4e0] ss:$16 sps:$4 sm:$0xff]   ;;  %v2973_v40 = vld [vmem:[%s3537_s7 + $0x4e8] ss:$16 sps:$4 sm:$0xff]  }
  0xe1   : > { %1945 = vmatprep.subr.bf16.mxu0 %v2882_v41  ;;  %2104 = vmatprep.subr.bf16.mxu1 %v2885_v42  ;;  %v2978_v41 = vld [vmem:[%s3537_s7 + $0x504] ss:$16 sps:$4 sm:$0xff]   ;;  %v2981_v42 = vld [vmem:[%s3537_s7 + $0x50c] ss:$16 sps:$4 sm:$0xff]  }
  0xe4   : > { %1946 = vmatpush1.bf16.msra.mxu0 %v2880_v43  ;;  %2105 = vmatpush1.bf16.msra.mxu1 %v2883_v44  ;;  %v2976_v43 = vld [vmem:[%s3537_s7 + $0x500] ss:$16 sps:$4 sm:$0xff]   ;;  %v2979_v44 = vld [vmem:[%s3537_s7 + $0x508] ss:$16 sps:$4 sm:$0xff]  }
  0xe5   : > { %1947 = vmatprep.subr.bf16.mxu0 %v2888_v45  ;;  %2106 = vmatprep.subr.bf16.mxu1 %v2891_v46  ;;  %v2984_v45 = vld [vmem:[%s3537_s7 + $0x524] ss:$16 sps:$4 sm:$0xff]   ;;  %v2987_v46 = vld [vmem:[%s3537_s7 + $0x52c] ss:$16 sps:$4 sm:$0xff]  }
  0xe8   : > { %1948 = vmatpush1.bf16.msra.mxu0 %v2886_v47  ;;  %2107 = vmatpush1.bf16.msra.mxu1 %v2889_v48  ;;  %v2982_v47 = vld [vmem:[%s3537_s7 + $0x520] ss:$16 sps:$4 sm:$0xff]   ;;  %v2985_v48 = vld [vmem:[%s3537_s7 + $0x528] ss:$16 sps:$4 sm:$0xff]  }
  0xe9   : > { %1949 = vmatprep.subr.bf16.mxu0 %v2894_v49  ;;  %2108 = vmatprep.subr.bf16.mxu1 %v2897_v50  ;;  %v2990_v49 = vld [vmem:[%s3537_s7 + $0x544] ss:$16 sps:$4 sm:$0xff]   ;;  %v2993_v50 = vld [vmem:[%s3537_s7 + $0x54c] ss:$16 sps:$4 sm:$0xff]  }
  0xec   : > { %1950 = vmatpush1.bf16.msra.mxu0 %v2892_v51  ;;  %2109 = vmatpush1.bf16.msra.mxu1 %v2895_v52  ;;  %v2988_v51 = vld [vmem:[%s3537_s7 + $0x540] ss:$16 sps:$4 sm:$0xff]   ;;  %v2991_v52 = vld [vmem:[%s3537_s7 + $0x548] ss:$16 sps:$4 sm:$0xff]  }
  0xed   : > { %1951 = vmatprep.subr.bf16.mxu0 %v2900_v53  ;;  %2110 = vmatprep.subr.bf16.mxu1 %v2903_v54  ;;  %v2996_v53 = vld [vmem:[%s3537_s7 + $0x564] ss:$16 sps:$4 sm:$0xff]   ;;  %v2999_v54 = vld [vmem:[%s3537_s7 + $0x56c] ss:$16 sps:$4 sm:$0xff]  }
  0xf0   : > { %1952 = vmatpush1.bf16.msra.mxu0 %v2898_v55  ;;  %2111 = vmatpush1.bf16.msra.mxu1 %v2901_v56  ;;  %v2994_v55 = vld [vmem:[%s3537_s7 + $0x560] ss:$16 sps:$4 sm:$0xff]   ;;  %v2997_v56 = vld [vmem:[%s3537_s7 + $0x568] ss:$16 sps:$4 sm:$0xff]  }
  0xf1   : > { %1953 = vmatprep.subr.bf16.mxu0 %v2906_v57  ;;  %2112 = vmatprep.subr.bf16.mxu1 %v2909_v58  ;;  %v3002_v57 = vld [vmem:[%s3537_s7 + $0x584] ss:$16 sps:$4 sm:$0xff]   ;;  %v3005_v58 = vld [vmem:[%s3537_s7 + $0x58c] ss:$16 sps:$4 sm:$0xff]  }
  0xf4   : > { %1954 = vmatpush1.bf16.msra.mxu0 %v2904_v59  ;;  %2113 = vmatpush1.bf16.msra.mxu1 %v2907_v60  ;;  %v3000_v59 = vld [vmem:[%s3537_s7 + $0x580] ss:$16 sps:$4 sm:$0xff]   ;;  %v3003_v60 = vld [vmem:[%s3537_s7 + $0x588] ss:$16 sps:$4 sm:$0xff]  }
  0xf5   : > { %1955 = vmatprep.subr.bf16.mxu0 %v2914_v61  ;;  %2114 = vmatprep.subr.bf16.mxu1 %v2917_v62  ;;  %v3008_v61 = vld [vmem:[%s3537_s7 + $0x5a4] ss:$16 sps:$4 sm:$0xff]   ;;  %v3011_v62 = vld [vmem:[%s3537_s7 + $0x5ac] ss:$16 sps:$4 sm:$0xff]  }
  0xf8   : > { %1956 = vmatpush1.bf16.msra.mxu0 %v2912_v63  ;;  %2115 = vmatpush1.bf16.msra.mxu1 %v2915_v0  ;;  %v3006_v63 = vld [vmem:[%s3537_s7 + $0x5a0] ss:$16 sps:$4 sm:$0xff]   ;;  %v3009_v0 = vld [vmem:[%s3537_s7 + $0x5a8] ss:$16 sps:$4 sm:$0xff]  }
  0xf9   : > { %1957 = vmatprep.subr.bf16.mxu0 %v2921_v1  ;;  %2116 = vmatprep.subr.bf16.mxu1 %v2924_v2  ;;  %v3017_v1 = vld [vmem:[%s3537_s7 + $0x5c4] ss:$16 sps:$4 sm:$0xff]   ;;  %v3020_v2 = vld [vmem:[%s3537_s7 + $0x5cc] ss:$16 sps:$4 sm:$0xff]  }
  0xfc   : > { %1958 = vmatpush1.bf16.msra.mxu0 %v2919_v3  ;;  %2117 = vmatpush1.bf16.msra.mxu1 %v2922_v4  ;;  %v3015_v3 = vld [vmem:[%s3537_s7 + $0x5c0] ss:$16 sps:$4 sm:$0xff]   ;;  %v3018_v4 = vld [vmem:[%s3537_s7 + $0x5c8] ss:$16 sps:$4 sm:$0xff]  }
  0xfd   : > { %1980 = vmatprep.subr.bf16.mxu0 %v2930_v5  ;;  %2139 = vmatprep.subr.bf16.mxu1 %v2933_v6  ;;  %v3023_v5 = vld [vmem:[%s3537_s7 + $0x5e4] ss:$16 sps:$4 sm:$0xff]   ;;  %v3026_v6 = vld [vmem:[%s3537_s7 + $0x5ec] ss:$16 sps:$4 sm:$0xff]  }
  0xff   : > { %1960 = vmatmul.mubr.bf16.vlgmr.msra.gmra.mrb[0].mxu0 %v2925_v7  ;;  %2119 = vmatmul.mubr.bf16.vlgmr.msra.gmra.mrb[0].mxu1 %v2925_v7  ;;  %v3021_v7 = vld [vmem:[%s3537_s7 + $0x5e0] ss:$16 sps:$4 sm:$0xff]  }
 0x100   : > { %1981 = vmatpush1.bf16.msra.mxu0 %v2928_v8  ;;  %2140 = vmatpush1.bf16.msra.mxu1 %v2931_v9  ;;  %v3024_v8 = vld [vmem:[%s3537_s7 + $0x5e8] ss:$16 sps:$4 sm:$0xff]   ;;  %s2409_s7 = sshll.u32 %s3063_s14, 2 }
 0x101   : > { %1982 = vmatprep.subr.bf16.mxu0 %v2936_v10  ;;  %2141 = vmatprep.subr.bf16.mxu1 %v2939_v11  ;;  %v3027_v9 = vld [vmem:[%s3809_s0 + $0x10] ss:$24 sps:$4 sm:$0xff]   ;;  %v3030_v10 = vld [vmem:[%s3809_s0 + $0x44] ss:$24 sps:$4 sm:$0xff]   ;;  %v3032_v11 = vld [vmem:[%s3809_s0 + $0x40] ss:$24 sps:$4 sm:$0xff]  }
 0x102   : > { %1969 = vmatprep.mubr.bf16.mxu0 %v3012_v12  ;;  %2128 = vmatprep.mubr.bf16.mxu1 %v3012_v12  ;;  %p622_p11 = scmp.lt.s32.totalorder %s2409_s7, 7  ;;  %v834_v12 = vlaneseq }
 0x104   : > { %1983 = vmatpush1.bf16.msra.mxu0 %v2934_v13  ;;  %2142 = vmatpush1.bf16.msra.mxu1 %v2937_v14  ;;  %s3821_s7 = smov (!%p622_p11, %s2409_s7), 7  ;;  %v835_v13 = vshrl.u32 %v834_v12, 7 }
 0x105   : > { %1984 = vmatprep.subr.bf16.mxu0 %v2942_v15  ;;  %2143 = vmatprep.subr.bf16.mxu1 %v2945_v16  ;;  %s624_s23 = scalar_lea.vmem %s3811_s2, %s3821_s7 }
 0x106   : > { %v836_v14 = vsub.s32 0, %v835_v13  ;;  %v844_v15 = vsub.s32 2, %v835_v13  ;;  %v832_v16 = vld [vmem:[%s624_s23] sm:$0xf] }
 0x107   : > { %1970 = vmatmul.mubr.bf16.gmra.mrb[4].mxu0 %v3014_v17  ;;  %2129 = vmatmul.mubr.bf16.gmra.mrb[4].mxu1 %v3014_v17  ;;  %v840_v17 = vsub.s32 1, %v835_v13 }
 0x108   : > { %1985 = vmatpush1.bf16.msra.mxu0 %v2940_v18  ;;  %2144 = vmatpush1.bf16.msra.mxu1 %v2943_v19  ;;  %v848_v18 = vsub.s32 3, %v835_v13  ;;  %v837_v19 = vrot.slane %v832_v16, %v836_v14 }
 0x109   : > { %1986 = vmatprep.subr.bf16.mxu0 %v2948_v20  ;;  %2145 = vmatprep.subr.bf16.mxu1 %v2951_v21  ;;  %v845_v20 = vrot.slane %v832_v16, %v844_v15  ;;  %v841_v21 = vrot.slane %v832_v16, %v840_v17 }
 0x10a   : > { %2012 = vmatprep.mubr.bf16.mxu0 %v3029_v22  ;;  %2171 = vmatprep.mubr.bf16.mxu1 %v3029_v22  ;;  %v849_v22 = vrot.slane %v832_v16, %v848_v18 }
 0x10c   : > { %1987 = vmatpush1.bf16.msra.mxu0 %v2946_v23  ;;  %2146 = vmatpush1.bf16.msra.mxu1 %v2949_v24 }
 0x10d   : > { %1988 = vmatprep.subr.bf16.mxu0 %v2954_v25  ;;  %2147 = vmatprep.subr.bf16.mxu1 %v2957_v26 }
 0x110   : > { %1989 = vmatpush1.bf16.msra.mxu0 %v2952_v27  ;;  %2148 = vmatpush1.bf16.msra.mxu1 %v2955_v28 }
 0x111   : > { %1990 = vmatprep.subr.bf16.mxu0 %v2960_v29  ;;  %2149 = vmatprep.subr.bf16.mxu1 %v2963_v30 }
 0x114   : > { %1991 = vmatpush1.bf16.msra.mxu0 %v2958_v31  ;;  %2150 = vmatpush1.bf16.msra.mxu1 %v2961_v32 }
 0x115   : > { %1992 = vmatprep.subr.bf16.mxu0 %v2966_v33  ;;  %2151 = vmatprep.subr.bf16.mxu1 %v2969_v34 }
 0x118   : > { %1993 = vmatpush1.bf16.msra.mxu0 %v2964_v35  ;;  %2152 = vmatpush1.bf16.msra.mxu1 %v2967_v36 }
 0x119   : > { %1994 = vmatprep.subr.bf16.mxu0 %v2972_v37  ;;  %2153 = vmatprep.subr.bf16.mxu1 %v2975_v38 }
 0x11c   : > { %1995 = vmatpush1.bf16.msra.mxu0 %v2970_v39  ;;  %2154 = vmatpush1.bf16.msra.mxu1 %v2973_v40 }
 0x11d   : > { %1996 = vmatprep.subr.bf16.mxu0 %v2978_v41  ;;  %2155 = vmatprep.subr.bf16.mxu1 %v2981_v42 }
 0x120   : > { %1997 = vmatpush1.bf16.msra.mxu0 %v2976_v43  ;;  %2156 = vmatpush1.bf16.msra.mxu1 %v2979_v44 }
 0x121   : > { %1998 = vmatprep.subr.bf16.mxu0 %v2984_v45  ;;  %2157 = vmatprep.subr.bf16.mxu1 %v2987_v46 }
 0x124   : > { %1999 = vmatpush1.bf16.msra.mxu0 %v2982_v47  ;;  %2158 = vmatpush1.bf16.msra.mxu1 %v2985_v48 }
 0x125   : > { %2000 = vmatprep.subr.bf16.mxu0 %v2990_v49  ;;  %2159 = vmatprep.subr.bf16.mxu1 %v2993_v50 }
 0x128   : > { %2001 = vmatpush1.bf16.msra.mxu0 %v2988_v51  ;;  %2160 = vmatpush1.bf16.msra.mxu1 %v2991_v52 }
 0x129   : > { %2002 = vmatprep.subr.bf16.mxu0 %v2996_v53  ;;  %2161 = vmatprep.subr.bf16.mxu1 %v2999_v54 }
 0x12c   : > { %2003 = vmatpush1.bf16.msra.mxu0 %v2994_v55  ;;  %2162 = vmatpush1.bf16.msra.mxu1 %v2997_v56 }
 0x12d   : > { %2004 = vmatprep.subr.bf16.mxu0 %v3002_v57  ;;  %2163 = vmatprep.subr.bf16.mxu1 %v3005_v58 }
 0x130   : > { %2005 = vmatpush1.bf16.msra.mxu0 %v3000_v59  ;;  %2164 = vmatpush1.bf16.msra.mxu1 %v3003_v60 }
 0x131   : > { %2006 = vmatprep.subr.bf16.mxu0 %v3008_v61  ;;  %2165 = vmatprep.subr.bf16.mxu1 %v3011_v62 }
 0x134   : > { %2007 = vmatpush1.bf16.msra.mxu0 %v3006_v63  ;;  %2166 = vmatpush1.bf16.msra.mxu1 %v3009_v0 }
 0x135   : > { %2008 = vmatprep.subr.bf16.mxu0 %v3017_v1  ;;  %2167 = vmatprep.subr.bf16.mxu1 %v3020_v2 }
 0x138   : > { %2009 = vmatpush1.bf16.msra.mxu0 %v3015_v3  ;;  %2168 = vmatpush1.bf16.msra.mxu1 %v3018_v4 }
 0x139   : > { %2010 = vmatprep.subr.bf16.mxu0 %v3023_v5  ;;  %2169 = vmatprep.subr.bf16.mxu1 %v3026_v6 }
 0x13c   : > { %2011 = vmatpush1.bf16.msra.mxu0 %v3021_v7  ;;  %2170 = vmatpush1.bf16.msra.mxu1 %v3024_v8 }
 0x13f   : > { %2013 = vmatmul.mubr.bf16.vlgmr.msra.gmra.mrb[0].mxu0 %v3027_v9  ;;  %2172 = vmatmul.mubr.bf16.vlgmr.msra.gmra.mrb[0].mxu1 %v3027_v9 }
 0x140   : > { %2022 = vmatprep.mubr.bf16.mxu0 %v3030_v10  ;;  %2181 = vmatprep.mubr.bf16.mxu1 %v3030_v10 }
 0x147   : > { %2023 = vmatmul.mubr.bf16.gmra.mrb[4].mxu0 %v3032_v11  ;;  %2182 = vmatmul.mubr.bf16.gmra.mrb[4].mxu1 %v3032_v11 }
 0x212   : > { %v2014_v23 = vpop.f32.mrb[0].mxu0  ;;  %v2173_v24 = vpop.f32.mrb[0].mxu1 }
 0x213   : > { %v2637_v25 = vadd.f32 %v2014_v23, %v837_v19  ;;  %v2645_v26 = vadd.f32 %v2173_v24, %v845_v20  ;;  %v2016_v27 = vpop.f32.mrb[1].mxu0  ;;  %v2175_v28 = vpop.f32.mrb[1].mxu1 }
 0x214   : > { %v2638_v29 = vadd.f32 %v2016_v27, %v841_v21  ;;  %v2646_v30 = vadd.f32 %v2175_v28, %v849_v22  ;;  %v2018_v31 = vpop.f32.mrb[2].mxu0  ;;  %v2177_v32 = vpop.f32.mrb[2].mxu1 }
 0x215   : > { %v2192_v33 = vmax.f32 %v2637_v25, 0.0  ;;  %v2194_v34 = vmax.f32 %v2645_v26, 0.0  ;;  %v2639_v35 = vadd.f32 %v2018_v31, %v837_v19  ;;  %v2647_v36 = vadd.f32 %v2177_v32, %v845_v20  ;;  %v2020_v37 = vpop.f32.mrb[3].mxu0  ;;  %v2179_v38 = vpop.f32.mrb[3].mxu1 }
 0x216   : > { %v2193_v39 = vmax.f32 %v2638_v29, 0.0  ;;  %v2195_v40 = vmax.f32 %v2646_v30, 0.0  ;;  %v2640_v41 = vadd.f32 %v2020_v37, %v841_v21  ;;  %v2648_v42 = vadd.f32 %v2179_v38, %v849_v22 }
 0x217   : > { %v2196_v43 = vmax.f32 %v2639_v35, 0.0  ;;  %v2198_v44 = vmax.f32 %v2647_v36, 0.0 }
 0x218   : > { %v2628_v45 = vpack.c.bf16 %v2193_v39, %v2192_v33  ;;  %v2629_v46 = vpack.c.bf16 %v2195_v40, %v2194_v34  ;;  %v2197_v47 = vmax.f32 %v2640_v41, 0.0  ;;  %v2199_v48 = vmax.f32 %v2648_v42, 0.0 }
 0x21a   : > { %2256 = vst [vmem:[%s3770_s12] sm:$0xff] %v2628_v45  ;;  %2257 = vst [vmem:[%s3770_s12 + $0x8] sm:$0xff] %v2629_v46  ;;  %v2630_v49 = vpack.c.bf16 %v2197_v47, %v2196_v43  ;;  %v2631_v50 = vpack.c.bf16 %v2199_v48, %v2198_v44  ;;  %v2024_v51 = vpop.f32.mrb[4].mxu0  ;;  %v2183_v52 = vpop.f32.mrb[4].mxu1 }
 0x21b   : > { %v2641_v53 = vadd.f32 %v2024_v51, %v837_v19  ;;  %v2649_v54 = vadd.f32 %v2183_v52, %v845_v20  ;;  %v2026_v55 = vpop.f32.mrb[5].mxu0  ;;  %v2185_v56 = vpop.f32.mrb[5].mxu1 }
 0x21c   : > { %2258 = vst [vmem:[%s3770_s12 + $0x10] sm:$0xff] %v2630_v49  ;;  %2259 = vst [vmem:[%s3770_s12 + $0x18] sm:$0xff] %v2631_v50  ;;  %v2642_v57 = vadd.f32 %v2026_v55, %v841_v21  ;;  %v2650_v58 = vadd.f32 %v2185_v56, %v849_v22  ;;  %v2028_v59 = vpop.f32.mrb[6].mxu0  ;;  %v2187_v60 = vpop.f32.mrb[6].mxu1 }
 0x21d   : > { %v2200_v61 = vmax.f32 %v2641_v53, 0.0  ;;  %v2202_v62 = vmax.f32 %v2649_v54, 0.0  ;;  %v2643_v63 = vadd.f32 %v2028_v59, %v837_v19  ;;  %v2651_v0 = vadd.f32 %v2187_v60, %v845_v20  ;;  %v2030_v1 = vpop.f32.mrb[7].mxu0  ;;  %v2189_v2 = vpop.f32.mrb[7].mxu1 }
 0x21e   : > { %v2201_v3 = vmax.f32 %v2642_v57, 0.0  ;;  %v2203_v4 = vmax.f32 %v2650_v58, 0.0  ;;  %v2644_v5 = vadd.f32 %v2030_v1, %v841_v21  ;;  %v2652_v6 = vadd.f32 %v2189_v2, %v849_v22  ;;  %2270 = sbr.rel (!%p3128_p6) target bundleno = 557 (0x22d), region = 59 }
 0x21f   : > { %v2204_v7 = vmax.f32 %v2643_v63, 0.0  ;;  %v2206_v8 = vmax.f32 %v2651_v0, 0.0 }
 0x220   : > { %v2632_v9 = vpack.c.bf16 %v2201_v3, %v2200_v61  ;;  %v2633_v10 = vpack.c.bf16 %v2203_v4, %v2202_v62  ;;  %v2205_v11 = vmax.f32 %v2644_v5, 0.0  ;;  %v2207_v12 = vmax.f32 %v2652_v6, 0.0 }
 0x221   : > { %v2289_v15 = vld [vmem:[%s3770_s12] sm:$0xff] (%p3128_p6)  ;;  %v2291_v16 = vld [vmem:[%s3770_s12 + $0x8] sm:$0xff] (%p3128_p6) }
 0x222   : > { %2260 = vst [vmem:[%s3770_s12 + $0x20] sm:$0xff] %v2632_v9  ;;  %2261 = vst [vmem:[%s3770_s12 + $0x28] sm:$0xff] %v2633_v10  ;;  %v2634_v13 = vpack.c.bf16 %v2205_v11, %v2204_v7  ;;  %v2635_v14 = vpack.c.bf16 %v2207_v12, %v2206_v8 }
 0x223   : > { %v2293_v17 = vld [vmem:[%s3770_s12 + $0x10] sm:$0xff] (%p3128_p6)  ;;  %v2295_v18 = vld [vmem:[%s3770_s12 + $0x18] sm:$0xff] (%p3128_p6)  ;;  %2290 = vst [vmem:[%s2276_s27] sm:$0xff] (%p3128_p6), %v2289_v15  ;;  %2292 = vst [vmem:[%s2276_s27 + $0x8] sm:$0xff] (%p3128_p6), %v2291_v16 }
 0x224   : > { %2262 = vst [vmem:[%s3770_s12 + $0x30] sm:$0xff] %v2634_v13  ;;  %2263 = vst [vmem:[%s3770_s12 + $0x38] sm:$0xff] %v2635_v14 }
 0x225   : > { %2294 = vst [vmem:[%s2276_s27 + $0x20] sm:$0xff] %v2293_v17  ;;  %2296 = vst [vmem:[%s2276_s27 + $0x28] sm:$0xff] %v2295_v18 }
 0x229   : > { %v2297_v19 = vld [vmem:[%s3770_s12 + $0x20] sm:$0xff]  ;;  %v2299_v20 = vld [vmem:[%s3770_s12 + $0x28] sm:$0xff] }
 0x22a   : > { %2298 = vst [vmem:[%s2276_s27 + $0x40] sm:$0xff] %v2297_v19  ;;  %2300 = vst [vmem:[%s2276_s27 + $0x48] sm:$0xff] %v2299_v20 }
 0x22b   : > { %v2301_v21 = vld [vmem:[%s3770_s12 + $0x30] sm:$0xff]  ;;  %v2303_v22 = vld [vmem:[%s3770_s12 + $0x38] sm:$0xff] }
 0x22c   : > { %2302 = vst [vmem:[%s2276_s27 + $0x60] sm:$0xff] %v2301_v21  ;;  %2304 = vst [vmem:[%s2276_s27 + $0x68] sm:$0xff] %v2303_v22 }
 0x22d PF: > { %s13_s16 = sadd.s32 1, %s3071_s16   ;;  %s3814_s12 = smov %s3059_s13 }
 0x22e   : > { %p10_p12 = scmp.ge.s32.totalorder %s13_s16, 4   ;;  %s3815_s13 = smov %s3133_s22 }
 0x22f   : > { %s3816_s14 = smov %s3067_s15  ;;  %s3817_s15 = smov %s3819_s17 }
 0x230   :  { %12 = sbr.rel (!%p10_p12) target bundleno = 3 (0x3), region = 119 }

// kernel: rtnet_forward.25
= control target key start
LH: loop header
LB: loop body
LE: loop exit
PB: predicated region body
PF: predicated region fallthrough
CT: control target
= control target key end

     0   :  { %s3791_s1 = inlined_call_operand.vmem [shape: bf16[1024,512], index: 1, kind: input, shape index: {}]   ;;  %s3792_s0 = inlined_call_operand.vmem [shape: bf16[32,1024], index: 0, kind: input, shape index: {}]   ;;  %s3793_s2 = inlined_call_operand.vmem [shape: f32[1,512], index: 2, kind: input, shape index: {}]   ;;  %s3794_s3 = inlined_call_operand.vmem [shape: bf16[32,512], index: 3, kind: output, shape index: {}]  }
   0x1   :  { %v2520_v0 = vld [vmem:[%s3791_s1 + $0x4] ss:$16 sps:$4 sm:$0xff]   ;;  %v2522_v1 = vld [vmem:[%s3791_s1 + $0xc] ss:$16 sps:$4 sm:$0xff]   ;;  %v2524_v2 = vld [vmem:[%s3791_s1] ss:$16 sps:$4 sm:$0xff]  }
   0x2   :  { %1668 = vmatprep.subr.bf16.mxu0 %v2520_v0  ;;  %v2525_v3 = vld [vmem:[%s3791_s1 + $0x8] ss:$16 sps:$4 sm:$0xff]   ;;  %1880 = vmatprep.subr.bf16.mxu1 %v2522_v1  ;;  %v2526_v4 = vld [vmem:[%s3791_s1 + $0x24] ss:$16 sps:$4 sm:$0xff]   ;;  %v2528_v5 = vld [vmem:[%s3791_s1 + $0x2c] ss:$16 sps:$4 sm:$0xff]  }
   0x3   :  { %1669 = vmatpush1.bf16.msra.mxu0 %v2524_v2  ;;  %1881 = vmatpush1.bf16.msra.mxu1 %v2525_v3  ;;  %v2530_v6 = vld [vmem:[%s3791_s1 + $0x20] ss:$16 sps:$4 sm:$0xff]   ;;  %v2531_v7 = vld [vmem:[%s3791_s1 + $0x28] ss:$16 sps:$4 sm:$0xff]   ;;  %v2532_v8 = vld [vmem:[%s3791_s1 + $0x44] ss:$16 sps:$4 sm:$0xff]  }
   0x4   :  { %1670 = vmatprep.subr.bf16.mxu0 %v2526_v4  ;;  %1882 = vmatprep.subr.bf16.mxu1 %v2528_v5  ;;  %v2534_v9 = vld [vmem:[%s3791_s1 + $0x4c] ss:$16 sps:$4 sm:$0xff]   ;;  %v2536_v10 = vld [vmem:[%s3791_s1 + $0x40] ss:$16 sps:$4 sm:$0xff]   ;;  %v2537_v11 = vld [vmem:[%s3791_s1 + $0x48] ss:$16 sps:$4 sm:$0xff]  }
   0x5   :  { %v2538_v12 = vld [vmem:[%s3791_s1 + $0x64] ss:$16 sps:$4 sm:$0xff]   ;;  %v2540_v13 = vld [vmem:[%s3791_s1 + $0x6c] ss:$16 sps:$4 sm:$0xff]   ;;  %v2542_v14 = vld [vmem:[%s3791_s1 + $0x60] ss:$16 sps:$4 sm:$0xff]  }
   0x6   :  { %v2543_v15 = vld [vmem:[%s3791_s1 + $0x68] ss:$16 sps:$4 sm:$0xff]   ;;  %v2544_v16 = vld [vmem:[%s3791_s1 + $0x84] ss:$16 sps:$4 sm:$0xff]   ;;  %v2546_v17 = vld [vmem:[%s3791_s1 + $0x8c] ss:$16 sps:$4 sm:$0xff]  }
   0x7   :  { %1671 = vmatpush1.bf16.msra.mxu0 %v2530_v6  ;;  %1883 = vmatpush1.bf16.msra.mxu1 %v2531_v7  ;;  %v2548_v18 = vld [vmem:[%s3791_s1 + $0x80] ss:$16 sps:$4 sm:$0xff]   ;;  %v2549_v19 = vld [vmem:[%s3791_s1 + $0x88] ss:$16 sps:$4 sm:$0xff]   ;;  %v2550_v20 = vld [vmem:[%s3791_s1 + $0xa4] ss:$16 sps:$4 sm:$0xff]  }
   0x8   :  { %1672 = vmatprep.subr.bf16.mxu0 %v2532_v8  ;;  %1884 = vmatprep.subr.bf16.mxu1 %v2534_v9  ;;  %v2552_v21 = vld [vmem:[%s3791_s1 + $0xac] ss:$16 sps:$4 sm:$0xff]   ;;  %v2554_v22 = vld [vmem:[%s3791_s1 + $0xa0] ss:$16 sps:$4 sm:$0xff]   ;;  %v2555_v23 = vld [vmem:[%s3791_s1 + $0xa8] ss:$16 sps:$4 sm:$0xff]  }
   0x9   :  { %v2556_v24 = vld [vmem:[%s3791_s1 + $0xc4] ss:$16 sps:$4 sm:$0xff]   ;;  %v2558_v25 = vld [vmem:[%s3791_s1 + $0xcc] ss:$16 sps:$4 sm:$0xff]   ;;  %v2560_v26 = vld [vmem:[%s3791_s1 + $0xc0] ss:$16 sps:$4 sm:$0xff]  }
   0xa   :  { %v2561_v27 = vld [vmem:[%s3791_s1 + $0xc8] ss:$16 sps:$4 sm:$0xff]   ;;  %v2562_v28 = vld [vmem:[%s3791_s1 + $0xe4] ss:$16 sps:$4 sm:$0xff]   ;;  %v2564_v29 = vld [vmem:[%s3791_s1 + $0xec] ss:$16 sps:$4 sm:$0xff]  }
   0xb   :  { %1673 = vmatpush1.bf16.msra.mxu0 %v2536_v10  ;;  %1885 = vmatpush1.bf16.msra.mxu1 %v2537_v11  ;;  %v2566_v30 = vld [vmem:[%s3791_s1 + $0xe0] ss:$16 sps:$4 sm:$0xff]   ;;  %v2567_v31 = vld [vmem:[%s3791_s1 + $0xe8] ss:$16 sps:$4 sm:$0xff]   ;;  %v2568_v32 = vld [vmem:[%s3791_s1 + $0x104] ss:$16 sps:$4 sm:$0xff]  }
   0xc   :  { %1674 = vmatprep.subr.bf16.mxu0 %v2538_v12  ;;  %1886 = vmatprep.subr.bf16.mxu1 %v2540_v13  ;;  %v2570_v33 = vld [vmem:[%s3791_s1 + $0x10c] ss:$16 sps:$4 sm:$0xff]   ;;  %v2572_v34 = vld [vmem:[%s3791_s1 + $0x100] ss:$16 sps:$4 sm:$0xff]   ;;  %v2573_v35 = vld [vmem:[%s3791_s1 + $0x108] ss:$16 sps:$4 sm:$0xff]  }
   0xd   :  { %v2574_v36 = vld [vmem:[%s3791_s1 + $0x124] ss:$16 sps:$4 sm:$0xff]   ;;  %v2576_v37 = vld [vmem:[%s3791_s1 + $0x12c] ss:$16 sps:$4 sm:$0xff]   ;;  %v2578_v38 = vld [vmem:[%s3791_s1 + $0x120] ss:$16 sps:$4 sm:$0xff]  }
   0xe   :  { %v2579_v39 = vld [vmem:[%s3791_s1 + $0x128] ss:$16 sps:$4 sm:$0xff]   ;;  %v2580_v40 = vld [vmem:[%s3791_s1 + $0x144] ss:$16 sps:$4 sm:$0xff]   ;;  %v2582_v41 = vld [vmem:[%s3791_s1 + $0x14c] ss:$16 sps:$4 sm:$0xff]  }
   0xf   :  { %1675 = vmatpush1.bf16.msra.mxu0 %v2542_v14  ;;  %1887 = vmatpush1.bf16.msra.mxu1 %v2543_v15  ;;  %v2584_v42 = vld [vmem:[%s3791_s1 + $0x140] ss:$16 sps:$4 sm:$0xff]   ;;  %v2585_v43 = vld [vmem:[%s3791_s1 + $0x148] ss:$16 sps:$4 sm:$0xff]   ;;  %v2586_v44 = vld [vmem:[%s3791_s1 + $0x164] ss:$16 sps:$4 sm:$0xff]  }
  0x10   :  { %1676 = vmatprep.subr.bf16.mxu0 %v2544_v16  ;;  %1888 = vmatprep.subr.bf16.mxu1 %v2546_v17  ;;  %v2588_v45 = vld [vmem:[%s3791_s1 + $0x16c] ss:$16 sps:$4 sm:$0xff]   ;;  %v14_v46 = vld [vmem:[%s3792_s0] sm:$0xff]  ;;  %v2591_v49 = vld [vmem:[%s3791_s1 + $0x168] ss:$16 sps:$4 sm:$0xff]  }
  0x11   :  { %v18_v47 = vld [vmem:[%s3792_s0 + $0x20] sm:$0xff]  ;;  %v2594_v52 = vld [vmem:[%s3791_s1 + $0x18c] ss:$16 sps:$4 sm:$0xff]   ;;  %v2597_v54 = vld [vmem:[%s3791_s1 + $0x188] ss:$16 sps:$4 sm:$0xff]  }
  0x12   :  { %v2590_v48 = vld [vmem:[%s3791_s1 + $0x160] ss:$16 sps:$4 sm:$0xff]   ;;  %v2169_v50 = vcombine.high %v14_v46, %v18_v47  ;;  %v2592_v51 = vld [vmem:[%s3791_s1 + $0x184] ss:$16 sps:$4 sm:$0xff]   ;;  %v2600_v56 = vld [vmem:[%s3791_s1 + $0x1ac] ss:$16 sps:$4 sm:$0xff]   ;;  %v2168_v5 = vcombine.low %v14_v46, %v18_v47 }
  0x13   :  { %1677 = vmatpush1.bf16.msra.mxu0 %v2548_v18  ;;  %1889 = vmatpush1.bf16.msra.mxu1 %v2549_v19  ;;  %v2596_v53 = vld [vmem:[%s3791_s1 + $0x180] ss:$16 sps:$4 sm:$0xff]   ;;  %v2598_v55 = vld [vmem:[%s3791_s1 + $0x1a4] ss:$16 sps:$4 sm:$0xff]   ;;  %v2603_v58 = vld [vmem:[%s3791_s1 + $0x1a8] ss:$16 sps:$4 sm:$0xff]  }
  0x14   :  { %1678 = vmatprep.subr.bf16.mxu0 %v2550_v20  ;;  %1890 = vmatprep.subr.bf16.mxu1 %v2552_v21  ;;  %v2602_v57 = vld [vmem:[%s3791_s1 + $0x1a0] ss:$16 sps:$4 sm:$0xff]   ;;  %v2604_v59 = vld [vmem:[%s3791_s1 + $0x1c4] ss:$16 sps:$4 sm:$0xff]   ;;  %v2606_v60 = vld [vmem:[%s3791_s1 + $0x1cc] ss:$16 sps:$4 sm:$0xff]  }
  0x15   :  { %1700 = vmatprep.mubr.bf16.mxu0 %v2169_v50  ;;  %1912 = vmatprep.mubr.bf16.mxu1 %v2169_v50  ;;  %v2608_v61 = vld [vmem:[%s3791_s1 + $0x1c0] ss:$16 sps:$4 sm:$0xff]   ;;  %v2609_v62 = vld [vmem:[%s3791_s1 + $0x1c8] ss:$16 sps:$4 sm:$0xff]   ;;  %v2610_v63 = vld [vmem:[%s3791_s1 + $0x1e4] ss:$16 sps:$4 sm:$0xff]  }
  0x16   :  { %v2612_v0 = vld [vmem:[%s3791_s1 + $0x1ec] ss:$16 sps:$4 sm:$0xff]   ;;  %v2614_v1 = vld [vmem:[%s3791_s1 + $0x1e0] ss:$16 sps:$4 sm:$0xff]   ;;  %v2615_v2 = vld [vmem:[%s3791_s1 + $0x1e8] ss:$16 sps:$4 sm:$0xff]  }
  0x17   :  { %1679 = vmatpush1.bf16.msra.mxu0 %v2554_v22  ;;  %1891 = vmatpush1.bf16.msra.mxu1 %v2555_v23  ;;  %v2618_v3 = vld [vmem:[%s3791_s1 + $0x204] ss:$16 sps:$4 sm:$0xff]   ;;  %v2621_v4 = vld [vmem:[%s3791_s1 + $0x20c] ss:$16 sps:$4 sm:$0xff]   ;;  %v2616_v6 = vld [vmem:[%s3791_s1 + $0x200] ss:$16 sps:$4 sm:$0xff]  }
  0x18   :  { %1680 = vmatprep.subr.bf16.mxu0 %v2556_v24  ;;  %1892 = vmatprep.subr.bf16.mxu1 %v2558_v25  ;;  %v2619_v7 = vld [vmem:[%s3791_s1 + $0x208] ss:$16 sps:$4 sm:$0xff]   ;;  %v2624_v8 = vld [vmem:[%s3791_s1 + $0x224] ss:$16 sps:$4 sm:$0xff]   ;;  %v2627_v9 = vld [vmem:[%s3791_s1 + $0x22c] ss:$16 sps:$4 sm:$0xff]  }
  0x19   :  { %v2622_v10 = vld [vmem:[%s3791_s1 + $0x220] ss:$16 sps:$4 sm:$0xff]   ;;  %v2625_v11 = vld [vmem:[%s3791_s1 + $0x228] ss:$16 sps:$4 sm:$0xff]   ;;  %v2630_v12 = vld [vmem:[%s3791_s1 + $0x244] ss:$16 sps:$4 sm:$0xff]  }
  0x1a   :  { %v2633_v13 = vld [vmem:[%s3791_s1 + $0x24c] ss:$16 sps:$4 sm:$0xff]   ;;  %v2628_v14 = vld [vmem:[%s3791_s1 + $0x240] ss:$16 sps:$4 sm:$0xff]   ;;  %v2631_v15 = vld [vmem:[%s3791_s1 + $0x248] ss:$16 sps:$4 sm:$0xff]  }
  0x1b   :  { %1681 = vmatpush1.bf16.msra.mxu0 %v2560_v26  ;;  %1893 = vmatpush1.bf16.msra.mxu1 %v2561_v27  ;;  %v2636_v16 = vld [vmem:[%s3791_s1 + $0x264] ss:$16 sps:$4 sm:$0xff]   ;;  %v2639_v17 = vld [vmem:[%s3791_s1 + $0x26c] ss:$16 sps:$4 sm:$0xff]   ;;  %v2634_v18 = vld [vmem:[%s3791_s1 + $0x260] ss:$16 sps:$4 sm:$0xff]  }
  0x1c   :  { %1682 = vmatprep.subr.bf16.mxu0 %v2562_v28  ;;  %1894 = vmatprep.subr.bf16.mxu1 %v2564_v29  ;;  %v2637_v19 = vld [vmem:[%s3791_s1 + $0x268] ss:$16 sps:$4 sm:$0xff]   ;;  %v2642_v20 = vld [vmem:[%s3791_s1 + $0x284] ss:$16 sps:$4 sm:$0xff]   ;;  %v2645_v21 = vld [vmem:[%s3791_s1 + $0x28c] ss:$16 sps:$4 sm:$0xff]  }
  0x1d   :  { %v2640_v22 = vld [vmem:[%s3791_s1 + $0x280] ss:$16 sps:$4 sm:$0xff]   ;;  %v2643_v23 = vld [vmem:[%s3791_s1 + $0x288] ss:$16 sps:$4 sm:$0xff]   ;;  %v2648_v24 = vld [vmem:[%s3791_s1 + $0x2a4] ss:$16 sps:$4 sm:$0xff]  }
  0x1e   :  { %v2651_v25 = vld [vmem:[%s3791_s1 + $0x2ac] ss:$16 sps:$4 sm:$0xff]   ;;  %v22_v26 = vld [vmem:[%s3792_s0 + $0x40] sm:$0xff]  ;;  %v2667_v46 = vld [vmem:[%s3791_s1 + $0x308] ss:$16 sps:$4 sm:$0xff]  }
  0x1f   :  { %1683 = vmatpush1.bf16.msra.mxu0 %v2566_v30  ;;  %1895 = vmatpush1.bf16.msra.mxu1 %v2567_v31  ;;  %v26_v27 = vld [vmem:[%s3792_s0 + $0x60] sm:$0xff]  ;;  %v2649_v30 = vld [vmem:[%s3791_s1 + $0x2a8] ss:$16 sps:$4 sm:$0xff]  }
  0x20   :  { %1684 = vmatprep.subr.bf16.mxu0 %v2568_v32  ;;  %1896 = vmatprep.subr.bf16.mxu1 %v2570_v33  ;;  %v2177_v28 = vcombine.high %v22_v26, %v26_v27  ;;  %v2646_v29 = vld [vmem:[%s3791_s1 + $0x2a0] ss:$16 sps:$4 sm:$0xff]   ;;  %v2176_v31 = vcombine.low %v22_v26, %v26_v27  ;;  %v2654_v32 = vld [vmem:[%s3791_s1 + $0x2c4] ss:$16 sps:$4 sm:$0xff]   ;;  %v2657_v33 = vld [vmem:[%s3791_s1 + $0x2cc] ss:$16 sps:$4 sm:$0xff]  }
  0x21   :  { %v2672_v47 = vld [vmem:[%s3791_s1 + $0x324] ss:$16 sps:$4 sm:$0xff]   ;;  %v2673_v50 = vld [vmem:[%s3791_s1 + $0x328] ss:$16 sps:$4 sm:$0xff]  }
  0x22   :  { %v3378_v27 = vld [vmem:[%s3792_s0 + $0x30] sm:$0xff] }
  0x23   :  { %1685 = vmatpush1.bf16.msra.mxu0 %v2572_v34  ;;  %1897 = vmatpush1.bf16.msra.mxu1 %v2573_v35  ;;  %v3209_v34 = vld [vmem:[%s3792_s0 + $0x8] sm:$0xff] }
  0x24   :  { %1686 = vmatprep.subr.bf16.mxu0 %v2574_v36  ;;  %1898 = vmatprep.subr.bf16.mxu1 %v2576_v37  ;;  %v3214_v35 = vld [vmem:[%s3792_s0 + $0x28] sm:$0xff]  ;;  %v2652_v36 = vld [vmem:[%s3791_s1 + $0x2c0] ss:$16 sps:$4 sm:$0xff]  }
  0x25   :  { %v2655_v37 = vld [vmem:[%s3791_s1 + $0x2c8] ss:$16 sps:$4 sm:$0xff]  }
  0x27   :  { %1687 = vmatpush1.bf16.msra.mxu0 %v2578_v38  ;;  %1899 = vmatpush1.bf16.msra.mxu1 %v2579_v39  ;;  %v2171_v38 = vcombine.high %v3209_v34, %v3214_v35  ;;  %v2660_v39 = vld [vmem:[%s3791_s1 + $0x2e4] ss:$16 sps:$4 sm:$0xff]  }
  0x28   :  { %1688 = vmatprep.subr.bf16.mxu0 %v2580_v40  ;;  %1900 = vmatprep.subr.bf16.mxu1 %v2582_v41  ;;  %v2663_v40 = vld [vmem:[%s3791_s1 + $0x2ec] ss:$16 sps:$4 sm:$0xff]   ;;  %v2658_v41 = vld [vmem:[%s3791_s1 + $0x2e0] ss:$16 sps:$4 sm:$0xff]  }
  0x2b   :  { %1689 = vmatpush1.bf16.msra.mxu0 %v2584_v42  ;;  %1901 = vmatpush1.bf16.msra.mxu1 %v2585_v43  ;;  %v2661_v42 = vld [vmem:[%s3791_s1 + $0x2e8] ss:$16 sps:$4 sm:$0xff]   ;;  %v2666_v43 = vld [vmem:[%s3791_s1 + $0x304] ss:$16 sps:$4 sm:$0xff]  }
  0x2c   :  { %1690 = vmatprep.subr.bf16.mxu0 %v2586_v44  ;;  %1902 = vmatprep.subr.bf16.mxu1 %v2588_v45  ;;  %v2669_v44 = vld [vmem:[%s3791_s1 + $0x30c] ss:$16 sps:$4 sm:$0xff]   ;;  %v2664_v45 = vld [vmem:[%s3791_s1 + $0x300] ss:$16 sps:$4 sm:$0xff]  }
  0x2f   :  { %1691 = vmatpush1.bf16.msra.mxu0 %v2590_v48  ;;  %1903 = vmatpush1.bf16.msra.mxu1 %v2591_v49  ;;  %v2675_v48 = vld [vmem:[%s3791_s1 + $0x32c] ss:$16 sps:$4 sm:$0xff]   ;;  %v2670_v49 = vld [vmem:[%s3791_s1 + $0x320] ss:$16 sps:$4 sm:$0xff]  }
  0x30   :  { %1692 = vmatprep.subr.bf16.mxu0 %v2592_v51  ;;  %1904 = vmatprep.subr.bf16.mxu1 %v2594_v52  ;;  %v2678_v51 = vld [vmem:[%s3791_s1 + $0x344] ss:$16 sps:$4 sm:$0xff]   ;;  %v2681_v52 = vld [vmem:[%s3791_s1 + $0x34c] ss:$16 sps:$4 sm:$0xff]  }
  0x33   :  { %1693 = vmatpush1.bf16.msra.mxu0 %v2596_v53  ;;  %1905 = vmatpush1.bf16.msra.mxu1 %v2597_v54  ;;  %v2676_v53 = vld [vmem:[%s3791_s1 + $0x340] ss:$16 sps:$4 sm:$0xff]   ;;  %v2679_v54 = vld [vmem:[%s3791_s1 + $0x348] ss:$16 sps:$4 sm:$0xff]  }
  0x34   :  { %1694 = vmatprep.subr.bf16.mxu0 %v2598_v55  ;;  %1906 = vmatprep.subr.bf16.mxu1 %v2600_v56  ;;  %v2684_v55 = vld [vmem:[%s3791_s1 + $0x364] ss:$16 sps:$4 sm:$0xff]   ;;  %v2687_v56 = vld [vmem:[%s3791_s1 + $0x36c] ss:$16 sps:$4 sm:$0xff]  }
  0x37   :  { %1695 = vmatpush1.bf16.msra.mxu0 %v2602_v57  ;;  %1907 = vmatpush1.bf16.msra.mxu1 %v2603_v58  ;;  %v2682_v57 = vld [vmem:[%s3791_s1 + $0x360] ss:$16 sps:$4 sm:$0xff]   ;;  %v2685_v58 = vld [vmem:[%s3791_s1 + $0x368] ss:$16 sps:$4 sm:$0xff]  }
  0x38   :  { %1696 = vmatprep.subr.bf16.mxu0 %v2604_v59  ;;  %1908 = vmatprep.subr.bf16.mxu1 %v2606_v60  ;;  %v2690_v59 = vld [vmem:[%s3791_s1 + $0x384] ss:$16 sps:$4 sm:$0xff]   ;;  %v2693_v60 = vld [vmem:[%s3791_s1 + $0x38c] ss:$16 sps:$4 sm:$0xff]  }
  0x3b   :  { %1697 = vmatpush1.bf16.msra.mxu0 %v2608_v61  ;;  %1909 = vmatpush1.bf16.msra.mxu1 %v2609_v62  ;;  %v2688_v61 = vld [vmem:[%s3791_s1 + $0x380] ss:$16 sps:$4 sm:$0xff]   ;;  %v2691_v62 = vld [vmem:[%s3791_s1 + $0x388] ss:$16 sps:$4 sm:$0xff]  }
  0x3c   :  { %1698 = vmatprep.subr.bf16.mxu0 %v2610_v63  ;;  %1910 = vmatprep.subr.bf16.mxu1 %v2612_v0  ;;  %v2696_v63 = vld [vmem:[%s3791_s1 + $0x3a4] ss:$16 sps:$4 sm:$0xff]   ;;  %v2699_v0 = vld [vmem:[%s3791_s1 + $0x3ac] ss:$16 sps:$4 sm:$0xff]  }
  0x3f   :  { %1699 = vmatpush1.bf16.msra.mxu0 %v2614_v1  ;;  %1911 = vmatpush1.bf16.msra.mxu1 %v2615_v2  ;;  %v2694_v1 = vld [vmem:[%s3791_s1 + $0x3a0] ss:$16 sps:$4 sm:$0xff]   ;;  %v2697_v2 = vld [vmem:[%s3791_s1 + $0x3a8] ss:$16 sps:$4 sm:$0xff]  }
  0x40   :  { %1721 = vmatprep.subr.bf16.mxu0 %v2618_v3  ;;  %1933 = vmatprep.subr.bf16.mxu1 %v2621_v4  ;;  %v2702_v3 = vld [vmem:[%s3791_s1 + $0x3c4] ss:$16 sps:$4 sm:$0xff]   ;;  %v2705_v4 = vld [vmem:[%s3791_s1 + $0x3cc] ss:$16 sps:$4 sm:$0xff]  }
  0x42   :  { %1701 = vmatmul.mubr.bf16.vlgmr.msra.gmra.mrb[0].mxu0 %v2168_v5  ;;  %1913 = vmatmul.mubr.bf16.vlgmr.msra.gmra.mrb[0].mxu1 %v2168_v5  ;;  %v2700_v5 = vld [vmem:[%s3791_s1 + $0x3c0] ss:$16 sps:$4 sm:$0xff]  }
  0x43   :  { %1722 = vmatpush1.bf16.msra.mxu0 %v2616_v6  ;;  %1934 = vmatpush1.bf16.msra.mxu1 %v2619_v7  ;;  %v2703_v6 = vld [vmem:[%s3791_s1 + $0x3c8] ss:$16 sps:$4 sm:$0xff]   ;;  %v2708_v7 = vld [vmem:[%s3791_s1 + $0x3e4] ss:$16 sps:$4 sm:$0xff]  }
  0x44   :  { %1723 = vmatprep.subr.bf16.mxu0 %v2624_v8  ;;  %1935 = vmatprep.subr.bf16.mxu1 %v2627_v9  ;;  %v2711_v8 = vld [vmem:[%s3791_s1 + $0x3ec] ss:$16 sps:$4 sm:$0xff]   ;;  %v2706_v9 = vld [vmem:[%s3791_s1 + $0x3e0] ss:$16 sps:$4 sm:$0xff]  }
  0x45   :  { %1710 = vmatprep.mubr.bf16.mxu0 %v2177_v28  ;;  %1922 = vmatprep.mubr.bf16.mxu1 %v2177_v28  ;;  %v2724_v28 = vld [vmem:[%s3791_s1 + $0x440] ss:$16 sps:$4 sm:$0xff]  }
  0x47   :  { %1724 = vmatpush1.bf16.msra.mxu0 %v2622_v10  ;;  %1936 = vmatpush1.bf16.msra.mxu1 %v2625_v11  ;;  %v2709_v10 = vld [vmem:[%s3791_s1 + $0x3e8] ss:$16 sps:$4 sm:$0xff]   ;;  %v2714_v11 = vld [vmem:[%s3791_s1 + $0x404] ss:$16 sps:$4 sm:$0xff]  }
  0x48   :  { %1725 = vmatprep.subr.bf16.mxu0 %v2630_v12  ;;  %1937 = vmatprep.subr.bf16.mxu1 %v2633_v13  ;;  %v2717_v12 = vld [vmem:[%s3791_s1 + $0x40c] ss:$16 sps:$4 sm:$0xff]   ;;  %v2712_v13 = vld [vmem:[%s3791_s1 + $0x400] ss:$16 sps:$4 sm:$0xff]  }
  0x4a   :  { %1711 = vmatmul.mubr.bf16.gmra.mrb[4].mxu0 %v2176_v31  ;;  %1923 = vmatmul.mubr.bf16.gmra.mrb[4].mxu1 %v2176_v31  ;;  %v2735_v31 = vld [vmem:[%s3791_s1 + $0x46c] ss:$16 sps:$4 sm:$0xff]  }
  0x4b   :  { %1726 = vmatpush1.bf16.msra.mxu0 %v2628_v14  ;;  %1938 = vmatpush1.bf16.msra.mxu1 %v2631_v15  ;;  %v2715_v14 = vld [vmem:[%s3791_s1 + $0x408] ss:$16 sps:$4 sm:$0xff]   ;;  %v2170_v15 = vcombine.low %v3209_v34, %v3214_v35  ;;  %v2738_v35 = vld [vmem:[%s3791_s1 + $0x484] ss:$16 sps:$4 sm:$0xff]  }
  0x4c   :  { %1727 = vmatprep.subr.bf16.mxu0 %v2636_v16  ;;  %1939 = vmatprep.subr.bf16.mxu1 %v2639_v17  ;;  %v23_v16 = vld [vmem:[%s3792_s0 + $0x48] sm:$0xff] }
  0x4d   :  { %1753 = vmatprep.mubr.bf16.mxu0 %v2171_v38  ;;  %1965 = vmatprep.mubr.bf16.mxu1 %v2171_v38  ;;  %v27_v17 = vld [vmem:[%s3792_s0 + $0x68] sm:$0xff] }
  0x4e   :  { %v2178_v26 = vcombine.low %v23_v16, %v27_v17  ;;  %v2733_v34 = vld [vmem:[%s3791_s1 + $0x468] ss:$16 sps:$4 sm:$0xff]  }
  0x4f   :  { %1728 = vmatpush1.bf16.msra.mxu0 %v2634_v18  ;;  %1940 = vmatpush1.bf16.msra.mxu1 %v2637_v19  ;;  %v2720_v18 = vld [vmem:[%s3791_s1 + $0x424] ss:$16 sps:$4 sm:$0xff]   ;;  %v2723_v19 = vld [vmem:[%s3791_s1 + $0x42c] ss:$16 sps:$4 sm:$0xff]   ;;  %v2739_v38 = vld [vmem:[%s3791_s1 + $0x488] ss:$16 sps:$4 sm:$0xff]  }
  0x50   :  { %1729 = vmatprep.subr.bf16.mxu0 %v2642_v20  ;;  %1941 = vmatprep.subr.bf16.mxu1 %v2645_v21  ;;  %v2179_v20 = vcombine.high %v23_v16, %v27_v17  ;;  %v2718_v21 = vld [vmem:[%s3791_s1 + $0x420] ss:$16 sps:$4 sm:$0xff]   ;;  %v2807_v16 = vld [vmem:[%s3791_s1 + $0x5ec] ss:$16 sps:$4 sm:$0xff]  }
  0x51   :  { %v2802_v17 = vld [vmem:[%s3791_s1 + $0x5e0] ss:$16 sps:$4 sm:$0xff]  }
  0x53   :  { %1730 = vmatpush1.bf16.msra.mxu0 %v2640_v22  ;;  %1942 = vmatpush1.bf16.msra.mxu1 %v2643_v23  ;;  %v2721_v22 = vld [vmem:[%s3791_s1 + $0x428] ss:$16 sps:$4 sm:$0xff]   ;;  %v2726_v23 = vld [vmem:[%s3791_s1 + $0x444] ss:$16 sps:$4 sm:$0xff]  }
  0x54   :  { %1731 = vmatprep.subr.bf16.mxu0 %v2648_v24  ;;  %1943 = vmatprep.subr.bf16.mxu1 %v2651_v25  ;;  %v2729_v24 = vld [vmem:[%s3791_s1 + $0x44c] ss:$16 sps:$4 sm:$0xff]   ;;  %v3373_v25 = vld [vmem:[%s3792_s0 + $0x10] sm:$0xff] }
  0x57   :  { %1732 = vmatpush1.bf16.msra.mxu0 %v2646_v29  ;;  %1944 = vmatpush1.bf16.msra.mxu1 %v2649_v30  ;;  %v2727_v29 = vld [vmem:[%s3791_s1 + $0x448] ss:$16 sps:$4 sm:$0xff]   ;;  %v2732_v30 = vld [vmem:[%s3791_s1 + $0x464] ss:$16 sps:$4 sm:$0xff]  }
  0x58   :  { %1733 = vmatprep.subr.bf16.mxu0 %v2654_v32  ;;  %1945 = vmatprep.subr.bf16.mxu1 %v2657_v33  ;;  %v2173_v32 = vcombine.high %v3373_v25, %v3378_v27  ;;  %v2730_v33 = vld [vmem:[%s3791_s1 + $0x460] ss:$16 sps:$4 sm:$0xff]  }
  0x5b   :  { %1734 = vmatpush1.bf16.msra.mxu0 %v2652_v36  ;;  %1946 = vmatpush1.bf16.msra.mxu1 %v2655_v37  ;;  %v2741_v36 = vld [vmem:[%s3791_s1 + $0x48c] ss:$16 sps:$4 sm:$0xff]   ;;  %v2736_v37 = vld [vmem:[%s3791_s1 + $0x480] ss:$16 sps:$4 sm:$0xff]  }
  0x5c   :  { %1735 = vmatprep.subr.bf16.mxu0 %v2660_v39  ;;  %1947 = vmatprep.subr.bf16.mxu1 %v2663_v40  ;;  %v2744_v39 = vld [vmem:[%s3791_s1 + $0x4a4] ss:$16 sps:$4 sm:$0xff]   ;;  %v2747_v40 = vld [vmem:[%s3791_s1 + $0x4ac] ss:$16 sps:$4 sm:$0xff]  }
  0x5f   :  { %1736 = vmatpush1.bf16.msra.mxu0 %v2658_v41  ;;  %1948 = vmatpush1.bf16.msra.mxu1 %v2661_v42  ;;  %v2742_v41 = vld [vmem:[%s3791_s1 + $0x4a0] ss:$16 sps:$4 sm:$0xff]   ;;  %v2745_v42 = vld [vmem:[%s3791_s1 + $0x4a8] ss:$16 sps:$4 sm:$0xff]  }
  0x60   :  { %1737 = vmatprep.subr.bf16.mxu0 %v2666_v43  ;;  %1949 = vmatprep.subr.bf16.mxu1 %v2669_v44  ;;  %v2750_v43 = vld [vmem:[%s3791_s1 + $0x4c4] ss:$16 sps:$4 sm:$0xff]   ;;  %v2753_v44 = vld [vmem:[%s3791_s1 + $0x4cc] ss:$16 sps:$4 sm:$0xff]  }
  0x63   :  { %1738 = vmatpush1.bf16.msra.mxu0 %v2664_v45  ;;  %1950 = vmatpush1.bf16.msra.mxu1 %v2667_v46  ;;  %v2748_v45 = vld [vmem:[%s3791_s1 + $0x4c0] ss:$16 sps:$4 sm:$0xff]   ;;  %v2751_v46 = vld [vmem:[%s3791_s1 + $0x4c8] ss:$16 sps:$4 sm:$0xff]  }
  0x64   :  { %1739 = vmatprep.subr.bf16.mxu0 %v2672_v47  ;;  %1951 = vmatprep.subr.bf16.mxu1 %v2675_v48  ;;  %v2756_v47 = vld [vmem:[%s3791_s1 + $0x4e4] ss:$16 sps:$4 sm:$0xff]   ;;  %v2759_v48 = vld [vmem:[%s3791_s1 + $0x4ec] ss:$16 sps:$4 sm:$0xff]  }
  0x67   :  { %1740 = vmatpush1.bf16.msra.mxu0 %v2670_v49  ;;  %1952 = vmatpush1.bf16.msra.mxu1 %v2673_v50  ;;  %v2754_v49 = vld [vmem:[%s3791_s1 + $0x4e0] ss:$16 sps:$4 sm:$0xff]   ;;  %v2757_v50 = vld [vmem:[%s3791_s1 + $0x4e8] ss:$16 sps:$4 sm:$0xff]  }
  0x68   :  { %1741 = vmatprep.subr.bf16.mxu0 %v2678_v51  ;;  %1953 = vmatprep.subr.bf16.mxu1 %v2681_v52  ;;  %v2762_v51 = vld [vmem:[%s3791_s1 + $0x504] ss:$16 sps:$4 sm:$0xff]   ;;  %v2765_v52 = vld [vmem:[%s3791_s1 + $0x50c] ss:$16 sps:$4 sm:$0xff]  }
  0x6b   :  { %1742 = vmatpush1.bf16.msra.mxu0 %v2676_v53  ;;  %1954 = vmatpush1.bf16.msra.mxu1 %v2679_v54  ;;  %v2760_v53 = vld [vmem:[%s3791_s1 + $0x500] ss:$16 sps:$4 sm:$0xff]   ;;  %v2763_v54 = vld [vmem:[%s3791_s1 + $0x508] ss:$16 sps:$4 sm:$0xff]  }
  0x6c   :  { %1743 = vmatprep.subr.bf16.mxu0 %v2684_v55  ;;  %1955 = vmatprep.subr.bf16.mxu1 %v2687_v56  ;;  %v2768_v55 = vld [vmem:[%s3791_s1 + $0x524] ss:$16 sps:$4 sm:$0xff]   ;;  %v2771_v56 = vld [vmem:[%s3791_s1 + $0x52c] ss:$16 sps:$4 sm:$0xff]  }
  0x6f   :  { %1744 = vmatpush1.bf16.msra.mxu0 %v2682_v57  ;;  %1956 = vmatpush1.bf16.msra.mxu1 %v2685_v58  ;;  %v2766_v57 = vld [vmem:[%s3791_s1 + $0x520] ss:$16 sps:$4 sm:$0xff]   ;;  %v2769_v58 = vld [vmem:[%s3791_s1 + $0x528] ss:$16 sps:$4 sm:$0xff]  }
  0x70   :  { %1745 = vmatprep.subr.bf16.mxu0 %v2690_v59  ;;  %1957 = vmatprep.subr.bf16.mxu1 %v2693_v60  ;;  %v2774_v59 = vld [vmem:[%s3791_s1 + $0x544] ss:$16 sps:$4 sm:$0xff]   ;;  %v2777_v60 = vld [vmem:[%s3791_s1 + $0x54c] ss:$16 sps:$4 sm:$0xff]  }
  0x73   :  { %1746 = vmatpush1.bf16.msra.mxu0 %v2688_v61  ;;  %1958 = vmatpush1.bf16.msra.mxu1 %v2691_v62  ;;  %v2772_v61 = vld [vmem:[%s3791_s1 + $0x540] ss:$16 sps:$4 sm:$0xff]   ;;  %v2775_v62 = vld [vmem:[%s3791_s1 + $0x548] ss:$16 sps:$4 sm:$0xff]  }
  0x74   :  { %1747 = vmatprep.subr.bf16.mxu0 %v2696_v63  ;;  %1959 = vmatprep.subr.bf16.mxu1 %v2699_v0  ;;  %v2780_v63 = vld [vmem:[%s3791_s1 + $0x564] ss:$16 sps:$4 sm:$0xff]   ;;  %v2783_v0 = vld [vmem:[%s3791_s1 + $0x56c] ss:$16 sps:$4 sm:$0xff]  }
  0x77   :  { %1748 = vmatpush1.bf16.msra.mxu0 %v2694_v1  ;;  %1960 = vmatpush1.bf16.msra.mxu1 %v2697_v2  ;;  %v2778_v1 = vld [vmem:[%s3791_s1 + $0x560] ss:$16 sps:$4 sm:$0xff]   ;;  %v2781_v2 = vld [vmem:[%s3791_s1 + $0x568] ss:$16 sps:$4 sm:$0xff]  }
  0x78   :  { %1749 = vmatprep.subr.bf16.mxu0 %v2702_v3  ;;  %1961 = vmatprep.subr.bf16.mxu1 %v2705_v4  ;;  %v2786_v3 = vld [vmem:[%s3791_s1 + $0x584] ss:$16 sps:$4 sm:$0xff]   ;;  %v2789_v4 = vld [vmem:[%s3791_s1 + $0x58c] ss:$16 sps:$4 sm:$0xff]  }
  0x7b   :  { %1750 = vmatpush1.bf16.msra.mxu0 %v2700_v5  ;;  %1962 = vmatpush1.bf16.msra.mxu1 %v2703_v6  ;;  %v2784_v5 = vld [vmem:[%s3791_s1 + $0x580] ss:$16 sps:$4 sm:$0xff]   ;;  %v2787_v6 = vld [vmem:[%s3791_s1 + $0x588] ss:$16 sps:$4 sm:$0xff]  }
  0x7c   :  { %1751 = vmatprep.subr.bf16.mxu0 %v2708_v7  ;;  %1963 = vmatprep.subr.bf16.mxu1 %v2711_v8  ;;  %v2792_v7 = vld [vmem:[%s3791_s1 + $0x5a4] ss:$16 sps:$4 sm:$0xff]   ;;  %v2795_v8 = vld [vmem:[%s3791_s1 + $0x5ac] ss:$16 sps:$4 sm:$0xff]  }
  0x7f   :  { %1752 = vmatpush1.bf16.msra.mxu0 %v2706_v9  ;;  %1964 = vmatpush1.bf16.msra.mxu1 %v2709_v10  ;;  %v2790_v9 = vld [vmem:[%s3791_s1 + $0x5a0] ss:$16 sps:$4 sm:$0xff]   ;;  %v2793_v10 = vld [vmem:[%s3791_s1 + $0x5a8] ss:$16 sps:$4 sm:$0xff]  }
  0x80   :  { %1774 = vmatprep.subr.bf16.mxu0 %v2714_v11  ;;  %1986 = vmatprep.subr.bf16.mxu1 %v2717_v12  ;;  %v2798_v11 = vld [vmem:[%s3791_s1 + $0x5c4] ss:$16 sps:$4 sm:$0xff]   ;;  %v2801_v12 = vld [vmem:[%s3791_s1 + $0x5cc] ss:$16 sps:$4 sm:$0xff]  }
  0x82   :  { %1754 = vmatmul.mubr.bf16.vlgmr.msra.gmra.mrb[0].mxu0 %v2170_v15  ;;  %1966 = vmatmul.mubr.bf16.vlgmr.msra.gmra.mrb[0].mxu1 %v2170_v15  ;;  %v2804_v15 = vld [vmem:[%s3791_s1 + $0x5e4] ss:$16 sps:$4 sm:$0xff]  }
  0x83   :  { %1775 = vmatpush1.bf16.msra.mxu0 %v2712_v13  ;;  %1987 = vmatpush1.bf16.msra.mxu1 %v2715_v14  ;;  %v2796_v13 = vld [vmem:[%s3791_s1 + $0x5c0] ss:$16 sps:$4 sm:$0xff]   ;;  %v2799_v14 = vld [vmem:[%s3791_s1 + $0x5c8] ss:$16 sps:$4 sm:$0xff]  }
  0x84   :  { %1776 = vmatprep.subr.bf16.mxu0 %v2720_v18  ;;  %1988 = vmatprep.subr.bf16.mxu1 %v2723_v19  ;;  %v2805_v18 = vld [vmem:[%s3791_s1 + $0x5e8] ss:$16 sps:$4 sm:$0xff]   ;;  %v2810_v19 = vld [vmem:[%s3791_s1 + $0x604] ss:$16 sps:$4 sm:$0xff]  }
  0x85   :  { %1763 = vmatprep.mubr.bf16.mxu0 %v2179_v20  ;;  %1975 = vmatprep.mubr.bf16.mxu1 %v2179_v20  ;;  %v2813_v20 = vld [vmem:[%s3791_s1 + $0x60c] ss:$16 sps:$4 sm:$0xff]  }
  0x87   :  { %1777 = vmatpush1.bf16.msra.mxu0 %v2718_v21  ;;  %1989 = vmatpush1.bf16.msra.mxu1 %v2721_v22  ;;  %v2172_v21 = vcombine.low %v3373_v25, %v3378_v27  ;;  %v24_v22 = vld [vmem:[%s3792_s0 + $0x50] sm:$0xff]  ;;  %v2819_v27 = vld [vmem:[%s3791_s1 + $0x62c] ss:$16 sps:$4 sm:$0xff]  }
  0x88   :  { %1778 = vmatprep.subr.bf16.mxu0 %v2726_v23  ;;  %1990 = vmatprep.subr.bf16.mxu1 %v2729_v24  ;;  %v28_v23 = vld [vmem:[%s3792_s0 + $0x70] sm:$0xff] }
  0x89   :  { %v2808_v24 = vld [vmem:[%s3791_s1 + $0x600] ss:$16 sps:$4 sm:$0xff]   ;;  %v2816_v25 = vld [vmem:[%s3791_s1 + $0x624] ss:$16 sps:$4 sm:$0xff]  }
  0x8a   :  { %1764 = vmatmul.mubr.bf16.gmra.mrb[4].mxu0 %v2178_v26  ;;  %1976 = vmatmul.mubr.bf16.gmra.mrb[4].mxu1 %v2178_v26  ;;  %v2811_v26 = vld [vmem:[%s3791_s1 + $0x608] ss:$16 sps:$4 sm:$0xff]  }
  0x8b   :  { %1779 = vmatpush1.bf16.msra.mxu0 %v2724_v28  ;;  %1991 = vmatpush1.bf16.msra.mxu1 %v2727_v29  ;;  %v2181_v28 = vcombine.high %v24_v22, %v28_v23  ;;  %v2814_v29 = vld [vmem:[%s3791_s1 + $0x620] ss:$16 sps:$4 sm:$0xff]  }
  0x8c   :  { %1780 = vmatprep.subr.bf16.mxu0 %v2732_v30  ;;  %1992 = vmatprep.subr.bf16.mxu1 %v2735_v31  ;;  %v2817_v30 = vld [vmem:[%s3791_s1 + $0x628] ss:$16 sps:$4 sm:$0xff]   ;;  %v2822_v31 = vld [vmem:[%s3791_s1 + $0x644] ss:$16 sps:$4 sm:$0xff]  }
  0x8d   :  { %1806 = vmatprep.mubr.bf16.mxu0 %v2173_v32  ;;  %2018 = vmatprep.mubr.bf16.mxu1 %v2173_v32  ;;  %v2825_v32 = vld [vmem:[%s3791_s1 + $0x64c] ss:$16 sps:$4 sm:$0xff]  }
  0x8f   :  { %1781 = vmatpush1.bf16.msra.mxu0 %v2730_v33  ;;  %1993 = vmatpush1.bf16.msra.mxu1 %v2733_v34  ;;  %v2180_v33 = vcombine.low %v24_v22, %v28_v23  ;;  %v3585_v34 = vld [vmem:[%s3792_s0 + $0x18] sm:$0xff]  ;;  %v2900_v23 = vld [vmem:[%s3791_s1 + $0x7e4] ss:$16 sps:$4 sm:$0xff]  }
  0x90   :  { %1782 = vmatprep.subr.bf16.mxu0 %v2738_v35  ;;  %1994 = vmatprep.subr.bf16.mxu1 %v2741_v36  ;;  %v3590_v35 = vld [vmem:[%s3792_s0 + $0x38] sm:$0xff]  ;;  %v2820_v36 = vld [vmem:[%s3791_s1 + $0x640] ss:$16 sps:$4 sm:$0xff]  }
  0x91   :  { %v2895_v22 = vld [vmem:[%s3791_s1 + $0x7c8] ss:$16 sps:$4 sm:$0xff]  }
  0x93   :  { %1783 = vmatpush1.bf16.msra.mxu0 %v2736_v37  ;;  %1995 = vmatpush1.bf16.msra.mxu1 %v2739_v38  ;;  %v2823_v37 = vld [vmem:[%s3791_s1 + $0x648] ss:$16 sps:$4 sm:$0xff]   ;;  %v2828_v38 = vld [vmem:[%s3791_s1 + $0x664] ss:$16 sps:$4 sm:$0xff]  }
  0x94   :  { %1784 = vmatprep.subr.bf16.mxu0 %v2744_v39  ;;  %1996 = vmatprep.subr.bf16.mxu1 %v2747_v40  ;;  %v2831_v39 = vld [vmem:[%s3791_s1 + $0x66c] ss:$16 sps:$4 sm:$0xff]   ;;  %v2175_v40 = vcombine.high %v3585_v34, %v3590_v35 }
  0x97   :  { %1785 = vmatpush1.bf16.msra.mxu0 %v2742_v41  ;;  %1997 = vmatpush1.bf16.msra.mxu1 %v2745_v42  ;;  %v2826_v41 = vld [vmem:[%s3791_s1 + $0x660] ss:$16 sps:$4 sm:$0xff]   ;;  %v2829_v42 = vld [vmem:[%s3791_s1 + $0x668] ss:$16 sps:$4 sm:$0xff]  }
  0x98   :  { %1786 = vmatprep.subr.bf16.mxu0 %v2750_v43  ;;  %1998 = vmatprep.subr.bf16.mxu1 %v2753_v44  ;;  %v2834_v43 = vld [vmem:[%s3791_s1 + $0x684] ss:$16 sps:$4 sm:$0xff]   ;;  %v2837_v44 = vld [vmem:[%s3791_s1 + $0x68c] ss:$16 sps:$4 sm:$0xff]  }
  0x9b   :  { %1787 = vmatpush1.bf16.msra.mxu0 %v2748_v45  ;;  %1999 = vmatpush1.bf16.msra.mxu1 %v2751_v46  ;;  %v2832_v45 = vld [vmem:[%s3791_s1 + $0x680] ss:$16 sps:$4 sm:$0xff]   ;;  %v2835_v46 = vld [vmem:[%s3791_s1 + $0x688] ss:$16 sps:$4 sm:$0xff]  }
  0x9c   :  { %1788 = vmatprep.subr.bf16.mxu0 %v2756_v47  ;;  %2000 = vmatprep.subr.bf16.mxu1 %v2759_v48  ;;  %v2840_v47 = vld [vmem:[%s3791_s1 + $0x6a4] ss:$16 sps:$4 sm:$0xff]   ;;  %v2843_v48 = vld [vmem:[%s3791_s1 + $0x6ac] ss:$16 sps:$4 sm:$0xff]  }
  0x9f   :  { %1789 = vmatpush1.bf16.msra.mxu0 %v2754_v49  ;;  %2001 = vmatpush1.bf16.msra.mxu1 %v2757_v50  ;;  %v2838_v49 = vld [vmem:[%s3791_s1 + $0x6a0] ss:$16 sps:$4 sm:$0xff]   ;;  %v2841_v50 = vld [vmem:[%s3791_s1 + $0x6a8] ss:$16 sps:$4 sm:$0xff]  }
  0xa0   :  { %1790 = vmatprep.subr.bf16.mxu0 %v2762_v51  ;;  %2002 = vmatprep.subr.bf16.mxu1 %v2765_v52  ;;  %v2846_v51 = vld [vmem:[%s3791_s1 + $0x6c4] ss:$16 sps:$4 sm:$0xff]   ;;  %v2849_v52 = vld [vmem:[%s3791_s1 + $0x6cc] ss:$16 sps:$4 sm:$0xff]  }
  0xa3   :  { %1791 = vmatpush1.bf16.msra.mxu0 %v2760_v53  ;;  %2003 = vmatpush1.bf16.msra.mxu1 %v2763_v54  ;;  %v2844_v53 = vld [vmem:[%s3791_s1 + $0x6c0] ss:$16 sps:$4 sm:$0xff]   ;;  %v2847_v54 = vld [vmem:[%s3791_s1 + $0x6c8] ss:$16 sps:$4 sm:$0xff]  }
  0xa4   :  { %1792 = vmatprep.subr.bf16.mxu0 %v2768_v55  ;;  %2004 = vmatprep.subr.bf16.mxu1 %v2771_v56  ;;  %v2852_v55 = vld [vmem:[%s3791_s1 + $0x6e4] ss:$16 sps:$4 sm:$0xff]   ;;  %v2855_v56 = vld [vmem:[%s3791_s1 + $0x6ec] ss:$16 sps:$4 sm:$0xff]  }
  0xa7   :  { %1793 = vmatpush1.bf16.msra.mxu0 %v2766_v57  ;;  %2005 = vmatpush1.bf16.msra.mxu1 %v2769_v58  ;;  %v2850_v57 = vld [vmem:[%s3791_s1 + $0x6e0] ss:$16 sps:$4 sm:$0xff]   ;;  %v2853_v58 = vld [vmem:[%s3791_s1 + $0x6e8] ss:$16 sps:$4 sm:$0xff]  }
  0xa8   :  { %1794 = vmatprep.subr.bf16.mxu0 %v2774_v59  ;;  %2006 = vmatprep.subr.bf16.mxu1 %v2777_v60  ;;  %v2858_v59 = vld [vmem:[%s3791_s1 + $0x704] ss:$16 sps:$4 sm:$0xff]   ;;  %v2861_v60 = vld [vmem:[%s3791_s1 + $0x70c] ss:$16 sps:$4 sm:$0xff]  }
  0xab   :  { %1795 = vmatpush1.bf16.msra.mxu0 %v2772_v61  ;;  %2007 = vmatpush1.bf16.msra.mxu1 %v2775_v62  ;;  %v2856_v61 = vld [vmem:[%s3791_s1 + $0x700] ss:$16 sps:$4 sm:$0xff]   ;;  %v2859_v62 = vld [vmem:[%s3791_s1 + $0x708] ss:$16 sps:$4 sm:$0xff]  }
  0xac   :  { %1796 = vmatprep.subr.bf16.mxu0 %v2780_v63  ;;  %2008 = vmatprep.subr.bf16.mxu1 %v2783_v0  ;;  %v2864_v63 = vld [vmem:[%s3791_s1 + $0x724] ss:$16 sps:$4 sm:$0xff]   ;;  %v2867_v0 = vld [vmem:[%s3791_s1 + $0x72c] ss:$16 sps:$4 sm:$0xff]  }
  0xaf   :  { %1797 = vmatpush1.bf16.msra.mxu0 %v2778_v1  ;;  %2009 = vmatpush1.bf16.msra.mxu1 %v2781_v2  ;;  %v2862_v1 = vld [vmem:[%s3791_s1 + $0x720] ss:$16 sps:$4 sm:$0xff]   ;;  %v2865_v2 = vld [vmem:[%s3791_s1 + $0x728] ss:$16 sps:$4 sm:$0xff]  }
  0xb0   :  { %1798 = vmatprep.subr.bf16.mxu0 %v2786_v3  ;;  %2010 = vmatprep.subr.bf16.mxu1 %v2789_v4  ;;  %v2870_v3 = vld [vmem:[%s3791_s1 + $0x744] ss:$16 sps:$4 sm:$0xff]   ;;  %v2873_v4 = vld [vmem:[%s3791_s1 + $0x74c] ss:$16 sps:$4 sm:$0xff]  }
  0xb3   :  { %1799 = vmatpush1.bf16.msra.mxu0 %v2784_v5  ;;  %2011 = vmatpush1.bf16.msra.mxu1 %v2787_v6  ;;  %v2868_v5 = vld [vmem:[%s3791_s1 + $0x740] ss:$16 sps:$4 sm:$0xff]   ;;  %v2871_v6 = vld [vmem:[%s3791_s1 + $0x748] ss:$16 sps:$4 sm:$0xff]  }
  0xb4   :  { %1800 = vmatprep.subr.bf16.mxu0 %v2792_v7  ;;  %2012 = vmatprep.subr.bf16.mxu1 %v2795_v8  ;;  %v2876_v7 = vld [vmem:[%s3791_s1 + $0x764] ss:$16 sps:$4 sm:$0xff]   ;;  %v2879_v8 = vld [vmem:[%s3791_s1 + $0x76c] ss:$16 sps:$4 sm:$0xff]  }
  0xb7   :  { %1801 = vmatpush1.bf16.msra.mxu0 %v2790_v9  ;;  %2013 = vmatpush1.bf16.msra.mxu1 %v2793_v10  ;;  %v2874_v9 = vld [vmem:[%s3791_s1 + $0x760] ss:$16 sps:$4 sm:$0xff]   ;;  %v2877_v10 = vld [vmem:[%s3791_s1 + $0x768] ss:$16 sps:$4 sm:$0xff]  }
  0xb8   :  { %1802 = vmatprep.subr.bf16.mxu0 %v2798_v11  ;;  %2014 = vmatprep.subr.bf16.mxu1 %v2801_v12  ;;  %v2882_v11 = vld [vmem:[%s3791_s1 + $0x784] ss:$16 sps:$4 sm:$0xff]   ;;  %v2885_v12 = vld [vmem:[%s3791_s1 + $0x78c] ss:$16 sps:$4 sm:$0xff]  }
  0xbb   :  { %1803 = vmatpush1.bf16.msra.mxu0 %v2796_v13  ;;  %2015 = vmatpush1.bf16.msra.mxu1 %v2799_v14  ;;  %v2880_v13 = vld [vmem:[%s3791_s1 + $0x780] ss:$16 sps:$4 sm:$0xff]   ;;  %v2883_v14 = vld [vmem:[%s3791_s1 + $0x788] ss:$16 sps:$4 sm:$0xff]  }
  0xbc   :  { %1804 = vmatprep.subr.bf16.mxu0 %v2804_v15  ;;  %2016 = vmatprep.subr.bf16.mxu1 %v2807_v16  ;;  %v2888_v15 = vld [vmem:[%s3791_s1 + $0x7a4] ss:$16 sps:$4 sm:$0xff]   ;;  %v2891_v16 = vld [vmem:[%s3791_s1 + $0x7ac] ss:$16 sps:$4 sm:$0xff]  }
  0xbf   :  { %1805 = vmatpush1.bf16.msra.mxu0 %v2802_v17  ;;  %2017 = vmatpush1.bf16.msra.mxu1 %v2805_v18  ;;  %v2886_v17 = vld [vmem:[%s3791_s1 + $0x7a0] ss:$16 sps:$4 sm:$0xff]   ;;  %v2889_v18 = vld [vmem:[%s3791_s1 + $0x7a8] ss:$16 sps:$4 sm:$0xff]  }
  0xc0   :  { %1827 = vmatprep.subr.bf16.mxu0 %v2810_v19  ;;  %2039 = vmatprep.subr.bf16.mxu1 %v2813_v20  ;;  %v2894_v19 = vld [vmem:[%s3791_s1 + $0x7c4] ss:$16 sps:$4 sm:$0xff]   ;;  %v2897_v20 = vld [vmem:[%s3791_s1 + $0x7cc] ss:$16 sps:$4 sm:$0xff]  }
  0xc2   :  { %1807 = vmatmul.mubr.bf16.vlgmr.msra.gmra.mrb[0].mxu0 %v2172_v21  ;;  %2019 = vmatmul.mubr.bf16.vlgmr.msra.gmra.mrb[0].mxu1 %v2172_v21  ;;  %v2892_v21 = vld [vmem:[%s3791_s1 + $0x7c0] ss:$16 sps:$4 sm:$0xff]  }
  0xc3   :  { %1828 = vmatpush1.bf16.msra.mxu0 %v2808_v24  ;;  %2040 = vmatpush1.bf16.msra.mxu1 %v2811_v26  ;;  %v2903_v24 = vld [vmem:[%s3791_s1 + $0x7ec] ss:$16 sps:$4 sm:$0xff]   ;;  %v2898_v26 = vld [vmem:[%s3791_s1 + $0x7e0] ss:$16 sps:$4 sm:$0xff]  }
  0xc4   :  { %1829 = vmatprep.subr.bf16.mxu0 %v2816_v25  ;;  %2041 = vmatprep.subr.bf16.mxu1 %v2819_v27  ;;  %v2901_v25 = vld [vmem:[%s3791_s1 + $0x7e8] ss:$16 sps:$4 sm:$0xff]  }
  0xc5   :  { %1816 = vmatprep.mubr.bf16.mxu0 %v2181_v28  ;;  %2028 = vmatprep.mubr.bf16.mxu1 %v2181_v28  ;;  %v25_v27 = vld [vmem:[%s3792_s0 + $0x58] sm:$0xff] }
  0xc6   :  { %v29_v28 = vld [vmem:[%s3792_s0 + $0x78] sm:$0xff] }
  0xc7   :  { %1830 = vmatpush1.bf16.msra.mxu0 %v2814_v29  ;;  %2042 = vmatpush1.bf16.msra.mxu1 %v2817_v30  ;;  %v2174_v29 = vcombine.low %v3585_v34, %v3590_v35  ;;  %v2183_v30 = vcombine.high %v25_v27, %v29_v28 }
  0xc8   :  { %1831 = vmatprep.subr.bf16.mxu0 %v2822_v31  ;;  %2043 = vmatprep.subr.bf16.mxu1 %v2825_v32  ;;  %v2182_v31 = vcombine.low %v25_v27, %v29_v28  ;;  %v288_v32 = vlaneseq }
  0xca   :  { %1817 = vmatmul.mubr.bf16.gmra.mrb[4].mxu0 %v2180_v33  ;;  %2029 = vmatmul.mubr.bf16.gmra.mrb[4].mxu1 %v2180_v33  ;;  %v289_v33 = vshrl.u32 %v288_v32, 7 }
  0xcb   :  { %1832 = vmatpush1.bf16.msra.mxu0 %v2820_v36  ;;  %2044 = vmatpush1.bf16.msra.mxu1 %v2823_v37 }
  0xcc   :  { %1833 = vmatprep.subr.bf16.mxu0 %v2828_v38  ;;  %2045 = vmatprep.subr.bf16.mxu1 %v2831_v39  ;;  %v290_v36 = vsub.s32 0, %v289_v33  ;;  %v298_v37 = vsub.s32 2, %v289_v33  ;;  %v286_v38 = vld [vmem:[%s3793_s2] sm:$0xf]  ;;  %v294_v39 = vsub.s32 1, %v289_v33  ;;  %v302_v34 = vsub.s32 3, %v289_v33 }
  0xcd   :  { %1859 = vmatprep.mubr.bf16.mxu0 %v2175_v40  ;;  %2071 = vmatprep.mubr.bf16.mxu1 %v2175_v40 }
  0xce   :  { %v291_v35 = vrot.slane %v286_v38, %v290_v36  ;;  %v299_v40 = vrot.slane %v286_v38, %v298_v37 }
  0xcf   :  { %1834 = vmatpush1.bf16.msra.mxu0 %v2826_v41  ;;  %2046 = vmatpush1.bf16.msra.mxu1 %v2829_v42  ;;  %v295_v41 = vrot.slane %v286_v38, %v294_v39  ;;  %v303_v42 = vrot.slane %v286_v38, %v302_v34 }
  0xd0   :  { %1835 = vmatprep.subr.bf16.mxu0 %v2834_v43  ;;  %2047 = vmatprep.subr.bf16.mxu1 %v2837_v44 }
  0xd3   :  { %1836 = vmatpush1.bf16.msra.mxu0 %v2832_v45  ;;  %2048 = vmatpush1.bf16.msra.mxu1 %v2835_v46 }
  0xd4   :  { %1837 = vmatprep.subr.bf16.mxu0 %v2840_v47  ;;  %2049 = vmatprep.subr.bf16.mxu1 %v2843_v48 }
  0xd7   :  { %1838 = vmatpush1.bf16.msra.mxu0 %v2838_v49  ;;  %2050 = vmatpush1.bf16.msra.mxu1 %v2841_v50 }
  0xd8   :  { %1839 = vmatprep.subr.bf16.mxu0 %v2846_v51  ;;  %2051 = vmatprep.subr.bf16.mxu1 %v2849_v52 }
  0xdb   :  { %1840 = vmatpush1.bf16.msra.mxu0 %v2844_v53  ;;  %2052 = vmatpush1.bf16.msra.mxu1 %v2847_v54 }
  0xdc   :  { %1841 = vmatprep.subr.bf16.mxu0 %v2852_v55  ;;  %2053 = vmatprep.subr.bf16.mxu1 %v2855_v56 }
  0xdf   :  { %1842 = vmatpush1.bf16.msra.mxu0 %v2850_v57  ;;  %2054 = vmatpush1.bf16.msra.mxu1 %v2853_v58 }
  0xe0   :  { %1843 = vmatprep.subr.bf16.mxu0 %v2858_v59  ;;  %2055 = vmatprep.subr.bf16.mxu1 %v2861_v60 }
  0xe3   :  { %1844 = vmatpush1.bf16.msra.mxu0 %v2856_v61  ;;  %2056 = vmatpush1.bf16.msra.mxu1 %v2859_v62 }
  0xe4   :  { %1845 = vmatprep.subr.bf16.mxu0 %v2864_v63  ;;  %2057 = vmatprep.subr.bf16.mxu1 %v2867_v0 }
  0xe7   :  { %1846 = vmatpush1.bf16.msra.mxu0 %v2862_v1  ;;  %2058 = vmatpush1.bf16.msra.mxu1 %v2865_v2 }
  0xe8   :  { %1847 = vmatprep.subr.bf16.mxu0 %v2870_v3  ;;  %2059 = vmatprep.subr.bf16.mxu1 %v2873_v4 }
  0xeb   :  { %1848 = vmatpush1.bf16.msra.mxu0 %v2868_v5  ;;  %2060 = vmatpush1.bf16.msra.mxu1 %v2871_v6 }
  0xec   :  { %1849 = vmatprep.subr.bf16.mxu0 %v2876_v7  ;;  %2061 = vmatprep.subr.bf16.mxu1 %v2879_v8 }
  0xef   :  { %1850 = vmatpush1.bf16.msra.mxu0 %v2874_v9  ;;  %2062 = vmatpush1.bf16.msra.mxu1 %v2877_v10 }
  0xf0   :  { %1851 = vmatprep.subr.bf16.mxu0 %v2882_v11  ;;  %2063 = vmatprep.subr.bf16.mxu1 %v2885_v12 }
  0xf3   :  { %1852 = vmatpush1.bf16.msra.mxu0 %v2880_v13  ;;  %2064 = vmatpush1.bf16.msra.mxu1 %v2883_v14 }
  0xf4   :  { %1853 = vmatprep.subr.bf16.mxu0 %v2888_v15  ;;  %2065 = vmatprep.subr.bf16.mxu1 %v2891_v16 }
  0xf7   :  { %1854 = vmatpush1.bf16.msra.mxu0 %v2886_v17  ;;  %2066 = vmatpush1.bf16.msra.mxu1 %v2889_v18 }
  0xf8   :  { %1855 = vmatprep.subr.bf16.mxu0 %v2894_v19  ;;  %2067 = vmatprep.subr.bf16.mxu1 %v2897_v20 }
  0xfb   :  { %1856 = vmatpush1.bf16.msra.mxu0 %v2892_v21  ;;  %2068 = vmatpush1.bf16.msra.mxu1 %v2895_v22 }
  0xfc   :  { %1857 = vmatprep.subr.bf16.mxu0 %v2900_v23  ;;  %2069 = vmatprep.subr.bf16.mxu1 %v2903_v24 }
  0xff   :  { %1858 = vmatpush1.bf16.msra.mxu0 %v2898_v26  ;;  %2070 = vmatpush1.bf16.msra.mxu1 %v2901_v25 }
 0x102   :  { %1860 = vmatmul.mubr.bf16.vlgmr.msra.gmra.mrb[0].mxu0 %v2174_v29  ;;  %2072 = vmatmul.mubr.bf16.vlgmr.msra.gmra.mrb[0].mxu1 %v2174_v29 }
 0x103   :  { %1869 = vmatprep.mubr.bf16.mxu0 %v2183_v30  ;;  %2081 = vmatprep.mubr.bf16.mxu1 %v2183_v30 }
 0x10a   :  { %1870 = vmatmul.mubr.bf16.gmra.mrb[4].mxu0 %v2182_v31  ;;  %2082 = vmatmul.mubr.bf16.gmra.mrb[4].mxu1 %v2182_v31 }
 0x1d5   :  { %v1861_v43 = vpop.f32.mrb[0].mxu0  ;;  %v2073_v44 = vpop.f32.mrb[0].mxu1 }
 0x1d6   :  { %v2456_v45 = vadd.f32 %v1861_v43, %v291_v35  ;;  %v2464_v46 = vadd.f32 %v2073_v44, %v299_v40  ;;  %v1863_v47 = vpop.f32.mrb[1].mxu0  ;;  %v2075_v48 = vpop.f32.mrb[1].mxu1 }
 0x1d7   :  { %v2457_v49 = vadd.f32 %v1863_v47, %v295_v41  ;;  %v2465_v50 = vadd.f32 %v2075_v48, %v303_v42  ;;  %v1865_v51 = vpop.f32.mrb[2].mxu0  ;;  %v2077_v52 = vpop.f32.mrb[2].mxu1 }
 0x1d8   :  { %v2092_v53 = vmax.f32 %v2456_v45, 0.0  ;;  %v2094_v54 = vmax.f32 %v2464_v46, 0.0  ;;  %v2458_v55 = vadd.f32 %v1865_v51, %v291_v35  ;;  %v2466_v56 = vadd.f32 %v2077_v52, %v299_v40  ;;  %v1867_v57 = vpop.f32.mrb[3].mxu0  ;;  %v2079_v58 = vpop.f32.mrb[3].mxu1 }
 0x1d9   :  { %v2093_v59 = vmax.f32 %v2457_v49, 0.0  ;;  %v2095_v60 = vmax.f32 %v2465_v50, 0.0  ;;  %v2459_v61 = vadd.f32 %v1867_v57, %v295_v41  ;;  %v2467_v62 = vadd.f32 %v2079_v58, %v303_v42 }
 0x1da   :  { %v2096_v63 = vmax.f32 %v2458_v55, 0.0  ;;  %v2098_v0 = vmax.f32 %v2466_v56, 0.0 }
 0x1db   :  { %v2448_v1 = vpack.c.bf16 %v2093_v59, %v2092_v53  ;;  %v2449_v2 = vpack.c.bf16 %v2095_v60, %v2094_v54  ;;  %v2097_v3 = vmax.f32 %v2459_v61, 0.0  ;;  %v2099_v4 = vmax.f32 %v2467_v62, 0.0 }
 0x1dd   :  { %2156 = vst [vmem:[%s3794_s3] sm:$0xff] %v2448_v1  ;;  %2157 = vst [vmem:[%s3794_s3 + $0x8] sm:$0xff] %v2449_v2  ;;  %v2450_v5 = vpack.c.bf16 %v2097_v3, %v2096_v63  ;;  %v2451_v6 = vpack.c.bf16 %v2099_v4, %v2098_v0  ;;  %v1871_v7 = vpop.f32.mrb[4].mxu0  ;;  %v2083_v8 = vpop.f32.mrb[4].mxu1 }
 0x1de   :  { %v2460_v9 = vadd.f32 %v1871_v7, %v291_v35  ;;  %v2468_v10 = vadd.f32 %v2083_v8, %v299_v40  ;;  %v1873_v11 = vpop.f32.mrb[5].mxu0  ;;  %v2085_v12 = vpop.f32.mrb[5].mxu1 }
 0x1df   :  { %2158 = vst [vmem:[%s3794_s3 + $0x10] sm:$0xff] %v2450_v5  ;;  %2159 = vst [vmem:[%s3794_s3 + $0x18] sm:$0xff] %v2451_v6  ;;  %v2461_v13 = vadd.f32 %v1873_v11, %v295_v41  ;;  %v2469_v14 = vadd.f32 %v2085_v12, %v303_v42  ;;  %v1875_v15 = vpop.f32.mrb[6].mxu0  ;;  %v2087_v16 = vpop.f32.mrb[6].mxu1 }
 0x1e0   :  { %v2100_v17 = vmax.f32 %v2460_v9, 0.0  ;;  %v2102_v18 = vmax.f32 %v2468_v10, 0.0  ;;  %v2462_v19 = vadd.f32 %v1875_v15, %v291_v35  ;;  %v2470_v20 = vadd.f32 %v2087_v16, %v299_v40  ;;  %v1877_v21 = vpop.f32.mrb[7].mxu0  ;;  %v2089_v22 = vpop.f32.mrb[7].mxu1 }
 0x1e1   :  { %v2101_v23 = vmax.f32 %v2461_v13, 0.0  ;;  %v2103_v24 = vmax.f32 %v2469_v14, 0.0  ;;  %v2463_v26 = vadd.f32 %v1877_v21, %v295_v41  ;;  %v2471_v25 = vadd.f32 %v2089_v22, %v303_v42 }
 0x1e2   :  { %v2104_v27 = vmax.f32 %v2462_v19, 0.0  ;;  %v2106_v28 = vmax.f32 %v2470_v20, 0.0 }
 0x1e3   :  { %v2452_v29 = vpack.c.bf16 %v2101_v23, %v2100_v17  ;;  %v2453_v30 = vpack.c.bf16 %v2103_v24, %v2102_v18  ;;  %v2105_v31 = vmax.f32 %v2463_v26, 0.0  ;;  %v2107_v32 = vmax.f32 %v2471_v25, 0.0 }
 0x1e5   :  { %2160 = vst [vmem:[%s3794_s3 + $0x20] sm:$0xff] %v2452_v29  ;;  %2161 = vst [vmem:[%s3794_s3 + $0x28] sm:$0xff] %v2453_v30  ;;  %v2454_v33 = vpack.c.bf16 %v2105_v31, %v2104_v27  ;;  %v2455_v36 = vpack.c.bf16 %v2107_v32, %v2106_v28 }
 0x1e7   :  { %2162 = vst [vmem:[%s3794_s3 + $0x30] sm:$0xff] %v2454_v33  ;;  %2163 = vst [vmem:[%s3794_s3 + $0x38] sm:$0xff] %v2455_v36 }

// kernel: rtnet_forward.26
= control target key start
LH: loop header
LB: loop body
LE: loop exit
PB: predicated region body
PF: predicated region fallthrough
CT: control target
= control target key end

     0   :  { %s3921_s12 = smov 0   ;;  %s3923_s13 = smov 0   ;;  %s4294_s0 = inlined_call_operand.vmem [shape: bf16[2,32,2304], index: 0, kind: input, shape index: {}]   ;;  %s4295_s1 = inlined_call_operand.vmem [shape: bf16[2,2304,256], index: 1, kind: input, shape index: {}]   ;;  %s4296_s2 = inlined_call_operand.vmem [shape: f32[2,1,256], index: 2, kind: input, shape index: {}]   ;;  %s4297_s3 = inlined_call_operand.vmem [shape: bf16[2,32,256], index: 3, kind: output, shape index: {}]  }
   0x1   :  { %s3925_s14 = smov 0  }
   0x2 LB: > { %s32_s15 = sadd.s32 1, %s3895_s13  ;;  %p2920_p0 = scmp.ge.s32.totalorder %s3899_s14, 1  ;;  %s3899_s14 = sphi %s3925_s14, %s13_s14   ;;  %s3895_s13 = sphi %s3923_s13, %s4299_s13   ;;  %s3891_s12 = sphi %s3921_s12, %s4298_s12  }
   0x3   : > { %p34_p1 = scmp.ge.s32.totalorder %s32_s15, 2  ;;  %p201_p2 = scmp.lt.s32.totalorder %s3899_s14, 3 }
   0x5   : > { %s4301_s15 = smov (%p34_p1, %s32_s15), 0  ;;  %p202_p3 = pnand %p2920_p0, %p201_p2 }
   0x6   : > { %p257_p4 = scmp.lt.s32.totalorder (!%p202_p3), %s3891_s12, 1 }
   0x7   : > { %205 = sbr.rel (%p202_p3) target bundleno = 562 (0x232), region = 32 }
   0xe   : > { %s4303_s12 = smov (!%p257_p4, %s3891_s12), 1 }
   0xf   : > { %s3366_s16 = smul.u32 2304, %s4303_s12  ;;  %s2923_s24 = sshll.u32 %s4303_s12, 1 }
  0x10   : > { %s3365_s20 = smul.u32 288, %s4303_s12  ;;  %s284_s27 = scalar_lea.vmem %s4296_s2, %s2923_s24 }
  0x11   : > { %s3945_s19 = scalar_lea.vmem %s4295_s1, %s3366_s16  ;;  %s3256_s28 = sshll.u32 %s4303_s12, 5 }
  0x12   : > { %v3391_v0 = vld [vmem:[%s3945_s19 + $0x4] ss:$8 sps:$4 sm:$0xff]   ;;  %v3395_v2 = vld [vmem:[%s3945_s19] ss:$8 sps:$4 sm:$0xff]   ;;  %v3397_v4 = vld [vmem:[%s3945_s19 + $0x14] ss:$8 sps:$4 sm:$0xff]   ;;  %s3996_s23 = scalar_lea.vmem %s4294_s0, %s3365_s20  ;;  %s299_s4 = scalar_lea.vmem %s4297_s3, %s3256_s28 }
  0x13   : > { %v3393_v1 = vld [vmem:[%s3945_s19 + $0x404] ss:$8 sps:$4 sm:$0xff]   ;;  %2258 = vmatprep.subr.bf16.mxu1 %v3391_v0  ;;  %v3396_v3 = vld [vmem:[%s3945_s19 + $0x400] ss:$8 sps:$4 sm:$0xff]   ;;  %v3399_v5 = vld [vmem:[%s3945_s19 + $0x414] ss:$8 sps:$4 sm:$0xff]  }
  0x14   : > { %2470 = vmatprep.subr.bf16.mxu0 %v3393_v1  ;;  %2259 = vmatpush1.bf16.msra.mxu1 %v3395_v2  ;;  %v3401_v6 = vld [vmem:[%s3945_s19 + $0x10] ss:$8 sps:$4 sm:$0xff]   ;;  %v3403_v8 = vld [vmem:[%s3945_s19 + $0x24] ss:$8 sps:$4 sm:$0xff]   ;;  %v3407_v10 = vld [vmem:[%s3945_s19 + $0x20] ss:$8 sps:$4 sm:$0xff]  }
  0x15   : > { %2471 = vmatpush1.bf16.msra.mxu0 %v3396_v3  ;;  %2260 = vmatprep.subr.bf16.mxu1 %v3397_v4  ;;  %v3402_v7 = vld [vmem:[%s3945_s19 + $0x410] ss:$8 sps:$4 sm:$0xff]   ;;  %v3405_v9 = vld [vmem:[%s3945_s19 + $0x424] ss:$8 sps:$4 sm:$0xff]   ;;  %v3408_v11 = vld [vmem:[%s3945_s19 + $0x420] ss:$8 sps:$4 sm:$0xff]  }
  0x16   : > { %2472 = vmatprep.subr.bf16.mxu0 %v3399_v5  ;;  %v3409_v12 = vld [vmem:[%s3945_s19 + $0x34] ss:$8 sps:$4 sm:$0xff]   ;;  %v3413_v14 = vld [vmem:[%s3945_s19 + $0x30] ss:$8 sps:$4 sm:$0xff]   ;;  %v3415_v16 = vld [vmem:[%s3945_s19 + $0x44] ss:$8 sps:$4 sm:$0xff]  }
  0x17   : > { %v3411_v13 = vld [vmem:[%s3945_s19 + $0x434] ss:$8 sps:$4 sm:$0xff]   ;;  %v3414_v15 = vld [vmem:[%s3945_s19 + $0x430] ss:$8 sps:$4 sm:$0xff]   ;;  %v3417_v17 = vld [vmem:[%s3945_s19 + $0x444] ss:$8 sps:$4 sm:$0xff]  }
  0x18   : > { %2261 = vmatpush1.bf16.msra.mxu1 %v3401_v6  ;;  %v3419_v18 = vld [vmem:[%s3945_s19 + $0x40] ss:$8 sps:$4 sm:$0xff]   ;;  %v3421_v20 = vld [vmem:[%s3945_s19 + $0x54] ss:$8 sps:$4 sm:$0xff]   ;;  %v3425_v22 = vld [vmem:[%s3945_s19 + $0x50] ss:$8 sps:$4 sm:$0xff]  }
  0x19   : > { %2473 = vmatpush1.bf16.msra.mxu0 %v3402_v7  ;;  %2262 = vmatprep.subr.bf16.mxu1 %v3403_v8  ;;  %v3420_v19 = vld [vmem:[%s3945_s19 + $0x440] ss:$8 sps:$4 sm:$0xff]   ;;  %v3423_v21 = vld [vmem:[%s3945_s19 + $0x454] ss:$8 sps:$4 sm:$0xff]   ;;  %v3426_v23 = vld [vmem:[%s3945_s19 + $0x450] ss:$8 sps:$4 sm:$0xff]  }
  0x1a   : > { %2474 = vmatprep.subr.bf16.mxu0 %v3405_v9  ;;  %v3427_v24 = vld [vmem:[%s3945_s19 + $0x64] ss:$8 sps:$4 sm:$0xff]   ;;  %v3431_v26 = vld [vmem:[%s3945_s19 + $0x60] ss:$8 sps:$4 sm:$0xff]   ;;  %v3433_v28 = vld [vmem:[%s3945_s19 + $0x74] ss:$8 sps:$4 sm:$0xff]  }
  0x1b   : > { %v3429_v25 = vld [vmem:[%s3945_s19 + $0x464] ss:$8 sps:$4 sm:$0xff]   ;;  %v3432_v27 = vld [vmem:[%s3945_s19 + $0x460] ss:$8 sps:$4 sm:$0xff]   ;;  %v3435_v29 = vld [vmem:[%s3945_s19 + $0x474] ss:$8 sps:$4 sm:$0xff]  }
  0x1c   : > { %2263 = vmatpush1.bf16.msra.mxu1 %v3407_v10  ;;  %v3437_v30 = vld [vmem:[%s3945_s19 + $0x70] ss:$8 sps:$4 sm:$0xff]   ;;  %v3439_v32 = vld [vmem:[%s3945_s19 + $0x84] ss:$8 sps:$4 sm:$0xff]   ;;  %v3443_v34 = vld [vmem:[%s3945_s19 + $0x80] ss:$8 sps:$4 sm:$0xff]  }
  0x1d   : > { %2475 = vmatpush1.bf16.msra.mxu0 %v3408_v11  ;;  %2264 = vmatprep.subr.bf16.mxu1 %v3409_v12  ;;  %v3438_v31 = vld [vmem:[%s3945_s19 + $0x470] ss:$8 sps:$4 sm:$0xff]   ;;  %v3441_v33 = vld [vmem:[%s3945_s19 + $0x484] ss:$8 sps:$4 sm:$0xff]   ;;  %v3444_v35 = vld [vmem:[%s3945_s19 + $0x480] ss:$8 sps:$4 sm:$0xff]  }
  0x1e   : > { %2476 = vmatprep.subr.bf16.mxu0 %v3411_v13  ;;  %v3445_v36 = vld [vmem:[%s3945_s19 + $0x94] ss:$8 sps:$4 sm:$0xff]   ;;  %v3449_v38 = vld [vmem:[%s3945_s19 + $0x90] ss:$8 sps:$4 sm:$0xff]   ;;  %v3451_v40 = vld [vmem:[%s3945_s19 + $0xa4] ss:$8 sps:$4 sm:$0xff]  }
  0x1f   : > { %v3447_v37 = vld [vmem:[%s3945_s19 + $0x494] ss:$8 sps:$4 sm:$0xff]   ;;  %v3450_v39 = vld [vmem:[%s3945_s19 + $0x490] ss:$8 sps:$4 sm:$0xff]   ;;  %v3453_v41 = vld [vmem:[%s3945_s19 + $0x4a4] ss:$8 sps:$4 sm:$0xff]  }
  0x20   : > { %2265 = vmatpush1.bf16.msra.mxu1 %v3413_v14  ;;  %v3455_v42 = vld [vmem:[%s3945_s19 + $0xa0] ss:$8 sps:$4 sm:$0xff]   ;;  %v3457_v44 = vld [vmem:[%s3945_s19 + $0xb4] ss:$8 sps:$4 sm:$0xff]   ;;  %v3461_v46 = vld [vmem:[%s3945_s19 + $0xb0] ss:$8 sps:$4 sm:$0xff]  }
  0x21   : > { %2477 = vmatpush1.bf16.msra.mxu0 %v3414_v15  ;;  %2266 = vmatprep.subr.bf16.mxu1 %v3415_v16  ;;  %v3456_v43 = vld [vmem:[%s3945_s19 + $0x4a0] ss:$8 sps:$4 sm:$0xff]   ;;  %v3459_v45 = vld [vmem:[%s3945_s19 + $0x4b4] ss:$8 sps:$4 sm:$0xff]   ;;  %v3462_v47 = vld [vmem:[%s3945_s19 + $0x4b0] ss:$8 sps:$4 sm:$0xff]  }
  0x22   : > { %2478 = vmatprep.subr.bf16.mxu0 %v3417_v17  ;;  %v3489_v48 = vld [vmem:[%s3996_s23 + $0x4] ss:$72 sps:$4 sm:$0xff]   ;;  %v3467_v52 = vld [vmem:[%s3945_s19 + $0xc0] ss:$8 sps:$4 sm:$0xff]   ;;  %v3469_v54 = vld [vmem:[%s3945_s19 + $0xd4] ss:$8 sps:$4 sm:$0xff]  }
  0x23   : > { %v3463_v49 = vld [vmem:[%s3945_s19 + $0xc4] ss:$8 sps:$4 sm:$0xff]   ;;  %2290 = vmatprep.mubr.bf16.mxu1 %v3489_v48  ;;  %v3468_v53 = vld [vmem:[%s3945_s19 + $0x4c0] ss:$8 sps:$4 sm:$0xff]   ;;  %v3471_v55 = vld [vmem:[%s3945_s19 + $0x4d4] ss:$8 sps:$4 sm:$0xff]  }
  0x24   : > { %2267 = vmatpush1.bf16.msra.mxu1 %v3419_v18  ;;  %v3465_v50 = vld [vmem:[%s3945_s19 + $0x4c4] ss:$8 sps:$4 sm:$0xff]   ;;  %v3473_v56 = vld [vmem:[%s3945_s19 + $0xd0] ss:$8 sps:$4 sm:$0xff]   ;;  %v3479_v60 = vld [vmem:[%s3945_s19 + $0xe0] ss:$8 sps:$4 sm:$0xff]  }
  0x25   : > { %2479 = vmatpush1.bf16.msra.mxu0 %v3420_v19  ;;  %2268 = vmatprep.subr.bf16.mxu1 %v3421_v20  ;;  %v3495_v51 = vld [vmem:[%s3996_s23 + $0x24] ss:$72 sps:$4 sm:$0xff]   ;;  %v3474_v57 = vld [vmem:[%s3945_s19 + $0x4d0] ss:$8 sps:$4 sm:$0xff]   ;;  %v3480_v61 = vld [vmem:[%s3945_s19 + $0x4e0] ss:$8 sps:$4 sm:$0xff]  }
  0x26   : > { %2480 = vmatprep.subr.bf16.mxu0 %v3423_v21  ;;  %2502 = vmatprep.mubr.bf16.mxu0 %v3495_v51  ;;  %v3475_v58 = vld [vmem:[%s3945_s19 + $0xe4] ss:$8 sps:$4 sm:$0xff]   ;;  %v3481_v62 = vld [vmem:[%s3945_s19 + $0xf4] ss:$8 sps:$4 sm:$0xff]   ;;  %v3485_v0 = vld [vmem:[%s3945_s19 + $0xf0] ss:$8 sps:$4 sm:$0xff]  }
  0x27   : > { %v3477_v59 = vld [vmem:[%s3945_s19 + $0x4e4] ss:$8 sps:$4 sm:$0xff]   ;;  %v3483_v63 = vld [vmem:[%s3945_s19 + $0x4f4] ss:$8 sps:$4 sm:$0xff]   ;;  %v3486_v1 = vld [vmem:[%s3945_s19 + $0x4f0] ss:$8 sps:$4 sm:$0xff]  }
  0x28   : > { %2269 = vmatpush1.bf16.msra.mxu1 %v3425_v22  ;;  %v3492_v2 = vld [vmem:[%s3945_s19 + $0x104] ss:$8 sps:$4 sm:$0xff]   ;;  %v3487_v4 = vld [vmem:[%s3996_s23] ss:$72 sps:$4 sm:$0xff]   ;;  %v3501_v8 = vld [vmem:[%s3945_s19 + $0x114] ss:$8 sps:$4 sm:$0xff]  }
  0x29   : > { %2481 = vmatpush1.bf16.msra.mxu0 %v3426_v23  ;;  %2270 = vmatprep.subr.bf16.mxu1 %v3427_v24  ;;  %v3498_v3 = vld [vmem:[%s3945_s19 + $0x504] ss:$8 sps:$4 sm:$0xff]   ;;  %v3490_v5 = vld [vmem:[%s3945_s19 + $0x100] ss:$8 sps:$4 sm:$0xff]   ;;  %v3504_v9 = vld [vmem:[%s3945_s19 + $0x514] ss:$8 sps:$4 sm:$0xff]  }
  0x2a   : > { %2482 = vmatprep.subr.bf16.mxu0 %v3429_v25  ;;  %v3493_v6 = vld [vmem:[%s3996_s23 + $0x20] ss:$72 sps:$4 sm:$0xff]   ;;  %v3499_v10 = vld [vmem:[%s3945_s19 + $0x110] ss:$8 sps:$4 sm:$0xff]   ;;  %v3507_v12 = vld [vmem:[%s3945_s19 + $0x124] ss:$8 sps:$4 sm:$0xff]  }
  0x2b   : > { %v3496_v7 = vld [vmem:[%s3945_s19 + $0x500] ss:$8 sps:$4 sm:$0xff]   ;;  %v3502_v11 = vld [vmem:[%s3945_s19 + $0x510] ss:$8 sps:$4 sm:$0xff]   ;;  %v3510_v13 = vld [vmem:[%s3945_s19 + $0x524] ss:$8 sps:$4 sm:$0xff]  }
  0x2c   : > { %2271 = vmatpush1.bf16.msra.mxu1 %v3431_v26  ;;  %v3505_v14 = vld [vmem:[%s3945_s19 + $0x120] ss:$8 sps:$4 sm:$0xff]   ;;  %v3513_v16 = vld [vmem:[%s3945_s19 + $0x134] ss:$8 sps:$4 sm:$0xff]   ;;  %v3511_v18 = vld [vmem:[%s3945_s19 + $0x130] ss:$8 sps:$4 sm:$0xff]  }
  0x2d   : > { %2483 = vmatpush1.bf16.msra.mxu0 %v3432_v27  ;;  %2272 = vmatprep.subr.bf16.mxu1 %v3433_v28  ;;  %v3508_v15 = vld [vmem:[%s3945_s19 + $0x520] ss:$8 sps:$4 sm:$0xff]   ;;  %v3516_v17 = vld [vmem:[%s3945_s19 + $0x534] ss:$8 sps:$4 sm:$0xff]   ;;  %v3514_v19 = vld [vmem:[%s3945_s19 + $0x530] ss:$8 sps:$4 sm:$0xff]  }
  0x2e   : > { %2484 = vmatprep.subr.bf16.mxu0 %v3435_v29  ;;  %v3519_v20 = vld [vmem:[%s3945_s19 + $0x144] ss:$8 sps:$4 sm:$0xff]   ;;  %v3517_v22 = vld [vmem:[%s3945_s19 + $0x140] ss:$8 sps:$4 sm:$0xff]   ;;  %v3525_v24 = vld [vmem:[%s3945_s19 + $0x154] ss:$8 sps:$4 sm:$0xff]  }
  0x2f   : > { %v3522_v21 = vld [vmem:[%s3945_s19 + $0x544] ss:$8 sps:$4 sm:$0xff]   ;;  %v3520_v23 = vld [vmem:[%s3945_s19 + $0x540] ss:$8 sps:$4 sm:$0xff]   ;;  %v3528_v25 = vld [vmem:[%s3945_s19 + $0x554] ss:$8 sps:$4 sm:$0xff]  }
  0x30   : > { %2273 = vmatpush1.bf16.msra.mxu1 %v3437_v30  ;;  %v3523_v26 = vld [vmem:[%s3945_s19 + $0x150] ss:$8 sps:$4 sm:$0xff]   ;;  %v3577_v28 = vld [vmem:[%s3996_s23 + $0x94] ss:$72 sps:$4 sm:$0xff]   ;;  %v3531_v29 = vld [vmem:[%s3945_s19 + $0x164] ss:$8 sps:$4 sm:$0xff]  }
  0x31   : > { %2485 = vmatpush1.bf16.msra.mxu0 %v3438_v31  ;;  %2274 = vmatprep.subr.bf16.mxu1 %v3439_v32  ;;  %v3526_v27 = vld [vmem:[%s3945_s19 + $0x550] ss:$8 sps:$4 sm:$0xff]   ;;  %v3534_v30 = vld [vmem:[%s3945_s19 + $0x564] ss:$8 sps:$4 sm:$0xff]   ;;  %v3582_v31 = vld [vmem:[%s3996_s23 + $0xb4] ss:$72 sps:$4 sm:$0xff]  }
  0x32   : > { %2486 = vmatprep.subr.bf16.mxu0 %v3441_v33  ;;  %v3529_v32 = vld [vmem:[%s3945_s19 + $0x160] ss:$8 sps:$4 sm:$0xff]   ;;  %v3547_v48 = vld [vmem:[%s3945_s19 + $0x190] ss:$8 sps:$4 sm:$0xff]   ;;  %v3558_v51 = vld [vmem:[%s3945_s19 + $0x5a4] ss:$8 sps:$4 sm:$0xff]  }
  0x33   : > { %v3532_v33 = vld [vmem:[%s3945_s19 + $0x560] ss:$8 sps:$4 sm:$0xff]  }
  0x34   : > { %2275 = vmatpush1.bf16.msra.mxu1 %v3443_v34  ;;  %v3587_v34 = vld [vmem:[%s3996_s23 + $0x90] ss:$72 sps:$4 sm:$0xff]  }
  0x35   : > { %2487 = vmatpush1.bf16.msra.mxu0 %v3444_v35  ;;  %2276 = vmatprep.subr.bf16.mxu1 %v3445_v36  ;;  %v3588_v35 = vld [vmem:[%s3996_s23 + $0xb0] ss:$72 sps:$4 sm:$0xff]   ;;  %v3537_v36 = vld [vmem:[%s3945_s19 + $0x174] ss:$8 sps:$4 sm:$0xff]  }
  0x36   : > { %2488 = vmatprep.subr.bf16.mxu0 %v3447_v37  ;;  %v3540_v37 = vld [vmem:[%s3945_s19 + $0x574] ss:$8 sps:$4 sm:$0xff]  }
  0x38   : > { %2277 = vmatpush1.bf16.msra.mxu1 %v3449_v38  ;;  %v3535_v38 = vld [vmem:[%s3945_s19 + $0x170] ss:$8 sps:$4 sm:$0xff]  }
  0x39   : > { %2489 = vmatpush1.bf16.msra.mxu0 %v3450_v39  ;;  %2278 = vmatprep.subr.bf16.mxu1 %v3451_v40  ;;  %v3538_v39 = vld [vmem:[%s3945_s19 + $0x570] ss:$8 sps:$4 sm:$0xff]   ;;  %v3597_v40 = vld [vmem:[%s3996_s23 + $0xc] ss:$72 sps:$4 sm:$0xff]  }
  0x3a   : > { %2490 = vmatprep.subr.bf16.mxu0 %v3453_v41  ;;  %v3543_v41 = vld [vmem:[%s3945_s19 + $0x184] ss:$8 sps:$4 sm:$0xff]  }
  0x3c   : > { %2279 = vmatpush1.bf16.msra.mxu1 %v3455_v42  ;;  %v3546_v42 = vld [vmem:[%s3945_s19 + $0x584] ss:$8 sps:$4 sm:$0xff]  }
  0x3d   : > { %2491 = vmatpush1.bf16.msra.mxu0 %v3456_v43  ;;  %2280 = vmatprep.subr.bf16.mxu1 %v3457_v44  ;;  %v3603_v43 = vld [vmem:[%s3996_s23 + $0x2c] ss:$72 sps:$4 sm:$0xff]   ;;  %v3541_v44 = vld [vmem:[%s3945_s19 + $0x180] ss:$8 sps:$4 sm:$0xff]  }
  0x3e   : > { %2492 = vmatprep.subr.bf16.mxu0 %v3459_v45  ;;  %v3544_v45 = vld [vmem:[%s3945_s19 + $0x580] ss:$8 sps:$4 sm:$0xff]  }
  0x40   : > { %2281 = vmatpush1.bf16.msra.mxu1 %v3461_v46  ;;  %v3549_v46 = vld [vmem:[%s3945_s19 + $0x194] ss:$8 sps:$4 sm:$0xff]  }
  0x41   : > { %2493 = vmatpush1.bf16.msra.mxu0 %v3462_v47  ;;  %2282 = vmatprep.subr.bf16.mxu1 %v3463_v49  ;;  %v3552_v47 = vld [vmem:[%s3945_s19 + $0x594] ss:$8 sps:$4 sm:$0xff]   ;;  %v3550_v49 = vld [vmem:[%s3945_s19 + $0x590] ss:$8 sps:$4 sm:$0xff]  }
  0x42   : > { %2494 = vmatprep.subr.bf16.mxu0 %v3465_v50  ;;  %v3555_v50 = vld [vmem:[%s3945_s19 + $0x1a4] ss:$8 sps:$4 sm:$0xff]  }
  0x44   : > { %2283 = vmatpush1.bf16.msra.mxu1 %v3467_v52  ;;  %v3553_v52 = vld [vmem:[%s3945_s19 + $0x1a0] ss:$8 sps:$4 sm:$0xff]  }
  0x45   : > { %2495 = vmatpush1.bf16.msra.mxu0 %v3468_v53  ;;  %2284 = vmatprep.subr.bf16.mxu1 %v3469_v54  ;;  %v3556_v53 = vld [vmem:[%s3945_s19 + $0x5a0] ss:$8 sps:$4 sm:$0xff]   ;;  %v3561_v54 = vld [vmem:[%s3945_s19 + $0x1b4] ss:$8 sps:$4 sm:$0xff]  }
  0x46   : > { %2496 = vmatprep.subr.bf16.mxu0 %v3471_v55  ;;  %v3564_v55 = vld [vmem:[%s3945_s19 + $0x5b4] ss:$8 sps:$4 sm:$0xff]  }
  0x48   : > { %2285 = vmatpush1.bf16.msra.mxu1 %v3473_v56  ;;  %v3559_v56 = vld [vmem:[%s3945_s19 + $0x1b0] ss:$8 sps:$4 sm:$0xff]  }
  0x49   : > { %2497 = vmatpush1.bf16.msra.mxu0 %v3474_v57  ;;  %2286 = vmatprep.subr.bf16.mxu1 %v3475_v58  ;;  %v3562_v57 = vld [vmem:[%s3945_s19 + $0x5b0] ss:$8 sps:$4 sm:$0xff]   ;;  %v3567_v58 = vld [vmem:[%s3945_s19 + $0x1c4] ss:$8 sps:$4 sm:$0xff]  }
  0x4a   : > { %2498 = vmatprep.subr.bf16.mxu0 %v3477_v59  ;;  %v3570_v59 = vld [vmem:[%s3945_s19 + $0x5c4] ss:$8 sps:$4 sm:$0xff]  }
  0x4c   : > { %2287 = vmatpush1.bf16.msra.mxu1 %v3479_v60  ;;  %v3565_v60 = vld [vmem:[%s3945_s19 + $0x1c0] ss:$8 sps:$4 sm:$0xff]  }
  0x4d   : > { %2499 = vmatpush1.bf16.msra.mxu0 %v3480_v61  ;;  %2288 = vmatprep.subr.bf16.mxu1 %v3481_v62  ;;  %v3568_v61 = vld [vmem:[%s3945_s19 + $0x5c0] ss:$8 sps:$4 sm:$0xff]   ;;  %v3573_v62 = vld [vmem:[%s3945_s19 + $0x1d4] ss:$8 sps:$4 sm:$0xff]  }
  0x4e   : > { %2500 = vmatprep.subr.bf16.mxu0 %v3483_v63  ;;  %v3576_v63 = vld [vmem:[%s3945_s19 + $0x5d4] ss:$8 sps:$4 sm:$0xff]  }
  0x50   : > { %2289 = vmatpush1.bf16.msra.mxu1 %v3485_v0  ;;  %v3571_v0 = vld [vmem:[%s3945_s19 + $0x1d0] ss:$8 sps:$4 sm:$0xff]  }
  0x51   : > { %2501 = vmatpush1.bf16.msra.mxu0 %v3486_v1  ;;  %2311 = vmatprep.subr.bf16.mxu1 %v3492_v2  ;;  %v3574_v1 = vld [vmem:[%s3945_s19 + $0x5d0] ss:$8 sps:$4 sm:$0xff]   ;;  %v3581_v2 = vld [vmem:[%s3945_s19 + $0x1e4] ss:$8 sps:$4 sm:$0xff]  }
  0x52   : > { %2523 = vmatprep.subr.bf16.mxu0 %v3498_v3  ;;  %v3586_v3 = vld [vmem:[%s3945_s19 + $0x5e4] ss:$8 sps:$4 sm:$0xff]  }
  0x53   : > { %2291 = vmatmul.mubr.bf16.vlgmr.msra.gmra.mrb[0].mxu1 %v3487_v4  ;;  %v3579_v4 = vld [vmem:[%s3945_s19 + $0x1e0] ss:$8 sps:$4 sm:$0xff]  }
  0x54   : > { %2503 = vmatmul.mubr.bf16.vlgmr.msra.gmra.mrb[0].mxu0 %v3493_v6  ;;  %2312 = vmatpush1.bf16.msra.mxu1 %v3490_v5  ;;  %v3584_v5 = vld [vmem:[%s3945_s19 + $0x5e0] ss:$8 sps:$4 sm:$0xff]   ;;  %v3591_v6 = vld [vmem:[%s3945_s19 + $0x1f4] ss:$8 sps:$4 sm:$0xff]  }
  0x55   : > { %2524 = vmatpush1.bf16.msra.mxu0 %v3496_v7  ;;  %2313 = vmatprep.subr.bf16.mxu1 %v3501_v8  ;;  %v3594_v7 = vld [vmem:[%s3945_s19 + $0x5f4] ss:$8 sps:$4 sm:$0xff]   ;;  %v3589_v8 = vld [vmem:[%s3945_s19 + $0x1f0] ss:$8 sps:$4 sm:$0xff]  }
  0x56   : > { %2525 = vmatprep.subr.bf16.mxu0 %v3504_v9  ;;  %2300 = vmatprep.mubr.bf16.mxu1 %v3577_v28  ;;  %v3592_v9 = vld [vmem:[%s3945_s19 + $0x5f0] ss:$8 sps:$4 sm:$0xff]   ;;  %v3621_v28 = vld [vmem:[%s3945_s19 + $0x234] ss:$8 sps:$4 sm:$0xff]  }
  0x57   : > { %2512 = vmatprep.mubr.bf16.mxu0 %v3582_v31  ;;  %v3622_v31 = vld [vmem:[%s3945_s19 + $0x630] ss:$8 sps:$4 sm:$0xff]  }
  0x58   : > { %2314 = vmatpush1.bf16.msra.mxu1 %v3499_v10  ;;  %v3600_v10 = vld [vmem:[%s3945_s19 + $0x204] ss:$8 sps:$4 sm:$0xff]  }
  0x59   : > { %2526 = vmatpush1.bf16.msra.mxu0 %v3502_v11  ;;  %2315 = vmatprep.subr.bf16.mxu1 %v3507_v12  ;;  %v3606_v11 = vld [vmem:[%s3945_s19 + $0x604] ss:$8 sps:$4 sm:$0xff]   ;;  %v3595_v12 = vld [vmem:[%s3996_s23 + $0x8] ss:$72 sps:$4 sm:$0xff]  }
  0x5a   : > { %2527 = vmatprep.subr.bf16.mxu0 %v3510_v13  ;;  %v3598_v13 = vld [vmem:[%s3945_s19 + $0x200] ss:$8 sps:$4 sm:$0xff]  }
  0x5b   : > { %2301 = vmatmul.mubr.bf16.gmra.mrb[4].mxu1 %v3587_v34  ;;  %v3630_v34 = vld [vmem:[%s3945_s19 + $0x644] ss:$8 sps:$4 sm:$0xff]  }
  0x5c   : > { %2316 = vmatpush1.bf16.msra.mxu1 %v3505_v14  ;;  %2513 = vmatmul.mubr.bf16.gmra.mrb[4].mxu0 %v3588_v35  ;;  %v3601_v14 = vld [vmem:[%s3996_s23 + $0x28] ss:$72 sps:$4 sm:$0xff]   ;;  %v3711_v35 = vld [vmem:[%s3996_s23 + $0x34] ss:$72 sps:$4 sm:$0xff]  }
  0x5d   : > { %2528 = vmatpush1.bf16.msra.mxu0 %v3508_v15  ;;  %2317 = vmatprep.subr.bf16.mxu1 %v3513_v16  ;;  %v3604_v15 = vld [vmem:[%s3945_s19 + $0x600] ss:$8 sps:$4 sm:$0xff]   ;;  %v3609_v16 = vld [vmem:[%s3945_s19 + $0x214] ss:$8 sps:$4 sm:$0xff]  }
  0x5e   : > { %2529 = vmatprep.subr.bf16.mxu0 %v3516_v17  ;;  %2343 = vmatprep.mubr.bf16.mxu1 %v3597_v40  ;;  %v3612_v17 = vld [vmem:[%s3945_s19 + $0x614] ss:$8 sps:$4 sm:$0xff]   ;;  %v3631_v40 = vld [vmem:[%s3945_s19 + $0x250] ss:$8 sps:$4 sm:$0xff]  }
  0x5f   : > { %2555 = vmatprep.mubr.bf16.mxu0 %v3603_v43  ;;  %v3642_v43 = vld [vmem:[%s3945_s19 + $0x664] ss:$8 sps:$4 sm:$0xff]  }
  0x60   : > { %2318 = vmatpush1.bf16.msra.mxu1 %v3511_v18  ;;  %v3607_v18 = vld [vmem:[%s3945_s19 + $0x210] ss:$8 sps:$4 sm:$0xff]  }
  0x61   : > { %2530 = vmatpush1.bf16.msra.mxu0 %v3514_v19  ;;  %2319 = vmatprep.subr.bf16.mxu1 %v3519_v20  ;;  %v3610_v19 = vld [vmem:[%s3945_s19 + $0x610] ss:$8 sps:$4 sm:$0xff]   ;;  %v3685_v20 = vld [vmem:[%s3996_s23 + $0x9c] ss:$72 sps:$4 sm:$0xff]  }
  0x62   : > { %2531 = vmatprep.subr.bf16.mxu0 %v3522_v21  ;;  %v3615_v21 = vld [vmem:[%s3945_s19 + $0x224] ss:$8 sps:$4 sm:$0xff]  }
  0x64   : > { %2320 = vmatpush1.bf16.msra.mxu1 %v3517_v22  ;;  %v3618_v22 = vld [vmem:[%s3945_s19 + $0x624] ss:$8 sps:$4 sm:$0xff]  }
  0x65   : > { %2532 = vmatpush1.bf16.msra.mxu0 %v3520_v23  ;;  %2321 = vmatprep.subr.bf16.mxu1 %v3525_v24  ;;  %v3690_v23 = vld [vmem:[%s3996_s23 + $0xbc] ss:$72 sps:$4 sm:$0xff]   ;;  %v3613_v24 = vld [vmem:[%s3945_s19 + $0x220] ss:$8 sps:$4 sm:$0xff]  }
  0x66   : > { %2533 = vmatprep.subr.bf16.mxu0 %v3528_v25  ;;  %v3616_v25 = vld [vmem:[%s3945_s19 + $0x620] ss:$8 sps:$4 sm:$0xff]  }
  0x68   : > { %2322 = vmatpush1.bf16.msra.mxu1 %v3523_v26  ;;  %v3695_v26 = vld [vmem:[%s3996_s23 + $0x98] ss:$72 sps:$4 sm:$0xff]  }
  0x69   : > { %2534 = vmatpush1.bf16.msra.mxu0 %v3526_v27  ;;  %2323 = vmatprep.subr.bf16.mxu1 %v3531_v29  ;;  %v3696_v27 = vld [vmem:[%s3996_s23 + $0xb8] ss:$72 sps:$4 sm:$0xff]   ;;  %v3624_v29 = vld [vmem:[%s3945_s19 + $0x634] ss:$8 sps:$4 sm:$0xff]  }
  0x6a   : > { %2535 = vmatprep.subr.bf16.mxu0 %v3534_v30  ;;  %v3619_v30 = vld [vmem:[%s3945_s19 + $0x230] ss:$8 sps:$4 sm:$0xff]  }
  0x6c   : > { %2324 = vmatpush1.bf16.msra.mxu1 %v3529_v32  ;;  %v3705_v32 = vld [vmem:[%s3996_s23 + $0x14] ss:$72 sps:$4 sm:$0xff]  }
  0x6d   : > { %2536 = vmatpush1.bf16.msra.mxu0 %v3532_v33  ;;  %2325 = vmatprep.subr.bf16.mxu1 %v3537_v36  ;;  %v3627_v33 = vld [vmem:[%s3945_s19 + $0x244] ss:$8 sps:$4 sm:$0xff]   ;;  %v3625_v36 = vld [vmem:[%s3945_s19 + $0x240] ss:$8 sps:$4 sm:$0xff]  }
  0x6e   : > { %2537 = vmatprep.subr.bf16.mxu0 %v3540_v37  ;;  %v3628_v37 = vld [vmem:[%s3945_s19 + $0x640] ss:$8 sps:$4 sm:$0xff]  }
  0x70   : > { %2326 = vmatpush1.bf16.msra.mxu1 %v3535_v38  ;;  %v3633_v38 = vld [vmem:[%s3945_s19 + $0x254] ss:$8 sps:$4 sm:$0xff]  }
  0x71   : > { %2538 = vmatpush1.bf16.msra.mxu0 %v3538_v39  ;;  %2327 = vmatprep.subr.bf16.mxu1 %v3543_v41  ;;  %v3636_v39 = vld [vmem:[%s3945_s19 + $0x654] ss:$8 sps:$4 sm:$0xff]   ;;  %v3634_v41 = vld [vmem:[%s3945_s19 + $0x650] ss:$8 sps:$4 sm:$0xff]  }
  0x72   : > { %2539 = vmatprep.subr.bf16.mxu0 %v3546_v42  ;;  %v3639_v42 = vld [vmem:[%s3945_s19 + $0x264] ss:$8 sps:$4 sm:$0xff]  }
  0x74   : > { %2328 = vmatpush1.bf16.msra.mxu1 %v3541_v44  ;;  %v3637_v44 = vld [vmem:[%s3945_s19 + $0x260] ss:$8 sps:$4 sm:$0xff]  }
  0x75   : > { %2540 = vmatpush1.bf16.msra.mxu0 %v3544_v45  ;;  %2329 = vmatprep.subr.bf16.mxu1 %v3549_v46  ;;  %v3640_v45 = vld [vmem:[%s3945_s19 + $0x660] ss:$8 sps:$4 sm:$0xff]   ;;  %v3645_v46 = vld [vmem:[%s3945_s19 + $0x274] ss:$8 sps:$4 sm:$0xff]  }
  0x76   : > { %2541 = vmatprep.subr.bf16.mxu0 %v3552_v47  ;;  %v3648_v47 = vld [vmem:[%s3945_s19 + $0x674] ss:$8 sps:$4 sm:$0xff]  }
  0x78   : > { %2330 = vmatpush1.bf16.msra.mxu1 %v3547_v48  ;;  %v3643_v48 = vld [vmem:[%s3945_s19 + $0x270] ss:$8 sps:$4 sm:$0xff]  }
  0x79   : > { %2542 = vmatpush1.bf16.msra.mxu0 %v3550_v49  ;;  %2331 = vmatprep.subr.bf16.mxu1 %v3555_v50  ;;  %v3646_v49 = vld [vmem:[%s3945_s19 + $0x670] ss:$8 sps:$4 sm:$0xff]   ;;  %v3651_v50 = vld [vmem:[%s3945_s19 + $0x284] ss:$8 sps:$4 sm:$0xff]  }
  0x7a   : > { %2543 = vmatprep.subr.bf16.mxu0 %v3558_v51  ;;  %v3654_v51 = vld [vmem:[%s3945_s19 + $0x684] ss:$8 sps:$4 sm:$0xff]  }
  0x7c   : > { %2332 = vmatpush1.bf16.msra.mxu1 %v3553_v52  ;;  %v3649_v52 = vld [vmem:[%s3945_s19 + $0x280] ss:$8 sps:$4 sm:$0xff]  }
  0x7d   : > { %2544 = vmatpush1.bf16.msra.mxu0 %v3556_v53  ;;  %2333 = vmatprep.subr.bf16.mxu1 %v3561_v54  ;;  %v3652_v53 = vld [vmem:[%s3945_s19 + $0x680] ss:$8 sps:$4 sm:$0xff]   ;;  %v3657_v54 = vld [vmem:[%s3945_s19 + $0x294] ss:$8 sps:$4 sm:$0xff]  }
  0x7e   : > { %2545 = vmatprep.subr.bf16.mxu0 %v3564_v55  ;;  %v3660_v55 = vld [vmem:[%s3945_s19 + $0x694] ss:$8 sps:$4 sm:$0xff]  }
  0x80   : > { %2334 = vmatpush1.bf16.msra.mxu1 %v3559_v56  ;;  %v3655_v56 = vld [vmem:[%s3945_s19 + $0x290] ss:$8 sps:$4 sm:$0xff]  }
  0x81   : > { %2546 = vmatpush1.bf16.msra.mxu0 %v3562_v57  ;;  %2335 = vmatprep.subr.bf16.mxu1 %v3567_v58  ;;  %v3658_v57 = vld [vmem:[%s3945_s19 + $0x690] ss:$8 sps:$4 sm:$0xff]   ;;  %v3663_v58 = vld [vmem:[%s3945_s19 + $0x2a4] ss:$8 sps:$4 sm:$0xff]  }
  0x82   : > { %2547 = vmatprep.subr.bf16.mxu0 %v3570_v59  ;;  %v3666_v59 = vld [vmem:[%s3945_s19 + $0x6a4] ss:$8 sps:$4 sm:$0xff]  }
  0x84   : > { %2336 = vmatpush1.bf16.msra.mxu1 %v3565_v60  ;;  %v3661_v60 = vld [vmem:[%s3945_s19 + $0x2a0] ss:$8 sps:$4 sm:$0xff]  }
  0x85   : > { %2548 = vmatpush1.bf16.msra.mxu0 %v3568_v61  ;;  %2337 = vmatprep.subr.bf16.mxu1 %v3573_v62  ;;  %v3664_v61 = vld [vmem:[%s3945_s19 + $0x6a0] ss:$8 sps:$4 sm:$0xff]   ;;  %v3669_v62 = vld [vmem:[%s3945_s19 + $0x2b4] ss:$8 sps:$4 sm:$0xff]  }
  0x86   : > { %2549 = vmatprep.subr.bf16.mxu0 %v3576_v63  ;;  %v3672_v63 = vld [vmem:[%s3945_s19 + $0x6b4] ss:$8 sps:$4 sm:$0xff]  }
  0x88   : > { %2338 = vmatpush1.bf16.msra.mxu1 %v3571_v0  ;;  %v3667_v0 = vld [vmem:[%s3945_s19 + $0x2b0] ss:$8 sps:$4 sm:$0xff]  }
  0x89   : > { %2550 = vmatpush1.bf16.msra.mxu0 %v3574_v1  ;;  %2339 = vmatprep.subr.bf16.mxu1 %v3581_v2  ;;  %v3670_v1 = vld [vmem:[%s3945_s19 + $0x6b0] ss:$8 sps:$4 sm:$0xff]   ;;  %v3675_v2 = vld [vmem:[%s3945_s19 + $0x2c4] ss:$8 sps:$4 sm:$0xff]  }
  0x8a   : > { %2551 = vmatprep.subr.bf16.mxu0 %v3586_v3  ;;  %v3678_v3 = vld [vmem:[%s3945_s19 + $0x6c4] ss:$8 sps:$4 sm:$0xff]  }
  0x8c   : > { %2340 = vmatpush1.bf16.msra.mxu1 %v3579_v4  ;;  %v3673_v4 = vld [vmem:[%s3945_s19 + $0x2c0] ss:$8 sps:$4 sm:$0xff]  }
  0x8d   : > { %2552 = vmatpush1.bf16.msra.mxu0 %v3584_v5  ;;  %2341 = vmatprep.subr.bf16.mxu1 %v3591_v6  ;;  %v3676_v5 = vld [vmem:[%s3945_s19 + $0x6c0] ss:$8 sps:$4 sm:$0xff]   ;;  %v3681_v6 = vld [vmem:[%s3945_s19 + $0x2d4] ss:$8 sps:$4 sm:$0xff]  }
  0x8e   : > { %2553 = vmatprep.subr.bf16.mxu0 %v3594_v7  ;;  %v3684_v7 = vld [vmem:[%s3945_s19 + $0x6d4] ss:$8 sps:$4 sm:$0xff]  }
  0x90   : > { %2342 = vmatpush1.bf16.msra.mxu1 %v3589_v8  ;;  %v3679_v8 = vld [vmem:[%s3945_s19 + $0x2d0] ss:$8 sps:$4 sm:$0xff]  }
  0x91   : > { %2554 = vmatpush1.bf16.msra.mxu0 %v3592_v9  ;;  %2364 = vmatprep.subr.bf16.mxu1 %v3600_v10  ;;  %v3682_v9 = vld [vmem:[%s3945_s19 + $0x6d0] ss:$8 sps:$4 sm:$0xff]   ;;  %v3689_v10 = vld [vmem:[%s3945_s19 + $0x2e4] ss:$8 sps:$4 sm:$0xff]  }
  0x92   : > { %2576 = vmatprep.subr.bf16.mxu0 %v3606_v11  ;;  %v3694_v11 = vld [vmem:[%s3945_s19 + $0x6e4] ss:$8 sps:$4 sm:$0xff]  }
  0x93   : > { %2344 = vmatmul.mubr.bf16.vlgmr.msra.gmra.mrb[0].mxu1 %v3595_v12  ;;  %v3687_v12 = vld [vmem:[%s3945_s19 + $0x2e0] ss:$8 sps:$4 sm:$0xff]  }
  0x94   : > { %2556 = vmatmul.mubr.bf16.vlgmr.msra.gmra.mrb[0].mxu0 %v3601_v14  ;;  %2365 = vmatpush1.bf16.msra.mxu1 %v3598_v13  ;;  %v3692_v13 = vld [vmem:[%s3945_s19 + $0x6e0] ss:$8 sps:$4 sm:$0xff]   ;;  %v3699_v14 = vld [vmem:[%s3945_s19 + $0x2f4] ss:$8 sps:$4 sm:$0xff]  }
  0x95   : > { %2577 = vmatpush1.bf16.msra.mxu0 %v3604_v15  ;;  %2366 = vmatprep.subr.bf16.mxu1 %v3609_v16  ;;  %v3702_v15 = vld [vmem:[%s3945_s19 + $0x6f4] ss:$8 sps:$4 sm:$0xff]   ;;  %v3697_v16 = vld [vmem:[%s3945_s19 + $0x2f0] ss:$8 sps:$4 sm:$0xff]  }
  0x96   : > { %2578 = vmatprep.subr.bf16.mxu0 %v3612_v17  ;;  %2353 = vmatprep.mubr.bf16.mxu1 %v3685_v20  ;;  %v3700_v17 = vld [vmem:[%s3945_s19 + $0x6f0] ss:$8 sps:$4 sm:$0xff]  }
  0x97   : > { %2565 = vmatprep.mubr.bf16.mxu0 %v3690_v23  ;;  %v3703_v20 = vld [vmem:[%s3996_s23 + $0x10] ss:$72 sps:$4 sm:$0xff]   ;;  %v3712_v23 = vld [vmem:[%s3945_s19 + $0x700] ss:$8 sps:$4 sm:$0xff]  }
  0x98   : > { %2367 = vmatpush1.bf16.msra.mxu1 %v3607_v18  ;;  %v3708_v18 = vld [vmem:[%s3945_s19 + $0x304] ss:$8 sps:$4 sm:$0xff]  }
  0x99   : > { %2579 = vmatpush1.bf16.msra.mxu0 %v3610_v19  ;;  %2368 = vmatprep.subr.bf16.mxu1 %v3615_v21  ;;  %v3714_v19 = vld [vmem:[%s3945_s19 + $0x704] ss:$8 sps:$4 sm:$0xff]   ;;  %v3706_v21 = vld [vmem:[%s3945_s19 + $0x300] ss:$8 sps:$4 sm:$0xff]  }
  0x9a   : > { %2580 = vmatprep.subr.bf16.mxu0 %v3618_v22  ;;  %v3709_v22 = vld [vmem:[%s3996_s23 + $0x30] ss:$72 sps:$4 sm:$0xff]  }
  0x9b   : > { %2354 = vmatmul.mubr.bf16.gmra.mrb[4].mxu1 %v3695_v26  ;;  %v3793_v26 = vld [vmem:[%s3996_s23 + $0xa4] ss:$72 sps:$4 sm:$0xff]  }
  0x9c   : > { %2566 = vmatmul.mubr.bf16.gmra.mrb[4].mxu0 %v3696_v27  ;;  %2369 = vmatpush1.bf16.msra.mxu1 %v3613_v24  ;;  %v3717_v24 = vld [vmem:[%s3945_s19 + $0x314] ss:$8 sps:$4 sm:$0xff]   ;;  %v3795_v27 = vld [vmem:[%s3996_s23 + $0xc4] ss:$72 sps:$4 sm:$0xff]  }
  0x9d   : > { %2581 = vmatpush1.bf16.msra.mxu0 %v3616_v25  ;;  %2370 = vmatprep.subr.bf16.mxu1 %v3621_v28  ;;  %v3720_v25 = vld [vmem:[%s3945_s19 + $0x714] ss:$8 sps:$4 sm:$0xff]   ;;  %v3715_v28 = vld [vmem:[%s3945_s19 + $0x310] ss:$8 sps:$4 sm:$0xff]  }
  0x9e   : > { %2582 = vmatprep.subr.bf16.mxu0 %v3624_v29  ;;  %2396 = vmatprep.mubr.bf16.mxu1 %v3705_v32  ;;  %v3718_v29 = vld [vmem:[%s3945_s19 + $0x710] ss:$8 sps:$4 sm:$0xff]   ;;  %v3721_v32 = vld [vmem:[%s3945_s19 + $0x320] ss:$8 sps:$4 sm:$0xff]  }
  0x9f   : > { %2608 = vmatprep.mubr.bf16.mxu0 %v3711_v35  ;;  %v3801_v35 = vld [vmem:[%s3996_s23 + $0xc0] ss:$72 sps:$4 sm:$0xff]  }
  0xa0   : > { %2371 = vmatpush1.bf16.msra.mxu1 %v3619_v30  ;;  %v3723_v30 = vld [vmem:[%s3945_s19 + $0x324] ss:$8 sps:$4 sm:$0xff]  }
  0xa1   : > { %2583 = vmatpush1.bf16.msra.mxu0 %v3622_v31  ;;  %2372 = vmatprep.subr.bf16.mxu1 %v3627_v33  ;;  %v3726_v31 = vld [vmem:[%s3945_s19 + $0x724] ss:$8 sps:$4 sm:$0xff]   ;;  %v3724_v33 = vld [vmem:[%s3945_s19 + $0x720] ss:$8 sps:$4 sm:$0xff]  }
  0xa2   : > { %2584 = vmatprep.subr.bf16.mxu0 %v3630_v34  ;;  %v3797_v34 = vld [vmem:[%s3996_s23 + $0xa0] ss:$72 sps:$4 sm:$0xff]  }
  0xa4   : > { %2373 = vmatpush1.bf16.msra.mxu1 %v3625_v36  ;;  %v3729_v36 = vld [vmem:[%s3945_s19 + $0x334] ss:$8 sps:$4 sm:$0xff]  }
  0xa5   : > { %2585 = vmatpush1.bf16.msra.mxu0 %v3628_v37  ;;  %2374 = vmatprep.subr.bf16.mxu1 %v3633_v38  ;;  %v3732_v37 = vld [vmem:[%s3945_s19 + $0x734] ss:$8 sps:$4 sm:$0xff]  }
  0xa6   : > { %2586 = vmatprep.subr.bf16.mxu0 %v3636_v39  ;;  %v3813_v38 = vld [vmem:[%s3996_s23 + $0x1c] ss:$72 sps:$4 sm:$0xff]  }
  0xa7   : > { %v3816_v39 = vld [vmem:[%s3996_s23 + $0x3c] ss:$72 sps:$4 sm:$0xff]  }
  0xa8   : > { %2375 = vmatpush1.bf16.msra.mxu1 %v3631_v40  ;;  %v3727_v40 = vld [vmem:[%s3945_s19 + $0x330] ss:$8 sps:$4 sm:$0xff]  }
  0xa9   : > { %2587 = vmatpush1.bf16.msra.mxu0 %v3634_v41  ;;  %2376 = vmatprep.subr.bf16.mxu1 %v3639_v42  ;;  %v3730_v41 = vld [vmem:[%s3945_s19 + $0x730] ss:$8 sps:$4 sm:$0xff]   ;;  %v3735_v42 = vld [vmem:[%s3945_s19 + $0x344] ss:$8 sps:$4 sm:$0xff]  }
  0xaa   : > { %2588 = vmatprep.subr.bf16.mxu0 %v3642_v43  ;;  %v3738_v43 = vld [vmem:[%s3945_s19 + $0x744] ss:$8 sps:$4 sm:$0xff]  }
  0xac   : > { %2377 = vmatpush1.bf16.msra.mxu1 %v3637_v44  ;;  %v3733_v44 = vld [vmem:[%s3945_s19 + $0x340] ss:$8 sps:$4 sm:$0xff]  }
  0xad   : > { %2589 = vmatpush1.bf16.msra.mxu0 %v3640_v45  ;;  %2378 = vmatprep.subr.bf16.mxu1 %v3645_v46  ;;  %v3736_v45 = vld [vmem:[%s3945_s19 + $0x740] ss:$8 sps:$4 sm:$0xff]   ;;  %v3741_v46 = vld [vmem:[%s3945_s19 + $0x354] ss:$8 sps:$4 sm:$0xff]  }
  0xae   : > { %2590 = vmatprep.subr.bf16.mxu0 %v3648_v47  ;;  %v3744_v47 = vld [vmem:[%s3945_s19 + $0x754] ss:$8 sps:$4 sm:$0xff]  }
  0xb0   : > { %2379 = vmatpush1.bf16.msra.mxu1 %v3643_v48  ;;  %v3739_v48 = vld [vmem:[%s3945_s19 + $0x350] ss:$8 sps:$4 sm:$0xff]  }
  0xb1   : > { %2591 = vmatpush1.bf16.msra.mxu0 %v3646_v49  ;;  %2380 = vmatprep.subr.bf16.mxu1 %v3651_v50  ;;  %v3742_v49 = vld [vmem:[%s3945_s19 + $0x750] ss:$8 sps:$4 sm:$0xff]   ;;  %v3747_v50 = vld [vmem:[%s3945_s19 + $0x364] ss:$8 sps:$4 sm:$0xff]  }
  0xb2   : > { %2592 = vmatprep.subr.bf16.mxu0 %v3654_v51  ;;  %v3750_v51 = vld [vmem:[%s3945_s19 + $0x764] ss:$8 sps:$4 sm:$0xff]  }
  0xb4   : > { %2381 = vmatpush1.bf16.msra.mxu1 %v3649_v52  ;;  %v3745_v52 = vld [vmem:[%s3945_s19 + $0x360] ss:$8 sps:$4 sm:$0xff]  }
  0xb5   : > { %2593 = vmatpush1.bf16.msra.mxu0 %v3652_v53  ;;  %2382 = vmatprep.subr.bf16.mxu1 %v3657_v54  ;;  %v3748_v53 = vld [vmem:[%s3945_s19 + $0x760] ss:$8 sps:$4 sm:$0xff]   ;;  %v3753_v54 = vld [vmem:[%s3945_s19 + $0x374] ss:$8 sps:$4 sm:$0xff]  }
  0xb6   : > { %2594 = vmatprep.subr.bf16.mxu0 %v3660_v55  ;;  %v3756_v55 = vld [vmem:[%s3945_s19 + $0x774] ss:$8 sps:$4 sm:$0xff]  }
  0xb8   : > { %2383 = vmatpush1.bf16.msra.mxu1 %v3655_v56  ;;  %v3751_v56 = vld [vmem:[%s3945_s19 + $0x370] ss:$8 sps:$4 sm:$0xff]  }
  0xb9   : > { %2595 = vmatpush1.bf16.msra.mxu0 %v3658_v57  ;;  %2384 = vmatprep.subr.bf16.mxu1 %v3663_v58  ;;  %v3754_v57 = vld [vmem:[%s3945_s19 + $0x770] ss:$8 sps:$4 sm:$0xff]   ;;  %v3759_v58 = vld [vmem:[%s3945_s19 + $0x384] ss:$8 sps:$4 sm:$0xff]  }
  0xba   : > { %2596 = vmatprep.subr.bf16.mxu0 %v3666_v59  ;;  %v3762_v59 = vld [vmem:[%s3945_s19 + $0x784] ss:$8 sps:$4 sm:$0xff]  }
  0xbc   : > { %2385 = vmatpush1.bf16.msra.mxu1 %v3661_v60  ;;  %v3757_v60 = vld [vmem:[%s3945_s19 + $0x380] ss:$8 sps:$4 sm:$0xff]  }
  0xbd   : > { %2597 = vmatpush1.bf16.msra.mxu0 %v3664_v61  ;;  %2386 = vmatprep.subr.bf16.mxu1 %v3669_v62  ;;  %v3760_v61 = vld [vmem:[%s3945_s19 + $0x780] ss:$8 sps:$4 sm:$0xff]   ;;  %v3765_v62 = vld [vmem:[%s3945_s19 + $0x394] ss:$8 sps:$4 sm:$0xff]  }
  0xbe   : > { %2598 = vmatprep.subr.bf16.mxu0 %v3672_v63  ;;  %v3768_v63 = vld [vmem:[%s3945_s19 + $0x794] ss:$8 sps:$4 sm:$0xff]  }
  0xc0   : > { %2387 = vmatpush1.bf16.msra.mxu1 %v3667_v0  ;;  %v3763_v0 = vld [vmem:[%s3945_s19 + $0x390] ss:$8 sps:$4 sm:$0xff]  }
  0xc1   : > { %2599 = vmatpush1.bf16.msra.mxu0 %v3670_v1  ;;  %2388 = vmatprep.subr.bf16.mxu1 %v3675_v2  ;;  %v3766_v1 = vld [vmem:[%s3945_s19 + $0x790] ss:$8 sps:$4 sm:$0xff]   ;;  %v3771_v2 = vld [vmem:[%s3945_s19 + $0x3a4] ss:$8 sps:$4 sm:$0xff]  }
  0xc2   : > { %2600 = vmatprep.subr.bf16.mxu0 %v3678_v3  ;;  %v3774_v3 = vld [vmem:[%s3945_s19 + $0x7a4] ss:$8 sps:$4 sm:$0xff]  }
  0xc4   : > { %2389 = vmatpush1.bf16.msra.mxu1 %v3673_v4  ;;  %v3769_v4 = vld [vmem:[%s3945_s19 + $0x3a0] ss:$8 sps:$4 sm:$0xff]  }
  0xc5   : > { %2601 = vmatpush1.bf16.msra.mxu0 %v3676_v5  ;;  %2390 = vmatprep.subr.bf16.mxu1 %v3681_v6  ;;  %v3772_v5 = vld [vmem:[%s3945_s19 + $0x7a0] ss:$8 sps:$4 sm:$0xff]   ;;  %v3777_v6 = vld [vmem:[%s3945_s19 + $0x3b4] ss:$8 sps:$4 sm:$0xff]  }
  0xc6   : > { %2602 = vmatprep.subr.bf16.mxu0 %v3684_v7  ;;  %v3780_v7 = vld [vmem:[%s3945_s19 + $0x7b4] ss:$8 sps:$4 sm:$0xff]  }
  0xc8   : > { %2391 = vmatpush1.bf16.msra.mxu1 %v3679_v8  ;;  %v3775_v8 = vld [vmem:[%s3945_s19 + $0x3b0] ss:$8 sps:$4 sm:$0xff]  }
  0xc9   : > { %2603 = vmatpush1.bf16.msra.mxu0 %v3682_v9  ;;  %2392 = vmatprep.subr.bf16.mxu1 %v3689_v10  ;;  %v3778_v9 = vld [vmem:[%s3945_s19 + $0x7b0] ss:$8 sps:$4 sm:$0xff]   ;;  %v3783_v10 = vld [vmem:[%s3945_s19 + $0x3c4] ss:$8 sps:$4 sm:$0xff]  }
  0xca   : > { %2604 = vmatprep.subr.bf16.mxu0 %v3694_v11  ;;  %v3786_v11 = vld [vmem:[%s3945_s19 + $0x7c4] ss:$8 sps:$4 sm:$0xff]  }
  0xcc   : > { %2393 = vmatpush1.bf16.msra.mxu1 %v3687_v12  ;;  %v3781_v12 = vld [vmem:[%s3945_s19 + $0x3c0] ss:$8 sps:$4 sm:$0xff]  }
  0xcd   : > { %2605 = vmatpush1.bf16.msra.mxu0 %v3692_v13  ;;  %2394 = vmatprep.subr.bf16.mxu1 %v3699_v14  ;;  %v3784_v13 = vld [vmem:[%s3945_s19 + $0x7c0] ss:$8 sps:$4 sm:$0xff]   ;;  %v3789_v14 = vld [vmem:[%s3945_s19 + $0x3d4] ss:$8 sps:$4 sm:$0xff]  }
  0xce   : > { %2606 = vmatprep.subr.bf16.mxu0 %v3702_v15  ;;  %v3792_v15 = vld [vmem:[%s3945_s19 + $0x7d4] ss:$8 sps:$4 sm:$0xff]  }
  0xd0   : > { %2395 = vmatpush1.bf16.msra.mxu1 %v3697_v16  ;;  %v3787_v16 = vld [vmem:[%s3945_s19 + $0x3d0] ss:$8 sps:$4 sm:$0xff]  }
  0xd1   : > { %2607 = vmatpush1.bf16.msra.mxu0 %v3700_v17  ;;  %2417 = vmatprep.subr.bf16.mxu1 %v3708_v18  ;;  %v3790_v17 = vld [vmem:[%s3945_s19 + $0x7d0] ss:$8 sps:$4 sm:$0xff]   ;;  %v3800_v18 = vld [vmem:[%s3945_s19 + $0x3e4] ss:$8 sps:$4 sm:$0xff]  }
  0xd2   : > { %2629 = vmatprep.subr.bf16.mxu0 %v3714_v19  ;;  %v3804_v19 = vld [vmem:[%s3945_s19 + $0x7e4] ss:$8 sps:$4 sm:$0xff]  }
  0xd3   : > { %2397 = vmatmul.mubr.bf16.vlgmr.msra.gmra.mrb[0].mxu1 %v3703_v20  ;;  %v3798_v20 = vld [vmem:[%s3945_s19 + $0x3e0] ss:$8 sps:$4 sm:$0xff]  }
  0xd4   : > { %2609 = vmatmul.mubr.bf16.vlgmr.msra.gmra.mrb[0].mxu0 %v3709_v22  ;;  %2418 = vmatpush1.bf16.msra.mxu1 %v3706_v21  ;;  %v3802_v21 = vld [vmem:[%s3945_s19 + $0x7e0] ss:$8 sps:$4 sm:$0xff]   ;;  %v3807_v22 = vld [vmem:[%s3945_s19 + $0x3f4] ss:$8 sps:$4 sm:$0xff]  }
  0xd5   : > { %2630 = vmatpush1.bf16.msra.mxu0 %v3712_v23  ;;  %2419 = vmatprep.subr.bf16.mxu1 %v3717_v24  ;;  %v3810_v23 = vld [vmem:[%s3945_s19 + $0x7f4] ss:$8 sps:$4 sm:$0xff]   ;;  %v3805_v24 = vld [vmem:[%s3945_s19 + $0x3f0] ss:$8 sps:$4 sm:$0xff]  }
  0xd6   : > { %2631 = vmatprep.subr.bf16.mxu0 %v3720_v25  ;;  %2406 = vmatprep.mubr.bf16.mxu1 %v3793_v26  ;;  %v3808_v25 = vld [vmem:[%s3945_s19 + $0x7f0] ss:$8 sps:$4 sm:$0xff]   ;;  %v3819_v26 = vld [vmem:[%s3945_s19 + $0x804] ss:$8 sps:$4 sm:$0xff]  }
  0xd7   : > { %2618 = vmatprep.mubr.bf16.mxu0 %v3795_v27  ;;  %v3811_v27 = vld [vmem:[%s3996_s23 + $0x18] ss:$72 sps:$4 sm:$0xff]  }
  0xd8   : > { %2420 = vmatpush1.bf16.msra.mxu1 %v3715_v28  ;;  %v3814_v28 = vld [vmem:[%s3996_s23 + $0x38] ss:$72 sps:$4 sm:$0xff]  }
  0xd9   : > { %2632 = vmatpush1.bf16.msra.mxu0 %v3718_v29  ;;  %2421 = vmatprep.subr.bf16.mxu1 %v3723_v30  ;;  %v3817_v29 = vld [vmem:[%s3945_s19 + $0x800] ss:$8 sps:$4 sm:$0xff]   ;;  %v3822_v30 = vld [vmem:[%s3945_s19 + $0x814] ss:$8 sps:$4 sm:$0xff]  }
  0xda   : > { %2633 = vmatprep.subr.bf16.mxu0 %v3726_v31  ;;  %v3823_v31 = vld [vmem:[%s3996_s23 + $0xac] ss:$72 sps:$4 sm:$0xff]  }
  0xdb   : > { %2407 = vmatmul.mubr.bf16.gmra.mrb[4].mxu1 %v3797_v34  ;;  %v3831_v34 = vld [vmem:[%s3945_s19 + $0x824] ss:$8 sps:$4 sm:$0xff]  }
  0xdc   : > { %2619 = vmatmul.mubr.bf16.gmra.mrb[4].mxu0 %v3801_v35  ;;  %2422 = vmatpush1.bf16.msra.mxu1 %v3721_v32  ;;  %v3825_v32 = vld [vmem:[%s3996_s23 + $0xcc] ss:$72 sps:$4 sm:$0xff]   ;;  %v3827_v35 = vld [vmem:[%s3996_s23 + $0xa8] ss:$72 sps:$4 sm:$0xff]  }
  0xdd   : > { %2634 = vmatpush1.bf16.msra.mxu0 %v3724_v33  ;;  %2423 = vmatprep.subr.bf16.mxu1 %v3729_v36  ;;  %v3820_v33 = vld [vmem:[%s3945_s19 + $0x810] ss:$8 sps:$4 sm:$0xff]  }
  0xde   : > { %2635 = vmatprep.subr.bf16.mxu0 %v3732_v37  ;;  %2449 = vmatprep.mubr.bf16.mxu1 %v3813_v38  ;;  %v3828_v36 = vld [vmem:[%s3996_s23 + $0xc8] ss:$72 sps:$4 sm:$0xff]   ;;  %v3834_v38 = vld [vmem:[%s3945_s19 + $0x834] ss:$8 sps:$4 sm:$0xff]  }
  0xdf   : > { %2661 = vmatprep.mubr.bf16.mxu0 %v3816_v39  ;;  %v3829_v37 = vld [vmem:[%s3945_s19 + $0x820] ss:$8 sps:$4 sm:$0xff]   ;;  %v3873_v39 = vld [vmem:[%s3996_s23 + $0x44] ss:$72 sps:$4 sm:$0xff]  }
  0xe0   : > { %2424 = vmatpush1.bf16.msra.mxu1 %v3727_v40  ;;  %v3876_v40 = vld [vmem:[%s3996_s23 + $0xd4] ss:$72 sps:$4 sm:$0xff]  }
  0xe1   : > { %2636 = vmatpush1.bf16.msra.mxu0 %v3730_v41  ;;  %2425 = vmatprep.subr.bf16.mxu1 %v3735_v42  ;;  %v3832_v41 = vld [vmem:[%s3945_s19 + $0x830] ss:$8 sps:$4 sm:$0xff]   ;;  %v3837_v42 = vld [vmem:[%s3945_s19 + $0x844] ss:$8 sps:$4 sm:$0xff]  }
  0xe2   : > { %2637 = vmatprep.subr.bf16.mxu0 %v3738_v43  ;;  %v3835_v43 = vld [vmem:[%s3945_s19 + $0x840] ss:$8 sps:$4 sm:$0xff]  }
  0xe4   : > { %2426 = vmatpush1.bf16.msra.mxu1 %v3733_v44  ;;  %v3840_v44 = vld [vmem:[%s3945_s19 + $0x854] ss:$8 sps:$4 sm:$0xff]  }
  0xe5   : > { %2638 = vmatpush1.bf16.msra.mxu0 %v3736_v45  ;;  %2427 = vmatprep.subr.bf16.mxu1 %v3741_v46  ;;  %v3838_v45 = vld [vmem:[%s3945_s19 + $0x850] ss:$8 sps:$4 sm:$0xff]   ;;  %v3843_v46 = vld [vmem:[%s3945_s19 + $0x864] ss:$8 sps:$4 sm:$0xff]  }
  0xe6   : > { %2639 = vmatprep.subr.bf16.mxu0 %v3744_v47  ;;  %v3841_v47 = vld [vmem:[%s3945_s19 + $0x860] ss:$8 sps:$4 sm:$0xff]  }
  0xe8   : > { %2428 = vmatpush1.bf16.msra.mxu1 %v3739_v48  ;;  %v3846_v48 = vld [vmem:[%s3945_s19 + $0x874] ss:$8 sps:$4 sm:$0xff]  }
  0xe9   : > { %2640 = vmatpush1.bf16.msra.mxu0 %v3742_v49  ;;  %2429 = vmatprep.subr.bf16.mxu1 %v3747_v50  ;;  %v3844_v49 = vld [vmem:[%s3945_s19 + $0x870] ss:$8 sps:$4 sm:$0xff]   ;;  %v3849_v50 = vld [vmem:[%s3945_s19 + $0x884] ss:$8 sps:$4 sm:$0xff]  }
  0xea   : > { %2641 = vmatprep.subr.bf16.mxu0 %v3750_v51  ;;  %v3847_v51 = vld [vmem:[%s3945_s19 + $0x880] ss:$8 sps:$4 sm:$0xff]  }
  0xec   : > { %2430 = vmatpush1.bf16.msra.mxu1 %v3745_v52  ;;  %v3852_v52 = vld [vmem:[%s3945_s19 + $0x894] ss:$8 sps:$4 sm:$0xff]  }
  0xed   : > { %2642 = vmatpush1.bf16.msra.mxu0 %v3748_v53  ;;  %2431 = vmatprep.subr.bf16.mxu1 %v3753_v54  ;;  %v3850_v53 = vld [vmem:[%s3945_s19 + $0x890] ss:$8 sps:$4 sm:$0xff]   ;;  %v3855_v54 = vld [vmem:[%s3945_s19 + $0x8a4] ss:$8 sps:$4 sm:$0xff]  }
  0xee   : > { %2643 = vmatprep.subr.bf16.mxu0 %v3756_v55  ;;  %v3853_v55 = vld [vmem:[%s3945_s19 + $0x8a0] ss:$8 sps:$4 sm:$0xff]  }
  0xf0   : > { %2432 = vmatpush1.bf16.msra.mxu1 %v3751_v56  ;;  %v3858_v56 = vld [vmem:[%s3945_s19 + $0x8b4] ss:$8 sps:$4 sm:$0xff]  }
  0xf1   : > { %2644 = vmatpush1.bf16.msra.mxu0 %v3754_v57  ;;  %2433 = vmatprep.subr.bf16.mxu1 %v3759_v58  ;;  %v3856_v57 = vld [vmem:[%s3945_s19 + $0x8b0] ss:$8 sps:$4 sm:$0xff]   ;;  %v3861_v58 = vld [vmem:[%s3945_s19 + $0x8c4] ss:$8 sps:$4 sm:$0xff]  }
  0xf2   : > { %2645 = vmatprep.subr.bf16.mxu0 %v3762_v59  ;;  %v3859_v59 = vld [vmem:[%s3945_s19 + $0x8c0] ss:$8 sps:$4 sm:$0xff]  }
  0xf4   : > { %2434 = vmatpush1.bf16.msra.mxu1 %v3757_v60  ;;  %v3864_v60 = vld [vmem:[%s3945_s19 + $0x8d4] ss:$8 sps:$4 sm:$0xff]  }
  0xf5   : > { %2646 = vmatpush1.bf16.msra.mxu0 %v3760_v61  ;;  %2435 = vmatprep.subr.bf16.mxu1 %v3765_v62  ;;  %v3862_v61 = vld [vmem:[%s3945_s19 + $0x8d0] ss:$8 sps:$4 sm:$0xff]   ;;  %v3867_v62 = vld [vmem:[%s3945_s19 + $0x8e4] ss:$8 sps:$4 sm:$0xff]  }
  0xf6   : > { %2647 = vmatprep.subr.bf16.mxu0 %v3768_v63  ;;  %v3865_v63 = vld [vmem:[%s3945_s19 + $0x8e0] ss:$8 sps:$4 sm:$0xff]  }
  0xf8   : > { %2436 = vmatpush1.bf16.msra.mxu1 %v3763_v0  ;;  %v3870_v0 = vld [vmem:[%s3945_s19 + $0x8f4] ss:$8 sps:$4 sm:$0xff]  }
  0xf9   : > { %2648 = vmatpush1.bf16.msra.mxu0 %v3766_v1  ;;  %2437 = vmatprep.subr.bf16.mxu1 %v3771_v2  ;;  %v3868_v1 = vld [vmem:[%s3945_s19 + $0x8f0] ss:$8 sps:$4 sm:$0xff]   ;;  %v3871_v2 = vld [vmem:[%s3996_s23 + $0x40] ss:$72 sps:$4 sm:$0xff]  }
  0xfa   : > { %2649 = vmatprep.subr.bf16.mxu0 %v3774_v3  ;;  %v3874_v3 = vld [vmem:[%s3996_s23 + $0xd0] ss:$72 sps:$4 sm:$0xff]  }
  0xfc   : > { %2438 = vmatpush1.bf16.msra.mxu1 %v3769_v4  ;;  %v628_v4 = vlaneseq }
  0xfd   : > { %2650 = vmatpush1.bf16.msra.mxu0 %v3772_v5  ;;  %2439 = vmatprep.subr.bf16.mxu1 %v3777_v6 }
  0xfe   : > { %2651 = vmatprep.subr.bf16.mxu0 %v3780_v7  ;;  %v629_v5 = vshrl.u32 %v628_v4, 7 }
 0x100   : > { %2440 = vmatpush1.bf16.msra.mxu1 %v3775_v8 }
 0x101   : > { %2652 = vmatpush1.bf16.msra.mxu0 %v3778_v9  ;;  %2441 = vmatprep.subr.bf16.mxu1 %v3783_v10  ;;  %v630_v9 = vsub.s32 0, %v629_v5 }
 0x102   : > { %2653 = vmatprep.subr.bf16.mxu0 %v3786_v11  ;;  %v626_v11 = vld [vmem:[%s284_s27] sm:$0x3] }
 0x104   : > { %2442 = vmatpush1.bf16.msra.mxu1 %v3781_v12  ;;  %v634_v12 = vsub.s32 1, %v629_v5 }
 0x105   : > { %2654 = vmatpush1.bf16.msra.mxu0 %v3784_v13  ;;  %2443 = vmatprep.subr.bf16.mxu1 %v3789_v14  ;;  %v631_v13 = vrot.slane %v626_v11, %v630_v9 }
 0x106   : > { %2655 = vmatprep.subr.bf16.mxu0 %v3792_v15  ;;  %v635_v14 = vrot.slane %v626_v11, %v634_v12 }
 0x108   : > { %2444 = vmatpush1.bf16.msra.mxu1 %v3787_v16 }
 0x109   : > { %2656 = vmatpush1.bf16.msra.mxu0 %v3790_v17  ;;  %2445 = vmatprep.subr.bf16.mxu1 %v3800_v18 }
 0x10a   : > { %2657 = vmatprep.subr.bf16.mxu0 %v3804_v19 }
 0x10c   : > { %2446 = vmatpush1.bf16.msra.mxu1 %v3798_v20 }
 0x10d   : > { %2658 = vmatpush1.bf16.msra.mxu0 %v3802_v21  ;;  %2447 = vmatprep.subr.bf16.mxu1 %v3807_v22 }
 0x10e   : > { %2659 = vmatprep.subr.bf16.mxu0 %v3810_v23 }
 0x110   : > { %2448 = vmatpush1.bf16.msra.mxu1 %v3805_v24 }
 0x111   : > { %2660 = vmatpush1.bf16.msra.mxu0 %v3808_v25  ;;  %3261 = vmatprep.subr.bf16.mxu1 %v3819_v26 }
 0x112   : > { %2682 = vmatprep.subr.bf16.mxu0 %v3819_v26 }
 0x113   : > { %2450 = vmatmul.mubr.bf16.vlgmr.msra.gmra.mrb[0].mxu1 %v3811_v27 }
 0x114   : > { %2662 = vmatmul.mubr.bf16.vlgmr.msra.gmra.mrb[0].mxu0 %v3814_v28  ;;  %3277 = vmatpush1.bf16.msra.mxu1 %v3817_v29 }
 0x115   : > { %2683 = vmatpush1.bf16.msra.mxu0 %v3817_v29  ;;  %3262 = vmatprep.subr.bf16.mxu1 %v3822_v30 }
 0x116   : > { %2684 = vmatprep.subr.bf16.mxu0 %v3822_v30  ;;  %2459 = vmatprep.mubr.bf16.mxu1 %v3823_v31 }
 0x117   : > { %2671 = vmatprep.mubr.bf16.mxu0 %v3825_v32 }
 0x118   : > { %3278 = vmatpush1.bf16.msra.mxu1 %v3820_v33 }
 0x119   : > { %2685 = vmatpush1.bf16.msra.mxu0 %v3820_v33  ;;  %3263 = vmatprep.subr.bf16.mxu1 %v3831_v34 }
 0x11a   : > { %2686 = vmatprep.subr.bf16.mxu0 %v3831_v34 }
 0x11b   : > { %2460 = vmatmul.mubr.bf16.gmra.mrb[4].mxu1 %v3827_v35 }
 0x11c   : > { %2672 = vmatmul.mubr.bf16.gmra.mrb[4].mxu0 %v3828_v36  ;;  %3279 = vmatpush1.bf16.msra.mxu1 %v3829_v37 }
 0x11d   : > { %2687 = vmatpush1.bf16.msra.mxu0 %v3829_v37  ;;  %3264 = vmatprep.subr.bf16.mxu1 %v3834_v38 }
 0x11e   : > { %2688 = vmatprep.subr.bf16.mxu0 %v3834_v38  ;;  %2714 = vmatprep.mubr.bf16.mxu0 %v3873_v39 }
 0x11f   : > { %2724 = vmatprep.mubr.bf16.mxu1 %v3876_v40 }
 0x120   : > { %3280 = vmatpush1.bf16.msra.mxu1 %v3832_v41 }
 0x121   : > { %2689 = vmatpush1.bf16.msra.mxu0 %v3832_v41  ;;  %3265 = vmatprep.subr.bf16.mxu1 %v3837_v42 }
 0x122   : > { %2690 = vmatprep.subr.bf16.mxu0 %v3837_v42 }
 0x124   : > { %3281 = vmatpush1.bf16.msra.mxu1 %v3835_v43 }
 0x125   : > { %2691 = vmatpush1.bf16.msra.mxu0 %v3835_v43  ;;  %3266 = vmatprep.subr.bf16.mxu1 %v3840_v44 }
 0x126   : > { %2692 = vmatprep.subr.bf16.mxu0 %v3840_v44 }
 0x128   : > { %3282 = vmatpush1.bf16.msra.mxu1 %v3838_v45 }
 0x129   : > { %2693 = vmatpush1.bf16.msra.mxu0 %v3838_v45  ;;  %3267 = vmatprep.subr.bf16.mxu1 %v3843_v46 }
 0x12a   : > { %2694 = vmatprep.subr.bf16.mxu0 %v3843_v46 }
 0x12c   : > { %3283 = vmatpush1.bf16.msra.mxu1 %v3841_v47 }
 0x12d   : > { %2695 = vmatpush1.bf16.msra.mxu0 %v3841_v47  ;;  %3268 = vmatprep.subr.bf16.mxu1 %v3846_v48 }
 0x12e   : > { %2696 = vmatprep.subr.bf16.mxu0 %v3846_v48 }
 0x130   : > { %3284 = vmatpush1.bf16.msra.mxu1 %v3844_v49 }
 0x131   : > { %2697 = vmatpush1.bf16.msra.mxu0 %v3844_v49  ;;  %3269 = vmatprep.subr.bf16.mxu1 %v3849_v50 }
 0x132   : > { %2698 = vmatprep.subr.bf16.mxu0 %v3849_v50 }
 0x134   : > { %3285 = vmatpush1.bf16.msra.mxu1 %v3847_v51 }
 0x135   : > { %2699 = vmatpush1.bf16.msra.mxu0 %v3847_v51  ;;  %3270 = vmatprep.subr.bf16.mxu1 %v3852_v52 }
 0x136   : > { %2700 = vmatprep.subr.bf16.mxu0 %v3852_v52 }
 0x138   : > { %3286 = vmatpush1.bf16.msra.mxu1 %v3850_v53 }
 0x139   : > { %2701 = vmatpush1.bf16.msra.mxu0 %v3850_v53  ;;  %3271 = vmatprep.subr.bf16.mxu1 %v3855_v54 }
 0x13a   : > { %2702 = vmatprep.subr.bf16.mxu0 %v3855_v54 }
 0x13c   : > { %3287 = vmatpush1.bf16.msra.mxu1 %v3853_v55 }
 0x13d   : > { %2703 = vmatpush1.bf16.msra.mxu0 %v3853_v55  ;;  %3272 = vmatprep.subr.bf16.mxu1 %v3858_v56 }
 0x13e   : > { %2704 = vmatprep.subr.bf16.mxu0 %v3858_v56 }
 0x140   : > { %3288 = vmatpush1.bf16.msra.mxu1 %v3856_v57 }
 0x141   : > { %2705 = vmatpush1.bf16.msra.mxu0 %v3856_v57  ;;  %3273 = vmatprep.subr.bf16.mxu1 %v3861_v58 }
 0x142   : > { %2706 = vmatprep.subr.bf16.mxu0 %v3861_v58 }
 0x144   : > { %3289 = vmatpush1.bf16.msra.mxu1 %v3859_v59 }
 0x145   : > { %2707 = vmatpush1.bf16.msra.mxu0 %v3859_v59  ;;  %3274 = vmatprep.subr.bf16.mxu1 %v3864_v60 }
 0x146   : > { %2708 = vmatprep.subr.bf16.mxu0 %v3864_v60 }
 0x148   : > { %3290 = vmatpush1.bf16.msra.mxu1 %v3862_v61 }
 0x149   : > { %2709 = vmatpush1.bf16.msra.mxu0 %v3862_v61  ;;  %3275 = vmatprep.subr.bf16.mxu1 %v3867_v62 }
 0x14a   : > { %2710 = vmatprep.subr.bf16.mxu0 %v3867_v62 }
 0x14c   : > { %3291 = vmatpush1.bf16.msra.mxu1 %v3865_v63 }
 0x14d   : > { %2711 = vmatpush1.bf16.msra.mxu0 %v3865_v63  ;;  %3276 = vmatprep.subr.bf16.mxu1 %v3870_v0 }
 0x14e   : > { %2712 = vmatprep.subr.bf16.mxu0 %v3870_v0 }
 0x150   : > { %3292 = vmatpush1.bf16.msra.mxu1 %v3868_v1 }
 0x151   : > { %2713 = vmatpush1.bf16.msra.mxu0 %v3868_v1 }
 0x153   : > { %2725 = vmatmul.mubr.bf16.vlgmr.msra.gmra.mrb[8].mxu1 %v3874_v3 }
 0x154   : > { %2715 = vmatmul.mubr.bf16.vlgmr.msra.gmra.mrb[0].mxu0 %v3871_v2 }
 0x1e6   : > { %v2451_v6 = vpop.f32.mrb[0].mxu1 }
 0x1e7   : > { %v2453_v7 = vpop.f32.mrb[1].mxu1  ;;  %v3293_v31 = vadd.f32 %v2451_v6, %v631_v13 }
 0x1e8   : > { %v2455_v8 = vpop.f32.mrb[2].mxu1  ;;  %v3295_v32 = vadd.f32 %v2453_v7, %v635_v14 }
 0x1e9   : > { %v2457_v10 = vpop.f32.mrb[3].mxu1  ;;  %v3297_v35 = vadd.f32 %v2455_v8, %v631_v13 }
 0x1ea   : > { %v3299_v40 = vadd.f32 %v2457_v10, %v635_v14 }
 0x1ee   : > { %v2461_v15 = vpop.f32.mrb[4].mxu1 }
 0x1ef   : > { %v2673_v16 = vpop.f32.mrb[4].mxu0  ;;  %v3301_v17 = vadd.f32 %v2461_v15, %v631_v13  ;;  %v2463_v18 = vpop.f32.mrb[5].mxu1 }
 0x1f0   : > { %v2675_v19 = vpop.f32.mrb[5].mxu0  ;;  %v3304_v20 = vadd.f32 %v2463_v18, %v635_v14  ;;  %v2465_v21 = vpop.f32.mrb[6].mxu1 }
 0x1f1   : > { %v2677_v22 = vpop.f32.mrb[6].mxu0  ;;  %v3302_v23 = vadd.f32 %v3301_v17, %v2673_v16  ;;  %v3307_v24 = vadd.f32 %v2465_v21, %v631_v13  ;;  %v2467_v25 = vpop.f32.mrb[7].mxu1 }
 0x1f2   : > { %v2679_v26 = vpop.f32.mrb[7].mxu0  ;;  %v3305_v27 = vadd.f32 %v3304_v20, %v2675_v19  ;;  %v3310_v28 = vadd.f32 %v2467_v25, %v635_v14 }
 0x1f3   : > { %v3308_v29 = vadd.f32 %v3307_v24, %v2677_v22 }
 0x1f4   : > { %v3311_v30 = vadd.f32 %v3310_v28, %v2679_v26 }
 0x226   : > { %v2726_v34 = vpop.f32.mrb[8].mxu1 }
 0x227   : > { %v2716_v33 = vpop.f32.mrb[0].mxu0  ;;  %v3303_v37 = vadd.f32 %v3302_v23, %v2726_v34  ;;  %v2728_v39 = vpop.f32.mrb[9].mxu1 }
 0x228   : > { %v3294_v36 = vadd.f32 %v3293_v31, %v2716_v33  ;;  %v2718_v38 = vpop.f32.mrb[1].mxu0  ;;  %v3306_v42 = vadd.f32 %v3305_v27, %v2728_v39  ;;  %v2730_v44 = vpop.f32.mrb[10].mxu1 }
 0x229   : > { %v3296_v41 = vadd.f32 %v3295_v32, %v2718_v38  ;;  %v2720_v43 = vpop.f32.mrb[2].mxu0  ;;  %v2739_v46 = vmax.f32 %v3303_v37, 0.0  ;;  %v3309_v48 = vadd.f32 %v3308_v29, %v2730_v44  ;;  %v2732_v50 = vpop.f32.mrb[11].mxu1 }
 0x22a   : > { %v2735_v45 = vmax.f32 %v3294_v36, 0.0  ;;  %v3298_v47 = vadd.f32 %v3297_v35, %v2720_v43  ;;  %v2722_v49 = vpop.f32.mrb[3].mxu0  ;;  %v2740_v52 = vmax.f32 %v3306_v42, 0.0  ;;  %v3312_v54 = vadd.f32 %v3311_v30, %v2732_v50 }
 0x22b   : > { %v2736_v51 = vmax.f32 %v3296_v41, 0.0  ;;  %v3300_v53 = vadd.f32 %v3299_v40, %v2722_v49  ;;  %v2741_v56 = vmax.f32 %v3309_v48, 0.0 }
 0x22c   : > { %v2737_v55 = vmax.f32 %v3298_v47, 0.0  ;;  %v3259_v58 = vpack.c.bf16 %v2740_v52, %v2739_v46  ;;  %v2742_v60 = vmax.f32 %v3312_v54, 0.0 }
 0x22d   : > { %v3257_v57 = vpack.c.bf16 %v2736_v51, %v2735_v45  ;;  %v2738_v59 = vmax.f32 %v3300_v53, 0.0 }
 0x22e   : > { %2769 = vst [vmem:[%s299_s4 + $0x10] sm:$0xff] %v3259_v58  ;;  %v3260_v62 = vpack.c.bf16 %v2742_v60, %v2741_v56 }
 0x22f   : > { %2767 = vst [vmem:[%s299_s4] sm:$0xff] %v3257_v57  ;;  %v3258_v61 = vpack.c.bf16 %v2738_v59, %v2737_v55 }
 0x230   : > { %2770 = vst [vmem:[%s299_s4 + $0x18] sm:$0xff] %v3260_v62 }
 0x231   : > { %2768 = vst [vmem:[%s299_s4 + $0x8] sm:$0xff] %v3258_v61 }
 0x232 PF: > { %s13_s14 = sadd.s32 1, %s3899_s14   ;;  %s4298_s12 = smov %s3895_s13 }
 0x233   : > { %p10_p5 = scmp.ge.s32.totalorder %s13_s14, 4   ;;  %s4299_s13 = smov %s4301_s15 }
 0x235   :  { %12 = sbr.rel (!%p10_p5) target bundleno = 2 (0x2), region = 68 }

// kernel: rtnet_forward.27
= control target key start
LH: loop header
LB: loop body
LE: loop exit
PB: predicated region body
PF: predicated region fallthrough
CT: control target
= control target key end

     0   :  { %s5577_s12 = smov 0   ;;  %s5579_s13 = smov 0   ;;  %s6905_s0 = inlined_call_operand.vmem [shape: bf16[32,1536], index: 0, kind: input, shape index: {}]   ;;  %s6906_s1 = inlined_call_operand.vmem [shape: bf16[1536,2048], index: 1, kind: input, shape index: {}]   ;;  %s6907_s2 = inlined_call_operand.vmem [shape: f32[1,2048], index: 2, kind: input, shape index: {}]   ;;  %s6908_s3 = inlined_call_operand.vmem [shape: bf16[32,2048], index: 3, kind: output, shape index: {}]  }
   0x1   :  { %s5581_s14 = smov 0   ;;  %s5583_s15 = smov 0  }
   0x2   :  { %s5585_s16 = smov 0  }
   0x3 LB: > { %s22_s17 = sadd.s32 1, %s5551_s15  ;;  %s4326_s18 = sadd.s32 4294967295, %s5555_s16   ;;  %s5555_s16 = sphi %s5585_s16, %s13_s16   ;;  %s5551_s15 = sphi %s5583_s15, %s6913_s15   ;;  %s5547_s14 = sphi %s5581_s14, %s6912_s14   ;;  %s5543_s13 = sphi %s5579_s13, %s6911_s13   ;;  %s5539_s12 = sphi %s5577_s12, %s6910_s12  }
   0x4   : > { %p23_p0 = scmp.ge.s32.totalorder %s22_s17, 4  ;;  %p65_p1 = scmp.ne.s32.totalorder %s5543_s13, %s5539_s12 }
   0x5   : > { %p66_p2 = scmp.eq.s32.totalorder %s5555_s16, 0  ;;  %p123_p4 = scmp.eq.s32.totalorder %s4326_s18, 3 }
   0x6   : > { %s6915_s17 = smov (%p23_p0, %s22_s17), 0  ;;  %s58_s20 = sadd.s32 1, %s5543_s13 }
   0x7   : > { %p67_p3 = por %p66_p2, %p65_p1  ;;  %s55_s19 = ssub.s32 %s5551_s15, %s6915_s17 }
   0x8   : > { %p56_p5 = scmp.eq.s32.totalorder %s55_s19, 0  ;;  %p5612_p6 = por %p123_p4, %p65_p1 }
   0x9   : > { %p4330_p7 = scmp.ge.s32.totalorder %s5555_s16, 4 }
   0xa   : > { %s5617_s22 = scalar_select %p56_p5, %s5543_s13, %s58_s20  }
   0xb   : > { %155 = sbr.rel (%p4330_p7) target bundleno = 214 (0xd6), region = 20 }
  0x12   : > { %158 = sbr.rel (!%p67_p3) target bundleno = 214 (0xd6), region = 24  ;;  %s160_s23 = sand.u32 (%p67_p3), 1, %s5543_s13  }
  0x13   : > { %s4757_s24 = sshll.u32 (%p67_p3), %s5551_s15, 4  ;;  %s4863_s25 = smul.u32 (%p67_p3), 3072, %s160_s23 }
  0x14   : > { %s5625_s28 = scalar_lea.vmem (%p67_p3), %s6906_s1, %s4757_s24 }
  0x15   : > { %v178_v0 = vld [vmem:[%s5625_s28] sm:$0xff] (%p67_p3)  ;;  %v180_v1 = vld [vmem:[%s5625_s28 + $0x8] sm:$0xff] (%p67_p3)  ;;  %s5633_s29 = scalar_lea.vmem (%p67_p3), [#allocation2], %s4863_s25 }
  0x16   : > { %v182_v2 = vld [vmem:[%s5625_s28 + $0x40] sm:$0xff] (%p67_p3)  ;;  %v184_v3 = vld [vmem:[%s5625_s28 + $0x48] sm:$0xff] (%p67_p3)  ;;  %179 = vst [vmem:[%s5633_s29] sm:$0xff] (%p67_p3), %v178_v0  ;;  %181 = vst [vmem:[%s5633_s29 + $0x8] sm:$0xff] (%p67_p3), %v180_v1 }
  0x17   : > { %v186_v4 = vld [vmem:[%s5625_s28 + $0x80] sm:$0xff] (%p67_p3)  ;;  %v188_v5 = vld [vmem:[%s5625_s28 + $0x88] sm:$0xff] (%p67_p3)  ;;  %183 = vst [vmem:[%s5633_s29 + $0x10] sm:$0xff] (%p67_p3), %v182_v2  ;;  %185 = vst [vmem:[%s5633_s29 + $0x18] sm:$0xff] (%p67_p3), %v184_v3 }
  0x18   : > { %187 = vst [vmem:[%s5633_s29 + $0x20] sm:$0xff] (%p67_p3), %v186_v4  ;;  %189 = vst [vmem:[%s5633_s29 + $0x28] sm:$0xff] (%p67_p3), %v188_v5  ;;  %v190_v6 = vld [vmem:[%s5625_s28 + $0xc0] sm:$0xff] (%p67_p3)  ;;  %v192_v7 = vld [vmem:[%s5625_s28 + $0xc8] sm:$0xff] (%p67_p3) }
  0x19   : > { %v194_v8 = vld [vmem:[%s5625_s28 + $0x100] sm:$0xff]  ;;  %191 = vst [vmem:[%s5633_s29 + $0x30] sm:$0xff] %v190_v6  ;;  %193 = vst [vmem:[%s5633_s29 + $0x38] sm:$0xff] %v192_v7  ;;  %v196_v9 = vld [vmem:[%s5625_s28 + $0x108] sm:$0xff] }
  0x1a   : > { %195 = vst [vmem:[%s5633_s29 + $0x40] sm:$0xff] %v194_v8  ;;  %v198_v10 = vld [vmem:[%s5625_s28 + $0x140] sm:$0xff]  ;;  %v200_v11 = vld [vmem:[%s5625_s28 + $0x148] sm:$0xff]  ;;  %197 = vst [vmem:[%s5633_s29 + $0x48] sm:$0xff] %v196_v9 }
  0x1b   : > { %199 = vst [vmem:[%s5633_s29 + $0x50] sm:$0xff] %v198_v10  ;;  %201 = vst [vmem:[%s5633_s29 + $0x58] sm:$0xff] %v200_v11  ;;  %v202_v12 = vld [vmem:[%s5625_s28 + $0x180] sm:$0xff]  ;;  %v204_v13 = vld [vmem:[%s5625_s28 + $0x188] sm:$0xff] }
  0x1c   : > { %v206_v14 = vld [vmem:[%s5625_s28 + $0x1c0] sm:$0xff]  ;;  %203 = vst [vmem:[%s5633_s29 + $0x60] sm:$0xff] %v202_v12  ;;  %205 = vst [vmem:[%s5633_s29 + $0x68] sm:$0xff] %v204_v13  ;;  %v208_v15 = vld [vmem:[%s5625_s28 + $0x1c8] sm:$0xff] }
  0x1d   : > { %207 = vst [vmem:[%s5633_s29 + $0x70] sm:$0xff] %v206_v14  ;;  %v210_v16 = vld [vmem:[%s5625_s28 + $0x200] sm:$0xff]  ;;  %v212_v17 = vld [vmem:[%s5625_s28 + $0x208] sm:$0xff]  ;;  %209 = vst [vmem:[%s5633_s29 + $0x78] sm:$0xff] %v208_v15 }
  0x1e   : > { %211 = vst [vmem:[%s5633_s29 + $0x80] sm:$0xff] %v210_v16  ;;  %213 = vst [vmem:[%s5633_s29 + $0x88] sm:$0xff] %v212_v17  ;;  %v214_v18 = vld [vmem:[%s5625_s28 + $0x240] sm:$0xff]  ;;  %v216_v19 = vld [vmem:[%s5625_s28 + $0x248] sm:$0xff] }
  0x1f   : > { %v218_v20 = vld [vmem:[%s5625_s28 + $0x280] sm:$0xff]  ;;  %215 = vst [vmem:[%s5633_s29 + $0x90] sm:$0xff] %v214_v18  ;;  %217 = vst [vmem:[%s5633_s29 + $0x98] sm:$0xff] %v216_v19  ;;  %v220_v21 = vld [vmem:[%s5625_s28 + $0x288] sm:$0xff] }
  0x20   : > { %219 = vst [vmem:[%s5633_s29 + $0xa0] sm:$0xff] %v218_v20  ;;  %v222_v22 = vld [vmem:[%s5625_s28 + $0x2c0] sm:$0xff]  ;;  %v224_v23 = vld [vmem:[%s5625_s28 + $0x2c8] sm:$0xff]  ;;  %221 = vst [vmem:[%s5633_s29 + $0xa8] sm:$0xff] %v220_v21 }
  0x21   : > { %223 = vst [vmem:[%s5633_s29 + $0xb0] sm:$0xff] %v222_v22  ;;  %225 = vst [vmem:[%s5633_s29 + $0xb8] sm:$0xff] %v224_v23  ;;  %v226_v24 = vld [vmem:[%s5625_s28 + $0x300] sm:$0xff]  ;;  %v228_v25 = vld [vmem:[%s5625_s28 + $0x308] sm:$0xff] }
  0x22   : > { %v230_v26 = vld [vmem:[%s5625_s28 + $0x340] sm:$0xff]  ;;  %227 = vst [vmem:[%s5633_s29 + $0xc0] sm:$0xff] %v226_v24  ;;  %229 = vst [vmem:[%s5633_s29 + $0xc8] sm:$0xff] %v228_v25  ;;  %v232_v27 = vld [vmem:[%s5625_s28 + $0x348] sm:$0xff] }
  0x23   : > { %231 = vst [vmem:[%s5633_s29 + $0xd0] sm:$0xff] %v230_v26  ;;  %v234_v28 = vld [vmem:[%s5625_s28 + $0x380] sm:$0xff]  ;;  %v236_v29 = vld [vmem:[%s5625_s28 + $0x388] sm:$0xff]  ;;  %233 = vst [vmem:[%s5633_s29 + $0xd8] sm:$0xff] %v232_v27 }
  0x24   : > { %235 = vst [vmem:[%s5633_s29 + $0xe0] sm:$0xff] %v234_v28  ;;  %237 = vst [vmem:[%s5633_s29 + $0xe8] sm:$0xff] %v236_v29  ;;  %v238_v30 = vld [vmem:[%s5625_s28 + $0x3c0] sm:$0xff]  ;;  %v240_v31 = vld [vmem:[%s5625_s28 + $0x3c8] sm:$0xff] }
  0x25   : > { %v242_v32 = vld [vmem:[%s5625_s28 + $0x400] sm:$0xff]  ;;  %239 = vst [vmem:[%s5633_s29 + $0xf0] sm:$0xff] %v238_v30  ;;  %241 = vst [vmem:[%s5633_s29 + $0xf8] sm:$0xff] %v240_v31  ;;  %v244_v33 = vld [vmem:[%s5625_s28 + $0x408] sm:$0xff] }
  0x26   : > { %243 = vst [vmem:[%s5633_s29 + $0x100] sm:$0xff] %v242_v32  ;;  %v246_v34 = vld [vmem:[%s5625_s28 + $0x440] sm:$0xff]  ;;  %v248_v35 = vld [vmem:[%s5625_s28 + $0x448] sm:$0xff]  ;;  %245 = vst [vmem:[%s5633_s29 + $0x108] sm:$0xff] %v244_v33 }
  0x27   : > { %247 = vst [vmem:[%s5633_s29 + $0x110] sm:$0xff] %v246_v34  ;;  %249 = vst [vmem:[%s5633_s29 + $0x118] sm:$0xff] %v248_v35  ;;  %v250_v36 = vld [vmem:[%s5625_s28 + $0x480] sm:$0xff]  ;;  %v252_v37 = vld [vmem:[%s5625_s28 + $0x488] sm:$0xff] }
  0x28   : > { %v254_v38 = vld [vmem:[%s5625_s28 + $0x4c0] sm:$0xff]  ;;  %251 = vst [vmem:[%s5633_s29 + $0x120] sm:$0xff] %v250_v36  ;;  %253 = vst [vmem:[%s5633_s29 + $0x128] sm:$0xff] %v252_v37  ;;  %v256_v39 = vld [vmem:[%s5625_s28 + $0x4c8] sm:$0xff] }
  0x29   : > { %255 = vst [vmem:[%s5633_s29 + $0x130] sm:$0xff] %v254_v38  ;;  %v258_v40 = vld [vmem:[%s5625_s28 + $0x500] sm:$0xff]  ;;  %v260_v41 = vld [vmem:[%s5625_s28 + $0x508] sm:$0xff]  ;;  %257 = vst [vmem:[%s5633_s29 + $0x138] sm:$0xff] %v256_v39 }
  0x2a   : > { %259 = vst [vmem:[%s5633_s29 + $0x140] sm:$0xff] %v258_v40  ;;  %261 = vst [vmem:[%s5633_s29 + $0x148] sm:$0xff] %v260_v41  ;;  %v262_v42 = vld [vmem:[%s5625_s28 + $0x540] sm:$0xff]  ;;  %v264_v43 = vld [vmem:[%s5625_s28 + $0x548] sm:$0xff] }
  0x2b   : > { %v266_v44 = vld [vmem:[%s5625_s28 + $0x580] sm:$0xff]  ;;  %263 = vst [vmem:[%s5633_s29 + $0x150] sm:$0xff] %v262_v42  ;;  %265 = vst [vmem:[%s5633_s29 + $0x158] sm:$0xff] %v264_v43  ;;  %v268_v45 = vld [vmem:[%s5625_s28 + $0x588] sm:$0xff] }
  0x2c   : > { %267 = vst [vmem:[%s5633_s29 + $0x160] sm:$0xff] %v266_v44  ;;  %v270_v46 = vld [vmem:[%s5625_s28 + $0x5c0] sm:$0xff]  ;;  %v272_v47 = vld [vmem:[%s5625_s28 + $0x5c8] sm:$0xff]  ;;  %269 = vst [vmem:[%s5633_s29 + $0x168] sm:$0xff] %v268_v45 }
  0x2d   : > { %271 = vst [vmem:[%s5633_s29 + $0x170] sm:$0xff] %v270_v46  ;;  %273 = vst [vmem:[%s5633_s29 + $0x178] sm:$0xff] %v272_v47  ;;  %v274_v48 = vld [vmem:[%s5625_s28 + $0x600] sm:$0xff]  ;;  %v276_v49 = vld [vmem:[%s5625_s28 + $0x608] sm:$0xff] }
  0x2e   : > { %v278_v50 = vld [vmem:[%s5625_s28 + $0x640] sm:$0xff]  ;;  %275 = vst [vmem:[%s5633_s29 + $0x180] sm:$0xff] %v274_v48  ;;  %277 = vst [vmem:[%s5633_s29 + $0x188] sm:$0xff] %v276_v49  ;;  %v280_v51 = vld [vmem:[%s5625_s28 + $0x648] sm:$0xff] }
  0x2f   : > { %279 = vst [vmem:[%s5633_s29 + $0x190] sm:$0xff] %v278_v50  ;;  %v282_v52 = vld [vmem:[%s5625_s28 + $0x680] sm:$0xff]  ;;  %v284_v53 = vld [vmem:[%s5625_s28 + $0x688] sm:$0xff]  ;;  %281 = vst [vmem:[%s5633_s29 + $0x198] sm:$0xff] %v280_v51 }
  0x30   : > { %283 = vst [vmem:[%s5633_s29 + $0x1a0] sm:$0xff] %v282_v52  ;;  %285 = vst [vmem:[%s5633_s29 + $0x1a8] sm:$0xff] %v284_v53  ;;  %v286_v54 = vld [vmem:[%s5625_s28 + $0x6c0] sm:$0xff]  ;;  %v288_v55 = vld [vmem:[%s5625_s28 + $0x6c8] sm:$0xff] }
  0x31   : > { %v290_v56 = vld [vmem:[%s5625_s28 + $0x700] sm:$0xff]  ;;  %287 = vst [vmem:[%s5633_s29 + $0x1b0] sm:$0xff] %v286_v54  ;;  %289 = vst [vmem:[%s5633_s29 + $0x1b8] sm:$0xff] %v288_v55  ;;  %v292_v57 = vld [vmem:[%s5625_s28 + $0x708] sm:$0xff] }
  0x32   : > { %291 = vst [vmem:[%s5633_s29 + $0x1c0] sm:$0xff] %v290_v56  ;;  %v294_v58 = vld [vmem:[%s5625_s28 + $0x740] sm:$0xff]  ;;  %v296_v59 = vld [vmem:[%s5625_s28 + $0x748] sm:$0xff]  ;;  %293 = vst [vmem:[%s5633_s29 + $0x1c8] sm:$0xff] %v292_v57 }
  0x33   : > { %295 = vst [vmem:[%s5633_s29 + $0x1d0] sm:$0xff] %v294_v58  ;;  %297 = vst [vmem:[%s5633_s29 + $0x1d8] sm:$0xff] %v296_v59  ;;  %v298_v60 = vld [vmem:[%s5625_s28 + $0x780] sm:$0xff]  ;;  %v300_v61 = vld [vmem:[%s5625_s28 + $0x788] sm:$0xff] }
  0x34   : > { %v302_v62 = vld [vmem:[%s5625_s28 + $0x7c0] sm:$0xff]  ;;  %299 = vst [vmem:[%s5633_s29 + $0x1e0] sm:$0xff] %v298_v60  ;;  %301 = vst [vmem:[%s5633_s29 + $0x1e8] sm:$0xff] %v300_v61  ;;  %v304_v63 = vld [vmem:[%s5625_s28 + $0x7c8] sm:$0xff] }
  0x35   : > { %303 = vst [vmem:[%s5633_s29 + $0x1f0] sm:$0xff] %v302_v62  ;;  %v306_v0 = vld [vmem:[%s5625_s28 + $0x800] sm:$0xff]  ;;  %v308_v1 = vld [vmem:[%s5625_s28 + $0x808] sm:$0xff]  ;;  %305 = vst [vmem:[%s5633_s29 + $0x1f8] sm:$0xff] %v304_v63 }
  0x36   : > { %307 = vst [vmem:[%s5633_s29 + $0x200] sm:$0xff] %v306_v0  ;;  %309 = vst [vmem:[%s5633_s29 + $0x208] sm:$0xff] %v308_v1  ;;  %v310_v2 = vld [vmem:[%s5625_s28 + $0x840] sm:$0xff]  ;;  %v312_v3 = vld [vmem:[%s5625_s28 + $0x848] sm:$0xff] }
  0x37   : > { %v314_v4 = vld [vmem:[%s5625_s28 + $0x880] sm:$0xff]  ;;  %311 = vst [vmem:[%s5633_s29 + $0x210] sm:$0xff] %v310_v2  ;;  %313 = vst [vmem:[%s5633_s29 + $0x218] sm:$0xff] %v312_v3  ;;  %v316_v5 = vld [vmem:[%s5625_s28 + $0x888] sm:$0xff] }
  0x38   : > { %315 = vst [vmem:[%s5633_s29 + $0x220] sm:$0xff] %v314_v4  ;;  %v318_v6 = vld [vmem:[%s5625_s28 + $0x8c0] sm:$0xff]  ;;  %v320_v7 = vld [vmem:[%s5625_s28 + $0x8c8] sm:$0xff]  ;;  %317 = vst [vmem:[%s5633_s29 + $0x228] sm:$0xff] %v316_v5 }
  0x39   : > { %319 = vst [vmem:[%s5633_s29 + $0x230] sm:$0xff] %v318_v6  ;;  %321 = vst [vmem:[%s5633_s29 + $0x238] sm:$0xff] %v320_v7  ;;  %v322_v8 = vld [vmem:[%s5625_s28 + $0x900] sm:$0xff]  ;;  %v324_v9 = vld [vmem:[%s5625_s28 + $0x908] sm:$0xff] }
  0x3a   : > { %v326_v10 = vld [vmem:[%s5625_s28 + $0x940] sm:$0xff]  ;;  %323 = vst [vmem:[%s5633_s29 + $0x240] sm:$0xff] %v322_v8  ;;  %325 = vst [vmem:[%s5633_s29 + $0x248] sm:$0xff] %v324_v9  ;;  %v328_v11 = vld [vmem:[%s5625_s28 + $0x948] sm:$0xff] }
  0x3b   : > { %327 = vst [vmem:[%s5633_s29 + $0x250] sm:$0xff] %v326_v10  ;;  %v330_v12 = vld [vmem:[%s5625_s28 + $0x980] sm:$0xff]  ;;  %v332_v13 = vld [vmem:[%s5625_s28 + $0x988] sm:$0xff]  ;;  %329 = vst [vmem:[%s5633_s29 + $0x258] sm:$0xff] %v328_v11 }
  0x3c   : > { %331 = vst [vmem:[%s5633_s29 + $0x260] sm:$0xff] %v330_v12  ;;  %333 = vst [vmem:[%s5633_s29 + $0x268] sm:$0xff] %v332_v13  ;;  %v334_v14 = vld [vmem:[%s5625_s28 + $0x9c0] sm:$0xff]  ;;  %v336_v15 = vld [vmem:[%s5625_s28 + $0x9c8] sm:$0xff] }
  0x3d   : > { %v338_v16 = vld [vmem:[%s5625_s28 + $0xa00] sm:$0xff]  ;;  %335 = vst [vmem:[%s5633_s29 + $0x270] sm:$0xff] %v334_v14  ;;  %337 = vst [vmem:[%s5633_s29 + $0x278] sm:$0xff] %v336_v15  ;;  %v340_v17 = vld [vmem:[%s5625_s28 + $0xa08] sm:$0xff] }
  0x3e   : > { %339 = vst [vmem:[%s5633_s29 + $0x280] sm:$0xff] %v338_v16  ;;  %v342_v18 = vld [vmem:[%s5625_s28 + $0xa40] sm:$0xff]  ;;  %v344_v19 = vld [vmem:[%s5625_s28 + $0xa48] sm:$0xff]  ;;  %341 = vst [vmem:[%s5633_s29 + $0x288] sm:$0xff] %v340_v17 }
  0x3f   : > { %343 = vst [vmem:[%s5633_s29 + $0x290] sm:$0xff] %v342_v18  ;;  %345 = vst [vmem:[%s5633_s29 + $0x298] sm:$0xff] %v344_v19  ;;  %v346_v20 = vld [vmem:[%s5625_s28 + $0xa80] sm:$0xff]  ;;  %v348_v21 = vld [vmem:[%s5625_s28 + $0xa88] sm:$0xff] }
  0x40   : > { %v350_v22 = vld [vmem:[%s5625_s28 + $0xac0] sm:$0xff]  ;;  %347 = vst [vmem:[%s5633_s29 + $0x2a0] sm:$0xff] %v346_v20  ;;  %349 = vst [vmem:[%s5633_s29 + $0x2a8] sm:$0xff] %v348_v21  ;;  %v352_v23 = vld [vmem:[%s5625_s28 + $0xac8] sm:$0xff] }
  0x41   : > { %351 = vst [vmem:[%s5633_s29 + $0x2b0] sm:$0xff] %v350_v22  ;;  %v354_v24 = vld [vmem:[%s5625_s28 + $0xb00] sm:$0xff]  ;;  %v356_v25 = vld [vmem:[%s5625_s28 + $0xb08] sm:$0xff]  ;;  %353 = vst [vmem:[%s5633_s29 + $0x2b8] sm:$0xff] %v352_v23 }
  0x42   : > { %355 = vst [vmem:[%s5633_s29 + $0x2c0] sm:$0xff] %v354_v24  ;;  %357 = vst [vmem:[%s5633_s29 + $0x2c8] sm:$0xff] %v356_v25  ;;  %v358_v26 = vld [vmem:[%s5625_s28 + $0xb40] sm:$0xff]  ;;  %v360_v27 = vld [vmem:[%s5625_s28 + $0xb48] sm:$0xff] }
  0x43   : > { %v362_v28 = vld [vmem:[%s5625_s28 + $0xb80] sm:$0xff]  ;;  %359 = vst [vmem:[%s5633_s29 + $0x2d0] sm:$0xff] %v358_v26  ;;  %361 = vst [vmem:[%s5633_s29 + $0x2d8] sm:$0xff] %v360_v27  ;;  %v364_v29 = vld [vmem:[%s5625_s28 + $0xb88] sm:$0xff] }
  0x44   : > { %363 = vst [vmem:[%s5633_s29 + $0x2e0] sm:$0xff] %v362_v28  ;;  %v366_v30 = vld [vmem:[%s5625_s28 + $0xbc0] sm:$0xff]  ;;  %v368_v31 = vld [vmem:[%s5625_s28 + $0xbc8] sm:$0xff]  ;;  %365 = vst [vmem:[%s5633_s29 + $0x2e8] sm:$0xff] %v364_v29 }
  0x45   : > { %367 = vst [vmem:[%s5633_s29 + $0x2f0] sm:$0xff] %v366_v30  ;;  %369 = vst [vmem:[%s5633_s29 + $0x2f8] sm:$0xff] %v368_v31  ;;  %v370_v32 = vld [vmem:[%s5625_s28 + $0xc00] sm:$0xff]  ;;  %v372_v33 = vld [vmem:[%s5625_s28 + $0xc08] sm:$0xff] }
  0x46   : > { %v374_v34 = vld [vmem:[%s5625_s28 + $0xc40] sm:$0xff]  ;;  %371 = vst [vmem:[%s5633_s29 + $0x300] sm:$0xff] %v370_v32  ;;  %373 = vst [vmem:[%s5633_s29 + $0x308] sm:$0xff] %v372_v33  ;;  %v376_v35 = vld [vmem:[%s5625_s28 + $0xc48] sm:$0xff] }
  0x47   : > { %375 = vst [vmem:[%s5633_s29 + $0x310] sm:$0xff] %v374_v34  ;;  %v378_v36 = vld [vmem:[%s5625_s28 + $0xc80] sm:$0xff]  ;;  %v380_v37 = vld [vmem:[%s5625_s28 + $0xc88] sm:$0xff]  ;;  %377 = vst [vmem:[%s5633_s29 + $0x318] sm:$0xff] %v376_v35 }
  0x48   : > { %379 = vst [vmem:[%s5633_s29 + $0x320] sm:$0xff] %v378_v36  ;;  %381 = vst [vmem:[%s5633_s29 + $0x328] sm:$0xff] %v380_v37  ;;  %v382_v38 = vld [vmem:[%s5625_s28 + $0xcc0] sm:$0xff]  ;;  %v384_v39 = vld [vmem:[%s5625_s28 + $0xcc8] sm:$0xff] }
  0x49   : > { %v386_v40 = vld [vmem:[%s5625_s28 + $0xd00] sm:$0xff]  ;;  %383 = vst [vmem:[%s5633_s29 + $0x330] sm:$0xff] %v382_v38  ;;  %385 = vst [vmem:[%s5633_s29 + $0x338] sm:$0xff] %v384_v39  ;;  %v388_v41 = vld [vmem:[%s5625_s28 + $0xd08] sm:$0xff] }
  0x4a   : > { %387 = vst [vmem:[%s5633_s29 + $0x340] sm:$0xff] %v386_v40  ;;  %v390_v42 = vld [vmem:[%s5625_s28 + $0xd40] sm:$0xff]  ;;  %v392_v43 = vld [vmem:[%s5625_s28 + $0xd48] sm:$0xff]  ;;  %389 = vst [vmem:[%s5633_s29 + $0x348] sm:$0xff] %v388_v41 }
  0x4b   : > { %391 = vst [vmem:[%s5633_s29 + $0x350] sm:$0xff] %v390_v42  ;;  %393 = vst [vmem:[%s5633_s29 + $0x358] sm:$0xff] %v392_v43  ;;  %v394_v44 = vld [vmem:[%s5625_s28 + $0xd80] sm:$0xff]  ;;  %v396_v45 = vld [vmem:[%s5625_s28 + $0xd88] sm:$0xff] }
  0x4c   : > { %v398_v46 = vld [vmem:[%s5625_s28 + $0xdc0] sm:$0xff]  ;;  %395 = vst [vmem:[%s5633_s29 + $0x360] sm:$0xff] %v394_v44  ;;  %397 = vst [vmem:[%s5633_s29 + $0x368] sm:$0xff] %v396_v45  ;;  %v400_v47 = vld [vmem:[%s5625_s28 + $0xdc8] sm:$0xff] }
  0x4d   : > { %399 = vst [vmem:[%s5633_s29 + $0x370] sm:$0xff] %v398_v46  ;;  %v402_v48 = vld [vmem:[%s5625_s28 + $0xe00] sm:$0xff]  ;;  %v404_v49 = vld [vmem:[%s5625_s28 + $0xe08] sm:$0xff]  ;;  %401 = vst [vmem:[%s5633_s29 + $0x378] sm:$0xff] %v400_v47 }
  0x4e   : > { %403 = vst [vmem:[%s5633_s29 + $0x380] sm:$0xff] %v402_v48  ;;  %405 = vst [vmem:[%s5633_s29 + $0x388] sm:$0xff] %v404_v49  ;;  %v406_v50 = vld [vmem:[%s5625_s28 + $0xe40] sm:$0xff]  ;;  %v408_v51 = vld [vmem:[%s5625_s28 + $0xe48] sm:$0xff] }
  0x4f   : > { %v410_v52 = vld [vmem:[%s5625_s28 + $0xe80] sm:$0xff]  ;;  %407 = vst [vmem:[%s5633_s29 + $0x390] sm:$0xff] %v406_v50  ;;  %409 = vst [vmem:[%s5633_s29 + $0x398] sm:$0xff] %v408_v51  ;;  %v412_v53 = vld [vmem:[%s5625_s28 + $0xe88] sm:$0xff] }
  0x50   : > { %411 = vst [vmem:[%s5633_s29 + $0x3a0] sm:$0xff] %v410_v52  ;;  %v414_v54 = vld [vmem:[%s5625_s28 + $0xec0] sm:$0xff]  ;;  %v416_v55 = vld [vmem:[%s5625_s28 + $0xec8] sm:$0xff]  ;;  %413 = vst [vmem:[%s5633_s29 + $0x3a8] sm:$0xff] %v412_v53 }
  0x51   : > { %415 = vst [vmem:[%s5633_s29 + $0x3b0] sm:$0xff] %v414_v54  ;;  %417 = vst [vmem:[%s5633_s29 + $0x3b8] sm:$0xff] %v416_v55  ;;  %v418_v56 = vld [vmem:[%s5625_s28 + $0xf00] sm:$0xff]  ;;  %v420_v57 = vld [vmem:[%s5625_s28 + $0xf08] sm:$0xff] }
  0x52   : > { %v422_v58 = vld [vmem:[%s5625_s28 + $0xf40] sm:$0xff]  ;;  %419 = vst [vmem:[%s5633_s29 + $0x3c0] sm:$0xff] %v418_v56  ;;  %421 = vst [vmem:[%s5633_s29 + $0x3c8] sm:$0xff] %v420_v57  ;;  %v424_v59 = vld [vmem:[%s5625_s28 + $0xf48] sm:$0xff] }
  0x53   : > { %423 = vst [vmem:[%s5633_s29 + $0x3d0] sm:$0xff] %v422_v58  ;;  %v426_v60 = vld [vmem:[%s5625_s28 + $0xf80] sm:$0xff]  ;;  %v428_v61 = vld [vmem:[%s5625_s28 + $0xf88] sm:$0xff]  ;;  %425 = vst [vmem:[%s5633_s29 + $0x3d8] sm:$0xff] %v424_v59 }
  0x54   : > { %427 = vst [vmem:[%s5633_s29 + $0x3e0] sm:$0xff] %v426_v60  ;;  %429 = vst [vmem:[%s5633_s29 + $0x3e8] sm:$0xff] %v428_v61  ;;  %v430_v62 = vld [vmem:[%s5625_s28 + $0xfc0] sm:$0xff]  ;;  %v432_v63 = vld [vmem:[%s5625_s28 + $0xfc8] sm:$0xff] }
  0x55   : > { %v434_v0 = vld [vmem:[%s5625_s28 + $0x1000] sm:$0xff]  ;;  %431 = vst [vmem:[%s5633_s29 + $0x3f0] sm:$0xff] %v430_v62  ;;  %433 = vst [vmem:[%s5633_s29 + $0x3f8] sm:$0xff] %v432_v63  ;;  %v436_v1 = vld [vmem:[%s5625_s28 + $0x1008] sm:$0xff] }
  0x56   : > { %435 = vst [vmem:[%s5633_s29 + $0x400] sm:$0xff] %v434_v0  ;;  %v438_v2 = vld [vmem:[%s5625_s28 + $0x1040] sm:$0xff]  ;;  %v440_v3 = vld [vmem:[%s5625_s28 + $0x1048] sm:$0xff]  ;;  %437 = vst [vmem:[%s5633_s29 + $0x408] sm:$0xff] %v436_v1 }
  0x57   : > { %439 = vst [vmem:[%s5633_s29 + $0x410] sm:$0xff] %v438_v2  ;;  %441 = vst [vmem:[%s5633_s29 + $0x418] sm:$0xff] %v440_v3  ;;  %v442_v4 = vld [vmem:[%s5625_s28 + $0x1080] sm:$0xff]  ;;  %v444_v5 = vld [vmem:[%s5625_s28 + $0x1088] sm:$0xff] }
  0x58   : > { %v446_v6 = vld [vmem:[%s5625_s28 + $0x10c0] sm:$0xff]  ;;  %443 = vst [vmem:[%s5633_s29 + $0x420] sm:$0xff] %v442_v4  ;;  %445 = vst [vmem:[%s5633_s29 + $0x428] sm:$0xff] %v444_v5  ;;  %v448_v7 = vld [vmem:[%s5625_s28 + $0x10c8] sm:$0xff] }
  0x59   : > { %447 = vst [vmem:[%s5633_s29 + $0x430] sm:$0xff] %v446_v6  ;;  %v450_v8 = vld [vmem:[%s5625_s28 + $0x1100] sm:$0xff]  ;;  %v452_v9 = vld [vmem:[%s5625_s28 + $0x1108] sm:$0xff]  ;;  %449 = vst [vmem:[%s5633_s29 + $0x438] sm:$0xff] %v448_v7 }
  0x5a   : > { %451 = vst [vmem:[%s5633_s29 + $0x440] sm:$0xff] %v450_v8  ;;  %453 = vst [vmem:[%s5633_s29 + $0x448] sm:$0xff] %v452_v9  ;;  %v454_v10 = vld [vmem:[%s5625_s28 + $0x1140] sm:$0xff]  ;;  %v456_v11 = vld [vmem:[%s5625_s28 + $0x1148] sm:$0xff] }
  0x5b   : > { %v458_v12 = vld [vmem:[%s5625_s28 + $0x1180] sm:$0xff]  ;;  %455 = vst [vmem:[%s5633_s29 + $0x450] sm:$0xff] %v454_v10  ;;  %457 = vst [vmem:[%s5633_s29 + $0x458] sm:$0xff] %v456_v11  ;;  %v460_v13 = vld [vmem:[%s5625_s28 + $0x1188] sm:$0xff] }
  0x5c   : > { %459 = vst [vmem:[%s5633_s29 + $0x460] sm:$0xff] %v458_v12  ;;  %v462_v14 = vld [vmem:[%s5625_s28 + $0x11c0] sm:$0xff]  ;;  %v464_v15 = vld [vmem:[%s5625_s28 + $0x11c8] sm:$0xff]  ;;  %461 = vst [vmem:[%s5633_s29 + $0x468] sm:$0xff] %v460_v13 }
  0x5d   : > { %463 = vst [vmem:[%s5633_s29 + $0x470] sm:$0xff] %v462_v14  ;;  %465 = vst [vmem:[%s5633_s29 + $0x478] sm:$0xff] %v464_v15  ;;  %v466_v16 = vld [vmem:[%s5625_s28 + $0x1200] sm:$0xff]  ;;  %v468_v17 = vld [vmem:[%s5625_s28 + $0x1208] sm:$0xff] }
  0x5e   : > { %v470_v18 = vld [vmem:[%s5625_s28 + $0x1240] sm:$0xff]  ;;  %467 = vst [vmem:[%s5633_s29 + $0x480] sm:$0xff] %v466_v16  ;;  %469 = vst [vmem:[%s5633_s29 + $0x488] sm:$0xff] %v468_v17  ;;  %v472_v19 = vld [vmem:[%s5625_s28 + $0x1248] sm:$0xff] }
  0x5f   : > { %471 = vst [vmem:[%s5633_s29 + $0x490] sm:$0xff] %v470_v18  ;;  %v474_v20 = vld [vmem:[%s5625_s28 + $0x1280] sm:$0xff]  ;;  %v476_v21 = vld [vmem:[%s5625_s28 + $0x1288] sm:$0xff]  ;;  %473 = vst [vmem:[%s5633_s29 + $0x498] sm:$0xff] %v472_v19 }
  0x60   : > { %475 = vst [vmem:[%s5633_s29 + $0x4a0] sm:$0xff] %v474_v20  ;;  %477 = vst [vmem:[%s5633_s29 + $0x4a8] sm:$0xff] %v476_v21  ;;  %v478_v22 = vld [vmem:[%s5625_s28 + $0x12c0] sm:$0xff]  ;;  %v480_v23 = vld [vmem:[%s5625_s28 + $0x12c8] sm:$0xff] }
  0x61   : > { %v482_v24 = vld [vmem:[%s5625_s28 + $0x1300] sm:$0xff]  ;;  %479 = vst [vmem:[%s5633_s29 + $0x4b0] sm:$0xff] %v478_v22  ;;  %481 = vst [vmem:[%s5633_s29 + $0x4b8] sm:$0xff] %v480_v23  ;;  %v484_v25 = vld [vmem:[%s5625_s28 + $0x1308] sm:$0xff] }
  0x62   : > { %483 = vst [vmem:[%s5633_s29 + $0x4c0] sm:$0xff] %v482_v24  ;;  %v486_v26 = vld [vmem:[%s5625_s28 + $0x1340] sm:$0xff]  ;;  %v488_v27 = vld [vmem:[%s5625_s28 + $0x1348] sm:$0xff]  ;;  %485 = vst [vmem:[%s5633_s29 + $0x4c8] sm:$0xff] %v484_v25 }
  0x63   : > { %487 = vst [vmem:[%s5633_s29 + $0x4d0] sm:$0xff] %v486_v26  ;;  %489 = vst [vmem:[%s5633_s29 + $0x4d8] sm:$0xff] %v488_v27  ;;  %v490_v28 = vld [vmem:[%s5625_s28 + $0x1380] sm:$0xff]  ;;  %v492_v29 = vld [vmem:[%s5625_s28 + $0x1388] sm:$0xff] }
  0x64   : > { %v494_v30 = vld [vmem:[%s5625_s28 + $0x13c0] sm:$0xff]  ;;  %491 = vst [vmem:[%s5633_s29 + $0x4e0] sm:$0xff] %v490_v28  ;;  %493 = vst [vmem:[%s5633_s29 + $0x4e8] sm:$0xff] %v492_v29  ;;  %v496_v31 = vld [vmem:[%s5625_s28 + $0x13c8] sm:$0xff] }
  0x65   : > { %495 = vst [vmem:[%s5633_s29 + $0x4f0] sm:$0xff] %v494_v30  ;;  %v498_v32 = vld [vmem:[%s5625_s28 + $0x1400] sm:$0xff]  ;;  %v500_v33 = vld [vmem:[%s5625_s28 + $0x1408] sm:$0xff]  ;;  %497 = vst [vmem:[%s5633_s29 + $0x4f8] sm:$0xff] %v496_v31 }
  0x66   : > { %499 = vst [vmem:[%s5633_s29 + $0x500] sm:$0xff] %v498_v32  ;;  %501 = vst [vmem:[%s5633_s29 + $0x508] sm:$0xff] %v500_v33  ;;  %v502_v34 = vld [vmem:[%s5625_s28 + $0x1440] sm:$0xff]  ;;  %v504_v35 = vld [vmem:[%s5625_s28 + $0x1448] sm:$0xff] }
  0x67   : > { %v506_v36 = vld [vmem:[%s5625_s28 + $0x1480] sm:$0xff]  ;;  %503 = vst [vmem:[%s5633_s29 + $0x510] sm:$0xff] %v502_v34  ;;  %505 = vst [vmem:[%s5633_s29 + $0x518] sm:$0xff] %v504_v35  ;;  %v508_v37 = vld [vmem:[%s5625_s28 + $0x1488] sm:$0xff] }
  0x68   : > { %507 = vst [vmem:[%s5633_s29 + $0x520] sm:$0xff] %v506_v36  ;;  %v510_v38 = vld [vmem:[%s5625_s28 + $0x14c0] sm:$0xff]  ;;  %v512_v39 = vld [vmem:[%s5625_s28 + $0x14c8] sm:$0xff]  ;;  %509 = vst [vmem:[%s5633_s29 + $0x528] sm:$0xff] %v508_v37 }
  0x69   : > { %511 = vst [vmem:[%s5633_s29 + $0x530] sm:$0xff] %v510_v38  ;;  %513 = vst [vmem:[%s5633_s29 + $0x538] sm:$0xff] %v512_v39  ;;  %v514_v40 = vld [vmem:[%s5625_s28 + $0x1500] sm:$0xff]  ;;  %v516_v41 = vld [vmem:[%s5625_s28 + $0x1508] sm:$0xff] }
  0x6a   : > { %v518_v42 = vld [vmem:[%s5625_s28 + $0x1540] sm:$0xff]  ;;  %515 = vst [vmem:[%s5633_s29 + $0x540] sm:$0xff] %v514_v40  ;;  %517 = vst [vmem:[%s5633_s29 + $0x548] sm:$0xff] %v516_v41  ;;  %v520_v43 = vld [vmem:[%s5625_s28 + $0x1548] sm:$0xff] }
  0x6b   : > { %519 = vst [vmem:[%s5633_s29 + $0x550] sm:$0xff] %v518_v42  ;;  %v522_v44 = vld [vmem:[%s5625_s28 + $0x1580] sm:$0xff]  ;;  %v524_v45 = vld [vmem:[%s5625_s28 + $0x1588] sm:$0xff]  ;;  %521 = vst [vmem:[%s5633_s29 + $0x558] sm:$0xff] %v520_v43 }
  0x6c   : > { %523 = vst [vmem:[%s5633_s29 + $0x560] sm:$0xff] %v522_v44  ;;  %525 = vst [vmem:[%s5633_s29 + $0x568] sm:$0xff] %v524_v45  ;;  %v526_v46 = vld [vmem:[%s5625_s28 + $0x15c0] sm:$0xff]  ;;  %v528_v47 = vld [vmem:[%s5625_s28 + $0x15c8] sm:$0xff] }
  0x6d   : > { %v530_v48 = vld [vmem:[%s5625_s28 + $0x1600] sm:$0xff]  ;;  %527 = vst [vmem:[%s5633_s29 + $0x570] sm:$0xff] %v526_v46  ;;  %529 = vst [vmem:[%s5633_s29 + $0x578] sm:$0xff] %v528_v47  ;;  %v532_v49 = vld [vmem:[%s5625_s28 + $0x1608] sm:$0xff] }
  0x6e   : > { %531 = vst [vmem:[%s5633_s29 + $0x580] sm:$0xff] %v530_v48  ;;  %v534_v50 = vld [vmem:[%s5625_s28 + $0x1640] sm:$0xff]  ;;  %v536_v51 = vld [vmem:[%s5625_s28 + $0x1648] sm:$0xff]  ;;  %533 = vst [vmem:[%s5633_s29 + $0x588] sm:$0xff] %v532_v49 }
  0x6f   : > { %535 = vst [vmem:[%s5633_s29 + $0x590] sm:$0xff] %v534_v50  ;;  %537 = vst [vmem:[%s5633_s29 + $0x598] sm:$0xff] %v536_v51  ;;  %v538_v52 = vld [vmem:[%s5625_s28 + $0x1680] sm:$0xff]  ;;  %v540_v53 = vld [vmem:[%s5625_s28 + $0x1688] sm:$0xff] }
  0x70   : > { %v542_v54 = vld [vmem:[%s5625_s28 + $0x16c0] sm:$0xff]  ;;  %539 = vst [vmem:[%s5633_s29 + $0x5a0] sm:$0xff] %v538_v52  ;;  %541 = vst [vmem:[%s5633_s29 + $0x5a8] sm:$0xff] %v540_v53  ;;  %v544_v55 = vld [vmem:[%s5625_s28 + $0x16c8] sm:$0xff] }
  0x71   : > { %543 = vst [vmem:[%s5633_s29 + $0x5b0] sm:$0xff] %v542_v54  ;;  %v546_v56 = vld [vmem:[%s5625_s28 + $0x1700] sm:$0xff]  ;;  %v548_v57 = vld [vmem:[%s5625_s28 + $0x1708] sm:$0xff]  ;;  %545 = vst [vmem:[%s5633_s29 + $0x5b8] sm:$0xff] %v544_v55 }
  0x72   : > { %547 = vst [vmem:[%s5633_s29 + $0x5c0] sm:$0xff] %v546_v56  ;;  %549 = vst [vmem:[%s5633_s29 + $0x5c8] sm:$0xff] %v548_v57  ;;  %v550_v58 = vld [vmem:[%s5625_s28 + $0x1740] sm:$0xff]  ;;  %v552_v59 = vld [vmem:[%s5625_s28 + $0x1748] sm:$0xff] }
  0x73   : > { %v554_v60 = vld [vmem:[%s5625_s28 + $0x1780] sm:$0xff]  ;;  %551 = vst [vmem:[%s5633_s29 + $0x5d0] sm:$0xff] %v550_v58  ;;  %553 = vst [vmem:[%s5633_s29 + $0x5d8] sm:$0xff] %v552_v59  ;;  %v556_v61 = vld [vmem:[%s5625_s28 + $0x1788] sm:$0xff] }
  0x74   : > { %555 = vst [vmem:[%s5633_s29 + $0x5e0] sm:$0xff] %v554_v60  ;;  %v558_v62 = vld [vmem:[%s5625_s28 + $0x17c0] sm:$0xff]  ;;  %v560_v63 = vld [vmem:[%s5625_s28 + $0x17c8] sm:$0xff]  ;;  %557 = vst [vmem:[%s5633_s29 + $0x5e8] sm:$0xff] %v556_v61 }
  0x75   : > { %559 = vst [vmem:[%s5633_s29 + $0x5f0] sm:$0xff] %v558_v62  ;;  %561 = vst [vmem:[%s5633_s29 + $0x5f8] sm:$0xff] %v560_v63  ;;  %v562_v0 = vld [vmem:[%s5625_s28 + $0x1800] sm:$0xff]  ;;  %v564_v1 = vld [vmem:[%s5625_s28 + $0x1808] sm:$0xff] }
  0x76   : > { %v566_v2 = vld [vmem:[%s5625_s28 + $0x1840] sm:$0xff]  ;;  %563 = vst [vmem:[%s5633_s29 + $0x600] sm:$0xff] %v562_v0  ;;  %565 = vst [vmem:[%s5633_s29 + $0x608] sm:$0xff] %v564_v1  ;;  %v568_v3 = vld [vmem:[%s5625_s28 + $0x1848] sm:$0xff] }
  0x77   : > { %567 = vst [vmem:[%s5633_s29 + $0x610] sm:$0xff] %v566_v2  ;;  %v570_v4 = vld [vmem:[%s5625_s28 + $0x1880] sm:$0xff]  ;;  %v572_v5 = vld [vmem:[%s5625_s28 + $0x1888] sm:$0xff]  ;;  %569 = vst [vmem:[%s5633_s29 + $0x618] sm:$0xff] %v568_v3 }
  0x78   : > { %571 = vst [vmem:[%s5633_s29 + $0x620] sm:$0xff] %v570_v4  ;;  %573 = vst [vmem:[%s5633_s29 + $0x628] sm:$0xff] %v572_v5  ;;  %v574_v6 = vld [vmem:[%s5625_s28 + $0x18c0] sm:$0xff]  ;;  %v576_v7 = vld [vmem:[%s5625_s28 + $0x18c8] sm:$0xff] }
  0x79   : > { %v578_v8 = vld [vmem:[%s5625_s28 + $0x1900] sm:$0xff]  ;;  %575 = vst [vmem:[%s5633_s29 + $0x630] sm:$0xff] %v574_v6  ;;  %577 = vst [vmem:[%s5633_s29 + $0x638] sm:$0xff] %v576_v7  ;;  %v580_v9 = vld [vmem:[%s5625_s28 + $0x1908] sm:$0xff] }
  0x7a   : > { %579 = vst [vmem:[%s5633_s29 + $0x640] sm:$0xff] %v578_v8  ;;  %v582_v10 = vld [vmem:[%s5625_s28 + $0x1940] sm:$0xff]  ;;  %v584_v11 = vld [vmem:[%s5625_s28 + $0x1948] sm:$0xff]  ;;  %581 = vst [vmem:[%s5633_s29 + $0x648] sm:$0xff] %v580_v9 }
  0x7b   : > { %583 = vst [vmem:[%s5633_s29 + $0x650] sm:$0xff] %v582_v10  ;;  %585 = vst [vmem:[%s5633_s29 + $0x658] sm:$0xff] %v584_v11  ;;  %v586_v12 = vld [vmem:[%s5625_s28 + $0x1980] sm:$0xff]  ;;  %v588_v13 = vld [vmem:[%s5625_s28 + $0x1988] sm:$0xff] }
  0x7c   : > { %v590_v14 = vld [vmem:[%s5625_s28 + $0x19c0] sm:$0xff]  ;;  %587 = vst [vmem:[%s5633_s29 + $0x660] sm:$0xff] %v586_v12  ;;  %589 = vst [vmem:[%s5633_s29 + $0x668] sm:$0xff] %v588_v13  ;;  %v592_v15 = vld [vmem:[%s5625_s28 + $0x19c8] sm:$0xff] }
  0x7d   : > { %591 = vst [vmem:[%s5633_s29 + $0x670] sm:$0xff] %v590_v14  ;;  %v594_v16 = vld [vmem:[%s5625_s28 + $0x1a00] sm:$0xff]  ;;  %v596_v17 = vld [vmem:[%s5625_s28 + $0x1a08] sm:$0xff]  ;;  %593 = vst [vmem:[%s5633_s29 + $0x678] sm:$0xff] %v592_v15 }
  0x7e   : > { %595 = vst [vmem:[%s5633_s29 + $0x680] sm:$0xff] %v594_v16  ;;  %597 = vst [vmem:[%s5633_s29 + $0x688] sm:$0xff] %v596_v17  ;;  %v598_v18 = vld [vmem:[%s5625_s28 + $0x1a40] sm:$0xff]  ;;  %v600_v19 = vld [vmem:[%s5625_s28 + $0x1a48] sm:$0xff] }
  0x7f   : > { %v602_v20 = vld [vmem:[%s5625_s28 + $0x1a80] sm:$0xff]  ;;  %599 = vst [vmem:[%s5633_s29 + $0x690] sm:$0xff] %v598_v18  ;;  %601 = vst [vmem:[%s5633_s29 + $0x698] sm:$0xff] %v600_v19  ;;  %v604_v21 = vld [vmem:[%s5625_s28 + $0x1a88] sm:$0xff] }
  0x80   : > { %603 = vst [vmem:[%s5633_s29 + $0x6a0] sm:$0xff] %v602_v20  ;;  %v606_v22 = vld [vmem:[%s5625_s28 + $0x1ac0] sm:$0xff]  ;;  %v608_v23 = vld [vmem:[%s5625_s28 + $0x1ac8] sm:$0xff]  ;;  %605 = vst [vmem:[%s5633_s29 + $0x6a8] sm:$0xff] %v604_v21 }
  0x81   : > { %607 = vst [vmem:[%s5633_s29 + $0x6b0] sm:$0xff] %v606_v22  ;;  %609 = vst [vmem:[%s5633_s29 + $0x6b8] sm:$0xff] %v608_v23  ;;  %v610_v24 = vld [vmem:[%s5625_s28 + $0x1b00] sm:$0xff]  ;;  %v612_v25 = vld [vmem:[%s5625_s28 + $0x1b08] sm:$0xff] }
  0x82   : > { %v614_v26 = vld [vmem:[%s5625_s28 + $0x1b40] sm:$0xff]  ;;  %611 = vst [vmem:[%s5633_s29 + $0x6c0] sm:$0xff] %v610_v24  ;;  %613 = vst [vmem:[%s5633_s29 + $0x6c8] sm:$0xff] %v612_v25  ;;  %v616_v27 = vld [vmem:[%s5625_s28 + $0x1b48] sm:$0xff] }
  0x83   : > { %615 = vst [vmem:[%s5633_s29 + $0x6d0] sm:$0xff] %v614_v26  ;;  %v618_v28 = vld [vmem:[%s5625_s28 + $0x1b80] sm:$0xff]  ;;  %v620_v29 = vld [vmem:[%s5625_s28 + $0x1b88] sm:$0xff]  ;;  %617 = vst [vmem:[%s5633_s29 + $0x6d8] sm:$0xff] %v616_v27 }
  0x84   : > { %619 = vst [vmem:[%s5633_s29 + $0x6e0] sm:$0xff] %v618_v28  ;;  %621 = vst [vmem:[%s5633_s29 + $0x6e8] sm:$0xff] %v620_v29  ;;  %v622_v30 = vld [vmem:[%s5625_s28 + $0x1bc0] sm:$0xff]  ;;  %v624_v31 = vld [vmem:[%s5625_s28 + $0x1bc8] sm:$0xff] }
  0x85   : > { %v626_v32 = vld [vmem:[%s5625_s28 + $0x1c00] sm:$0xff]  ;;  %623 = vst [vmem:[%s5633_s29 + $0x6f0] sm:$0xff] %v622_v30  ;;  %625 = vst [vmem:[%s5633_s29 + $0x6f8] sm:$0xff] %v624_v31  ;;  %v628_v33 = vld [vmem:[%s5625_s28 + $0x1c08] sm:$0xff] }
  0x86   : > { %627 = vst [vmem:[%s5633_s29 + $0x700] sm:$0xff] %v626_v32  ;;  %v630_v34 = vld [vmem:[%s5625_s28 + $0x1c40] sm:$0xff]  ;;  %v632_v35 = vld [vmem:[%s5625_s28 + $0x1c48] sm:$0xff]  ;;  %629 = vst [vmem:[%s5633_s29 + $0x708] sm:$0xff] %v628_v33 }
  0x87   : > { %631 = vst [vmem:[%s5633_s29 + $0x710] sm:$0xff] %v630_v34  ;;  %633 = vst [vmem:[%s5633_s29 + $0x718] sm:$0xff] %v632_v35  ;;  %v634_v36 = vld [vmem:[%s5625_s28 + $0x1c80] sm:$0xff]  ;;  %v636_v37 = vld [vmem:[%s5625_s28 + $0x1c88] sm:$0xff] }
  0x88   : > { %v638_v38 = vld [vmem:[%s5625_s28 + $0x1cc0] sm:$0xff]  ;;  %635 = vst [vmem:[%s5633_s29 + $0x720] sm:$0xff] %v634_v36  ;;  %637 = vst [vmem:[%s5633_s29 + $0x728] sm:$0xff] %v636_v37  ;;  %v640_v39 = vld [vmem:[%s5625_s28 + $0x1cc8] sm:$0xff] }
  0x89   : > { %639 = vst [vmem:[%s5633_s29 + $0x730] sm:$0xff] %v638_v38  ;;  %v642_v40 = vld [vmem:[%s5625_s28 + $0x1d00] sm:$0xff]  ;;  %v644_v41 = vld [vmem:[%s5625_s28 + $0x1d08] sm:$0xff]  ;;  %641 = vst [vmem:[%s5633_s29 + $0x738] sm:$0xff] %v640_v39 }
  0x8a   : > { %643 = vst [vmem:[%s5633_s29 + $0x740] sm:$0xff] %v642_v40  ;;  %645 = vst [vmem:[%s5633_s29 + $0x748] sm:$0xff] %v644_v41  ;;  %v646_v42 = vld [vmem:[%s5625_s28 + $0x1d40] sm:$0xff]  ;;  %v648_v43 = vld [vmem:[%s5625_s28 + $0x1d48] sm:$0xff] }
  0x8b   : > { %v650_v44 = vld [vmem:[%s5625_s28 + $0x1d80] sm:$0xff]  ;;  %647 = vst [vmem:[%s5633_s29 + $0x750] sm:$0xff] %v646_v42  ;;  %649 = vst [vmem:[%s5633_s29 + $0x758] sm:$0xff] %v648_v43  ;;  %v652_v45 = vld [vmem:[%s5625_s28 + $0x1d88] sm:$0xff] }
  0x8c   : > { %651 = vst [vmem:[%s5633_s29 + $0x760] sm:$0xff] %v650_v44  ;;  %v654_v46 = vld [vmem:[%s5625_s28 + $0x1dc0] sm:$0xff]  ;;  %v656_v47 = vld [vmem:[%s5625_s28 + $0x1dc8] sm:$0xff]  ;;  %653 = vst [vmem:[%s5633_s29 + $0x768] sm:$0xff] %v652_v45 }
  0x8d   : > { %655 = vst [vmem:[%s5633_s29 + $0x770] sm:$0xff] %v654_v46  ;;  %657 = vst [vmem:[%s5633_s29 + $0x778] sm:$0xff] %v656_v47  ;;  %v658_v48 = vld [vmem:[%s5625_s28 + $0x1e00] sm:$0xff]  ;;  %v660_v49 = vld [vmem:[%s5625_s28 + $0x1e08] sm:$0xff] }
  0x8e   : > { %v662_v50 = vld [vmem:[%s5625_s28 + $0x1e40] sm:$0xff]  ;;  %659 = vst [vmem:[%s5633_s29 + $0x780] sm:$0xff] %v658_v48  ;;  %661 = vst [vmem:[%s5633_s29 + $0x788] sm:$0xff] %v660_v49  ;;  %v664_v51 = vld [vmem:[%s5625_s28 + $0x1e48] sm:$0xff] }
  0x8f   : > { %663 = vst [vmem:[%s5633_s29 + $0x790] sm:$0xff] %v662_v50  ;;  %v666_v52 = vld [vmem:[%s5625_s28 + $0x1e80] sm:$0xff]  ;;  %v668_v53 = vld [vmem:[%s5625_s28 + $0x1e88] sm:$0xff]  ;;  %665 = vst [vmem:[%s5633_s29 + $0x798] sm:$0xff] %v664_v51 }
  0x90   : > { %667 = vst [vmem:[%s5633_s29 + $0x7a0] sm:$0xff] %v666_v52  ;;  %669 = vst [vmem:[%s5633_s29 + $0x7a8] sm:$0xff] %v668_v53  ;;  %v670_v54 = vld [vmem:[%s5625_s28 + $0x1ec0] sm:$0xff]  ;;  %v672_v55 = vld [vmem:[%s5625_s28 + $0x1ec8] sm:$0xff] }
  0x91   : > { %v674_v56 = vld [vmem:[%s5625_s28 + $0x1f00] sm:$0xff]  ;;  %671 = vst [vmem:[%s5633_s29 + $0x7b0] sm:$0xff] %v670_v54  ;;  %673 = vst [vmem:[%s5633_s29 + $0x7b8] sm:$0xff] %v672_v55  ;;  %v676_v57 = vld [vmem:[%s5625_s28 + $0x1f08] sm:$0xff] }
  0x92   : > { %675 = vst [vmem:[%s5633_s29 + $0x7c0] sm:$0xff] %v674_v56  ;;  %v678_v58 = vld [vmem:[%s5625_s28 + $0x1f40] sm:$0xff]  ;;  %v680_v59 = vld [vmem:[%s5625_s28 + $0x1f48] sm:$0xff]  ;;  %677 = vst [vmem:[%s5633_s29 + $0x7c8] sm:$0xff] %v676_v57 }
  0x93   : > { %679 = vst [vmem:[%s5633_s29 + $0x7d0] sm:$0xff] %v678_v58  ;;  %681 = vst [vmem:[%s5633_s29 + $0x7d8] sm:$0xff] %v680_v59  ;;  %v682_v60 = vld [vmem:[%s5625_s28 + $0x1f80] sm:$0xff]  ;;  %v684_v61 = vld [vmem:[%s5625_s28 + $0x1f88] sm:$0xff] }
  0x94   : > { %v686_v62 = vld [vmem:[%s5625_s28 + $0x1fc0] sm:$0xff]  ;;  %683 = vst [vmem:[%s5633_s29 + $0x7e0] sm:$0xff] %v682_v60  ;;  %685 = vst [vmem:[%s5633_s29 + $0x7e8] sm:$0xff] %v684_v61  ;;  %v688_v63 = vld [vmem:[%s5625_s28 + $0x1fc8] sm:$0xff] }
  0x95   : > { %687 = vst [vmem:[%s5633_s29 + $0x7f0] sm:$0xff] %v686_v62  ;;  %v690_v0 = vld [vmem:[%s5625_s28 + $0x2000] sm:$0xff]  ;;  %v692_v1 = vld [vmem:[%s5625_s28 + $0x2008] sm:$0xff]  ;;  %689 = vst [vmem:[%s5633_s29 + $0x7f8] sm:$0xff] %v688_v63 }
  0x96   : > { %691 = vst [vmem:[%s5633_s29 + $0x800] sm:$0xff] %v690_v0  ;;  %693 = vst [vmem:[%s5633_s29 + $0x808] sm:$0xff] %v692_v1  ;;  %v694_v2 = vld [vmem:[%s5625_s28 + $0x2040] sm:$0xff]  ;;  %v696_v3 = vld [vmem:[%s5625_s28 + $0x2048] sm:$0xff] }
  0x97   : > { %v698_v4 = vld [vmem:[%s5625_s28 + $0x2080] sm:$0xff]  ;;  %695 = vst [vmem:[%s5633_s29 + $0x810] sm:$0xff] %v694_v2  ;;  %697 = vst [vmem:[%s5633_s29 + $0x818] sm:$0xff] %v696_v3  ;;  %v700_v5 = vld [vmem:[%s5625_s28 + $0x2088] sm:$0xff] }
  0x98   : > { %699 = vst [vmem:[%s5633_s29 + $0x820] sm:$0xff] %v698_v4  ;;  %v702_v6 = vld [vmem:[%s5625_s28 + $0x20c0] sm:$0xff]  ;;  %v704_v7 = vld [vmem:[%s5625_s28 + $0x20c8] sm:$0xff]  ;;  %701 = vst [vmem:[%s5633_s29 + $0x828] sm:$0xff] %v700_v5 }
  0x99   : > { %703 = vst [vmem:[%s5633_s29 + $0x830] sm:$0xff] %v702_v6  ;;  %705 = vst [vmem:[%s5633_s29 + $0x838] sm:$0xff] %v704_v7  ;;  %v706_v8 = vld [vmem:[%s5625_s28 + $0x2100] sm:$0xff]  ;;  %v708_v9 = vld [vmem:[%s5625_s28 + $0x2108] sm:$0xff] }
  0x9a   : > { %v710_v10 = vld [vmem:[%s5625_s28 + $0x2140] sm:$0xff]  ;;  %707 = vst [vmem:[%s5633_s29 + $0x840] sm:$0xff] %v706_v8  ;;  %709 = vst [vmem:[%s5633_s29 + $0x848] sm:$0xff] %v708_v9  ;;  %v712_v11 = vld [vmem:[%s5625_s28 + $0x2148] sm:$0xff] }
  0x9b   : > { %711 = vst [vmem:[%s5633_s29 + $0x850] sm:$0xff] %v710_v10  ;;  %v714_v12 = vld [vmem:[%s5625_s28 + $0x2180] sm:$0xff]  ;;  %v716_v13 = vld [vmem:[%s5625_s28 + $0x2188] sm:$0xff]  ;;  %713 = vst [vmem:[%s5633_s29 + $0x858] sm:$0xff] %v712_v11 }
  0x9c   : > { %715 = vst [vmem:[%s5633_s29 + $0x860] sm:$0xff] %v714_v12  ;;  %717 = vst [vmem:[%s5633_s29 + $0x868] sm:$0xff] %v716_v13  ;;  %v718_v14 = vld [vmem:[%s5625_s28 + $0x21c0] sm:$0xff]  ;;  %v720_v15 = vld [vmem:[%s5625_s28 + $0x21c8] sm:$0xff] }
  0x9d   : > { %v722_v16 = vld [vmem:[%s5625_s28 + $0x2200] sm:$0xff]  ;;  %719 = vst [vmem:[%s5633_s29 + $0x870] sm:$0xff] %v718_v14  ;;  %721 = vst [vmem:[%s5633_s29 + $0x878] sm:$0xff] %v720_v15  ;;  %v724_v17 = vld [vmem:[%s5625_s28 + $0x2208] sm:$0xff] }
  0x9e   : > { %723 = vst [vmem:[%s5633_s29 + $0x880] sm:$0xff] %v722_v16  ;;  %v726_v18 = vld [vmem:[%s5625_s28 + $0x2240] sm:$0xff]  ;;  %v728_v19 = vld [vmem:[%s5625_s28 + $0x2248] sm:$0xff]  ;;  %725 = vst [vmem:[%s5633_s29 + $0x888] sm:$0xff] %v724_v17 }
  0x9f   : > { %727 = vst [vmem:[%s5633_s29 + $0x890] sm:$0xff] %v726_v18  ;;  %729 = vst [vmem:[%s5633_s29 + $0x898] sm:$0xff] %v728_v19  ;;  %v730_v20 = vld [vmem:[%s5625_s28 + $0x2280] sm:$0xff]  ;;  %v732_v21 = vld [vmem:[%s5625_s28 + $0x2288] sm:$0xff] }
  0xa0   : > { %v734_v22 = vld [vmem:[%s5625_s28 + $0x22c0] sm:$0xff]  ;;  %731 = vst [vmem:[%s5633_s29 + $0x8a0] sm:$0xff] %v730_v20  ;;  %733 = vst [vmem:[%s5633_s29 + $0x8a8] sm:$0xff] %v732_v21  ;;  %v736_v23 = vld [vmem:[%s5625_s28 + $0x22c8] sm:$0xff] }
  0xa1   : > { %735 = vst [vmem:[%s5633_s29 + $0x8b0] sm:$0xff] %v734_v22  ;;  %v738_v24 = vld [vmem:[%s5625_s28 + $0x2300] sm:$0xff]  ;;  %v740_v25 = vld [vmem:[%s5625_s28 + $0x2308] sm:$0xff]  ;;  %737 = vst [vmem:[%s5633_s29 + $0x8b8] sm:$0xff] %v736_v23 }
  0xa2   : > { %739 = vst [vmem:[%s5633_s29 + $0x8c0] sm:$0xff] %v738_v24  ;;  %741 = vst [vmem:[%s5633_s29 + $0x8c8] sm:$0xff] %v740_v25  ;;  %v742_v26 = vld [vmem:[%s5625_s28 + $0x2340] sm:$0xff]  ;;  %v744_v27 = vld [vmem:[%s5625_s28 + $0x2348] sm:$0xff] }
  0xa3   : > { %v746_v28 = vld [vmem:[%s5625_s28 + $0x2380] sm:$0xff]  ;;  %743 = vst [vmem:[%s5633_s29 + $0x8d0] sm:$0xff] %v742_v26  ;;  %745 = vst [vmem:[%s5633_s29 + $0x8d8] sm:$0xff] %v744_v27  ;;  %v748_v29 = vld [vmem:[%s5625_s28 + $0x2388] sm:$0xff] }
  0xa4   : > { %747 = vst [vmem:[%s5633_s29 + $0x8e0] sm:$0xff] %v746_v28  ;;  %v750_v30 = vld [vmem:[%s5625_s28 + $0x23c0] sm:$0xff]  ;;  %v752_v31 = vld [vmem:[%s5625_s28 + $0x23c8] sm:$0xff]  ;;  %749 = vst [vmem:[%s5633_s29 + $0x8e8] sm:$0xff] %v748_v29 }
  0xa5   : > { %751 = vst [vmem:[%s5633_s29 + $0x8f0] sm:$0xff] %v750_v30  ;;  %753 = vst [vmem:[%s5633_s29 + $0x8f8] sm:$0xff] %v752_v31  ;;  %v754_v32 = vld [vmem:[%s5625_s28 + $0x2400] sm:$0xff]  ;;  %v756_v33 = vld [vmem:[%s5625_s28 + $0x2408] sm:$0xff] }
  0xa6   : > { %v758_v34 = vld [vmem:[%s5625_s28 + $0x2440] sm:$0xff]  ;;  %755 = vst [vmem:[%s5633_s29 + $0x900] sm:$0xff] %v754_v32  ;;  %757 = vst [vmem:[%s5633_s29 + $0x908] sm:$0xff] %v756_v33  ;;  %v760_v35 = vld [vmem:[%s5625_s28 + $0x2448] sm:$0xff] }
  0xa7   : > { %759 = vst [vmem:[%s5633_s29 + $0x910] sm:$0xff] %v758_v34  ;;  %v762_v36 = vld [vmem:[%s5625_s28 + $0x2480] sm:$0xff]  ;;  %v764_v37 = vld [vmem:[%s5625_s28 + $0x2488] sm:$0xff]  ;;  %761 = vst [vmem:[%s5633_s29 + $0x918] sm:$0xff] %v760_v35 }
  0xa8   : > { %763 = vst [vmem:[%s5633_s29 + $0x920] sm:$0xff] %v762_v36  ;;  %765 = vst [vmem:[%s5633_s29 + $0x928] sm:$0xff] %v764_v37  ;;  %v766_v38 = vld [vmem:[%s5625_s28 + $0x24c0] sm:$0xff]  ;;  %v768_v39 = vld [vmem:[%s5625_s28 + $0x24c8] sm:$0xff] }
  0xa9   : > { %v770_v40 = vld [vmem:[%s5625_s28 + $0x2500] sm:$0xff]  ;;  %767 = vst [vmem:[%s5633_s29 + $0x930] sm:$0xff] %v766_v38  ;;  %769 = vst [vmem:[%s5633_s29 + $0x938] sm:$0xff] %v768_v39  ;;  %v772_v41 = vld [vmem:[%s5625_s28 + $0x2508] sm:$0xff] }
  0xaa   : > { %771 = vst [vmem:[%s5633_s29 + $0x940] sm:$0xff] %v770_v40  ;;  %v774_v42 = vld [vmem:[%s5625_s28 + $0x2540] sm:$0xff]  ;;  %v776_v43 = vld [vmem:[%s5625_s28 + $0x2548] sm:$0xff]  ;;  %773 = vst [vmem:[%s5633_s29 + $0x948] sm:$0xff] %v772_v41 }
  0xab   : > { %775 = vst [vmem:[%s5633_s29 + $0x950] sm:$0xff] %v774_v42  ;;  %777 = vst [vmem:[%s5633_s29 + $0x958] sm:$0xff] %v776_v43  ;;  %v778_v44 = vld [vmem:[%s5625_s28 + $0x2580] sm:$0xff]  ;;  %v780_v45 = vld [vmem:[%s5625_s28 + $0x2588] sm:$0xff] }
  0xac   : > { %v782_v46 = vld [vmem:[%s5625_s28 + $0x25c0] sm:$0xff]  ;;  %779 = vst [vmem:[%s5633_s29 + $0x960] sm:$0xff] %v778_v44  ;;  %781 = vst [vmem:[%s5633_s29 + $0x968] sm:$0xff] %v780_v45  ;;  %v784_v47 = vld [vmem:[%s5625_s28 + $0x25c8] sm:$0xff] }
  0xad   : > { %783 = vst [vmem:[%s5633_s29 + $0x970] sm:$0xff] %v782_v46  ;;  %v786_v48 = vld [vmem:[%s5625_s28 + $0x2600] sm:$0xff]  ;;  %v788_v49 = vld [vmem:[%s5625_s28 + $0x2608] sm:$0xff]  ;;  %785 = vst [vmem:[%s5633_s29 + $0x978] sm:$0xff] %v784_v47 }
  0xae   : > { %787 = vst [vmem:[%s5633_s29 + $0x980] sm:$0xff] %v786_v48  ;;  %789 = vst [vmem:[%s5633_s29 + $0x988] sm:$0xff] %v788_v49  ;;  %v790_v50 = vld [vmem:[%s5625_s28 + $0x2640] sm:$0xff]  ;;  %v792_v51 = vld [vmem:[%s5625_s28 + $0x2648] sm:$0xff] }
  0xaf   : > { %v794_v52 = vld [vmem:[%s5625_s28 + $0x2680] sm:$0xff]  ;;  %791 = vst [vmem:[%s5633_s29 + $0x990] sm:$0xff] %v790_v50  ;;  %793 = vst [vmem:[%s5633_s29 + $0x998] sm:$0xff] %v792_v51  ;;  %v796_v53 = vld [vmem:[%s5625_s28 + $0x2688] sm:$0xff] }
  0xb0   : > { %795 = vst [vmem:[%s5633_s29 + $0x9a0] sm:$0xff] %v794_v52  ;;  %v798_v54 = vld [vmem:[%s5625_s28 + $0x26c0] sm:$0xff]  ;;  %v800_v55 = vld [vmem:[%s5625_s28 + $0x26c8] sm:$0xff]  ;;  %797 = vst [vmem:[%s5633_s29 + $0x9a8] sm:$0xff] %v796_v53 }
  0xb1   : > { %799 = vst [vmem:[%s5633_s29 + $0x9b0] sm:$0xff] %v798_v54  ;;  %801 = vst [vmem:[%s5633_s29 + $0x9b8] sm:$0xff] %v800_v55  ;;  %v802_v56 = vld [vmem:[%s5625_s28 + $0x2700] sm:$0xff]  ;;  %v804_v57 = vld [vmem:[%s5625_s28 + $0x2708] sm:$0xff] }
  0xb2   : > { %v806_v58 = vld [vmem:[%s5625_s28 + $0x2740] sm:$0xff]  ;;  %803 = vst [vmem:[%s5633_s29 + $0x9c0] sm:$0xff] %v802_v56  ;;  %805 = vst [vmem:[%s5633_s29 + $0x9c8] sm:$0xff] %v804_v57  ;;  %v808_v59 = vld [vmem:[%s5625_s28 + $0x2748] sm:$0xff] }
  0xb3   : > { %807 = vst [vmem:[%s5633_s29 + $0x9d0] sm:$0xff] %v806_v58  ;;  %v810_v60 = vld [vmem:[%s5625_s28 + $0x2780] sm:$0xff]  ;;  %v812_v61 = vld [vmem:[%s5625_s28 + $0x2788] sm:$0xff]  ;;  %809 = vst [vmem:[%s5633_s29 + $0x9d8] sm:$0xff] %v808_v59 }
  0xb4   : > { %811 = vst [vmem:[%s5633_s29 + $0x9e0] sm:$0xff] %v810_v60  ;;  %813 = vst [vmem:[%s5633_s29 + $0x9e8] sm:$0xff] %v812_v61  ;;  %v814_v62 = vld [vmem:[%s5625_s28 + $0x27c0] sm:$0xff]  ;;  %v816_v63 = vld [vmem:[%s5625_s28 + $0x27c8] sm:$0xff] }
  0xb5   : > { %v818_v0 = vld [vmem:[%s5625_s28 + $0x2800] sm:$0xff]  ;;  %815 = vst [vmem:[%s5633_s29 + $0x9f0] sm:$0xff] %v814_v62  ;;  %817 = vst [vmem:[%s5633_s29 + $0x9f8] sm:$0xff] %v816_v63  ;;  %v820_v1 = vld [vmem:[%s5625_s28 + $0x2808] sm:$0xff] }
  0xb6   : > { %819 = vst [vmem:[%s5633_s29 + $0xa00] sm:$0xff] %v818_v0  ;;  %v822_v2 = vld [vmem:[%s5625_s28 + $0x2840] sm:$0xff]  ;;  %v824_v3 = vld [vmem:[%s5625_s28 + $0x2848] sm:$0xff]  ;;  %821 = vst [vmem:[%s5633_s29 + $0xa08] sm:$0xff] %v820_v1 }
  0xb7   : > { %823 = vst [vmem:[%s5633_s29 + $0xa10] sm:$0xff] %v822_v2  ;;  %825 = vst [vmem:[%s5633_s29 + $0xa18] sm:$0xff] %v824_v3  ;;  %v826_v4 = vld [vmem:[%s5625_s28 + $0x2880] sm:$0xff]  ;;  %v828_v5 = vld [vmem:[%s5625_s28 + $0x2888] sm:$0xff] }
  0xb8   : > { %v830_v6 = vld [vmem:[%s5625_s28 + $0x28c0] sm:$0xff]  ;;  %827 = vst [vmem:[%s5633_s29 + $0xa20] sm:$0xff] %v826_v4  ;;  %829 = vst [vmem:[%s5633_s29 + $0xa28] sm:$0xff] %v828_v5  ;;  %v832_v7 = vld [vmem:[%s5625_s28 + $0x28c8] sm:$0xff] }
  0xb9   : > { %831 = vst [vmem:[%s5633_s29 + $0xa30] sm:$0xff] %v830_v6  ;;  %v834_v8 = vld [vmem:[%s5625_s28 + $0x2900] sm:$0xff]  ;;  %v836_v9 = vld [vmem:[%s5625_s28 + $0x2908] sm:$0xff]  ;;  %833 = vst [vmem:[%s5633_s29 + $0xa38] sm:$0xff] %v832_v7 }
  0xba   : > { %835 = vst [vmem:[%s5633_s29 + $0xa40] sm:$0xff] %v834_v8  ;;  %837 = vst [vmem:[%s5633_s29 + $0xa48] sm:$0xff] %v836_v9  ;;  %v838_v10 = vld [vmem:[%s5625_s28 + $0x2940] sm:$0xff]  ;;  %v840_v11 = vld [vmem:[%s5625_s28 + $0x2948] sm:$0xff] }
  0xbb   : > { %v842_v12 = vld [vmem:[%s5625_s28 + $0x2980] sm:$0xff]  ;;  %839 = vst [vmem:[%s5633_s29 + $0xa50] sm:$0xff] %v838_v10  ;;  %841 = vst [vmem:[%s5633_s29 + $0xa58] sm:$0xff] %v840_v11  ;;  %v844_v13 = vld [vmem:[%s5625_s28 + $0x2988] sm:$0xff] }
  0xbc   : > { %843 = vst [vmem:[%s5633_s29 + $0xa60] sm:$0xff] %v842_v12  ;;  %v846_v14 = vld [vmem:[%s5625_s28 + $0x29c0] sm:$0xff]  ;;  %v848_v15 = vld [vmem:[%s5625_s28 + $0x29c8] sm:$0xff]  ;;  %845 = vst [vmem:[%s5633_s29 + $0xa68] sm:$0xff] %v844_v13 }
  0xbd   : > { %847 = vst [vmem:[%s5633_s29 + $0xa70] sm:$0xff] %v846_v14  ;;  %849 = vst [vmem:[%s5633_s29 + $0xa78] sm:$0xff] %v848_v15  ;;  %v850_v16 = vld [vmem:[%s5625_s28 + $0x2a00] sm:$0xff]  ;;  %v852_v17 = vld [vmem:[%s5625_s28 + $0x2a08] sm:$0xff] }
  0xbe   : > { %v854_v18 = vld [vmem:[%s5625_s28 + $0x2a40] sm:$0xff]  ;;  %851 = vst [vmem:[%s5633_s29 + $0xa80] sm:$0xff] %v850_v16  ;;  %853 = vst [vmem:[%s5633_s29 + $0xa88] sm:$0xff] %v852_v17  ;;  %v856_v19 = vld [vmem:[%s5625_s28 + $0x2a48] sm:$0xff] }
  0xbf   : > { %855 = vst [vmem:[%s5633_s29 + $0xa90] sm:$0xff] %v854_v18  ;;  %v858_v20 = vld [vmem:[%s5625_s28 + $0x2a80] sm:$0xff]  ;;  %v860_v21 = vld [vmem:[%s5625_s28 + $0x2a88] sm:$0xff]  ;;  %857 = vst [vmem:[%s5633_s29 + $0xa98] sm:$0xff] %v856_v19 }
  0xc0   : > { %859 = vst [vmem:[%s5633_s29 + $0xaa0] sm:$0xff] %v858_v20  ;;  %861 = vst [vmem:[%s5633_s29 + $0xaa8] sm:$0xff] %v860_v21  ;;  %v862_v22 = vld [vmem:[%s5625_s28 + $0x2ac0] sm:$0xff]  ;;  %v864_v23 = vld [vmem:[%s5625_s28 + $0x2ac8] sm:$0xff] }
  0xc1   : > { %v866_v24 = vld [vmem:[%s5625_s28 + $0x2b00] sm:$0xff]  ;;  %863 = vst [vmem:[%s5633_s29 + $0xab0] sm:$0xff] %v862_v22  ;;  %865 = vst [vmem:[%s5633_s29 + $0xab8] sm:$0xff] %v864_v23  ;;  %v868_v25 = vld [vmem:[%s5625_s28 + $0x2b08] sm:$0xff] }
  0xc2   : > { %867 = vst [vmem:[%s5633_s29 + $0xac0] sm:$0xff] %v866_v24  ;;  %v870_v26 = vld [vmem:[%s5625_s28 + $0x2b40] sm:$0xff]  ;;  %v872_v27 = vld [vmem:[%s5625_s28 + $0x2b48] sm:$0xff]  ;;  %869 = vst [vmem:[%s5633_s29 + $0xac8] sm:$0xff] %v868_v25 }
  0xc3   : > { %871 = vst [vmem:[%s5633_s29 + $0xad0] sm:$0xff] %v870_v26  ;;  %873 = vst [vmem:[%s5633_s29 + $0xad8] sm:$0xff] %v872_v27  ;;  %v874_v28 = vld [vmem:[%s5625_s28 + $0x2b80] sm:$0xff]  ;;  %v876_v29 = vld [vmem:[%s5625_s28 + $0x2b88] sm:$0xff] }
  0xc4   : > { %v878_v30 = vld [vmem:[%s5625_s28 + $0x2bc0] sm:$0xff]  ;;  %875 = vst [vmem:[%s5633_s29 + $0xae0] sm:$0xff] %v874_v28  ;;  %877 = vst [vmem:[%s5633_s29 + $0xae8] sm:$0xff] %v876_v29  ;;  %v880_v31 = vld [vmem:[%s5625_s28 + $0x2bc8] sm:$0xff] }
  0xc5   : > { %879 = vst [vmem:[%s5633_s29 + $0xaf0] sm:$0xff] %v878_v30  ;;  %v882_v32 = vld [vmem:[%s5625_s28 + $0x2c00] sm:$0xff]  ;;  %v884_v33 = vld [vmem:[%s5625_s28 + $0x2c08] sm:$0xff]  ;;  %881 = vst [vmem:[%s5633_s29 + $0xaf8] sm:$0xff] %v880_v31 }
  0xc6   : > { %883 = vst [vmem:[%s5633_s29 + $0xb00] sm:$0xff] %v882_v32  ;;  %885 = vst [vmem:[%s5633_s29 + $0xb08] sm:$0xff] %v884_v33  ;;  %v886_v34 = vld [vmem:[%s5625_s28 + $0x2c40] sm:$0xff]  ;;  %v888_v35 = vld [vmem:[%s5625_s28 + $0x2c48] sm:$0xff] }
  0xc7   : > { %v890_v36 = vld [vmem:[%s5625_s28 + $0x2c80] sm:$0xff]  ;;  %887 = vst [vmem:[%s5633_s29 + $0xb10] sm:$0xff] %v886_v34  ;;  %889 = vst [vmem:[%s5633_s29 + $0xb18] sm:$0xff] %v888_v35  ;;  %v892_v37 = vld [vmem:[%s5625_s28 + $0x2c88] sm:$0xff] }
  0xc8   : > { %891 = vst [vmem:[%s5633_s29 + $0xb20] sm:$0xff] %v890_v36  ;;  %v894_v38 = vld [vmem:[%s5625_s28 + $0x2cc0] sm:$0xff]  ;;  %v896_v39 = vld [vmem:[%s5625_s28 + $0x2cc8] sm:$0xff]  ;;  %893 = vst [vmem:[%s5633_s29 + $0xb28] sm:$0xff] %v892_v37 }
  0xc9   : > { %895 = vst [vmem:[%s5633_s29 + $0xb30] sm:$0xff] %v894_v38  ;;  %897 = vst [vmem:[%s5633_s29 + $0xb38] sm:$0xff] %v896_v39  ;;  %v898_v40 = vld [vmem:[%s5625_s28 + $0x2d00] sm:$0xff]  ;;  %v900_v41 = vld [vmem:[%s5625_s28 + $0x2d08] sm:$0xff] }
  0xca   : > { %v902_v42 = vld [vmem:[%s5625_s28 + $0x2d40] sm:$0xff]  ;;  %899 = vst [vmem:[%s5633_s29 + $0xb40] sm:$0xff] %v898_v40  ;;  %901 = vst [vmem:[%s5633_s29 + $0xb48] sm:$0xff] %v900_v41  ;;  %v904_v43 = vld [vmem:[%s5625_s28 + $0x2d48] sm:$0xff] }
  0xcb   : > { %903 = vst [vmem:[%s5633_s29 + $0xb50] sm:$0xff] %v902_v42  ;;  %v906_v44 = vld [vmem:[%s5625_s28 + $0x2d80] sm:$0xff]  ;;  %v908_v45 = vld [vmem:[%s5625_s28 + $0x2d88] sm:$0xff]  ;;  %905 = vst [vmem:[%s5633_s29 + $0xb58] sm:$0xff] %v904_v43 }
  0xcc   : > { %907 = vst [vmem:[%s5633_s29 + $0xb60] sm:$0xff] %v906_v44  ;;  %909 = vst [vmem:[%s5633_s29 + $0xb68] sm:$0xff] %v908_v45  ;;  %v910_v46 = vld [vmem:[%s5625_s28 + $0x2dc0] sm:$0xff]  ;;  %v912_v47 = vld [vmem:[%s5625_s28 + $0x2dc8] sm:$0xff] }
  0xcd   : > { %v914_v48 = vld [vmem:[%s5625_s28 + $0x2e00] sm:$0xff]  ;;  %911 = vst [vmem:[%s5633_s29 + $0xb70] sm:$0xff] %v910_v46  ;;  %913 = vst [vmem:[%s5633_s29 + $0xb78] sm:$0xff] %v912_v47  ;;  %v916_v49 = vld [vmem:[%s5625_s28 + $0x2e08] sm:$0xff] }
  0xce   : > { %915 = vst [vmem:[%s5633_s29 + $0xb80] sm:$0xff] %v914_v48  ;;  %v918_v50 = vld [vmem:[%s5625_s28 + $0x2e40] sm:$0xff]  ;;  %v920_v51 = vld [vmem:[%s5625_s28 + $0x2e48] sm:$0xff]  ;;  %917 = vst [vmem:[%s5633_s29 + $0xb88] sm:$0xff] %v916_v49 }
  0xcf   : > { %919 = vst [vmem:[%s5633_s29 + $0xb90] sm:$0xff] %v918_v50  ;;  %921 = vst [vmem:[%s5633_s29 + $0xb98] sm:$0xff] %v920_v51  ;;  %v922_v52 = vld [vmem:[%s5625_s28 + $0x2e80] sm:$0xff]  ;;  %v924_v53 = vld [vmem:[%s5625_s28 + $0x2e88] sm:$0xff] }
  0xd0   : > { %v926_v54 = vld [vmem:[%s5625_s28 + $0x2ec0] sm:$0xff]  ;;  %923 = vst [vmem:[%s5633_s29 + $0xba0] sm:$0xff] %v922_v52  ;;  %925 = vst [vmem:[%s5633_s29 + $0xba8] sm:$0xff] %v924_v53  ;;  %v928_v55 = vld [vmem:[%s5625_s28 + $0x2ec8] sm:$0xff] }
  0xd1   : > { %927 = vst [vmem:[%s5633_s29 + $0xbb0] sm:$0xff] %v926_v54  ;;  %v930_v56 = vld [vmem:[%s5625_s28 + $0x2f00] sm:$0xff]  ;;  %v932_v57 = vld [vmem:[%s5625_s28 + $0x2f08] sm:$0xff]  ;;  %929 = vst [vmem:[%s5633_s29 + $0xbb8] sm:$0xff] %v928_v55 }
  0xd2   : > { %931 = vst [vmem:[%s5633_s29 + $0xbc0] sm:$0xff] %v930_v56  ;;  %933 = vst [vmem:[%s5633_s29 + $0xbc8] sm:$0xff] %v932_v57  ;;  %v934_v58 = vld [vmem:[%s5625_s28 + $0x2f40] sm:$0xff]  ;;  %v936_v59 = vld [vmem:[%s5625_s28 + $0x2f48] sm:$0xff] }
  0xd3   : > { %v938_v60 = vld [vmem:[%s5625_s28 + $0x2f80] sm:$0xff]  ;;  %935 = vst [vmem:[%s5633_s29 + $0xbd0] sm:$0xff] %v934_v58  ;;  %937 = vst [vmem:[%s5633_s29 + $0xbd8] sm:$0xff] %v936_v59  ;;  %v940_v61 = vld [vmem:[%s5625_s28 + $0x2f88] sm:$0xff] }
  0xd4   : > { %939 = vst [vmem:[%s5633_s29 + $0xbe0] sm:$0xff] %v938_v60  ;;  %v942_v62 = vld [vmem:[%s5625_s28 + $0x2fc0] sm:$0xff]  ;;  %v944_v63 = vld [vmem:[%s5625_s28 + $0x2fc8] sm:$0xff]  ;;  %941 = vst [vmem:[%s5633_s29 + $0xbe8] sm:$0xff] %v940_v61 }
  0xd5   : > { %943 = vst [vmem:[%s5633_s29 + $0xbf0] sm:$0xff] %v942_v62  ;;  %945 = vst [vmem:[%s5633_s29 + $0xbf8] sm:$0xff] %v944_v63 }
  0xd6 PF: > { %p4333_p8 = scmp.ge.s32.totalorder %s5555_s16, 1  ;;  %p958_p9 = scmp.lt.s32.totalorder %s5555_s16, 5 }
  0xd8   : > { %p959_p10 = pnand %p4333_p8, %p958_p9 }
  0xd9   : > { %s965_s30 = sand.u32 (!%p959_p10), 1, %s5539_s12   ;;  %v5003_v0 = vld [vmem:[%s6905_s0 + $0x4] ss:$48 sps:$4 sm:$0xff] (!%p959_p10)  }
  0xda   : > { %962 = sbr.rel (%p959_p10) target bundleno = 845 (0x34d), region = 51  ;;  %3514 = vmatprep.mubr.bf16.mxu0 (!%p959_p10), %v5003_v0  ;;  %3832 = vmatprep.mubr.bf16.mxu1 (!%p959_p10), %v5003_v0  ;;  %s4334_s5 = sshll.u32 (!%p959_p10), %s965_s30, 6 }
  0xdb   : > { %s4864_s4 = smul.u32 (!%p959_p10), 3072, %s965_s30  ;;  %s6866_s12 = scalar_lea.vmem (!%p959_p10), [#allocation3], %s4334_s5 }
  0xdd   : > { %s6405_s7 = scalar_lea.vmem (!%p959_p10), [#allocation2], %s4864_s4 }
  0xde   : > { %v4905_v1 = vld [vmem:[%s6405_s7 + $0x4] ss:$16 sps:$4 sm:$0xff] (!%p959_p10)   ;;  %v4907_v2 = vld [vmem:[%s6405_s7 + $0xc] ss:$16 sps:$4 sm:$0xff] (!%p959_p10)   ;;  %v4909_v3 = vld [vmem:[%s6405_s7] ss:$16 sps:$4 sm:$0xff] (!%p959_p10)  }
  0xdf   : > { %3482 = vmatprep.subr.bf16.mxu0 (!%p959_p10), %v4905_v1  ;;  %v4910_v4 = vld [vmem:[%s6405_s7 + $0x8] ss:$16 sps:$4 sm:$0xff] (!%p959_p10)   ;;  %3800 = vmatprep.subr.bf16.mxu1 (!%p959_p10), %v4907_v2  ;;  %v4911_v5 = vld [vmem:[%s6405_s7 + $0x24] ss:$16 sps:$4 sm:$0xff] (!%p959_p10)   ;;  %v4913_v6 = vld [vmem:[%s6405_s7 + $0x2c] ss:$16 sps:$4 sm:$0xff] (!%p959_p10)  }
  0xe0   : > { %3483 = vmatpush1.bf16.msra.mxu0 (!%p959_p10), %v4909_v3  ;;  %3801 = vmatpush1.bf16.msra.mxu1 (!%p959_p10), %v4910_v4  ;;  %v4915_v7 = vld [vmem:[%s6405_s7 + $0x20] ss:$16 sps:$4 sm:$0xff] (!%p959_p10)   ;;  %v4916_v8 = vld [vmem:[%s6405_s7 + $0x28] ss:$16 sps:$4 sm:$0xff] (!%p959_p10)   ;;  %v4917_v9 = vld [vmem:[%s6405_s7 + $0x44] ss:$16 sps:$4 sm:$0xff] (!%p959_p10)  }
  0xe1   : > { %3484 = vmatprep.subr.bf16.mxu0 %v4911_v5  ;;  %3802 = vmatprep.subr.bf16.mxu1 %v4913_v6  ;;  %v4919_v10 = vld [vmem:[%s6405_s7 + $0x4c] ss:$16 sps:$4 sm:$0xff]   ;;  %v4921_v11 = vld [vmem:[%s6405_s7 + $0x40] ss:$16 sps:$4 sm:$0xff]   ;;  %v4922_v12 = vld [vmem:[%s6405_s7 + $0x48] ss:$16 sps:$4 sm:$0xff]  }
  0xe2   : > { %v4923_v13 = vld [vmem:[%s6405_s7 + $0x64] ss:$16 sps:$4 sm:$0xff]   ;;  %v4925_v14 = vld [vmem:[%s6405_s7 + $0x6c] ss:$16 sps:$4 sm:$0xff]   ;;  %v4927_v15 = vld [vmem:[%s6405_s7 + $0x60] ss:$16 sps:$4 sm:$0xff]  }
  0xe3   : > { %v4928_v16 = vld [vmem:[%s6405_s7 + $0x68] ss:$16 sps:$4 sm:$0xff]   ;;  %v4929_v17 = vld [vmem:[%s6405_s7 + $0x84] ss:$16 sps:$4 sm:$0xff]   ;;  %v4931_v18 = vld [vmem:[%s6405_s7 + $0x8c] ss:$16 sps:$4 sm:$0xff]  }
  0xe4   : > { %3485 = vmatpush1.bf16.msra.mxu0 %v4915_v7  ;;  %3803 = vmatpush1.bf16.msra.mxu1 %v4916_v8  ;;  %v4933_v19 = vld [vmem:[%s6405_s7 + $0x80] ss:$16 sps:$4 sm:$0xff]   ;;  %v4934_v20 = vld [vmem:[%s6405_s7 + $0x88] ss:$16 sps:$4 sm:$0xff]   ;;  %v4935_v21 = vld [vmem:[%s6405_s7 + $0xa4] ss:$16 sps:$4 sm:$0xff]  }
  0xe5   : > { %3486 = vmatprep.subr.bf16.mxu0 %v4917_v9  ;;  %3804 = vmatprep.subr.bf16.mxu1 %v4919_v10  ;;  %v4937_v22 = vld [vmem:[%s6405_s7 + $0xac] ss:$16 sps:$4 sm:$0xff]   ;;  %v4939_v23 = vld [vmem:[%s6405_s7 + $0xa0] ss:$16 sps:$4 sm:$0xff]   ;;  %v4940_v24 = vld [vmem:[%s6405_s7 + $0xa8] ss:$16 sps:$4 sm:$0xff]  }
  0xe6   : > { %v4941_v25 = vld [vmem:[%s6405_s7 + $0xc4] ss:$16 sps:$4 sm:$0xff]   ;;  %v4943_v26 = vld [vmem:[%s6405_s7 + $0xcc] ss:$16 sps:$4 sm:$0xff]   ;;  %v4945_v27 = vld [vmem:[%s6405_s7 + $0xc0] ss:$16 sps:$4 sm:$0xff]  }
  0xe7   : > { %v4946_v28 = vld [vmem:[%s6405_s7 + $0xc8] ss:$16 sps:$4 sm:$0xff]   ;;  %v4947_v29 = vld [vmem:[%s6405_s7 + $0xe4] ss:$16 sps:$4 sm:$0xff]   ;;  %v4949_v30 = vld [vmem:[%s6405_s7 + $0xec] ss:$16 sps:$4 sm:$0xff]  }
  0xe8   : > { %3487 = vmatpush1.bf16.msra.mxu0 %v4921_v11  ;;  %3805 = vmatpush1.bf16.msra.mxu1 %v4922_v12  ;;  %v4951_v31 = vld [vmem:[%s6405_s7 + $0xe0] ss:$16 sps:$4 sm:$0xff]   ;;  %v4952_v32 = vld [vmem:[%s6405_s7 + $0xe8] ss:$16 sps:$4 sm:$0xff]   ;;  %v4953_v33 = vld [vmem:[%s6405_s7 + $0x104] ss:$16 sps:$4 sm:$0xff]  }
  0xe9   : > { %3488 = vmatprep.subr.bf16.mxu0 %v4923_v13  ;;  %3806 = vmatprep.subr.bf16.mxu1 %v4925_v14  ;;  %v4955_v34 = vld [vmem:[%s6405_s7 + $0x10c] ss:$16 sps:$4 sm:$0xff]   ;;  %v4957_v35 = vld [vmem:[%s6405_s7 + $0x100] ss:$16 sps:$4 sm:$0xff]   ;;  %v4958_v36 = vld [vmem:[%s6405_s7 + $0x108] ss:$16 sps:$4 sm:$0xff]  }
  0xea   : > { %v4959_v37 = vld [vmem:[%s6405_s7 + $0x124] ss:$16 sps:$4 sm:$0xff]   ;;  %v4961_v38 = vld [vmem:[%s6405_s7 + $0x12c] ss:$16 sps:$4 sm:$0xff]   ;;  %v4963_v39 = vld [vmem:[%s6405_s7 + $0x120] ss:$16 sps:$4 sm:$0xff]  }
  0xeb   : > { %v4964_v40 = vld [vmem:[%s6405_s7 + $0x128] ss:$16 sps:$4 sm:$0xff]   ;;  %v4965_v41 = vld [vmem:[%s6405_s7 + $0x144] ss:$16 sps:$4 sm:$0xff]   ;;  %v4967_v42 = vld [vmem:[%s6405_s7 + $0x14c] ss:$16 sps:$4 sm:$0xff]  }
  0xec   : > { %3489 = vmatpush1.bf16.msra.mxu0 %v4927_v15  ;;  %3807 = vmatpush1.bf16.msra.mxu1 %v4928_v16  ;;  %v4969_v43 = vld [vmem:[%s6405_s7 + $0x140] ss:$16 sps:$4 sm:$0xff]   ;;  %v4970_v44 = vld [vmem:[%s6405_s7 + $0x148] ss:$16 sps:$4 sm:$0xff]   ;;  %v4971_v45 = vld [vmem:[%s6405_s7 + $0x164] ss:$16 sps:$4 sm:$0xff]  }
  0xed   : > { %3490 = vmatprep.subr.bf16.mxu0 %v4929_v17  ;;  %3808 = vmatprep.subr.bf16.mxu1 %v4931_v18  ;;  %v4973_v46 = vld [vmem:[%s6405_s7 + $0x16c] ss:$16 sps:$4 sm:$0xff]   ;;  %v4975_v47 = vld [vmem:[%s6405_s7 + $0x160] ss:$16 sps:$4 sm:$0xff]   ;;  %v4976_v48 = vld [vmem:[%s6405_s7 + $0x168] ss:$16 sps:$4 sm:$0xff]  }
  0xee   : > { %v4977_v49 = vld [vmem:[%s6405_s7 + $0x184] ss:$16 sps:$4 sm:$0xff]   ;;  %v4979_v50 = vld [vmem:[%s6405_s7 + $0x18c] ss:$16 sps:$4 sm:$0xff]   ;;  %v4981_v51 = vld [vmem:[%s6405_s7 + $0x180] ss:$16 sps:$4 sm:$0xff]  }
  0xef   : > { %v4982_v52 = vld [vmem:[%s6405_s7 + $0x188] ss:$16 sps:$4 sm:$0xff]   ;;  %v4983_v53 = vld [vmem:[%s6405_s7 + $0x1a4] ss:$16 sps:$4 sm:$0xff]   ;;  %v4985_v54 = vld [vmem:[%s6405_s7 + $0x1ac] ss:$16 sps:$4 sm:$0xff]  }
  0xf0   : > { %3491 = vmatpush1.bf16.msra.mxu0 %v4933_v19  ;;  %3809 = vmatpush1.bf16.msra.mxu1 %v4934_v20  ;;  %v4987_v55 = vld [vmem:[%s6405_s7 + $0x1a0] ss:$16 sps:$4 sm:$0xff]   ;;  %v4988_v56 = vld [vmem:[%s6405_s7 + $0x1a8] ss:$16 sps:$4 sm:$0xff]   ;;  %v4989_v57 = vld [vmem:[%s6405_s7 + $0x1c4] ss:$16 sps:$4 sm:$0xff]  }
  0xf1   : > { %3492 = vmatprep.subr.bf16.mxu0 %v4935_v21  ;;  %3810 = vmatprep.subr.bf16.mxu1 %v4937_v22  ;;  %v4991_v58 = vld [vmem:[%s6405_s7 + $0x1cc] ss:$16 sps:$4 sm:$0xff]   ;;  %v4993_v59 = vld [vmem:[%s6405_s7 + $0x1c0] ss:$16 sps:$4 sm:$0xff]   ;;  %v4994_v60 = vld [vmem:[%s6405_s7 + $0x1c8] ss:$16 sps:$4 sm:$0xff]  }
  0xf2   : > { %v4995_v61 = vld [vmem:[%s6405_s7 + $0x1e4] ss:$16 sps:$4 sm:$0xff]   ;;  %v4997_v62 = vld [vmem:[%s6405_s7 + $0x1ec] ss:$16 sps:$4 sm:$0xff]   ;;  %v4999_v63 = vld [vmem:[%s6405_s7 + $0x1e0] ss:$16 sps:$4 sm:$0xff]  }
  0xf3   : > { %v5000_v0 = vld [vmem:[%s6405_s7 + $0x1e8] ss:$16 sps:$4 sm:$0xff]   ;;  %v5006_v1 = vld [vmem:[%s6405_s7 + $0x204] ss:$16 sps:$4 sm:$0xff]   ;;  %v5009_v2 = vld [vmem:[%s6405_s7 + $0x20c] ss:$16 sps:$4 sm:$0xff]  }
  0xf4   : > { %3493 = vmatpush1.bf16.msra.mxu0 %v4939_v23  ;;  %3811 = vmatpush1.bf16.msra.mxu1 %v4940_v24  ;;  %v5001_v3 = vld [vmem:[%s6905_s0] ss:$48 sps:$4 sm:$0xff]   ;;  %v5007_v5 = vld [vmem:[%s6405_s7 + $0x208] ss:$16 sps:$4 sm:$0xff]   ;;  %v5012_v6 = vld [vmem:[%s6405_s7 + $0x224] ss:$16 sps:$4 sm:$0xff]  }
  0xf5   : > { %3494 = vmatprep.subr.bf16.mxu0 %v4941_v25  ;;  %3812 = vmatprep.subr.bf16.mxu1 %v4943_v26  ;;  %v5004_v4 = vld [vmem:[%s6405_s7 + $0x200] ss:$16 sps:$4 sm:$0xff]   ;;  %v5015_v7 = vld [vmem:[%s6405_s7 + $0x22c] ss:$16 sps:$4 sm:$0xff]   ;;  %v5088_v8 = vld [vmem:[%s6905_s0 + $0x64] ss:$48 sps:$4 sm:$0xff]  }
  0xf6   : > { %v5010_v9 = vld [vmem:[%s6405_s7 + $0x220] ss:$16 sps:$4 sm:$0xff]   ;;  %v5013_v10 = vld [vmem:[%s6405_s7 + $0x228] ss:$16 sps:$4 sm:$0xff]   ;;  %v5018_v11 = vld [vmem:[%s6405_s7 + $0x244] ss:$16 sps:$4 sm:$0xff]  }
  0xf7   : > { %v5021_v12 = vld [vmem:[%s6405_s7 + $0x24c] ss:$16 sps:$4 sm:$0xff]   ;;  %v5096_v13 = vld [vmem:[%s6905_s0 + $0x60] ss:$48 sps:$4 sm:$0xff]   ;;  %v5019_v15 = vld [vmem:[%s6405_s7 + $0x248] ss:$16 sps:$4 sm:$0xff]  }
  0xf8   : > { %3495 = vmatpush1.bf16.msra.mxu0 %v4945_v27  ;;  %3813 = vmatpush1.bf16.msra.mxu1 %v4946_v28  ;;  %v5016_v14 = vld [vmem:[%s6405_s7 + $0x240] ss:$16 sps:$4 sm:$0xff]   ;;  %v5024_v16 = vld [vmem:[%s6405_s7 + $0x264] ss:$16 sps:$4 sm:$0xff]   ;;  %v5027_v17 = vld [vmem:[%s6405_s7 + $0x26c] ss:$16 sps:$4 sm:$0xff]  }
  0xf9   : > { %3496 = vmatprep.subr.bf16.mxu0 %v4947_v29  ;;  %3814 = vmatprep.subr.bf16.mxu1 %v4949_v30  ;;  %v5022_v18 = vld [vmem:[%s6405_s7 + $0x260] ss:$16 sps:$4 sm:$0xff]   ;;  %v5025_v19 = vld [vmem:[%s6405_s7 + $0x268] ss:$16 sps:$4 sm:$0xff]   ;;  %v5030_v20 = vld [vmem:[%s6405_s7 + $0x284] ss:$16 sps:$4 sm:$0xff]  }
  0xfa   : > { %v5033_v21 = vld [vmem:[%s6405_s7 + $0x28c] ss:$16 sps:$4 sm:$0xff]   ;;  %v5028_v22 = vld [vmem:[%s6405_s7 + $0x280] ss:$16 sps:$4 sm:$0xff]   ;;  %v5031_v23 = vld [vmem:[%s6405_s7 + $0x288] ss:$16 sps:$4 sm:$0xff]  }
  0xfb   : > { %v5036_v24 = vld [vmem:[%s6405_s7 + $0x2a4] ss:$16 sps:$4 sm:$0xff]   ;;  %v5039_v25 = vld [vmem:[%s6405_s7 + $0x2ac] ss:$16 sps:$4 sm:$0xff]   ;;  %v5034_v26 = vld [vmem:[%s6405_s7 + $0x2a0] ss:$16 sps:$4 sm:$0xff]  }
  0xfc   : > { %3497 = vmatpush1.bf16.msra.mxu0 %v4951_v31  ;;  %3815 = vmatpush1.bf16.msra.mxu1 %v4952_v32  ;;  %v5037_v27 = vld [vmem:[%s6405_s7 + $0x2a8] ss:$16 sps:$4 sm:$0xff]   ;;  %v5042_v28 = vld [vmem:[%s6405_s7 + $0x2c4] ss:$16 sps:$4 sm:$0xff]   ;;  %v5045_v29 = vld [vmem:[%s6405_s7 + $0x2cc] ss:$16 sps:$4 sm:$0xff]  }
  0xfd   : > { %3498 = vmatprep.subr.bf16.mxu0 %v4953_v33  ;;  %3816 = vmatprep.subr.bf16.mxu1 %v4955_v34  ;;  %v5105_v30 = vld [vmem:[%s6905_s0 + $0xc] ss:$48 sps:$4 sm:$0xff]   ;;  %v5040_v31 = vld [vmem:[%s6405_s7 + $0x2c0] ss:$16 sps:$4 sm:$0xff]   ;;  %v5043_v32 = vld [vmem:[%s6405_s7 + $0x2c8] ss:$16 sps:$4 sm:$0xff]  }
  0xfe   : > { %v5048_v33 = vld [vmem:[%s6405_s7 + $0x2e4] ss:$16 sps:$4 sm:$0xff]   ;;  %v5051_v34 = vld [vmem:[%s6405_s7 + $0x2ec] ss:$16 sps:$4 sm:$0xff]   ;;  %s4766_s30 = sshll.u32 (%p5612_p6), %s5547_s14, 4 }
  0xff   : > { %s4202_s9 = scalar_lea.vmem (%p5612_p6), %s6908_s3, %s4766_s30 }
 0x100   : > { %3499 = vmatpush1.bf16.msra.mxu0 %v4957_v35  ;;  %3817 = vmatpush1.bf16.msra.mxu1 %v4958_v36  ;;  %v5046_v35 = vld [vmem:[%s6405_s7 + $0x2e0] ss:$16 sps:$4 sm:$0xff]   ;;  %v5049_v36 = vld [vmem:[%s6405_s7 + $0x2e8] ss:$16 sps:$4 sm:$0xff]  }
 0x101   : > { %3500 = vmatprep.subr.bf16.mxu0 %v4959_v37  ;;  %3818 = vmatprep.subr.bf16.mxu1 %v4961_v38  ;;  %v5054_v37 = vld [vmem:[%s6405_s7 + $0x304] ss:$16 sps:$4 sm:$0xff]   ;;  %v5057_v38 = vld [vmem:[%s6405_s7 + $0x30c] ss:$16 sps:$4 sm:$0xff]  }
 0x104   : > { %3501 = vmatpush1.bf16.msra.mxu0 %v4963_v39  ;;  %3819 = vmatpush1.bf16.msra.mxu1 %v4964_v40  ;;  %v5052_v39 = vld [vmem:[%s6405_s7 + $0x300] ss:$16 sps:$4 sm:$0xff]   ;;  %v5055_v40 = vld [vmem:[%s6405_s7 + $0x308] ss:$16 sps:$4 sm:$0xff]  }
 0x105   : > { %3502 = vmatprep.subr.bf16.mxu0 %v4965_v41  ;;  %3820 = vmatprep.subr.bf16.mxu1 %v4967_v42  ;;  %v5060_v41 = vld [vmem:[%s6405_s7 + $0x324] ss:$16 sps:$4 sm:$0xff]   ;;  %v5063_v42 = vld [vmem:[%s6405_s7 + $0x32c] ss:$16 sps:$4 sm:$0xff]  }
 0x108   : > { %3503 = vmatpush1.bf16.msra.mxu0 %v4969_v43  ;;  %3821 = vmatpush1.bf16.msra.mxu1 %v4970_v44  ;;  %v5058_v43 = vld [vmem:[%s6405_s7 + $0x320] ss:$16 sps:$4 sm:$0xff]   ;;  %v5061_v44 = vld [vmem:[%s6405_s7 + $0x328] ss:$16 sps:$4 sm:$0xff]  }
 0x109   : > { %3504 = vmatprep.subr.bf16.mxu0 %v4971_v45  ;;  %3822 = vmatprep.subr.bf16.mxu1 %v4973_v46  ;;  %v5066_v45 = vld [vmem:[%s6405_s7 + $0x344] ss:$16 sps:$4 sm:$0xff]   ;;  %v5069_v46 = vld [vmem:[%s6405_s7 + $0x34c] ss:$16 sps:$4 sm:$0xff]  }
 0x10c   : > { %3505 = vmatpush1.bf16.msra.mxu0 %v4975_v47  ;;  %3823 = vmatpush1.bf16.msra.mxu1 %v4976_v48  ;;  %v5064_v47 = vld [vmem:[%s6405_s7 + $0x340] ss:$16 sps:$4 sm:$0xff]   ;;  %v5067_v48 = vld [vmem:[%s6405_s7 + $0x348] ss:$16 sps:$4 sm:$0xff]  }
 0x10d   : > { %3506 = vmatprep.subr.bf16.mxu0 %v4977_v49  ;;  %3824 = vmatprep.subr.bf16.mxu1 %v4979_v50  ;;  %v5072_v49 = vld [vmem:[%s6405_s7 + $0x364] ss:$16 sps:$4 sm:$0xff]   ;;  %v5075_v50 = vld [vmem:[%s6405_s7 + $0x36c] ss:$16 sps:$4 sm:$0xff]  }
 0x110   : > { %3507 = vmatpush1.bf16.msra.mxu0 %v4981_v51  ;;  %3825 = vmatpush1.bf16.msra.mxu1 %v4982_v52  ;;  %v5070_v51 = vld [vmem:[%s6405_s7 + $0x360] ss:$16 sps:$4 sm:$0xff]   ;;  %v5073_v52 = vld [vmem:[%s6405_s7 + $0x368] ss:$16 sps:$4 sm:$0xff]  }
 0x111   : > { %3508 = vmatprep.subr.bf16.mxu0 %v4983_v53  ;;  %3826 = vmatprep.subr.bf16.mxu1 %v4985_v54  ;;  %v5078_v53 = vld [vmem:[%s6405_s7 + $0x384] ss:$16 sps:$4 sm:$0xff]   ;;  %v5081_v54 = vld [vmem:[%s6405_s7 + $0x38c] ss:$16 sps:$4 sm:$0xff]  }
 0x114   : > { %3509 = vmatpush1.bf16.msra.mxu0 %v4987_v55  ;;  %3827 = vmatpush1.bf16.msra.mxu1 %v4988_v56  ;;  %v5076_v55 = vld [vmem:[%s6405_s7 + $0x380] ss:$16 sps:$4 sm:$0xff]   ;;  %v5079_v56 = vld [vmem:[%s6405_s7 + $0x388] ss:$16 sps:$4 sm:$0xff]  }
 0x115   : > { %3510 = vmatprep.subr.bf16.mxu0 %v4989_v57  ;;  %3828 = vmatprep.subr.bf16.mxu1 %v4991_v58  ;;  %v5084_v57 = vld [vmem:[%s6405_s7 + $0x3a4] ss:$16 sps:$4 sm:$0xff]   ;;  %v5087_v58 = vld [vmem:[%s6405_s7 + $0x3ac] ss:$16 sps:$4 sm:$0xff]  }
 0x118   : > { %3511 = vmatpush1.bf16.msra.mxu0 %v4993_v59  ;;  %3829 = vmatpush1.bf16.msra.mxu1 %v4994_v60  ;;  %v5082_v59 = vld [vmem:[%s6405_s7 + $0x3a0] ss:$16 sps:$4 sm:$0xff]   ;;  %v5085_v60 = vld [vmem:[%s6405_s7 + $0x3a8] ss:$16 sps:$4 sm:$0xff]  }
 0x119   : > { %3512 = vmatprep.subr.bf16.mxu0 %v4995_v61  ;;  %3830 = vmatprep.subr.bf16.mxu1 %v4997_v62  ;;  %v5092_v61 = vld [vmem:[%s6405_s7 + $0x3c4] ss:$16 sps:$4 sm:$0xff]   ;;  %v5095_v62 = vld [vmem:[%s6405_s7 + $0x3cc] ss:$16 sps:$4 sm:$0xff]  }
 0x11c   : > { %3513 = vmatpush1.bf16.msra.mxu0 %v4999_v63  ;;  %3831 = vmatpush1.bf16.msra.mxu1 %v5000_v0  ;;  %v5090_v63 = vld [vmem:[%s6405_s7 + $0x3c0] ss:$16 sps:$4 sm:$0xff]   ;;  %v5093_v0 = vld [vmem:[%s6405_s7 + $0x3c8] ss:$16 sps:$4 sm:$0xff]  }
 0x11d   : > { %3535 = vmatprep.subr.bf16.mxu0 %v5006_v1  ;;  %3853 = vmatprep.subr.bf16.mxu1 %v5009_v2  ;;  %v5099_v1 = vld [vmem:[%s6405_s7 + $0x3e4] ss:$16 sps:$4 sm:$0xff]   ;;  %v5102_v2 = vld [vmem:[%s6405_s7 + $0x3ec] ss:$16 sps:$4 sm:$0xff]  }
 0x11f   : > { %3515 = vmatmul.mubr.bf16.vlgmr.msra.gmra.mrb[0].mxu0 %v5001_v3  ;;  %3833 = vmatmul.mubr.bf16.vlgmr.msra.gmra.mrb[0].mxu1 %v5001_v3  ;;  %v5097_v3 = vld [vmem:[%s6405_s7 + $0x3e0] ss:$16 sps:$4 sm:$0xff]  }
 0x120   : > { %3536 = vmatpush1.bf16.msra.mxu0 %v5004_v4  ;;  %3854 = vmatpush1.bf16.msra.mxu1 %v5007_v5  ;;  %v5100_v4 = vld [vmem:[%s6405_s7 + $0x3e8] ss:$16 sps:$4 sm:$0xff]   ;;  %v5108_v5 = vld [vmem:[%s6405_s7 + $0x404] ss:$16 sps:$4 sm:$0xff]  }
 0x121   : > { %3537 = vmatprep.subr.bf16.mxu0 %v5012_v6  ;;  %3855 = vmatprep.subr.bf16.mxu1 %v5015_v7  ;;  %v5111_v6 = vld [vmem:[%s6405_s7 + $0x40c] ss:$16 sps:$4 sm:$0xff]   ;;  %v5103_v7 = vld [vmem:[%s6905_s0 + $0x8] ss:$48 sps:$4 sm:$0xff]  }
 0x122   : > { %3524 = vmatprep.mubr.bf16.mxu0 %v5088_v8  ;;  %3842 = vmatprep.mubr.bf16.mxu1 %v5088_v8  ;;  %v5106_v8 = vld [vmem:[%s6405_s7 + $0x400] ss:$16 sps:$4 sm:$0xff]  }
 0x124   : > { %3538 = vmatpush1.bf16.msra.mxu0 %v5010_v9  ;;  %3856 = vmatpush1.bf16.msra.mxu1 %v5013_v10  ;;  %v5109_v9 = vld [vmem:[%s6405_s7 + $0x408] ss:$16 sps:$4 sm:$0xff]   ;;  %v5114_v10 = vld [vmem:[%s6405_s7 + $0x424] ss:$16 sps:$4 sm:$0xff]  }
 0x125   : > { %3539 = vmatprep.subr.bf16.mxu0 %v5018_v11  ;;  %3857 = vmatprep.subr.bf16.mxu1 %v5021_v12  ;;  %v5117_v11 = vld [vmem:[%s6405_s7 + $0x42c] ss:$16 sps:$4 sm:$0xff]  }
 0x126   : > { %v5190_v12 = vld [vmem:[%s6905_s0 + $0x6c] ss:$48 sps:$4 sm:$0xff]  }
 0x127   : > { %3525 = vmatmul.mubr.bf16.gmra.mrb[4].mxu0 %v5096_v13  ;;  %3843 = vmatmul.mubr.bf16.gmra.mrb[4].mxu1 %v5096_v13  ;;  %v5112_v13 = vld [vmem:[%s6405_s7 + $0x420] ss:$16 sps:$4 sm:$0xff]  }
 0x128   : > { %3540 = vmatpush1.bf16.msra.mxu0 %v5016_v14  ;;  %3858 = vmatpush1.bf16.msra.mxu1 %v5019_v15  ;;  %v5115_v14 = vld [vmem:[%s6405_s7 + $0x428] ss:$16 sps:$4 sm:$0xff]   ;;  %v5120_v15 = vld [vmem:[%s6405_s7 + $0x444] ss:$16 sps:$4 sm:$0xff]  }
 0x129   : > { %3541 = vmatprep.subr.bf16.mxu0 %v5024_v16  ;;  %3859 = vmatprep.subr.bf16.mxu1 %v5027_v17  ;;  %v5123_v16 = vld [vmem:[%s6405_s7 + $0x44c] ss:$16 sps:$4 sm:$0xff]   ;;  %v5118_v17 = vld [vmem:[%s6405_s7 + $0x440] ss:$16 sps:$4 sm:$0xff]  }
 0x12a   : > { %3567 = vmatprep.mubr.bf16.mxu0 %v5105_v30  ;;  %3885 = vmatprep.mubr.bf16.mxu1 %v5105_v30  ;;  %v5141_v30 = vld [vmem:[%s6405_s7 + $0x4ac] ss:$16 sps:$4 sm:$0xff]  }
 0x12c   : > { %3542 = vmatpush1.bf16.msra.mxu0 %v5022_v18  ;;  %3860 = vmatpush1.bf16.msra.mxu1 %v5025_v19  ;;  %v5121_v18 = vld [vmem:[%s6405_s7 + $0x448] ss:$16 sps:$4 sm:$0xff]  }
 0x12d   : > { %3543 = vmatprep.subr.bf16.mxu0 %v5030_v20  ;;  %3861 = vmatprep.subr.bf16.mxu1 %v5033_v21  ;;  %v5198_v19 = vld [vmem:[%s6905_s0 + $0x68] ss:$48 sps:$4 sm:$0xff]   ;;  %v5126_v20 = vld [vmem:[%s6405_s7 + $0x464] ss:$16 sps:$4 sm:$0xff]   ;;  %v5129_v21 = vld [vmem:[%s6405_s7 + $0x46c] ss:$16 sps:$4 sm:$0xff]  }
 0x130   : > { %3544 = vmatpush1.bf16.msra.mxu0 %v5028_v22  ;;  %3862 = vmatpush1.bf16.msra.mxu1 %v5031_v23  ;;  %v5207_v22 = vld [vmem:[%s6905_s0 + $0x14] ss:$48 sps:$4 sm:$0xff]   ;;  %v5124_v23 = vld [vmem:[%s6405_s7 + $0x460] ss:$16 sps:$4 sm:$0xff]  }
 0x131   : > { %3545 = vmatprep.subr.bf16.mxu0 %v5036_v24  ;;  %3863 = vmatprep.subr.bf16.mxu1 %v5039_v25  ;;  %v5127_v24 = vld [vmem:[%s6405_s7 + $0x468] ss:$16 sps:$4 sm:$0xff]   ;;  %v5132_v25 = vld [vmem:[%s6405_s7 + $0x484] ss:$16 sps:$4 sm:$0xff]  }
 0x134   : > { %3546 = vmatpush1.bf16.msra.mxu0 %v5034_v26  ;;  %3864 = vmatpush1.bf16.msra.mxu1 %v5037_v27  ;;  %v5135_v26 = vld [vmem:[%s6405_s7 + $0x48c] ss:$16 sps:$4 sm:$0xff]   ;;  %v5130_v27 = vld [vmem:[%s6405_s7 + $0x480] ss:$16 sps:$4 sm:$0xff]  }
 0x135   : > { %3547 = vmatprep.subr.bf16.mxu0 %v5042_v28  ;;  %3865 = vmatprep.subr.bf16.mxu1 %v5045_v29  ;;  %v5133_v28 = vld [vmem:[%s6405_s7 + $0x488] ss:$16 sps:$4 sm:$0xff]   ;;  %v5138_v29 = vld [vmem:[%s6405_s7 + $0x4a4] ss:$16 sps:$4 sm:$0xff]  }
 0x138   : > { %3548 = vmatpush1.bf16.msra.mxu0 %v5040_v31  ;;  %3866 = vmatpush1.bf16.msra.mxu1 %v5043_v32  ;;  %v5136_v31 = vld [vmem:[%s6405_s7 + $0x4a0] ss:$16 sps:$4 sm:$0xff]   ;;  %v5139_v32 = vld [vmem:[%s6405_s7 + $0x4a8] ss:$16 sps:$4 sm:$0xff]  }
 0x139   : > { %3549 = vmatprep.subr.bf16.mxu0 %v5048_v33  ;;  %3867 = vmatprep.subr.bf16.mxu1 %v5051_v34  ;;  %v5144_v33 = vld [vmem:[%s6405_s7 + $0x4c4] ss:$16 sps:$4 sm:$0xff]   ;;  %v5147_v34 = vld [vmem:[%s6405_s7 + $0x4cc] ss:$16 sps:$4 sm:$0xff]  }
 0x13c   : > { %3550 = vmatpush1.bf16.msra.mxu0 %v5046_v35  ;;  %3868 = vmatpush1.bf16.msra.mxu1 %v5049_v36  ;;  %v5142_v35 = vld [vmem:[%s6405_s7 + $0x4c0] ss:$16 sps:$4 sm:$0xff]   ;;  %v5145_v36 = vld [vmem:[%s6405_s7 + $0x4c8] ss:$16 sps:$4 sm:$0xff]  }
 0x13d   : > { %3551 = vmatprep.subr.bf16.mxu0 %v5054_v37  ;;  %3869 = vmatprep.subr.bf16.mxu1 %v5057_v38  ;;  %v5150_v37 = vld [vmem:[%s6405_s7 + $0x4e4] ss:$16 sps:$4 sm:$0xff]   ;;  %v5153_v38 = vld [vmem:[%s6405_s7 + $0x4ec] ss:$16 sps:$4 sm:$0xff]  }
 0x140   : > { %3552 = vmatpush1.bf16.msra.mxu0 %v5052_v39  ;;  %3870 = vmatpush1.bf16.msra.mxu1 %v5055_v40  ;;  %v5148_v39 = vld [vmem:[%s6405_s7 + $0x4e0] ss:$16 sps:$4 sm:$0xff]   ;;  %v5151_v40 = vld [vmem:[%s6405_s7 + $0x4e8] ss:$16 sps:$4 sm:$0xff]  }
 0x141   : > { %3553 = vmatprep.subr.bf16.mxu0 %v5060_v41  ;;  %3871 = vmatprep.subr.bf16.mxu1 %v5063_v42  ;;  %v5156_v41 = vld [vmem:[%s6405_s7 + $0x504] ss:$16 sps:$4 sm:$0xff]   ;;  %v5159_v42 = vld [vmem:[%s6405_s7 + $0x50c] ss:$16 sps:$4 sm:$0xff]  }
 0x144   : > { %3554 = vmatpush1.bf16.msra.mxu0 %v5058_v43  ;;  %3872 = vmatpush1.bf16.msra.mxu1 %v5061_v44  ;;  %v5154_v43 = vld [vmem:[%s6405_s7 + $0x500] ss:$16 sps:$4 sm:$0xff]   ;;  %v5157_v44 = vld [vmem:[%s6405_s7 + $0x508] ss:$16 sps:$4 sm:$0xff]  }
 0x145   : > { %3555 = vmatprep.subr.bf16.mxu0 %v5066_v45  ;;  %3873 = vmatprep.subr.bf16.mxu1 %v5069_v46  ;;  %v5162_v45 = vld [vmem:[%s6405_s7 + $0x524] ss:$16 sps:$4 sm:$0xff]   ;;  %v5165_v46 = vld [vmem:[%s6405_s7 + $0x52c] ss:$16 sps:$4 sm:$0xff]  }
 0x148   : > { %3556 = vmatpush1.bf16.msra.mxu0 %v5064_v47  ;;  %3874 = vmatpush1.bf16.msra.mxu1 %v5067_v48  ;;  %v5160_v47 = vld [vmem:[%s6405_s7 + $0x520] ss:$16 sps:$4 sm:$0xff]   ;;  %v5163_v48 = vld [vmem:[%s6405_s7 + $0x528] ss:$16 sps:$4 sm:$0xff]  }
 0x149   : > { %3557 = vmatprep.subr.bf16.mxu0 %v5072_v49  ;;  %3875 = vmatprep.subr.bf16.mxu1 %v5075_v50  ;;  %v5168_v49 = vld [vmem:[%s6405_s7 + $0x544] ss:$16 sps:$4 sm:$0xff]   ;;  %v5171_v50 = vld [vmem:[%s6405_s7 + $0x54c] ss:$16 sps:$4 sm:$0xff]  }
 0x14c   : > { %3558 = vmatpush1.bf16.msra.mxu0 %v5070_v51  ;;  %3876 = vmatpush1.bf16.msra.mxu1 %v5073_v52  ;;  %v5166_v51 = vld [vmem:[%s6405_s7 + $0x540] ss:$16 sps:$4 sm:$0xff]   ;;  %v5169_v52 = vld [vmem:[%s6405_s7 + $0x548] ss:$16 sps:$4 sm:$0xff]  }
 0x14d   : > { %3559 = vmatprep.subr.bf16.mxu0 %v5078_v53  ;;  %3877 = vmatprep.subr.bf16.mxu1 %v5081_v54  ;;  %v5174_v53 = vld [vmem:[%s6405_s7 + $0x564] ss:$16 sps:$4 sm:$0xff]   ;;  %v5177_v54 = vld [vmem:[%s6405_s7 + $0x56c] ss:$16 sps:$4 sm:$0xff]  }
 0x150   : > { %3560 = vmatpush1.bf16.msra.mxu0 %v5076_v55  ;;  %3878 = vmatpush1.bf16.msra.mxu1 %v5079_v56  ;;  %v5172_v55 = vld [vmem:[%s6405_s7 + $0x560] ss:$16 sps:$4 sm:$0xff]   ;;  %v5175_v56 = vld [vmem:[%s6405_s7 + $0x568] ss:$16 sps:$4 sm:$0xff]  }
 0x151   : > { %3561 = vmatprep.subr.bf16.mxu0 %v5084_v57  ;;  %3879 = vmatprep.subr.bf16.mxu1 %v5087_v58  ;;  %v5180_v57 = vld [vmem:[%s6405_s7 + $0x584] ss:$16 sps:$4 sm:$0xff]   ;;  %v5183_v58 = vld [vmem:[%s6405_s7 + $0x58c] ss:$16 sps:$4 sm:$0xff]  }
 0x154   : > { %3562 = vmatpush1.bf16.msra.mxu0 %v5082_v59  ;;  %3880 = vmatpush1.bf16.msra.mxu1 %v5085_v60  ;;  %v5178_v59 = vld [vmem:[%s6405_s7 + $0x580] ss:$16 sps:$4 sm:$0xff]   ;;  %v5181_v60 = vld [vmem:[%s6405_s7 + $0x588] ss:$16 sps:$4 sm:$0xff]  }
 0x155   : > { %3563 = vmatprep.subr.bf16.mxu0 %v5092_v61  ;;  %3881 = vmatprep.subr.bf16.mxu1 %v5095_v62  ;;  %v5186_v61 = vld [vmem:[%s6405_s7 + $0x5a4] ss:$16 sps:$4 sm:$0xff]   ;;  %v5189_v62 = vld [vmem:[%s6405_s7 + $0x5ac] ss:$16 sps:$4 sm:$0xff]  }
 0x158   : > { %3564 = vmatpush1.bf16.msra.mxu0 %v5090_v63  ;;  %3882 = vmatpush1.bf16.msra.mxu1 %v5093_v0  ;;  %v5184_v63 = vld [vmem:[%s6405_s7 + $0x5a0] ss:$16 sps:$4 sm:$0xff]   ;;  %v5187_v0 = vld [vmem:[%s6405_s7 + $0x5a8] ss:$16 sps:$4 sm:$0xff]  }
 0x159   : > { %3565 = vmatprep.subr.bf16.mxu0 %v5099_v1  ;;  %3883 = vmatprep.subr.bf16.mxu1 %v5102_v2  ;;  %v5194_v1 = vld [vmem:[%s6405_s7 + $0x5c4] ss:$16 sps:$4 sm:$0xff]   ;;  %v5197_v2 = vld [vmem:[%s6405_s7 + $0x5cc] ss:$16 sps:$4 sm:$0xff]  }
 0x15c   : > { %3566 = vmatpush1.bf16.msra.mxu0 %v5097_v3  ;;  %3884 = vmatpush1.bf16.msra.mxu1 %v5100_v4  ;;  %v5192_v3 = vld [vmem:[%s6405_s7 + $0x5c0] ss:$16 sps:$4 sm:$0xff]   ;;  %v5195_v4 = vld [vmem:[%s6405_s7 + $0x5c8] ss:$16 sps:$4 sm:$0xff]  }
 0x15d   : > { %3588 = vmatprep.subr.bf16.mxu0 %v5108_v5  ;;  %3906 = vmatprep.subr.bf16.mxu1 %v5111_v6  ;;  %v5201_v5 = vld [vmem:[%s6405_s7 + $0x5e4] ss:$16 sps:$4 sm:$0xff]   ;;  %v5204_v6 = vld [vmem:[%s6405_s7 + $0x5ec] ss:$16 sps:$4 sm:$0xff]  }
 0x15f   : > { %3568 = vmatmul.mubr.bf16.vlgmr.msra.gmra.mrb[0].mxu0 %v5103_v7  ;;  %3886 = vmatmul.mubr.bf16.vlgmr.msra.gmra.mrb[0].mxu1 %v5103_v7  ;;  %v5199_v7 = vld [vmem:[%s6405_s7 + $0x5e0] ss:$16 sps:$4 sm:$0xff]  }
 0x160   : > { %3589 = vmatpush1.bf16.msra.mxu0 %v5106_v8  ;;  %3907 = vmatpush1.bf16.msra.mxu1 %v5109_v9  ;;  %v5202_v8 = vld [vmem:[%s6405_s7 + $0x5e8] ss:$16 sps:$4 sm:$0xff]   ;;  %v5210_v9 = vld [vmem:[%s6405_s7 + $0x604] ss:$16 sps:$4 sm:$0xff]  }
 0x161   : > { %3590 = vmatprep.subr.bf16.mxu0 %v5114_v10  ;;  %3908 = vmatprep.subr.bf16.mxu1 %v5117_v11  ;;  %v5213_v10 = vld [vmem:[%s6405_s7 + $0x60c] ss:$16 sps:$4 sm:$0xff]   ;;  %v5205_v11 = vld [vmem:[%s6905_s0 + $0x10] ss:$48 sps:$4 sm:$0xff]  }
 0x162   : > { %3577 = vmatprep.mubr.bf16.mxu0 %v5190_v12  ;;  %3895 = vmatprep.mubr.bf16.mxu1 %v5190_v12  ;;  %v5208_v12 = vld [vmem:[%s6405_s7 + $0x600] ss:$16 sps:$4 sm:$0xff]  }
 0x164   : > { %3591 = vmatpush1.bf16.msra.mxu0 %v5112_v13  ;;  %3909 = vmatpush1.bf16.msra.mxu1 %v5115_v14  ;;  %v5211_v13 = vld [vmem:[%s6405_s7 + $0x608] ss:$16 sps:$4 sm:$0xff]   ;;  %v5216_v14 = vld [vmem:[%s6405_s7 + $0x624] ss:$16 sps:$4 sm:$0xff]  }
 0x165   : > { %3592 = vmatprep.subr.bf16.mxu0 %v5120_v15  ;;  %3910 = vmatprep.subr.bf16.mxu1 %v5123_v16  ;;  %v5219_v15 = vld [vmem:[%s6405_s7 + $0x62c] ss:$16 sps:$4 sm:$0xff]   ;;  %v5292_v16 = vld [vmem:[%s6905_s0 + $0x74] ss:$48 sps:$4 sm:$0xff]  }
 0x167   : > { %3578 = vmatmul.mubr.bf16.gmra.mrb[4].mxu0 %v5198_v19  ;;  %3896 = vmatmul.mubr.bf16.gmra.mrb[4].mxu1 %v5198_v19  ;;  %v5222_v19 = vld [vmem:[%s6405_s7 + $0x644] ss:$16 sps:$4 sm:$0xff]  }
 0x168   : > { %3593 = vmatpush1.bf16.msra.mxu0 %v5118_v17  ;;  %3911 = vmatpush1.bf16.msra.mxu1 %v5121_v18  ;;  %v5214_v17 = vld [vmem:[%s6405_s7 + $0x620] ss:$16 sps:$4 sm:$0xff]   ;;  %v5217_v18 = vld [vmem:[%s6405_s7 + $0x628] ss:$16 sps:$4 sm:$0xff]  }
 0x169   : > { %3594 = vmatprep.subr.bf16.mxu0 %v5126_v20  ;;  %3912 = vmatprep.subr.bf16.mxu1 %v5129_v21  ;;  %v5225_v20 = vld [vmem:[%s6405_s7 + $0x64c] ss:$16 sps:$4 sm:$0xff]   ;;  %v5220_v21 = vld [vmem:[%s6405_s7 + $0x640] ss:$16 sps:$4 sm:$0xff]  }
 0x16a   : > { %3620 = vmatprep.mubr.bf16.mxu0 %v5207_v22  ;;  %3938 = vmatprep.mubr.bf16.mxu1 %v5207_v22  ;;  %v5223_v22 = vld [vmem:[%s6405_s7 + $0x648] ss:$16 sps:$4 sm:$0xff]  }
 0x16c   : > { %3595 = vmatpush1.bf16.msra.mxu0 %v5124_v23  ;;  %3913 = vmatpush1.bf16.msra.mxu1 %v5127_v24  ;;  %v5300_v23 = vld [vmem:[%s6905_s0 + $0x70] ss:$48 sps:$4 sm:$0xff]   ;;  %v5228_v24 = vld [vmem:[%s6405_s7 + $0x664] ss:$16 sps:$4 sm:$0xff]  }
 0x16d   : > { %3596 = vmatprep.subr.bf16.mxu0 %v5132_v25  ;;  %3914 = vmatprep.subr.bf16.mxu1 %v5135_v26  ;;  %v5231_v25 = vld [vmem:[%s6405_s7 + $0x66c] ss:$16 sps:$4 sm:$0xff]  }
 0x16e   : > { %v5309_v26 = vld [vmem:[%s6905_s0 + $0x1c] ss:$48 sps:$4 sm:$0xff]  }
 0x170   : > { %3597 = vmatpush1.bf16.msra.mxu0 %v5130_v27  ;;  %3915 = vmatpush1.bf16.msra.mxu1 %v5133_v28  ;;  %v5226_v27 = vld [vmem:[%s6405_s7 + $0x660] ss:$16 sps:$4 sm:$0xff]   ;;  %v5229_v28 = vld [vmem:[%s6405_s7 + $0x668] ss:$16 sps:$4 sm:$0xff]  }
 0x171   : > { %3598 = vmatprep.subr.bf16.mxu0 %v5138_v29  ;;  %3916 = vmatprep.subr.bf16.mxu1 %v5141_v30  ;;  %v5234_v29 = vld [vmem:[%s6405_s7 + $0x684] ss:$16 sps:$4 sm:$0xff]   ;;  %v5237_v30 = vld [vmem:[%s6405_s7 + $0x68c] ss:$16 sps:$4 sm:$0xff]  }
 0x174   : > { %3599 = vmatpush1.bf16.msra.mxu0 %v5136_v31  ;;  %3917 = vmatpush1.bf16.msra.mxu1 %v5139_v32  ;;  %v5232_v31 = vld [vmem:[%s6405_s7 + $0x680] ss:$16 sps:$4 sm:$0xff]   ;;  %v5235_v32 = vld [vmem:[%s6405_s7 + $0x688] ss:$16 sps:$4 sm:$0xff]  }
 0x175   : > { %3600 = vmatprep.subr.bf16.mxu0 %v5144_v33  ;;  %3918 = vmatprep.subr.bf16.mxu1 %v5147_v34  ;;  %v5240_v33 = vld [vmem:[%s6405_s7 + $0x6a4] ss:$16 sps:$4 sm:$0xff]   ;;  %v5243_v34 = vld [vmem:[%s6405_s7 + $0x6ac] ss:$16 sps:$4 sm:$0xff]  }
 0x178   : > { %3601 = vmatpush1.bf16.msra.mxu0 %v5142_v35  ;;  %3919 = vmatpush1.bf16.msra.mxu1 %v5145_v36  ;;  %v5238_v35 = vld [vmem:[%s6405_s7 + $0x6a0] ss:$16 sps:$4 sm:$0xff]   ;;  %v5241_v36 = vld [vmem:[%s6405_s7 + $0x6a8] ss:$16 sps:$4 sm:$0xff]  }
 0x179   : > { %3602 = vmatprep.subr.bf16.mxu0 %v5150_v37  ;;  %3920 = vmatprep.subr.bf16.mxu1 %v5153_v38  ;;  %v5246_v37 = vld [vmem:[%s6405_s7 + $0x6c4] ss:$16 sps:$4 sm:$0xff]   ;;  %v5249_v38 = vld [vmem:[%s6405_s7 + $0x6cc] ss:$16 sps:$4 sm:$0xff]  }
 0x17c   : > { %3603 = vmatpush1.bf16.msra.mxu0 %v5148_v39  ;;  %3921 = vmatpush1.bf16.msra.mxu1 %v5151_v40  ;;  %v5244_v39 = vld [vmem:[%s6405_s7 + $0x6c0] ss:$16 sps:$4 sm:$0xff]   ;;  %v5247_v40 = vld [vmem:[%s6405_s7 + $0x6c8] ss:$16 sps:$4 sm:$0xff]  }
 0x17d   : > { %3604 = vmatprep.subr.bf16.mxu0 %v5156_v41  ;;  %3922 = vmatprep.subr.bf16.mxu1 %v5159_v42  ;;  %v5252_v41 = vld [vmem:[%s6405_s7 + $0x6e4] ss:$16 sps:$4 sm:$0xff]   ;;  %v5255_v42 = vld [vmem:[%s6405_s7 + $0x6ec] ss:$16 sps:$4 sm:$0xff]  }
 0x180   : > { %3605 = vmatpush1.bf16.msra.mxu0 %v5154_v43  ;;  %3923 = vmatpush1.bf16.msra.mxu1 %v5157_v44  ;;  %v5250_v43 = vld [vmem:[%s6405_s7 + $0x6e0] ss:$16 sps:$4 sm:$0xff]   ;;  %v5253_v44 = vld [vmem:[%s6405_s7 + $0x6e8] ss:$16 sps:$4 sm:$0xff]  }
 0x181   : > { %3606 = vmatprep.subr.bf16.mxu0 %v5162_v45  ;;  %3924 = vmatprep.subr.bf16.mxu1 %v5165_v46  ;;  %v5258_v45 = vld [vmem:[%s6405_s7 + $0x704] ss:$16 sps:$4 sm:$0xff]   ;;  %v5261_v46 = vld [vmem:[%s6405_s7 + $0x70c] ss:$16 sps:$4 sm:$0xff]  }
 0x184   : > { %3607 = vmatpush1.bf16.msra.mxu0 %v5160_v47  ;;  %3925 = vmatpush1.bf16.msra.mxu1 %v5163_v48  ;;  %v5256_v47 = vld [vmem:[%s6405_s7 + $0x700] ss:$16 sps:$4 sm:$0xff]   ;;  %v5259_v48 = vld [vmem:[%s6405_s7 + $0x708] ss:$16 sps:$4 sm:$0xff]  }
 0x185   : > { %3608 = vmatprep.subr.bf16.mxu0 %v5168_v49  ;;  %3926 = vmatprep.subr.bf16.mxu1 %v5171_v50  ;;  %v5264_v49 = vld [vmem:[%s6405_s7 + $0x724] ss:$16 sps:$4 sm:$0xff]   ;;  %v5267_v50 = vld [vmem:[%s6405_s7 + $0x72c] ss:$16 sps:$4 sm:$0xff]  }
 0x188   : > { %3609 = vmatpush1.bf16.msra.mxu0 %v5166_v51  ;;  %3927 = vmatpush1.bf16.msra.mxu1 %v5169_v52  ;;  %v5262_v51 = vld [vmem:[%s6405_s7 + $0x720] ss:$16 sps:$4 sm:$0xff]   ;;  %v5265_v52 = vld [vmem:[%s6405_s7 + $0x728] ss:$16 sps:$4 sm:$0xff]  }
 0x189   : > { %3610 = vmatprep.subr.bf16.mxu0 %v5174_v53  ;;  %3928 = vmatprep.subr.bf16.mxu1 %v5177_v54  ;;  %v5270_v53 = vld [vmem:[%s6405_s7 + $0x744] ss:$16 sps:$4 sm:$0xff]   ;;  %v5273_v54 = vld [vmem:[%s6405_s7 + $0x74c] ss:$16 sps:$4 sm:$0xff]  }
 0x18c   : > { %3611 = vmatpush1.bf16.msra.mxu0 %v5172_v55  ;;  %3929 = vmatpush1.bf16.msra.mxu1 %v5175_v56  ;;  %v5268_v55 = vld [vmem:[%s6405_s7 + $0x740] ss:$16 sps:$4 sm:$0xff]   ;;  %v5271_v56 = vld [vmem:[%s6405_s7 + $0x748] ss:$16 sps:$4 sm:$0xff]  }
 0x18d   : > { %3612 = vmatprep.subr.bf16.mxu0 %v5180_v57  ;;  %3930 = vmatprep.subr.bf16.mxu1 %v5183_v58  ;;  %v5276_v57 = vld [vmem:[%s6405_s7 + $0x764] ss:$16 sps:$4 sm:$0xff]   ;;  %v5279_v58 = vld [vmem:[%s6405_s7 + $0x76c] ss:$16 sps:$4 sm:$0xff]  }
 0x190   : > { %3613 = vmatpush1.bf16.msra.mxu0 %v5178_v59  ;;  %3931 = vmatpush1.bf16.msra.mxu1 %v5181_v60  ;;  %v5274_v59 = vld [vmem:[%s6405_s7 + $0x760] ss:$16 sps:$4 sm:$0xff]   ;;  %v5277_v60 = vld [vmem:[%s6405_s7 + $0x768] ss:$16 sps:$4 sm:$0xff]  }
 0x191   : > { %3614 = vmatprep.subr.bf16.mxu0 %v5186_v61  ;;  %3932 = vmatprep.subr.bf16.mxu1 %v5189_v62  ;;  %v5282_v61 = vld [vmem:[%s6405_s7 + $0x784] ss:$16 sps:$4 sm:$0xff]   ;;  %v5285_v62 = vld [vmem:[%s6405_s7 + $0x78c] ss:$16 sps:$4 sm:$0xff]  }
 0x194   : > { %3615 = vmatpush1.bf16.msra.mxu0 %v5184_v63  ;;  %3933 = vmatpush1.bf16.msra.mxu1 %v5187_v0  ;;  %v5280_v63 = vld [vmem:[%s6405_s7 + $0x780] ss:$16 sps:$4 sm:$0xff]   ;;  %v5283_v0 = vld [vmem:[%s6405_s7 + $0x788] ss:$16 sps:$4 sm:$0xff]  }
 0x195   : > { %3616 = vmatprep.subr.bf16.mxu0 %v5194_v1  ;;  %3934 = vmatprep.subr.bf16.mxu1 %v5197_v2  ;;  %v5288_v1 = vld [vmem:[%s6405_s7 + $0x7a4] ss:$16 sps:$4 sm:$0xff]   ;;  %v5291_v2 = vld [vmem:[%s6405_s7 + $0x7ac] ss:$16 sps:$4 sm:$0xff]  }
 0x198   : > { %3617 = vmatpush1.bf16.msra.mxu0 %v5192_v3  ;;  %3935 = vmatpush1.bf16.msra.mxu1 %v5195_v4  ;;  %v5286_v3 = vld [vmem:[%s6405_s7 + $0x7a0] ss:$16 sps:$4 sm:$0xff]   ;;  %v5289_v4 = vld [vmem:[%s6405_s7 + $0x7a8] ss:$16 sps:$4 sm:$0xff]  }
 0x199   : > { %3618 = vmatprep.subr.bf16.mxu0 %v5201_v5  ;;  %3936 = vmatprep.subr.bf16.mxu1 %v5204_v6  ;;  %v5296_v5 = vld [vmem:[%s6405_s7 + $0x7c4] ss:$16 sps:$4 sm:$0xff]   ;;  %v5299_v6 = vld [vmem:[%s6405_s7 + $0x7cc] ss:$16 sps:$4 sm:$0xff]  }
 0x19c   : > { %3619 = vmatpush1.bf16.msra.mxu0 %v5199_v7  ;;  %3937 = vmatpush1.bf16.msra.mxu1 %v5202_v8  ;;  %v5294_v7 = vld [vmem:[%s6405_s7 + $0x7c0] ss:$16 sps:$4 sm:$0xff]   ;;  %v5297_v8 = vld [vmem:[%s6405_s7 + $0x7c8] ss:$16 sps:$4 sm:$0xff]  }
 0x19d   : > { %3641 = vmatprep.subr.bf16.mxu0 %v5210_v9  ;;  %3959 = vmatprep.subr.bf16.mxu1 %v5213_v10  ;;  %v5303_v9 = vld [vmem:[%s6405_s7 + $0x7e4] ss:$16 sps:$4 sm:$0xff]   ;;  %v5306_v10 = vld [vmem:[%s6405_s7 + $0x7ec] ss:$16 sps:$4 sm:$0xff]  }
 0x19f   : > { %3621 = vmatmul.mubr.bf16.vlgmr.msra.gmra.mrb[0].mxu0 %v5205_v11  ;;  %3939 = vmatmul.mubr.bf16.vlgmr.msra.gmra.mrb[0].mxu1 %v5205_v11  ;;  %v5301_v11 = vld [vmem:[%s6405_s7 + $0x7e0] ss:$16 sps:$4 sm:$0xff]  }
 0x1a0   : > { %3642 = vmatpush1.bf16.msra.mxu0 %v5208_v12  ;;  %3960 = vmatpush1.bf16.msra.mxu1 %v5211_v13  ;;  %v5304_v12 = vld [vmem:[%s6405_s7 + $0x7e8] ss:$16 sps:$4 sm:$0xff]   ;;  %v5312_v13 = vld [vmem:[%s6405_s7 + $0x804] ss:$16 sps:$4 sm:$0xff]  }
 0x1a1   : > { %3643 = vmatprep.subr.bf16.mxu0 %v5216_v14  ;;  %3961 = vmatprep.subr.bf16.mxu1 %v5219_v15  ;;  %v5315_v14 = vld [vmem:[%s6405_s7 + $0x80c] ss:$16 sps:$4 sm:$0xff]   ;;  %v5307_v15 = vld [vmem:[%s6905_s0 + $0x18] ss:$48 sps:$4 sm:$0xff]  }
 0x1a2   : > { %3630 = vmatprep.mubr.bf16.mxu0 %v5292_v16  ;;  %3948 = vmatprep.mubr.bf16.mxu1 %v5292_v16  ;;  %v5310_v16 = vld [vmem:[%s6405_s7 + $0x800] ss:$16 sps:$4 sm:$0xff]  }
 0x1a4   : > { %3644 = vmatpush1.bf16.msra.mxu0 %v5214_v17  ;;  %3962 = vmatpush1.bf16.msra.mxu1 %v5217_v18  ;;  %v5313_v17 = vld [vmem:[%s6405_s7 + $0x808] ss:$16 sps:$4 sm:$0xff]   ;;  %v5318_v18 = vld [vmem:[%s6405_s7 + $0x824] ss:$16 sps:$4 sm:$0xff]  }
 0x1a5   : > { %3645 = vmatprep.subr.bf16.mxu0 %v5222_v19  ;;  %3963 = vmatprep.subr.bf16.mxu1 %v5225_v20  ;;  %v5321_v19 = vld [vmem:[%s6405_s7 + $0x82c] ss:$16 sps:$4 sm:$0xff]  }
 0x1a6   : > { %v5394_v20 = vld [vmem:[%s6905_s0 + $0x7c] ss:$48 sps:$4 sm:$0xff]  }
 0x1a7   : > { %3631 = vmatmul.mubr.bf16.gmra.mrb[4].mxu0 %v5300_v23  ;;  %3949 = vmatmul.mubr.bf16.gmra.mrb[4].mxu1 %v5300_v23  ;;  %v5324_v23 = vld [vmem:[%s6405_s7 + $0x844] ss:$16 sps:$4 sm:$0xff]  }
 0x1a8   : > { %3646 = vmatpush1.bf16.msra.mxu0 %v5220_v21  ;;  %3964 = vmatpush1.bf16.msra.mxu1 %v5223_v22  ;;  %v5316_v21 = vld [vmem:[%s6405_s7 + $0x820] ss:$16 sps:$4 sm:$0xff]   ;;  %v5319_v22 = vld [vmem:[%s6405_s7 + $0x828] ss:$16 sps:$4 sm:$0xff]  }
 0x1a9   : > { %3647 = vmatprep.subr.bf16.mxu0 %v5228_v24  ;;  %3965 = vmatprep.subr.bf16.mxu1 %v5231_v25  ;;  %v5327_v24 = vld [vmem:[%s6405_s7 + $0x84c] ss:$16 sps:$4 sm:$0xff]   ;;  %v5322_v25 = vld [vmem:[%s6405_s7 + $0x840] ss:$16 sps:$4 sm:$0xff]  }
 0x1aa   : > { %3673 = vmatprep.mubr.bf16.mxu0 %v5309_v26  ;;  %3991 = vmatprep.mubr.bf16.mxu1 %v5309_v26  ;;  %v5325_v26 = vld [vmem:[%s6405_s7 + $0x848] ss:$16 sps:$4 sm:$0xff]  }
 0x1ac   : > { %3648 = vmatpush1.bf16.msra.mxu0 %v5226_v27  ;;  %3966 = vmatpush1.bf16.msra.mxu1 %v5229_v28  ;;  %v5402_v27 = vld [vmem:[%s6905_s0 + $0x78] ss:$48 sps:$4 sm:$0xff]   ;;  %v5330_v28 = vld [vmem:[%s6405_s7 + $0x864] ss:$16 sps:$4 sm:$0xff]  }
 0x1ad   : > { %3649 = vmatprep.subr.bf16.mxu0 %v5234_v29  ;;  %3967 = vmatprep.subr.bf16.mxu1 %v5237_v30  ;;  %v5333_v29 = vld [vmem:[%s6405_s7 + $0x86c] ss:$16 sps:$4 sm:$0xff]   ;;  %v5411_v30 = vld [vmem:[%s6905_s0 + $0x24] ss:$48 sps:$4 sm:$0xff]  }
 0x1b0   : > { %3650 = vmatpush1.bf16.msra.mxu0 %v5232_v31  ;;  %3968 = vmatpush1.bf16.msra.mxu1 %v5235_v32  ;;  %v5328_v31 = vld [vmem:[%s6405_s7 + $0x860] ss:$16 sps:$4 sm:$0xff]   ;;  %v5331_v32 = vld [vmem:[%s6405_s7 + $0x868] ss:$16 sps:$4 sm:$0xff]  }
 0x1b1   : > { %3651 = vmatprep.subr.bf16.mxu0 %v5240_v33  ;;  %3969 = vmatprep.subr.bf16.mxu1 %v5243_v34  ;;  %v5336_v33 = vld [vmem:[%s6405_s7 + $0x884] ss:$16 sps:$4 sm:$0xff]   ;;  %v5339_v34 = vld [vmem:[%s6405_s7 + $0x88c] ss:$16 sps:$4 sm:$0xff]  }
 0x1b4   : > { %3652 = vmatpush1.bf16.msra.mxu0 %v5238_v35  ;;  %3970 = vmatpush1.bf16.msra.mxu1 %v5241_v36  ;;  %v5334_v35 = vld [vmem:[%s6405_s7 + $0x880] ss:$16 sps:$4 sm:$0xff]   ;;  %v5337_v36 = vld [vmem:[%s6405_s7 + $0x888] ss:$16 sps:$4 sm:$0xff]  }
 0x1b5   : > { %3653 = vmatprep.subr.bf16.mxu0 %v5246_v37  ;;  %3971 = vmatprep.subr.bf16.mxu1 %v5249_v38  ;;  %v5342_v37 = vld [vmem:[%s6405_s7 + $0x8a4] ss:$16 sps:$4 sm:$0xff]   ;;  %v5345_v38 = vld [vmem:[%s6405_s7 + $0x8ac] ss:$16 sps:$4 sm:$0xff]  }
 0x1b8   : > { %3654 = vmatpush1.bf16.msra.mxu0 %v5244_v39  ;;  %3972 = vmatpush1.bf16.msra.mxu1 %v5247_v40  ;;  %v5340_v39 = vld [vmem:[%s6405_s7 + $0x8a0] ss:$16 sps:$4 sm:$0xff]   ;;  %v5343_v40 = vld [vmem:[%s6405_s7 + $0x8a8] ss:$16 sps:$4 sm:$0xff]  }
 0x1b9   : > { %3655 = vmatprep.subr.bf16.mxu0 %v5252_v41  ;;  %3973 = vmatprep.subr.bf16.mxu1 %v5255_v42  ;;  %v5348_v41 = vld [vmem:[%s6405_s7 + $0x8c4] ss:$16 sps:$4 sm:$0xff]   ;;  %v5351_v42 = vld [vmem:[%s6405_s7 + $0x8cc] ss:$16 sps:$4 sm:$0xff]  }
 0x1bc   : > { %3656 = vmatpush1.bf16.msra.mxu0 %v5250_v43  ;;  %3974 = vmatpush1.bf16.msra.mxu1 %v5253_v44  ;;  %v5346_v43 = vld [vmem:[%s6405_s7 + $0x8c0] ss:$16 sps:$4 sm:$0xff]   ;;  %v5349_v44 = vld [vmem:[%s6405_s7 + $0x8c8] ss:$16 sps:$4 sm:$0xff]  }
 0x1bd   : > { %3657 = vmatprep.subr.bf16.mxu0 %v5258_v45  ;;  %3975 = vmatprep.subr.bf16.mxu1 %v5261_v46  ;;  %v5354_v45 = vld [vmem:[%s6405_s7 + $0x8e4] ss:$16 sps:$4 sm:$0xff]   ;;  %v5357_v46 = vld [vmem:[%s6405_s7 + $0x8ec] ss:$16 sps:$4 sm:$0xff]  }
 0x1c0   : > { %3658 = vmatpush1.bf16.msra.mxu0 %v5256_v47  ;;  %3976 = vmatpush1.bf16.msra.mxu1 %v5259_v48  ;;  %v5352_v47 = vld [vmem:[%s6405_s7 + $0x8e0] ss:$16 sps:$4 sm:$0xff]   ;;  %v5355_v48 = vld [vmem:[%s6405_s7 + $0x8e8] ss:$16 sps:$4 sm:$0xff]  }
 0x1c1   : > { %3659 = vmatprep.subr.bf16.mxu0 %v5264_v49  ;;  %3977 = vmatprep.subr.bf16.mxu1 %v5267_v50  ;;  %v5360_v49 = vld [vmem:[%s6405_s7 + $0x904] ss:$16 sps:$4 sm:$0xff]   ;;  %v5363_v50 = vld [vmem:[%s6405_s7 + $0x90c] ss:$16 sps:$4 sm:$0xff]  }
 0x1c4   : > { %3660 = vmatpush1.bf16.msra.mxu0 %v5262_v51  ;;  %3978 = vmatpush1.bf16.msra.mxu1 %v5265_v52  ;;  %v5358_v51 = vld [vmem:[%s6405_s7 + $0x900] ss:$16 sps:$4 sm:$0xff]   ;;  %v5361_v52 = vld [vmem:[%s6405_s7 + $0x908] ss:$16 sps:$4 sm:$0xff]  }
 0x1c5   : > { %3661 = vmatprep.subr.bf16.mxu0 %v5270_v53  ;;  %3979 = vmatprep.subr.bf16.mxu1 %v5273_v54  ;;  %v5366_v53 = vld [vmem:[%s6405_s7 + $0x924] ss:$16 sps:$4 sm:$0xff]   ;;  %v5369_v54 = vld [vmem:[%s6405_s7 + $0x92c] ss:$16 sps:$4 sm:$0xff]  }
 0x1c8   : > { %3662 = vmatpush1.bf16.msra.mxu0 %v5268_v55  ;;  %3980 = vmatpush1.bf16.msra.mxu1 %v5271_v56  ;;  %v5364_v55 = vld [vmem:[%s6405_s7 + $0x920] ss:$16 sps:$4 sm:$0xff]   ;;  %v5367_v56 = vld [vmem:[%s6405_s7 + $0x928] ss:$16 sps:$4 sm:$0xff]  }
 0x1c9   : > { %3663 = vmatprep.subr.bf16.mxu0 %v5276_v57  ;;  %3981 = vmatprep.subr.bf16.mxu1 %v5279_v58  ;;  %v5372_v57 = vld [vmem:[%s6405_s7 + $0x944] ss:$16 sps:$4 sm:$0xff]   ;;  %v5375_v58 = vld [vmem:[%s6405_s7 + $0x94c] ss:$16 sps:$4 sm:$0xff]  }
 0x1cc   : > { %3664 = vmatpush1.bf16.msra.mxu0 %v5274_v59  ;;  %3982 = vmatpush1.bf16.msra.mxu1 %v5277_v60  ;;  %v5370_v59 = vld [vmem:[%s6405_s7 + $0x940] ss:$16 sps:$4 sm:$0xff]   ;;  %v5373_v60 = vld [vmem:[%s6405_s7 + $0x948] ss:$16 sps:$4 sm:$0xff]  }
 0x1cd   : > { %3665 = vmatprep.subr.bf16.mxu0 %v5282_v61  ;;  %3983 = vmatprep.subr.bf16.mxu1 %v5285_v62  ;;  %v5378_v61 = vld [vmem:[%s6405_s7 + $0x964] ss:$16 sps:$4 sm:$0xff]   ;;  %v5381_v62 = vld [vmem:[%s6405_s7 + $0x96c] ss:$16 sps:$4 sm:$0xff]  }
 0x1d0   : > { %3666 = vmatpush1.bf16.msra.mxu0 %v5280_v63  ;;  %3984 = vmatpush1.bf16.msra.mxu1 %v5283_v0  ;;  %v5376_v63 = vld [vmem:[%s6405_s7 + $0x960] ss:$16 sps:$4 sm:$0xff]   ;;  %v5379_v0 = vld [vmem:[%s6405_s7 + $0x968] ss:$16 sps:$4 sm:$0xff]  }
 0x1d1   : > { %3667 = vmatprep.subr.bf16.mxu0 %v5288_v1  ;;  %3985 = vmatprep.subr.bf16.mxu1 %v5291_v2  ;;  %v5384_v1 = vld [vmem:[%s6405_s7 + $0x984] ss:$16 sps:$4 sm:$0xff]   ;;  %v5387_v2 = vld [vmem:[%s6405_s7 + $0x98c] ss:$16 sps:$4 sm:$0xff]  }
 0x1d4   : > { %3668 = vmatpush1.bf16.msra.mxu0 %v5286_v3  ;;  %3986 = vmatpush1.bf16.msra.mxu1 %v5289_v4  ;;  %v5382_v3 = vld [vmem:[%s6405_s7 + $0x980] ss:$16 sps:$4 sm:$0xff]   ;;  %v5385_v4 = vld [vmem:[%s6405_s7 + $0x988] ss:$16 sps:$4 sm:$0xff]  }
 0x1d5   : > { %3669 = vmatprep.subr.bf16.mxu0 %v5296_v5  ;;  %3987 = vmatprep.subr.bf16.mxu1 %v5299_v6  ;;  %v5390_v5 = vld [vmem:[%s6405_s7 + $0x9a4] ss:$16 sps:$4 sm:$0xff]   ;;  %v5393_v6 = vld [vmem:[%s6405_s7 + $0x9ac] ss:$16 sps:$4 sm:$0xff]  }
 0x1d8   : > { %3670 = vmatpush1.bf16.msra.mxu0 %v5294_v7  ;;  %3988 = vmatpush1.bf16.msra.mxu1 %v5297_v8  ;;  %v5388_v7 = vld [vmem:[%s6405_s7 + $0x9a0] ss:$16 sps:$4 sm:$0xff]   ;;  %v5391_v8 = vld [vmem:[%s6405_s7 + $0x9a8] ss:$16 sps:$4 sm:$0xff]  }
 0x1d9   : > { %3671 = vmatprep.subr.bf16.mxu0 %v5303_v9  ;;  %3989 = vmatprep.subr.bf16.mxu1 %v5306_v10  ;;  %v5398_v9 = vld [vmem:[%s6405_s7 + $0x9c4] ss:$16 sps:$4 sm:$0xff]   ;;  %v5401_v10 = vld [vmem:[%s6405_s7 + $0x9cc] ss:$16 sps:$4 sm:$0xff]  }
 0x1dc   : > { %3672 = vmatpush1.bf16.msra.mxu0 %v5301_v11  ;;  %3990 = vmatpush1.bf16.msra.mxu1 %v5304_v12  ;;  %v5396_v11 = vld [vmem:[%s6405_s7 + $0x9c0] ss:$16 sps:$4 sm:$0xff]   ;;  %v5399_v12 = vld [vmem:[%s6405_s7 + $0x9c8] ss:$16 sps:$4 sm:$0xff]  }
 0x1dd   : > { %3694 = vmatprep.subr.bf16.mxu0 %v5312_v13  ;;  %4012 = vmatprep.subr.bf16.mxu1 %v5315_v14  ;;  %v5405_v13 = vld [vmem:[%s6405_s7 + $0x9e4] ss:$16 sps:$4 sm:$0xff]   ;;  %v5408_v14 = vld [vmem:[%s6405_s7 + $0x9ec] ss:$16 sps:$4 sm:$0xff]  }
 0x1df   : > { %3674 = vmatmul.mubr.bf16.vlgmr.msra.gmra.mrb[0].mxu0 %v5307_v15  ;;  %3992 = vmatmul.mubr.bf16.vlgmr.msra.gmra.mrb[0].mxu1 %v5307_v15  ;;  %v5403_v15 = vld [vmem:[%s6405_s7 + $0x9e0] ss:$16 sps:$4 sm:$0xff]  }
 0x1e0   : > { %3695 = vmatpush1.bf16.msra.mxu0 %v5310_v16  ;;  %4013 = vmatpush1.bf16.msra.mxu1 %v5313_v17  ;;  %v5406_v16 = vld [vmem:[%s6405_s7 + $0x9e8] ss:$16 sps:$4 sm:$0xff]   ;;  %v5414_v17 = vld [vmem:[%s6405_s7 + $0xa04] ss:$16 sps:$4 sm:$0xff]  }
 0x1e1   : > { %3696 = vmatprep.subr.bf16.mxu0 %v5318_v18  ;;  %4014 = vmatprep.subr.bf16.mxu1 %v5321_v19  ;;  %v5417_v18 = vld [vmem:[%s6405_s7 + $0xa0c] ss:$16 sps:$4 sm:$0xff]   ;;  %v5409_v19 = vld [vmem:[%s6905_s0 + $0x20] ss:$48 sps:$4 sm:$0xff]  }
 0x1e2   : > { %3683 = vmatprep.mubr.bf16.mxu0 %v5394_v20  ;;  %4001 = vmatprep.mubr.bf16.mxu1 %v5394_v20  ;;  %v5412_v20 = vld [vmem:[%s6405_s7 + $0xa00] ss:$16 sps:$4 sm:$0xff]  }
 0x1e4   : > { %3697 = vmatpush1.bf16.msra.mxu0 %v5316_v21  ;;  %4015 = vmatpush1.bf16.msra.mxu1 %v5319_v22  ;;  %v5415_v21 = vld [vmem:[%s6405_s7 + $0xa08] ss:$16 sps:$4 sm:$0xff]   ;;  %v5420_v22 = vld [vmem:[%s6405_s7 + $0xa24] ss:$16 sps:$4 sm:$0xff]  }
 0x1e5   : > { %3698 = vmatprep.subr.bf16.mxu0 %v5324_v23  ;;  %4016 = vmatprep.subr.bf16.mxu1 %v5327_v24  ;;  %v5423_v23 = vld [vmem:[%s6405_s7 + $0xa2c] ss:$16 sps:$4 sm:$0xff]   ;;  %v5496_v24 = vld [vmem:[%s6905_s0 + $0x84] ss:$48 sps:$4 sm:$0xff]  }
 0x1e7   : > { %3684 = vmatmul.mubr.bf16.gmra.mrb[4].mxu0 %v5402_v27  ;;  %4002 = vmatmul.mubr.bf16.gmra.mrb[4].mxu1 %v5402_v27  ;;  %v5426_v27 = vld [vmem:[%s6405_s7 + $0xa44] ss:$16 sps:$4 sm:$0xff]  }
 0x1e8   : > { %3699 = vmatpush1.bf16.msra.mxu0 %v5322_v25  ;;  %4017 = vmatpush1.bf16.msra.mxu1 %v5325_v26  ;;  %v5418_v25 = vld [vmem:[%s6405_s7 + $0xa20] ss:$16 sps:$4 sm:$0xff]   ;;  %v5421_v26 = vld [vmem:[%s6405_s7 + $0xa28] ss:$16 sps:$4 sm:$0xff]  }
 0x1e9   : > { %3700 = vmatprep.subr.bf16.mxu0 %v5330_v28  ;;  %4018 = vmatprep.subr.bf16.mxu1 %v5333_v29  ;;  %v5429_v28 = vld [vmem:[%s6405_s7 + $0xa4c] ss:$16 sps:$4 sm:$0xff]   ;;  %v5498_v29 = vld [vmem:[%s6905_s0 + $0x80] ss:$48 sps:$4 sm:$0xff]  }
 0x1ea   : > { %3726 = vmatprep.mubr.bf16.mxu0 %v5411_v30  ;;  %4044 = vmatprep.mubr.bf16.mxu1 %v5411_v30  ;;  %v5424_v30 = vld [vmem:[%s6405_s7 + $0xa40] ss:$16 sps:$4 sm:$0xff]  }
 0x1ec   : > { %3701 = vmatpush1.bf16.msra.mxu0 %v5328_v31  ;;  %4019 = vmatpush1.bf16.msra.mxu1 %v5331_v32  ;;  %v5427_v31 = vld [vmem:[%s6405_s7 + $0xa48] ss:$16 sps:$4 sm:$0xff]   ;;  %v5432_v32 = vld [vmem:[%s6405_s7 + $0xa64] ss:$16 sps:$4 sm:$0xff]  }
 0x1ed   : > { %3702 = vmatprep.subr.bf16.mxu0 %v5336_v33  ;;  %4020 = vmatprep.subr.bf16.mxu1 %v5339_v34  ;;  %v5435_v33 = vld [vmem:[%s6405_s7 + $0xa6c] ss:$16 sps:$4 sm:$0xff]  }
 0x1ee   : > { %v5513_v34 = vld [vmem:[%s6905_s0 + $0x2c] ss:$48 sps:$4 sm:$0xff]  }
 0x1f0   : > { %3703 = vmatpush1.bf16.msra.mxu0 %v5334_v35  ;;  %4021 = vmatpush1.bf16.msra.mxu1 %v5337_v36  ;;  %v5430_v35 = vld [vmem:[%s6405_s7 + $0xa60] ss:$16 sps:$4 sm:$0xff]   ;;  %v5433_v36 = vld [vmem:[%s6405_s7 + $0xa68] ss:$16 sps:$4 sm:$0xff]  }
 0x1f1   : > { %3704 = vmatprep.subr.bf16.mxu0 %v5342_v37  ;;  %4022 = vmatprep.subr.bf16.mxu1 %v5345_v38  ;;  %v5438_v37 = vld [vmem:[%s6405_s7 + $0xa84] ss:$16 sps:$4 sm:$0xff]   ;;  %v5441_v38 = vld [vmem:[%s6405_s7 + $0xa8c] ss:$16 sps:$4 sm:$0xff]  }
 0x1f4   : > { %3705 = vmatpush1.bf16.msra.mxu0 %v5340_v39  ;;  %4023 = vmatpush1.bf16.msra.mxu1 %v5343_v40  ;;  %v5436_v39 = vld [vmem:[%s6405_s7 + $0xa80] ss:$16 sps:$4 sm:$0xff]   ;;  %v5439_v40 = vld [vmem:[%s6405_s7 + $0xa88] ss:$16 sps:$4 sm:$0xff]  }
 0x1f5   : > { %3706 = vmatprep.subr.bf16.mxu0 %v5348_v41  ;;  %4024 = vmatprep.subr.bf16.mxu1 %v5351_v42  ;;  %v5444_v41 = vld [vmem:[%s6405_s7 + $0xaa4] ss:$16 sps:$4 sm:$0xff]   ;;  %v5447_v42 = vld [vmem:[%s6405_s7 + $0xaac] ss:$16 sps:$4 sm:$0xff]  }
 0x1f8   : > { %3707 = vmatpush1.bf16.msra.mxu0 %v5346_v43  ;;  %4025 = vmatpush1.bf16.msra.mxu1 %v5349_v44  ;;  %v5442_v43 = vld [vmem:[%s6405_s7 + $0xaa0] ss:$16 sps:$4 sm:$0xff]   ;;  %v5445_v44 = vld [vmem:[%s6405_s7 + $0xaa8] ss:$16 sps:$4 sm:$0xff]  }
 0x1f9   : > { %3708 = vmatprep.subr.bf16.mxu0 %v5354_v45  ;;  %4026 = vmatprep.subr.bf16.mxu1 %v5357_v46  ;;  %v5450_v45 = vld [vmem:[%s6405_s7 + $0xac4] ss:$16 sps:$4 sm:$0xff]   ;;  %v5453_v46 = vld [vmem:[%s6405_s7 + $0xacc] ss:$16 sps:$4 sm:$0xff]  }
 0x1fc   : > { %3709 = vmatpush1.bf16.msra.mxu0 %v5352_v47  ;;  %4027 = vmatpush1.bf16.msra.mxu1 %v5355_v48  ;;  %v5448_v47 = vld [vmem:[%s6405_s7 + $0xac0] ss:$16 sps:$4 sm:$0xff]   ;;  %v5451_v48 = vld [vmem:[%s6405_s7 + $0xac8] ss:$16 sps:$4 sm:$0xff]  }
 0x1fd   : > { %3710 = vmatprep.subr.bf16.mxu0 %v5360_v49  ;;  %4028 = vmatprep.subr.bf16.mxu1 %v5363_v50  ;;  %v5456_v49 = vld [vmem:[%s6405_s7 + $0xae4] ss:$16 sps:$4 sm:$0xff]   ;;  %v5459_v50 = vld [vmem:[%s6405_s7 + $0xaec] ss:$16 sps:$4 sm:$0xff]  }
 0x200   : > { %3711 = vmatpush1.bf16.msra.mxu0 %v5358_v51  ;;  %4029 = vmatpush1.bf16.msra.mxu1 %v5361_v52  ;;  %v5454_v51 = vld [vmem:[%s6405_s7 + $0xae0] ss:$16 sps:$4 sm:$0xff]   ;;  %v5457_v52 = vld [vmem:[%s6405_s7 + $0xae8] ss:$16 sps:$4 sm:$0xff]  }
 0x201   : > { %3712 = vmatprep.subr.bf16.mxu0 %v5366_v53  ;;  %4030 = vmatprep.subr.bf16.mxu1 %v5369_v54  ;;  %v5462_v53 = vld [vmem:[%s6405_s7 + $0xb04] ss:$16 sps:$4 sm:$0xff]   ;;  %v5465_v54 = vld [vmem:[%s6405_s7 + $0xb0c] ss:$16 sps:$4 sm:$0xff]  }
 0x204   : > { %3713 = vmatpush1.bf16.msra.mxu0 %v5364_v55  ;;  %4031 = vmatpush1.bf16.msra.mxu1 %v5367_v56  ;;  %v5460_v55 = vld [vmem:[%s6405_s7 + $0xb00] ss:$16 sps:$4 sm:$0xff]   ;;  %v5463_v56 = vld [vmem:[%s6405_s7 + $0xb08] ss:$16 sps:$4 sm:$0xff]  }
 0x205   : > { %3714 = vmatprep.subr.bf16.mxu0 %v5372_v57  ;;  %4032 = vmatprep.subr.bf16.mxu1 %v5375_v58  ;;  %v5468_v57 = vld [vmem:[%s6405_s7 + $0xb24] ss:$16 sps:$4 sm:$0xff]   ;;  %v5471_v58 = vld [vmem:[%s6405_s7 + $0xb2c] ss:$16 sps:$4 sm:$0xff]  }
 0x208   : > { %3715 = vmatpush1.bf16.msra.mxu0 %v5370_v59  ;;  %4033 = vmatpush1.bf16.msra.mxu1 %v5373_v60  ;;  %v5466_v59 = vld [vmem:[%s6405_s7 + $0xb20] ss:$16 sps:$4 sm:$0xff]   ;;  %v5469_v60 = vld [vmem:[%s6405_s7 + $0xb28] ss:$16 sps:$4 sm:$0xff]  }
 0x209   : > { %3716 = vmatprep.subr.bf16.mxu0 %v5378_v61  ;;  %4034 = vmatprep.subr.bf16.mxu1 %v5381_v62  ;;  %v5474_v61 = vld [vmem:[%s6405_s7 + $0xb44] ss:$16 sps:$4 sm:$0xff]   ;;  %v5477_v62 = vld [vmem:[%s6405_s7 + $0xb4c] ss:$16 sps:$4 sm:$0xff]  }
 0x20c   : > { %3717 = vmatpush1.bf16.msra.mxu0 %v5376_v63  ;;  %4035 = vmatpush1.bf16.msra.mxu1 %v5379_v0  ;;  %v5472_v63 = vld [vmem:[%s6405_s7 + $0xb40] ss:$16 sps:$4 sm:$0xff]   ;;  %v5475_v0 = vld [vmem:[%s6405_s7 + $0xb48] ss:$16 sps:$4 sm:$0xff]  }
 0x20d   : > { %3718 = vmatprep.subr.bf16.mxu0 %v5384_v1  ;;  %4036 = vmatprep.subr.bf16.mxu1 %v5387_v2  ;;  %v5480_v1 = vld [vmem:[%s6405_s7 + $0xb64] ss:$16 sps:$4 sm:$0xff]   ;;  %v5483_v2 = vld [vmem:[%s6405_s7 + $0xb6c] ss:$16 sps:$4 sm:$0xff]  }
 0x210   : > { %3719 = vmatpush1.bf16.msra.mxu0 %v5382_v3  ;;  %4037 = vmatpush1.bf16.msra.mxu1 %v5385_v4  ;;  %v5478_v3 = vld [vmem:[%s6405_s7 + $0xb60] ss:$16 sps:$4 sm:$0xff]   ;;  %v5481_v4 = vld [vmem:[%s6405_s7 + $0xb68] ss:$16 sps:$4 sm:$0xff]  }
 0x211   : > { %3720 = vmatprep.subr.bf16.mxu0 %v5390_v5  ;;  %4038 = vmatprep.subr.bf16.mxu1 %v5393_v6  ;;  %v5486_v5 = vld [vmem:[%s6405_s7 + $0xb84] ss:$16 sps:$4 sm:$0xff]   ;;  %v5489_v6 = vld [vmem:[%s6405_s7 + $0xb8c] ss:$16 sps:$4 sm:$0xff]  }
 0x214   : > { %3721 = vmatpush1.bf16.msra.mxu0 %v5388_v7  ;;  %4039 = vmatpush1.bf16.msra.mxu1 %v5391_v8  ;;  %v5484_v7 = vld [vmem:[%s6405_s7 + $0xb80] ss:$16 sps:$4 sm:$0xff]   ;;  %v5487_v8 = vld [vmem:[%s6405_s7 + $0xb88] ss:$16 sps:$4 sm:$0xff]  }
 0x215   : > { %3722 = vmatprep.subr.bf16.mxu0 %v5398_v9  ;;  %4040 = vmatprep.subr.bf16.mxu1 %v5401_v10  ;;  %v5492_v9 = vld [vmem:[%s6405_s7 + $0xba4] ss:$16 sps:$4 sm:$0xff]   ;;  %v5495_v10 = vld [vmem:[%s6405_s7 + $0xbac] ss:$16 sps:$4 sm:$0xff]  }
 0x218   : > { %3723 = vmatpush1.bf16.msra.mxu0 %v5396_v11  ;;  %4041 = vmatpush1.bf16.msra.mxu1 %v5399_v12  ;;  %v5490_v11 = vld [vmem:[%s6405_s7 + $0xba0] ss:$16 sps:$4 sm:$0xff]   ;;  %v5493_v12 = vld [vmem:[%s6405_s7 + $0xba8] ss:$16 sps:$4 sm:$0xff]  }
 0x219   : > { %3724 = vmatprep.subr.bf16.mxu0 %v5405_v13  ;;  %4042 = vmatprep.subr.bf16.mxu1 %v5408_v14  ;;  %v5501_v13 = vld [vmem:[%s6405_s7 + $0xbc4] ss:$16 sps:$4 sm:$0xff]   ;;  %v5504_v14 = vld [vmem:[%s6405_s7 + $0xbcc] ss:$16 sps:$4 sm:$0xff]  }
 0x21c   : > { %3725 = vmatpush1.bf16.msra.mxu0 %v5403_v15  ;;  %4043 = vmatpush1.bf16.msra.mxu1 %v5406_v16  ;;  %v5499_v15 = vld [vmem:[%s6405_s7 + $0xbc0] ss:$16 sps:$4 sm:$0xff]   ;;  %v5502_v16 = vld [vmem:[%s6405_s7 + $0xbc8] ss:$16 sps:$4 sm:$0xff]  }
 0x21d   : > { %3747 = vmatprep.subr.bf16.mxu0 %v5414_v17  ;;  %4065 = vmatprep.subr.bf16.mxu1 %v5417_v18  ;;  %v5507_v17 = vld [vmem:[%s6405_s7 + $0xbe4] ss:$16 sps:$4 sm:$0xff]   ;;  %v5510_v18 = vld [vmem:[%s6405_s7 + $0xbec] ss:$16 sps:$4 sm:$0xff]  }
 0x21f   : > { %3727 = vmatmul.mubr.bf16.vlgmr.msra.gmra.mrb[0].mxu0 %v5409_v19  ;;  %4045 = vmatmul.mubr.bf16.vlgmr.msra.gmra.mrb[0].mxu1 %v5409_v19  ;;  %v5505_v19 = vld [vmem:[%s6405_s7 + $0xbe0] ss:$16 sps:$4 sm:$0xff]  }
 0x220   : > { %3748 = vmatpush1.bf16.msra.mxu0 %v5412_v20  ;;  %4066 = vmatpush1.bf16.msra.mxu1 %v5415_v21  ;;  %v5508_v20 = vld [vmem:[%s6405_s7 + $0xbe8] ss:$16 sps:$4 sm:$0xff]   ;;  %s4335_s7 = sshll.u32 %s5547_s14, 2 }
 0x221   : > { %3749 = vmatprep.subr.bf16.mxu0 %v5420_v22  ;;  %4067 = vmatprep.subr.bf16.mxu1 %v5423_v23  ;;  %v5511_v21 = vld [vmem:[%s6905_s0 + $0x28] ss:$48 sps:$4 sm:$0xff]   ;;  %v5514_v22 = vld [vmem:[%s6905_s0 + $0x8c] ss:$48 sps:$4 sm:$0xff]   ;;  %p1006_p11 = scmp.lt.s32.totalorder %s4335_s7, 15 }
 0x222   : > { %3736 = vmatprep.mubr.bf16.mxu0 %v5496_v24  ;;  %4054 = vmatprep.mubr.bf16.mxu1 %v5496_v24  ;;  %v5516_v23 = vld [vmem:[%s6905_s0 + $0x88] ss:$48 sps:$4 sm:$0xff]   ;;  %v1422_v24 = vlaneseq }
 0x223   : > { %s6917_s7 = smov (!%p1006_p11, %s4335_s7), 15 }
 0x224   : > { %3750 = vmatpush1.bf16.msra.mxu0 %v5418_v25  ;;  %4068 = vmatpush1.bf16.msra.mxu1 %v5421_v26  ;;  %v1423_v25 = vshrl.u32 %v1422_v24, 7  ;;  %s1008_s4 = scalar_lea.vmem %s6907_s2, %s6917_s7 }
 0x225   : > { %3751 = vmatprep.subr.bf16.mxu0 %v5426_v27  ;;  %4069 = vmatprep.subr.bf16.mxu1 %v5429_v28  ;;  %v1420_v28 = vld [vmem:[%s1008_s4] sm:$0xf] }
 0x226   : > { %v1424_v26 = vsub.s32 0, %v1423_v25  ;;  %v1432_v27 = vsub.s32 2, %v1423_v25 }
 0x227   : > { %3737 = vmatmul.mubr.bf16.gmra.mrb[4].mxu0 %v5498_v29  ;;  %4055 = vmatmul.mubr.bf16.gmra.mrb[4].mxu1 %v5498_v29  ;;  %v1428_v29 = vsub.s32 1, %v1423_v25 }
 0x228   : > { %3752 = vmatpush1.bf16.msra.mxu0 %v5424_v30  ;;  %4070 = vmatpush1.bf16.msra.mxu1 %v5427_v31  ;;  %v1436_v30 = vsub.s32 3, %v1423_v25  ;;  %v1425_v31 = vrot.slane %v1420_v28, %v1424_v26 }
 0x229   : > { %3753 = vmatprep.subr.bf16.mxu0 %v5432_v32  ;;  %4071 = vmatprep.subr.bf16.mxu1 %v5435_v33  ;;  %v1433_v32 = vrot.slane %v1420_v28, %v1432_v27  ;;  %v1429_v33 = vrot.slane %v1420_v28, %v1428_v29 }
 0x22a   : > { %3779 = vmatprep.mubr.bf16.mxu0 %v5513_v34  ;;  %4097 = vmatprep.mubr.bf16.mxu1 %v5513_v34  ;;  %v1437_v34 = vrot.slane %v1420_v28, %v1436_v30 }
 0x22c   : > { %3754 = vmatpush1.bf16.msra.mxu0 %v5430_v35  ;;  %4072 = vmatpush1.bf16.msra.mxu1 %v5433_v36 }
 0x22d   : > { %3755 = vmatprep.subr.bf16.mxu0 %v5438_v37  ;;  %4073 = vmatprep.subr.bf16.mxu1 %v5441_v38 }
 0x230   : > { %3756 = vmatpush1.bf16.msra.mxu0 %v5436_v39  ;;  %4074 = vmatpush1.bf16.msra.mxu1 %v5439_v40 }
 0x231   : > { %3757 = vmatprep.subr.bf16.mxu0 %v5444_v41  ;;  %4075 = vmatprep.subr.bf16.mxu1 %v5447_v42 }
 0x234   : > { %3758 = vmatpush1.bf16.msra.mxu0 %v5442_v43  ;;  %4076 = vmatpush1.bf16.msra.mxu1 %v5445_v44 }
 0x235   : > { %3759 = vmatprep.subr.bf16.mxu0 %v5450_v45  ;;  %4077 = vmatprep.subr.bf16.mxu1 %v5453_v46 }
 0x238   : > { %3760 = vmatpush1.bf16.msra.mxu0 %v5448_v47  ;;  %4078 = vmatpush1.bf16.msra.mxu1 %v5451_v48 }
 0x239   : > { %3761 = vmatprep.subr.bf16.mxu0 %v5456_v49  ;;  %4079 = vmatprep.subr.bf16.mxu1 %v5459_v50 }
 0x23c   : > { %3762 = vmatpush1.bf16.msra.mxu0 %v5454_v51  ;;  %4080 = vmatpush1.bf16.msra.mxu1 %v5457_v52 }
 0x23d   : > { %3763 = vmatprep.subr.bf16.mxu0 %v5462_v53  ;;  %4081 = vmatprep.subr.bf16.mxu1 %v5465_v54 }
 0x240   : > { %3764 = vmatpush1.bf16.msra.mxu0 %v5460_v55  ;;  %4082 = vmatpush1.bf16.msra.mxu1 %v5463_v56 }
 0x241   : > { %3765 = vmatprep.subr.bf16.mxu0 %v5468_v57  ;;  %4083 = vmatprep.subr.bf16.mxu1 %v5471_v58 }
 0x244   : > { %3766 = vmatpush1.bf16.msra.mxu0 %v5466_v59  ;;  %4084 = vmatpush1.bf16.msra.mxu1 %v5469_v60 }
 0x245   : > { %3767 = vmatprep.subr.bf16.mxu0 %v5474_v61  ;;  %4085 = vmatprep.subr.bf16.mxu1 %v5477_v62 }
 0x248   : > { %3768 = vmatpush1.bf16.msra.mxu0 %v5472_v63  ;;  %4086 = vmatpush1.bf16.msra.mxu1 %v5475_v0 }
 0x249   : > { %3769 = vmatprep.subr.bf16.mxu0 %v5480_v1  ;;  %4087 = vmatprep.subr.bf16.mxu1 %v5483_v2 }
 0x24c   : > { %3770 = vmatpush1.bf16.msra.mxu0 %v5478_v3  ;;  %4088 = vmatpush1.bf16.msra.mxu1 %v5481_v4 }
 0x24d   : > { %3771 = vmatprep.subr.bf16.mxu0 %v5486_v5  ;;  %4089 = vmatprep.subr.bf16.mxu1 %v5489_v6 }
 0x250   : > { %3772 = vmatpush1.bf16.msra.mxu0 %v5484_v7  ;;  %4090 = vmatpush1.bf16.msra.mxu1 %v5487_v8 }
 0x251   : > { %3773 = vmatprep.subr.bf16.mxu0 %v5492_v9  ;;  %4091 = vmatprep.subr.bf16.mxu1 %v5495_v10 }
 0x254   : > { %3774 = vmatpush1.bf16.msra.mxu0 %v5490_v11  ;;  %4092 = vmatpush1.bf16.msra.mxu1 %v5493_v12 }
 0x255   : > { %3775 = vmatprep.subr.bf16.mxu0 %v5501_v13  ;;  %4093 = vmatprep.subr.bf16.mxu1 %v5504_v14 }
 0x258   : > { %3776 = vmatpush1.bf16.msra.mxu0 %v5499_v15  ;;  %4094 = vmatpush1.bf16.msra.mxu1 %v5502_v16 }
 0x259   : > { %3777 = vmatprep.subr.bf16.mxu0 %v5507_v17  ;;  %4095 = vmatprep.subr.bf16.mxu1 %v5510_v18 }
 0x25c   : > { %3778 = vmatpush1.bf16.msra.mxu0 %v5505_v19  ;;  %4096 = vmatpush1.bf16.msra.mxu1 %v5508_v20 }
 0x25f   : > { %3780 = vmatmul.mubr.bf16.vlgmr.msra.gmra.mrb[0].mxu0 %v5511_v21  ;;  %4098 = vmatmul.mubr.bf16.vlgmr.msra.gmra.mrb[0].mxu1 %v5511_v21 }
 0x260   : > { %3789 = vmatprep.mubr.bf16.mxu0 %v5514_v22  ;;  %4107 = vmatprep.mubr.bf16.mxu1 %v5514_v22 }
 0x267   : > { %3790 = vmatmul.mubr.bf16.gmra.mrb[4].mxu0 %v5516_v23  ;;  %4108 = vmatmul.mubr.bf16.gmra.mrb[4].mxu1 %v5516_v23 }
 0x332   : > { %v3781_v35 = vpop.f32.mrb[0].mxu0  ;;  %v4099_v36 = vpop.f32.mrb[0].mxu1 }
 0x333   : > { %v4767_v37 = vadd.f32 %v3781_v35, %v1425_v31  ;;  %v4775_v38 = vadd.f32 %v4099_v36, %v1433_v32  ;;  %v3783_v39 = vpop.f32.mrb[1].mxu0  ;;  %v4101_v40 = vpop.f32.mrb[1].mxu1 }
 0x334   : > { %v4768_v41 = vadd.f32 %v3783_v39, %v1429_v33  ;;  %v4776_v42 = vadd.f32 %v4101_v40, %v1437_v34  ;;  %v3785_v43 = vpop.f32.mrb[2].mxu0  ;;  %v4103_v44 = vpop.f32.mrb[2].mxu1 }
 0x335   : > { %v4118_v45 = vmax.f32 %v4767_v37, 0.0  ;;  %v4120_v46 = vmax.f32 %v4775_v38, 0.0  ;;  %v4769_v47 = vadd.f32 %v3785_v43, %v1425_v31  ;;  %v4777_v48 = vadd.f32 %v4103_v44, %v1433_v32  ;;  %v3787_v49 = vpop.f32.mrb[3].mxu0  ;;  %v4105_v50 = vpop.f32.mrb[3].mxu1 }
 0x336   : > { %v4119_v51 = vmax.f32 %v4768_v41, 0.0  ;;  %v4121_v52 = vmax.f32 %v4776_v42, 0.0  ;;  %v4770_v53 = vadd.f32 %v3787_v49, %v1429_v33  ;;  %v4778_v54 = vadd.f32 %v4105_v50, %v1437_v34 }
 0x337   : > { %v4122_v55 = vmax.f32 %v4769_v47, 0.0  ;;  %v4124_v56 = vmax.f32 %v4777_v48, 0.0 }
 0x338   : > { %v4758_v57 = vpack.c.bf16 %v4119_v51, %v4118_v45  ;;  %v4759_v58 = vpack.c.bf16 %v4121_v52, %v4120_v46  ;;  %v4123_v59 = vmax.f32 %v4770_v53, 0.0  ;;  %v4125_v60 = vmax.f32 %v4778_v54, 0.0 }
 0x33a   : > { %4182 = vst [vmem:[%s6866_s12] sm:$0xff] %v4758_v57  ;;  %4183 = vst [vmem:[%s6866_s12 + $0x8] sm:$0xff] %v4759_v58  ;;  %v4760_v61 = vpack.c.bf16 %v4123_v59, %v4122_v55  ;;  %v4761_v62 = vpack.c.bf16 %v4125_v60, %v4124_v56  ;;  %v3791_v63 = vpop.f32.mrb[4].mxu0  ;;  %v4109_v0 = vpop.f32.mrb[4].mxu1 }
 0x33b   : > { %v4771_v1 = vadd.f32 %v3791_v63, %v1425_v31  ;;  %v4779_v2 = vadd.f32 %v4109_v0, %v1433_v32  ;;  %v3793_v3 = vpop.f32.mrb[5].mxu0  ;;  %v4111_v4 = vpop.f32.mrb[5].mxu1 }
 0x33c   : > { %4184 = vst [vmem:[%s6866_s12 + $0x10] sm:$0xff] %v4760_v61  ;;  %4185 = vst [vmem:[%s6866_s12 + $0x18] sm:$0xff] %v4761_v62  ;;  %v4772_v5 = vadd.f32 %v3793_v3, %v1429_v33  ;;  %v4780_v6 = vadd.f32 %v4111_v4, %v1437_v34  ;;  %v3795_v7 = vpop.f32.mrb[6].mxu0  ;;  %v4113_v8 = vpop.f32.mrb[6].mxu1 }
 0x33d   : > { %v4126_v9 = vmax.f32 %v4771_v1, 0.0  ;;  %v4128_v10 = vmax.f32 %v4779_v2, 0.0  ;;  %v4773_v11 = vadd.f32 %v3795_v7, %v1425_v31  ;;  %v4781_v12 = vadd.f32 %v4113_v8, %v1433_v32  ;;  %v3797_v13 = vpop.f32.mrb[7].mxu0  ;;  %v4115_v14 = vpop.f32.mrb[7].mxu1 }
 0x33e   : > { %v4127_v15 = vmax.f32 %v4772_v5, 0.0  ;;  %v4129_v16 = vmax.f32 %v4780_v6, 0.0  ;;  %v4774_v17 = vadd.f32 %v3797_v13, %v1429_v33  ;;  %v4782_v18 = vadd.f32 %v4115_v14, %v1437_v34  ;;  %4196 = sbr.rel (!%p5612_p6) target bundleno = 845 (0x34d), region = 59 }
 0x33f   : > { %v4130_v19 = vmax.f32 %v4773_v11, 0.0  ;;  %v4132_v20 = vmax.f32 %v4781_v12, 0.0 }
 0x340   : > { %v4762_v21 = vpack.c.bf16 %v4127_v15, %v4126_v9  ;;  %v4763_v22 = vpack.c.bf16 %v4129_v16, %v4128_v10  ;;  %v4131_v23 = vmax.f32 %v4774_v17, 0.0  ;;  %v4133_v24 = vmax.f32 %v4782_v18, 0.0 }
 0x341   : > { %v4215_v27 = vld [vmem:[%s6866_s12] sm:$0xff] (%p5612_p6)  ;;  %v4217_v28 = vld [vmem:[%s6866_s12 + $0x8] sm:$0xff] (%p5612_p6) }
 0x342   : > { %4186 = vst [vmem:[%s6866_s12 + $0x20] sm:$0xff] %v4762_v21  ;;  %4187 = vst [vmem:[%s6866_s12 + $0x28] sm:$0xff] %v4763_v22  ;;  %v4764_v25 = vpack.c.bf16 %v4131_v23, %v4130_v19  ;;  %v4765_v26 = vpack.c.bf16 %v4133_v24, %v4132_v20 }
 0x343   : > { %v4219_v29 = vld [vmem:[%s6866_s12 + $0x10] sm:$0xff] (%p5612_p6)  ;;  %v4221_v30 = vld [vmem:[%s6866_s12 + $0x18] sm:$0xff] (%p5612_p6)  ;;  %4216 = vst [vmem:[%s4202_s9] sm:$0xff] (%p5612_p6), %v4215_v27  ;;  %4218 = vst [vmem:[%s4202_s9 + $0x8] sm:$0xff] (%p5612_p6), %v4217_v28 }
 0x344   : > { %4188 = vst [vmem:[%s6866_s12 + $0x30] sm:$0xff] %v4764_v25  ;;  %4189 = vst [vmem:[%s6866_s12 + $0x38] sm:$0xff] %v4765_v26 }
 0x345   : > { %4220 = vst [vmem:[%s4202_s9 + $0x40] sm:$0xff] %v4219_v29  ;;  %4222 = vst [vmem:[%s4202_s9 + $0x48] sm:$0xff] %v4221_v30 }
 0x349   : > { %v4223_v31 = vld [vmem:[%s6866_s12 + $0x20] sm:$0xff]  ;;  %v4225_v32 = vld [vmem:[%s6866_s12 + $0x28] sm:$0xff] }
 0x34a   : > { %4224 = vst [vmem:[%s4202_s9 + $0x80] sm:$0xff] %v4223_v31  ;;  %4226 = vst [vmem:[%s4202_s9 + $0x88] sm:$0xff] %v4225_v32 }
 0x34b   : > { %v4227_v33 = vld [vmem:[%s6866_s12 + $0x30] sm:$0xff]  ;;  %v4229_v34 = vld [vmem:[%s6866_s12 + $0x38] sm:$0xff] }
 0x34c   : > { %4228 = vst [vmem:[%s4202_s9 + $0xc0] sm:$0xff] %v4227_v33  ;;  %4230 = vst [vmem:[%s4202_s9 + $0xc8] sm:$0xff] %v4229_v34 }
 0x34d PF: > { %s13_s16 = sadd.s32 1, %s5555_s16   ;;  %s6910_s12 = smov %s5543_s13 }
 0x34e   : > { %p10_p12 = scmp.ge.s32.totalorder %s13_s16, 6   ;;  %s6911_s13 = smov %s5617_s22 }
 0x34f   : > { %s6912_s14 = smov %s5551_s15  ;;  %s6913_s15 = smov %s6915_s17 }
 0x350   :  { %12 = sbr.rel (!%p10_p12) target bundleno = 3 (0x3), region = 119 }

</bundles_post_ra>
